<compile_context>
chip_gen: v7x
topology: tpu7x:2x2x1
jax: 0.10.0
libtpu: 0.0.40
codegen_flags: <defaults>
</compile_context>

<pallas_src>
import jax
import jax.numpy as jnp
from jax import lax
from jax.experimental import pallas as pl
from jax.experimental.pallas import tpu as pltpu

# ---- static problem sizes (small, consistent with the module's forward) ----
B = 2            # batch
T = 16           # #frames
F = 16           # #freq channels
M = 8            # number of modulation kernels
KT, KF = 3, 3    # modulation (STRF-like) kernel extent in (time, freq)
TP = T - KT + 1  # 14
FP = F - KF + 1  # 14
NK = KT * KF     # 9 taps
LANES = M * B * FP  # 224 — lane-dense working width; also == #ncc elements


def _ncc_loss_kernel(wl_ref, taps_ref, out_ref):
    # wl_ref:   (NK, 1, LANES)     weights broadcast along lanes,
    #                              lane index = m*(B*FP) + b*FP + fp
    # taps_ref: (2, NK, TP, LANES) im2col taps; [0] = clean, [1] = enhanced
    # out_ref:  (1, 1) VMEM        scalar loss
    acc_c = jnp.zeros((TP, LANES), jnp.float32)
    acc_e = jnp.zeros((TP, LANES), jnp.float32)

    # 3x3 "conv" for all M kernels at once: 9 broadcast multiply-accumulates
    # (static unroll, VPU only, no MXU / no relayouts).
    for k in range(NK):
        wk = wl_ref[k]                       # (1, LANES)
        acc_c = acc_c + wk * taps_ref[0, k]  # (TP, LANES)
        acc_e = acc_e + wk * taps_ref[1, k]

    # NCC over the T' axis (sublane reductions on the lane-dense slab).
    cm = acc_c - jnp.mean(acc_c, axis=0, keepdims=True)
    em = acc_e - jnp.mean(acc_e, axis=0, keepdims=True)
    inner = jnp.sum(cm * em, axis=0, keepdims=True)   # (1, LANES)
    cc = jnp.sum(cm * cm, axis=0, keepdims=True)
    ee = jnp.sum(em * em, axis=0, keepdims=True)
    ncc = inner * lax.rsqrt(cc * ee)                  # == inner/(sqrt(cc)*sqrt(ee))

    # mean over (B, M, F') == mean over the LANES axis; keepdims -> (1, 1) store.
    diff = ncc - 1.0
    out_ref[...] = jnp.sum(diff * diff, axis=1, keepdims=True) * (1.0 / float(LANES))


@jax.jit
def modulation_ncc_loss(enhanced_spect, clean_spect, mod_weights):
    """enhanced_spect, clean_spect: (B, T, F) f32; mod_weights: (M, KT*KF) f32
    (dt-major / df-minor, equivalent to PyTorch Conv2d weight (M, 1, KT, KF))."""
    # ---- layout plumbing in the wrapper (pure slicing/reshape, no compute) ----
    x_all = jnp.stack([clean_spect, enhanced_spect], axis=0)          # (2, B, T, F)
    taps = [x_all[:, :, dt:dt + TP, df:df + FP]                       # (2, B, TP, FP)
            for dt in range(KT) for df in range(KF)]
    base = jnp.stack(taps, axis=1)                                    # (2, NK, B, TP, FP)
    base = jnp.transpose(base, (0, 1, 3, 2, 4)).reshape(2, NK, TP, B * FP)
    taps_lane = jnp.tile(base, (1, 1, 1, M))                          # (2, NK, TP, LANES)
    # wlane[k, 0, m*(B*FP)+j] = mod_weights[m, k]
    wlane = jnp.repeat(mod_weights.T, B * FP, axis=1)[:, None, :]     # (NK, 1, LANES)

    out = pl.pallas_call(
        _ncc_loss_kernel,
        out_shape=jax.ShapeDtypeStruct((1, 1), jnp.float32),
        in_specs=[
            pl.BlockSpec(memory_space=pltpu.MemorySpace.VMEM),
            pl.BlockSpec(memory_space=pltpu.MemorySpace.VMEM),
        ],
        out_specs=pl.BlockSpec(memory_space=pltpu.MemorySpace.VMEM),
    )(wlane, taps_lane)
    return out[0, 0]


def _reference_loss(enhanced_spect, clean_spect, mod_weights):
    """Pure-JAX reference mirroring the PyTorch module exactly."""
    w4 = mod_weights.reshape(M, 1, KT, KF)

    def mod(x):
        x4 = x[:, None, :, :]  # NCHW, C=1
        return lax.conv_general_dilated(
            x4, w4, (1, 1), "VALID",
            dimension_numbers=("NCHW", "OIHW", "NCHW"))  # (B, M, TP, FP)

    cm = mod(clean_spect)
    em = mod(enhanced_spect)
    cm = cm - cm.mean(axis=2, keepdims=True)
    em = em - em.mean(axis=2, keepdims=True)
    inner = (cm * em).sum(axis=2)
    denom = jnp.sqrt((cm * cm).sum(axis=2)) * jnp.sqrt((em * em).sum(axis=2))
    ncc = inner / denom
    return jnp.mean((ncc - 1.0) ** 2)


if __name__ == "__main__":
    key = jax.random.PRNGKey(0)
    k_enh, k_cln, k_w = jax.random.split(key, 3)

    enhanced = jax.random.normal(k_enh, (B, T, F), dtype=jnp.float32)
    clean = jax.random.normal(k_cln, (B, T, F), dtype=jnp.float32)
    # deterministic synthetic gabor-STRF-style modulation kernel weights
    mod_w = 0.1 * jax.random.normal(k_w, (M, NK), dtype=jnp.float32)

    loss = jax.block_until_ready(modulation_ncc_loss(enhanced, clean, mod_w))
    ref = jax.block_until_ready(_reference_loss(enhanced, clean, mod_w))

    assert jnp.isfinite(loss)
    assert jnp.allclose(loss, ref, rtol=1e-4, atol=1e-5), (loss, ref)
    print("KERNEL_OK")
</pallas_src>

<mosaic_0001>
module attributes {stable_mosaic.version = 11 : i64} {
  func.func @_ncc_loss_kernel(%arg0: memref<9x1x224xf32, #tpu.memory_space<vmem>>, %arg1: memref<2x9x14x224xf32, #tpu.memory_space<vmem>>, %arg2: memref<1x1xf32, #tpu.memory_space<vmem>>) attributes {dimension_semantics = [], scalar_prefetch = 0 : i64, scratch_operands = 0 : i64, tpu.core_type = #tpu.core_type<tc>} {
    %cst = arith.constant 0.000000e+00 : f32
    %0 = vector.broadcast %cst : f32 to vector<14x224xf32>
    %cst_0 = arith.constant 0.000000e+00 : f32
    %1 = vector.broadcast %cst_0 : f32 to vector<14x224xf32>
    %c0 = arith.constant 0 : index
    %c0_1 = arith.constant 0 : index
    %c0_2 = arith.constant 0 : index
    %2 = vector.load %arg0[%c0, %c0_1, %c0_2] : memref<9x1x224xf32, #tpu.memory_space<vmem>>, vector<1x1x224xf32>
    %3 = vector.shape_cast %2 : vector<1x1x224xf32> to vector<1x224xf32>
    %c0_3 = arith.constant 0 : index
    %c0_4 = arith.constant 0 : index
    %c0_5 = arith.constant 0 : index
    %c0_6 = arith.constant 0 : index
    %4 = vector.load %arg1[%c0_3, %c0_4, %c0_5, %c0_6] : memref<2x9x14x224xf32, #tpu.memory_space<vmem>>, vector<1x1x14x224xf32>
    %5 = vector.shape_cast %4 : vector<1x1x14x224xf32> to vector<14x224xf32>
    %6 = vector.broadcast %3 : vector<1x224xf32> to vector<14x224xf32>
    %7 = arith.mulf %6, %5 : vector<14x224xf32>
    %8 = arith.addf %0, %7 : vector<14x224xf32>
    %c1 = arith.constant 1 : index
    %c0_7 = arith.constant 0 : index
    %c0_8 = arith.constant 0 : index
    %c0_9 = arith.constant 0 : index
    %9 = vector.load %arg1[%c1, %c0_7, %c0_8, %c0_9] : memref<2x9x14x224xf32, #tpu.memory_space<vmem>>, vector<1x1x14x224xf32>
    %10 = vector.shape_cast %9 : vector<1x1x14x224xf32> to vector<14x224xf32>
    %11 = vector.broadcast %3 : vector<1x224xf32> to vector<14x224xf32>
    %12 = arith.mulf %11, %10 : vector<14x224xf32>
    %13 = arith.addf %1, %12 : vector<14x224xf32>
    %c1_10 = arith.constant 1 : index
    %c0_11 = arith.constant 0 : index
    %c0_12 = arith.constant 0 : index
    %14 = vector.load %arg0[%c1_10, %c0_11, %c0_12] : memref<9x1x224xf32, #tpu.memory_space<vmem>>, vector<1x1x224xf32>
    %15 = vector.shape_cast %14 : vector<1x1x224xf32> to vector<1x224xf32>
    %c0_13 = arith.constant 0 : index
    %c1_14 = arith.constant 1 : index
    %c0_15 = arith.constant 0 : index
    %c0_16 = arith.constant 0 : index
    %16 = vector.load %arg1[%c0_13, %c1_14, %c0_15, %c0_16] : memref<2x9x14x224xf32, #tpu.memory_space<vmem>>, vector<1x1x14x224xf32>
    %17 = vector.shape_cast %16 : vector<1x1x14x224xf32> to vector<14x224xf32>
    %18 = vector.broadcast %15 : vector<1x224xf32> to vector<14x224xf32>
    %19 = arith.mulf %18, %17 : vector<14x224xf32>
    %20 = arith.addf %8, %19 : vector<14x224xf32>
    %c1_17 = arith.constant 1 : index
    %c1_18 = arith.constant 1 : index
    %c0_19 = arith.constant 0 : index
    %c0_20 = arith.constant 0 : index
    %21 = vector.load %arg1[%c1_17, %c1_18, %c0_19, %c0_20] : memref<2x9x14x224xf32, #tpu.memory_space<vmem>>, vector<1x1x14x224xf32>
    %22 = vector.shape_cast %21 : vector<1x1x14x224xf32> to vector<14x224xf32>
    %23 = vector.broadcast %15 : vector<1x224xf32> to vector<14x224xf32>
    %24 = arith.mulf %23, %22 : vector<14x224xf32>
    %25 = arith.addf %13, %24 : vector<14x224xf32>
    %c2 = arith.constant 2 : index
    %c0_21 = arith.constant 0 : index
    %c0_22 = arith.constant 0 : index
    %26 = vector.load %arg0[%c2, %c0_21, %c0_22] : memref<9x1x224xf32, #tpu.memory_space<vmem>>, vector<1x1x224xf32>
    %27 = vector.shape_cast %26 : vector<1x1x224xf32> to vector<1x224xf32>
    %c0_23 = arith.constant 0 : index
    %c2_24 = arith.constant 2 : index
    %c0_25 = arith.constant 0 : index
    %c0_26 = arith.constant 0 : index
    %28 = vector.load %arg1[%c0_23, %c2_24, %c0_25, %c0_26] : memref<2x9x14x224xf32, #tpu.memory_space<vmem>>, vector<1x1x14x224xf32>
    %29 = vector.shape_cast %28 : vector<1x1x14x224xf32> to vector<14x224xf32>
    %30 = vector.broadcast %27 : vector<1x224xf32> to vector<14x224xf32>
    %31 = arith.mulf %30, %29 : vector<14x224xf32>
    %32 = arith.addf %20, %31 : vector<14x224xf32>
    %c1_27 = arith.constant 1 : index
    %c2_28 = arith.constant 2 : index
    %c0_29 = arith.constant 0 : index
    %c0_30 = arith.constant 0 : index
    %33 = vector.load %arg1[%c1_27, %c2_28, %c0_29, %c0_30] : memref<2x9x14x224xf32, #tpu.memory_space<vmem>>, vector<1x1x14x224xf32>
    %34 = vector.shape_cast %33 : vector<1x1x14x224xf32> to vector<14x224xf32>
    %35 = vector.broadcast %27 : vector<1x224xf32> to vector<14x224xf32>
    %36 = arith.mulf %35, %34 : vector<14x224xf32>
    %37 = arith.addf %25, %36 : vector<14x224xf32>
    %c3 = arith.constant 3 : index
    %c0_31 = arith.constant 0 : index
    %c0_32 = arith.constant 0 : index
    %38 = vector.load %arg0[%c3, %c0_31, %c0_32] : memref<9x1x224xf32, #tpu.memory_space<vmem>>, vector<1x1x224xf32>
    %39 = vector.shape_cast %38 : vector<1x1x224xf32> to vector<1x224xf32>
    %c0_33 = arith.constant 0 : index
    %c3_34 = arith.constant 3 : index
    %c0_35 = arith.constant 0 : index
    %c0_36 = arith.constant 0 : index
    %40 = vector.load %arg1[%c0_33, %c3_34, %c0_35, %c0_36] : memref<2x9x14x224xf32, #tpu.memory_space<vmem>>, vector<1x1x14x224xf32>
    %41 = vector.shape_cast %40 : vector<1x1x14x224xf32> to vector<14x224xf32>
    %42 = vector.broadcast %39 : vector<1x224xf32> to vector<14x224xf32>
    %43 = arith.mulf %42, %41 : vector<14x224xf32>
    %44 = arith.addf %32, %43 : vector<14x224xf32>
    %c1_37 = arith.constant 1 : index
    %c3_38 = arith.constant 3 : index
    %c0_39 = arith.constant 0 : index
    %c0_40 = arith.constant 0 : index
    %45 = vector.load %arg1[%c1_37, %c3_38, %c0_39, %c0_40] : memref<2x9x14x224xf32, #tpu.memory_space<vmem>>, vector<1x1x14x224xf32>
    %46 = vector.shape_cast %45 : vector<1x1x14x224xf32> to vector<14x224xf32>
    %47 = vector.broadcast %39 : vector<1x224xf32> to vector<14x224xf32>
    %48 = arith.mulf %47, %46 : vector<14x224xf32>
    %49 = arith.addf %37, %48 : vector<14x224xf32>
    %c4 = arith.constant 4 : index
    %c0_41 = arith.constant 0 : index
    %c0_42 = arith.constant 0 : index
    %50 = vector.load %arg0[%c4, %c0_41, %c0_42] : memref<9x1x224xf32, #tpu.memory_space<vmem>>, vector<1x1x224xf32>
    %51 = vector.shape_cast %50 : vector<1x1x224xf32> to vector<1x224xf32>
    %c0_43 = arith.constant 0 : index
    %c4_44 = arith.constant 4 : index
    %c0_45 = arith.constant 0 : index
    %c0_46 = arith.constant 0 : index
    %52 = vector.load %arg1[%c0_43, %c4_44, %c0_45, %c0_46] : memref<2x9x14x224xf32, #tpu.memory_space<vmem>>, vector<1x1x14x224xf32>
    %53 = vector.shape_cast %52 : vector<1x1x14x224xf32> to vector<14x224xf32>
    %54 = vector.broadcast %51 : vector<1x224xf32> to vector<14x224xf32>
    %55 = arith.mulf %54, %53 : vector<14x224xf32>
    %56 = arith.addf %44, %55 : vector<14x224xf32>
    %c1_47 = arith.constant 1 : index
    %c4_48 = arith.constant 4 : index
    %c0_49 = arith.constant 0 : index
    %c0_50 = arith.constant 0 : index
    %57 = vector.load %arg1[%c1_47, %c4_48, %c0_49, %c0_50] : memref<2x9x14x224xf32, #tpu.memory_space<vmem>>, vector<1x1x14x224xf32>
    %58 = vector.shape_cast %57 : vector<1x1x14x224xf32> to vector<14x224xf32>
    %59 = vector.broadcast %51 : vector<1x224xf32> to vector<14x224xf32>
    %60 = arith.mulf %59, %58 : vector<14x224xf32>
    %61 = arith.addf %49, %60 : vector<14x224xf32>
    %c5 = arith.constant 5 : index
    %c0_51 = arith.constant 0 : index
    %c0_52 = arith.constant 0 : index
    %62 = vector.load %arg0[%c5, %c0_51, %c0_52] : memref<9x1x224xf32, #tpu.memory_space<vmem>>, vector<1x1x224xf32>
    %63 = vector.shape_cast %62 : vector<1x1x224xf32> to vector<1x224xf32>
    %c0_53 = arith.constant 0 : index
    %c5_54 = arith.constant 5 : index
    %c0_55 = arith.constant 0 : index
    %c0_56 = arith.constant 0 : index
    %64 = vector.load %arg1[%c0_53, %c5_54, %c0_55, %c0_56] : memref<2x9x14x224xf32, #tpu.memory_space<vmem>>, vector<1x1x14x224xf32>
    %65 = vector.shape_cast %64 : vector<1x1x14x224xf32> to vector<14x224xf32>
    %66 = vector.broadcast %63 : vector<1x224xf32> to vector<14x224xf32>
    %67 = arith.mulf %66, %65 : vector<14x224xf32>
    %68 = arith.addf %56, %67 : vector<14x224xf32>
    %c1_57 = arith.constant 1 : index
    %c5_58 = arith.constant 5 : index
    %c0_59 = arith.constant 0 : index
    %c0_60 = arith.constant 0 : index
    %69 = vector.load %arg1[%c1_57, %c5_58, %c0_59, %c0_60] : memref<2x9x14x224xf32, #tpu.memory_space<vmem>>, vector<1x1x14x224xf32>
    %70 = vector.shape_cast %69 : vector<1x1x14x224xf32> to vector<14x224xf32>
    %71 = vector.broadcast %63 : vector<1x224xf32> to vector<14x224xf32>
    %72 = arith.mulf %71, %70 : vector<14x224xf32>
    %73 = arith.addf %61, %72 : vector<14x224xf32>
    %c6 = arith.constant 6 : index
    %c0_61 = arith.constant 0 : index
    %c0_62 = arith.constant 0 : index
    %74 = vector.load %arg0[%c6, %c0_61, %c0_62] : memref<9x1x224xf32, #tpu.memory_space<vmem>>, vector<1x1x224xf32>
    %75 = vector.shape_cast %74 : vector<1x1x224xf32> to vector<1x224xf32>
    %c0_63 = arith.constant 0 : index
    %c6_64 = arith.constant 6 : index
    %c0_65 = arith.constant 0 : index
    %c0_66 = arith.constant 0 : index
    %76 = vector.load %arg1[%c0_63, %c6_64, %c0_65, %c0_66] : memref<2x9x14x224xf32, #tpu.memory_space<vmem>>, vector<1x1x14x224xf32>
    %77 = vector.shape_cast %76 : vector<1x1x14x224xf32> to vector<14x224xf32>
    %78 = vector.broadcast %75 : vector<1x224xf32> to vector<14x224xf32>
    %79 = arith.mulf %78, %77 : vector<14x224xf32>
    %80 = arith.addf %68, %79 : vector<14x224xf32>
    %c1_67 = arith.constant 1 : index
    %c6_68 = arith.constant 6 : index
    %c0_69 = arith.constant 0 : index
    %c0_70 = arith.constant 0 : index
    %81 = vector.load %arg1[%c1_67, %c6_68, %c0_69, %c0_70] : memref<2x9x14x224xf32, #tpu.memory_space<vmem>>, vector<1x1x14x224xf32>
    %82 = vector.shape_cast %81 : vector<1x1x14x224xf32> to vector<14x224xf32>
    %83 = vector.broadcast %75 : vector<1x224xf32> to vector<14x224xf32>
    %84 = arith.mulf %83, %82 : vector<14x224xf32>
    %85 = arith.addf %73, %84 : vector<14x224xf32>
    %c7 = arith.constant 7 : index
    %c0_71 = arith.constant 0 : index
    %c0_72 = arith.constant 0 : index
    %86 = vector.load %arg0[%c7, %c0_71, %c0_72] : memref<9x1x224xf32, #tpu.memory_space<vmem>>, vector<1x1x224xf32>
    %87 = vector.shape_cast %86 : vector<1x1x224xf32> to vector<1x224xf32>
    %c0_73 = arith.constant 0 : index
    %c7_74 = arith.constant 7 : index
    %c0_75 = arith.constant 0 : index
    %c0_76 = arith.constant 0 : index
    %88 = vector.load %arg1[%c0_73, %c7_74, %c0_75, %c0_76] : memref<2x9x14x224xf32, #tpu.memory_space<vmem>>, vector<1x1x14x224xf32>
    %89 = vector.shape_cast %88 : vector<1x1x14x224xf32> to vector<14x224xf32>
    %90 = vector.broadcast %87 : vector<1x224xf32> to vector<14x224xf32>
    %91 = arith.mulf %90, %89 : vector<14x224xf32>
    %92 = arith.addf %80, %91 : vector<14x224xf32>
    %c1_77 = arith.constant 1 : index
    %c7_78 = arith.constant 7 : index
    %c0_79 = arith.constant 0 : index
    %c0_80 = arith.constant 0 : index
    %93 = vector.load %arg1[%c1_77, %c7_78, %c0_79, %c0_80] : memref<2x9x14x224xf32, #tpu.memory_space<vmem>>, vector<1x1x14x224xf32>
    %94 = vector.shape_cast %93 : vector<1x1x14x224xf32> to vector<14x224xf32>
    %95 = vector.broadcast %87 : vector<1x224xf32> to vector<14x224xf32>
    %96 = arith.mulf %95, %94 : vector<14x224xf32>
    %97 = arith.addf %85, %96 : vector<14x224xf32>
    %c8 = arith.constant 8 : index
    %c0_81 = arith.constant 0 : index
    %c0_82 = arith.constant 0 : index
    %98 = vector.load %arg0[%c8, %c0_81, %c0_82] : memref<9x1x224xf32, #tpu.memory_space<vmem>>, vector<1x1x224xf32>
    %99 = vector.shape_cast %98 : vector<1x1x224xf32> to vector<1x224xf32>
    %c0_83 = arith.constant 0 : index
    %c8_84 = arith.constant 8 : index
    %c0_85 = arith.constant 0 : index
    %c0_86 = arith.constant 0 : index
    %100 = vector.load %arg1[%c0_83, %c8_84, %c0_85, %c0_86] : memref<2x9x14x224xf32, #tpu.memory_space<vmem>>, vector<1x1x14x224xf32>
    %101 = vector.shape_cast %100 : vector<1x1x14x224xf32> to vector<14x224xf32>
    %102 = vector.broadcast %99 : vector<1x224xf32> to vector<14x224xf32>
    %103 = arith.mulf %102, %101 : vector<14x224xf32>
    %104 = arith.addf %92, %103 : vector<14x224xf32>
    %c1_87 = arith.constant 1 : index
    %c8_88 = arith.constant 8 : index
    %c0_89 = arith.constant 0 : index
    %c0_90 = arith.constant 0 : index
    %105 = vector.load %arg1[%c1_87, %c8_88, %c0_89, %c0_90] : memref<2x9x14x224xf32, #tpu.memory_space<vmem>>, vector<1x1x14x224xf32>
    %106 = vector.shape_cast %105 : vector<1x1x14x224xf32> to vector<14x224xf32>
    %107 = vector.broadcast %99 : vector<1x224xf32> to vector<14x224xf32>
    %108 = arith.mulf %107, %106 : vector<14x224xf32>
    %109 = arith.addf %97, %108 : vector<14x224xf32>
    %cst_91 = arith.constant dense<0.000000e+00> : vector<224xf32>
    %110 = vector.multi_reduction <add>, %104, %cst_91 [0] : vector<14x224xf32> to vector<224xf32>
    %111 = vector.shape_cast %110 : vector<224xf32> to vector<1x224xf32>
    %cst_92 = arith.constant 1.400000e+01 : f32
    %112 = vector.broadcast %cst_92 : f32 to vector<1x224xf32>
    %113 = arith.divf %111, %112 : vector<1x224xf32>
    %114 = vector.broadcast %113 : vector<1x224xf32> to vector<14x224xf32>
    %115 = arith.subf %104, %114 : vector<14x224xf32>
    %cst_93 = arith.constant dense<0.000000e+00> : vector<224xf32>
    %116 = vector.multi_reduction <add>, %109, %cst_93 [0] : vector<14x224xf32> to vector<224xf32>
    %117 = vector.shape_cast %116 : vector<224xf32> to vector<1x224xf32>
    %cst_94 = arith.constant 1.400000e+01 : f32
    %118 = vector.broadcast %cst_94 : f32 to vector<1x224xf32>
    %119 = arith.divf %117, %118 : vector<1x224xf32>
    %120 = vector.broadcast %119 : vector<1x224xf32> to vector<14x224xf32>
    %121 = arith.subf %109, %120 : vector<14x224xf32>
    %122 = arith.mulf %115, %121 : vector<14x224xf32>
    %cst_95 = arith.constant dense<0.000000e+00> : vector<224xf32>
    %123 = vector.multi_reduction <add>, %122, %cst_95 [0] : vector<14x224xf32> to vector<224xf32>
    %124 = vector.shape_cast %123 : vector<224xf32> to vector<1x224xf32>
    %125 = arith.mulf %115, %115 : vector<14x224xf32>
    %cst_96 = arith.constant dense<0.000000e+00> : vector<224xf32>
    %126 = vector.multi_reduction <add>, %125, %cst_96 [0] : vector<14x224xf32> to vector<224xf32>
    %127 = vector.shape_cast %126 : vector<224xf32> to vector<1x224xf32>
    %128 = arith.mulf %121, %121 : vector<14x224xf32>
    %cst_97 = arith.constant dense<0.000000e+00> : vector<224xf32>
    %129 = vector.multi_reduction <add>, %128, %cst_97 [0] : vector<14x224xf32> to vector<224xf32>
    %130 = vector.shape_cast %129 : vector<224xf32> to vector<1x224xf32>
    %131 = arith.mulf %127, %130 : vector<1x224xf32>
    %132 = math.rsqrt %131 : vector<1x224xf32>
    %133 = arith.mulf %124, %132 : vector<1x224xf32>
    %cst_98 = arith.constant 1.000000e+00 : f32
    %134 = vector.broadcast %cst_98 : f32 to vector<1x224xf32>
    %135 = arith.subf %133, %134 : vector<1x224xf32>
    %136 = arith.mulf %135, %135 : vector<1x224xf32>
    %cst_99 = arith.constant dense<0.000000e+00> : vector<1xf32>
    %137 = vector.multi_reduction <add>, %136, %cst_99 [1] : vector<1x224xf32> to vector<1xf32>
    %138 = vector.shape_cast %137 : vector<1xf32> to vector<1x1xf32>
    %cst_100 = arith.constant 0.00446428591 : f32
    %139 = vector.broadcast %cst_100 : f32 to vector<1x1xf32>
    %140 = arith.mulf %138, %139 : vector<1x1xf32>
    %c0_101 = arith.constant 0 : index
    %c0_102 = arith.constant 0 : index
    %141 = vector.load %arg2[%c0_101, %c0_102] : memref<1x1xf32, #tpu.memory_space<vmem>>, vector<1x1xf32>
    tpu.vector_store %arg2[%c0_101, %c0_102], %140 {strides = array<i32>} : memref<1x1xf32, #tpu.memory_space<vmem>>, vector<1x1xf32>,
    return
  }
}

</mosaic_0001>

<bundles_post_ra>
// kernel: tile.7
= control target key start
LH: loop header
LB: loop body
LE: loop exit
PB: predicated region body
PF: predicated region fallthrough
CT: control target
= control target key end

     0   :  { %vm4_vm0 = vcmask 1047556   ;;  %vm483_vm1 = vcmask 130048   ;;  %s7339_s24 = smov 112   ;;  %s7340_s17 = smov 84   ;;  %vm6_vm2 = vcmask 228352   ;;  %vm496_vm3 = vcmask 1048448   ;;  %s11810_s0 = inlined_call_operand.vmem [shape: f32[2,9,14,8,28], index: 0, kind: input, shape index: {}]   ;;  %s11811_s1 = inlined_call_operand.vmem [shape: f32[2,9,14,224], index: 1, kind: output, shape index: {}]  }
   0x1   :  { %v6585_v0 = vld [vmem:[%s11810_s0 + $0x84] ss:$8 sm:$0xf]   ;;  %s7341_s3 = smov 68   ;;  %vm1550_vm4 = vcmask 917152   ;;  %vm487_vm5 = vcmask 97280  }
   0x2   :  { %v6586_v1 = vld [vmem:[%s11810_s0 + $0x84] ss:$8 sm:$0xf0]   ;;  %s7342_s27 = smov 56   ;;  %vm2085_vm6 = vcmask 785952   ;;  %s7343_s16 = smov 40  }
   0x3   :  { %v6587_v2 = vld [vmem:[%s11810_s0 + $0x84] ss:$8 sm:$0xf]   ;;  %v543_v3 = vsel %vm4_vm0, %v6586_v1, %v6585_v0  ;;  %vm2621_vm7 = vcmask 687552   ;;  %s7344_s2 = smov 28   ;;  %vm3156_vm8 = vcmask 556352  }
   0x4   :  { %v6588_v4 = vld [vmem:[%s11810_s0 + $0x84] ss:$8 sm:$0xf0]   ;;  %s7345_s15 = smov 12   ;;  %vm3692_vm9 = vcmask 457952   ;;  %vm4227_vm10 = vcmask 326752  }
   0x5   :  { %v6577_v5 = vld [vmem:[%s11810_s0 + $0x4] ss:$8 sm:$0xf]   ;;  %v549_v6 = vsel %vm4_vm0, %v6588_v4, %v6587_v2 }
   0x6   :  { %v6578_v7 = vld [vmem:[%s11810_s0 + $0x4] ss:$8 sm:$0xf0]   ;;  %v551_v9 = vsel %vm483_vm1, %v549_v6, %v543_v3 }
   0x7   :  { %v6579_v8 = vld [vmem:[%s11810_s0 + $0x4] ss:$8 sm:$0xf]   ;;  %v476_v10 = vsel %vm4_vm0, %v6578_v7, %v6577_v5  ;;  %552 = vrot.lane.b32.xlu1 %v551_v9, %s7339_s24 }
   0x8   :  { %v6580_v11 = vld [vmem:[%s11810_s0 + $0x4] ss:$8 sm:$0xf0]  }
   0x9   :  { %v6589_v12 = vld [vmem:[%s11810_s0 + $0xc4] ss:$8 sm:$0xf]   ;;  %v482_v13 = vsel %vm4_vm0, %v6580_v11, %v6579_v8 }
   0xa   :  { %v6590_v14 = vld [vmem:[%s11810_s0 + $0xc4] ss:$8 sm:$0xf0]   ;;  %v484_v16 = vsel %vm483_vm1, %v482_v13, %v476_v10 }
   0xb   :  { %v6591_v15 = vld [vmem:[%s11810_s0 + $0xc4] ss:$8 sm:$0xf]   ;;  %v577_v17 = vsel %vm4_vm0, %v6590_v14, %v6589_v12  ;;  %485 = vrot.lane.b32.xlu0 %v484_v16, %s7339_s24 }
   0xc   :  { %v6592_v18 = vld [vmem:[%s11810_s0 + $0xc4] ss:$8 sm:$0xf0]  }
   0xd   :  { %v6581_v19 = vld [vmem:[%s11810_s0 + $0x44] ss:$8 sm:$0xf]   ;;  %v583_v20 = vsel %vm4_vm0, %v6592_v18, %v6591_v15 }
   0xe   :  { %v6582_v21 = vld [vmem:[%s11810_s0 + $0x44] ss:$8 sm:$0xf0]   ;;  %v585_v23 = vsel %vm483_vm1, %v583_v20, %v577_v17 }
   0xf   :  { %v6583_v22 = vld [vmem:[%s11810_s0 + $0x44] ss:$8 sm:$0xf]   ;;  %v509_v24 = vsel %vm4_vm0, %v6582_v21, %v6581_v19  ;;  %586 = vrot.lane.b32.xlu1 %v585_v23, %s7339_s24 }
  0x10   :  { %v6584_v25 = vld [vmem:[%s11810_s0 + $0x44] ss:$8 sm:$0xf0]  }
  0x11   :  { %v6597_v26 = vld [vmem:[%s11810_s0 + $0x144] ss:$8 sm:$0xf]   ;;  %v515_v27 = vsel %vm4_vm0, %v6584_v25, %v6583_v22 }
  0x12   :  { %v6598_v28 = vld [vmem:[%s11810_s0 + $0x144] ss:$8 sm:$0xf0]   ;;  %v517_v30 = vsel %vm483_vm1, %v515_v27, %v509_v24 }
  0x13   :  { %v6599_v29 = vld [vmem:[%s11810_s0 + $0x144] ss:$8 sm:$0xf]   ;;  %v645_v31 = vsel %vm4_vm0, %v6598_v28, %v6597_v26  ;;  %518 = vrot.lane.b32.xlu0 %v517_v30, %s7339_s24 }
  0x14   :  { %v6600_v32 = vld [vmem:[%s11810_s0 + $0x144] ss:$8 sm:$0xf0]  }
  0x15   :  { %v6593_v33 = vld [vmem:[%s11810_s0 + $0x104] ss:$8 sm:$0xf]   ;;  %v651_v34 = vsel %vm4_vm0, %v6600_v32, %v6599_v29 }
  0x16   :  { %v6594_v35 = vld [vmem:[%s11810_s0 + $0x104] ss:$8 sm:$0xf0]   ;;  %v653_v37 = vsel %vm483_vm1, %v651_v34, %v645_v31 }
  0x17   :  { %v6595_v36 = vld [vmem:[%s11810_s0 + $0x104] ss:$8 sm:$0xf]   ;;  %v611_v38 = vsel %vm4_vm0, %v6594_v35, %v6593_v33  ;;  %654 = vrot.lane.b32.xlu1 %v653_v37, %s7339_s24 }
  0x18   :  { %v6596_v39 = vld [vmem:[%s11810_s0 + $0x104] ss:$8 sm:$0xf0]  }
  0x19   :  { %v6605_v40 = vld [vmem:[%s11810_s0 + $0x1c4] ss:$8 sm:$0xf]   ;;  %v617_v41 = vsel %vm4_vm0, %v6596_v39, %v6595_v36 }
  0x1a   :  { %v6606_v42 = vld [vmem:[%s11810_s0 + $0x1c4] ss:$8 sm:$0xf0]   ;;  %v619_v44 = vsel %vm483_vm1, %v617_v41, %v611_v38 }
  0x1b   :  { %v6607_v43 = vld [vmem:[%s11810_s0 + $0x1c4] ss:$8 sm:$0xf]   ;;  %v713_v45 = vsel %vm4_vm0, %v6606_v42, %v6605_v40  ;;  %620 = vrot.lane.b32.xlu0 %v619_v44, %s7339_s24 }
  0x1c   :  { %v6608_v46 = vld [vmem:[%s11810_s0 + $0x1c4] ss:$8 sm:$0xf0]  }
  0x1d   :  { %v6601_v47 = vld [vmem:[%s11810_s0 + $0x184] ss:$8 sm:$0xf]   ;;  %v719_v48 = vsel %vm4_vm0, %v6608_v46, %v6607_v43 }
  0x1e   :  { %v6602_v49 = vld [vmem:[%s11810_s0 + $0x184] ss:$8 sm:$0xf0]   ;;  %v721_v51 = vsel %vm483_vm1, %v719_v48, %v713_v45 }
  0x1f   :  { %v6603_v50 = vld [vmem:[%s11810_s0 + $0x184] ss:$8 sm:$0xf]   ;;  %v679_v52 = vsel %vm4_vm0, %v6602_v49, %v6601_v47  ;;  %722 = vrot.lane.b32.xlu1 %v721_v51, %s7339_s24 }
  0x20   :  { %v6604_v53 = vld [vmem:[%s11810_s0 + $0x184] ss:$8 sm:$0xf0]  }
  0x21   :  { %v6613_v54 = vld [vmem:[%s11810_s0 + $0x244] ss:$8 sm:$0xf]   ;;  %v685_v55 = vsel %vm4_vm0, %v6604_v53, %v6603_v50 }
  0x22   :  { %v6614_v56 = vld [vmem:[%s11810_s0 + $0x244] ss:$8 sm:$0xf0]   ;;  %v687_v58 = vsel %vm483_vm1, %v685_v55, %v679_v52 }
  0x23   :  { %v6615_v57 = vld [vmem:[%s11810_s0 + $0x244] ss:$8 sm:$0xf]   ;;  %v781_v59 = vsel %vm4_vm0, %v6614_v56, %v6613_v54  ;;  %688 = vrot.lane.b32.xlu0 %v687_v58, %s7339_s24 }
  0x24   :  { %v6616_v60 = vld [vmem:[%s11810_s0 + $0x244] ss:$8 sm:$0xf0]  }
  0x25   :  { %v6609_v61 = vld [vmem:[%s11810_s0 + $0x204] ss:$8 sm:$0xf]   ;;  %v787_v62 = vsel %vm4_vm0, %v6616_v60, %v6615_v57 }
  0x26   :  { %v6610_v63 = vld [vmem:[%s11810_s0 + $0x204] ss:$8 sm:$0xf0]   ;;  %v789_v1 = vsel %vm483_vm1, %v787_v62, %v781_v59 }
  0x27   :  { %v6611_v0 = vld [vmem:[%s11810_s0 + $0x204] ss:$8 sm:$0xf]   ;;  %v747_v2 = vsel %vm4_vm0, %v6610_v63, %v6609_v61  ;;  %790 = vrot.lane.b32.xlu1 %v789_v1, %s7339_s24 }
  0x28   :  { %v6612_v3 = vld [vmem:[%s11810_s0 + $0x204] ss:$8 sm:$0xf0]  }
  0x29   :  { %v6621_v4 = vld [vmem:[%s11810_s0 + $0x2c4] ss:$8 sm:$0xf]   ;;  %v753_v5 = vsel %vm4_vm0, %v6612_v3, %v6611_v0 }
  0x2a   :  { %v6622_v6 = vld [vmem:[%s11810_s0 + $0x2c4] ss:$8 sm:$0xf0]   ;;  %v755_v8 = vsel %vm483_vm1, %v753_v5, %v747_v2 }
  0x2b   :  { %v6623_v7 = vld [vmem:[%s11810_s0 + $0x2c4] ss:$8 sm:$0xf]   ;;  %v849_v9 = vsel %vm4_vm0, %v6622_v6, %v6621_v4  ;;  %756 = vrot.lane.b32.xlu0 %v755_v8, %s7339_s24 }
  0x2c   :  { %v6624_v10 = vld [vmem:[%s11810_s0 + $0x2c4] ss:$8 sm:$0xf0]  }
  0x2d   :  { %v6617_v11 = vld [vmem:[%s11810_s0 + $0x284] ss:$8 sm:$0xf]   ;;  %v855_v12 = vsel %vm4_vm0, %v6624_v10, %v6623_v7 }
  0x2e   :  { %v6618_v13 = vld [vmem:[%s11810_s0 + $0x284] ss:$8 sm:$0xf0]   ;;  %v857_v15 = vsel %vm483_vm1, %v855_v12, %v849_v9 }
  0x2f   :  { %v6619_v14 = vld [vmem:[%s11810_s0 + $0x284] ss:$8 sm:$0xf]   ;;  %v815_v16 = vsel %vm4_vm0, %v6618_v13, %v6617_v11  ;;  %858 = vrot.lane.b32.xlu1 %v857_v15, %s7339_s24 }
  0x30   :  { %v6620_v17 = vld [vmem:[%s11810_s0 + $0x284] ss:$8 sm:$0xf0]  }
  0x31   :  { %v6629_v18 = vld [vmem:[%s11810_s0 + $0x344] ss:$8 sm:$0xf]   ;;  %v821_v19 = vsel %vm4_vm0, %v6620_v17, %v6619_v14 }
  0x32   :  { %v6630_v20 = vld [vmem:[%s11810_s0 + $0x344] ss:$8 sm:$0xf0]   ;;  %v823_v22 = vsel %vm483_vm1, %v821_v19, %v815_v16 }
  0x33   :  { %v6631_v21 = vld [vmem:[%s11810_s0 + $0x344] ss:$8 sm:$0xf]   ;;  %v917_v23 = vsel %vm4_vm0, %v6630_v20, %v6629_v18  ;;  %824 = vrot.lane.b32.xlu0 %v823_v22, %s7339_s24 }
  0x34   :  { %v6632_v24 = vld [vmem:[%s11810_s0 + $0x344] ss:$8 sm:$0xf0]  }
  0x35   :  { %v6625_v25 = vld [vmem:[%s11810_s0 + $0x304] ss:$8 sm:$0xf]   ;;  %v923_v26 = vsel %vm4_vm0, %v6632_v24, %v6631_v21 }
  0x36   :  { %v6626_v27 = vld [vmem:[%s11810_s0 + $0x304] ss:$8 sm:$0xf0]   ;;  %v925_v29 = vsel %vm483_vm1, %v923_v26, %v917_v23 }
  0x37   :  { %v6627_v28 = vld [vmem:[%s11810_s0 + $0x304] ss:$8 sm:$0xf]   ;;  %v883_v30 = vsel %vm4_vm0, %v6626_v27, %v6625_v25  ;;  %926 = vrot.lane.b32.xlu1 %v925_v29, %s7339_s24 }
  0x38   :  { %v6628_v31 = vld [vmem:[%s11810_s0 + $0x304] ss:$8 sm:$0xf0]  }
  0x39   :  { %v6637_v32 = vld [vmem:[%s11810_s0 + $0x3c4] ss:$8 sm:$0xf]   ;;  %v889_v33 = vsel %vm4_vm0, %v6628_v31, %v6627_v28 }
  0x3a   :  { %v6638_v34 = vld [vmem:[%s11810_s0 + $0x3c4] ss:$8 sm:$0xf0]   ;;  %v891_v36 = vsel %vm483_vm1, %v889_v33, %v883_v30 }
  0x3b   :  { %v6639_v35 = vld [vmem:[%s11810_s0 + $0x3c4] ss:$8 sm:$0xf]   ;;  %v985_v37 = vsel %vm4_vm0, %v6638_v34, %v6637_v32  ;;  %892 = vrot.lane.b32.xlu0 %v891_v36, %s7339_s24 }
  0x3c   :  { %v6640_v38 = vld [vmem:[%s11810_s0 + $0x3c4] ss:$8 sm:$0xf0]  }
  0x3d   :  { %v6633_v39 = vld [vmem:[%s11810_s0 + $0x384] ss:$8 sm:$0xf]   ;;  %v991_v40 = vsel %vm4_vm0, %v6640_v38, %v6639_v35 }
  0x3e   :  { %v6634_v41 = vld [vmem:[%s11810_s0 + $0x384] ss:$8 sm:$0xf0]   ;;  %v993_v43 = vsel %vm483_vm1, %v991_v40, %v985_v37 }
  0x3f   :  { %v6635_v42 = vld [vmem:[%s11810_s0 + $0x384] ss:$8 sm:$0xf]   ;;  %v951_v44 = vsel %vm4_vm0, %v6634_v41, %v6633_v39  ;;  %994 = vrot.lane.b32.xlu1 %v993_v43, %s7339_s24 }
  0x40   :  { %v6636_v45 = vld [vmem:[%s11810_s0 + $0x384] ss:$8 sm:$0xf0]  }
  0x41   :  { %v6645_v46 = vld [vmem:[%s11810_s0 + $0x444] ss:$8 sm:$0xf]   ;;  %v957_v47 = vsel %vm4_vm0, %v6636_v45, %v6635_v42 }
  0x42   :  { %v6646_v48 = vld [vmem:[%s11810_s0 + $0x444] ss:$8 sm:$0xf0]   ;;  %v959_v50 = vsel %vm483_vm1, %v957_v47, %v951_v44 }
  0x43   :  { %v6647_v49 = vld [vmem:[%s11810_s0 + $0x444] ss:$8 sm:$0xf]   ;;  %v1053_v51 = vsel %vm4_vm0, %v6646_v48, %v6645_v46  ;;  %960 = vrot.lane.b32.xlu0 %v959_v50, %s7339_s24 }
  0x44   :  { %v6648_v52 = vld [vmem:[%s11810_s0 + $0x444] ss:$8 sm:$0xf0]  }
  0x45   :  { %v6641_v53 = vld [vmem:[%s11810_s0 + $0x404] ss:$8 sm:$0xf]   ;;  %v1059_v54 = vsel %vm4_vm0, %v6648_v52, %v6647_v49 }
  0x46   :  { %v6642_v55 = vld [vmem:[%s11810_s0 + $0x404] ss:$8 sm:$0xf0]   ;;  %v1061_v57 = vsel %vm483_vm1, %v1059_v54, %v1053_v51 }
  0x47   :  { %v6643_v56 = vld [vmem:[%s11810_s0 + $0x404] ss:$8 sm:$0xf]   ;;  %v1019_v58 = vsel %vm4_vm0, %v6642_v55, %v6641_v53  ;;  %1062 = vrot.lane.b32.xlu1 %v1061_v57, %s7339_s24 }
  0x48   :  { %v6644_v59 = vld [vmem:[%s11810_s0 + $0x404] ss:$8 sm:$0xf0]  }
  0x49   :  { %v6653_v60 = vld [vmem:[%s11810_s0 + $0x4c4] ss:$8 sm:$0xf]   ;;  %v1025_v61 = vsel %vm4_vm0, %v6644_v59, %v6643_v56 }
  0x4a   :  { %v6654_v62 = vld [vmem:[%s11810_s0 + $0x4c4] ss:$8 sm:$0xf0]   ;;  %v1027_v0 = vsel %vm483_vm1, %v1025_v61, %v1019_v58 }
  0x4b   :  { %v6655_v63 = vld [vmem:[%s11810_s0 + $0x4c4] ss:$8 sm:$0xf]   ;;  %v1121_v1 = vsel %vm4_vm0, %v6654_v62, %v6653_v60  ;;  %1028 = vrot.lane.b32.xlu0 %v1027_v0, %s7339_s24 }
  0x4c   :  { %v6656_v2 = vld [vmem:[%s11810_s0 + $0x4c4] ss:$8 sm:$0xf0]  }
  0x4d   :  { %v6649_v3 = vld [vmem:[%s11810_s0 + $0x484] ss:$8 sm:$0xf]   ;;  %v1127_v4 = vsel %vm4_vm0, %v6656_v2, %v6655_v63 }
  0x4e   :  { %v6650_v5 = vld [vmem:[%s11810_s0 + $0x484] ss:$8 sm:$0xf0]   ;;  %v1129_v7 = vsel %vm483_vm1, %v1127_v4, %v1121_v1 }
  0x4f   :  { %v6651_v6 = vld [vmem:[%s11810_s0 + $0x484] ss:$8 sm:$0xf]   ;;  %v1087_v8 = vsel %vm4_vm0, %v6650_v5, %v6649_v3  ;;  %1130 = vrot.lane.b32.xlu1 %v1129_v7, %s7339_s24 }
  0x50   :  { %v6652_v9 = vld [vmem:[%s11810_s0 + $0x484] ss:$8 sm:$0xf0]  }
  0x51   :  { %v6661_v10 = vld [vmem:[%s11810_s0 + $0x544] ss:$8 sm:$0xf]   ;;  %v1093_v11 = vsel %vm4_vm0, %v6652_v9, %v6651_v6 }
  0x52   :  { %v6662_v12 = vld [vmem:[%s11810_s0 + $0x544] ss:$8 sm:$0xf0]   ;;  %v1095_v14 = vsel %vm483_vm1, %v1093_v11, %v1087_v8 }
  0x53   :  { %v6663_v13 = vld [vmem:[%s11810_s0 + $0x544] ss:$8 sm:$0xf]   ;;  %v1189_v15 = vsel %vm4_vm0, %v6662_v12, %v6661_v10  ;;  %1096 = vrot.lane.b32.xlu0 %v1095_v14, %s7339_s24 }
  0x54   :  { %v6664_v16 = vld [vmem:[%s11810_s0 + $0x544] ss:$8 sm:$0xf0]  }
  0x55   :  { %v6657_v17 = vld [vmem:[%s11810_s0 + $0x504] ss:$8 sm:$0xf]   ;;  %v1195_v18 = vsel %vm4_vm0, %v6664_v16, %v6663_v13 }
  0x56   :  { %v6658_v19 = vld [vmem:[%s11810_s0 + $0x504] ss:$8 sm:$0xf0]   ;;  %v1197_v21 = vsel %vm483_vm1, %v1195_v18, %v1189_v15 }
  0x57   :  { %v6659_v20 = vld [vmem:[%s11810_s0 + $0x504] ss:$8 sm:$0xf]   ;;  %v1155_v22 = vsel %vm4_vm0, %v6658_v19, %v6657_v17  ;;  %1198 = vrot.lane.b32.xlu1 %v1197_v21, %s7339_s24 }
  0x58   :  { %v6660_v23 = vld [vmem:[%s11810_s0 + $0x504] ss:$8 sm:$0xf0]  }
  0x59   :  { %v6669_v24 = vld [vmem:[%s11810_s0 + $0x5c4] ss:$8 sm:$0xf]   ;;  %v1161_v25 = vsel %vm4_vm0, %v6660_v23, %v6659_v20 }
  0x5a   :  { %v6670_v26 = vld [vmem:[%s11810_s0 + $0x5c4] ss:$8 sm:$0xf0]   ;;  %v1163_v28 = vsel %vm483_vm1, %v1161_v25, %v1155_v22 }
  0x5b   :  { %v6671_v27 = vld [vmem:[%s11810_s0 + $0x5c4] ss:$8 sm:$0xf]   ;;  %v1257_v29 = vsel %vm4_vm0, %v6670_v26, %v6669_v24  ;;  %1164 = vrot.lane.b32.xlu0 %v1163_v28, %s7339_s24  ;;  %v6706_v28 = vld [vmem:[%s11810_s0 + $0x43] ss:$8 sm:$0xf0]  }
  0x5c   :  { %v6672_v30 = vld [vmem:[%s11810_s0 + $0x5c4] ss:$8 sm:$0xf0]  }
  0x5d   :  { %v6665_v31 = vld [vmem:[%s11810_s0 + $0x584] ss:$8 sm:$0xf]   ;;  %v1263_v32 = vsel %vm4_vm0, %v6672_v30, %v6671_v27  ;;  %v6705_v27 = vld [vmem:[%s11810_s0 + $0x43] ss:$8 sm:$0xf]  }
  0x5e   :  { %v6666_v33 = vld [vmem:[%s11810_s0 + $0x584] ss:$8 sm:$0xf0]   ;;  %v1265_v35 = vsel %vm483_vm1, %v1263_v32, %v1257_v29  ;;  %v6703_v30 = vld [vmem:[%s11810_s0 + $0x3] ss:$8 sm:$0xf]   ;;  %v1563_v32 = vsel %vm4_vm0, %v6706_v28, %v6705_v27 }
  0x5f   :  { %v6667_v34 = vld [vmem:[%s11810_s0 + $0x584] ss:$8 sm:$0xf]   ;;  %v1223_v36 = vsel %vm4_vm0, %v6666_v33, %v6665_v31  ;;  %1266 = vrot.lane.b32.xlu1 %v1265_v35, %s7339_s24  ;;  %v6704_v31 = vld [vmem:[%s11810_s0 + $0x3] ss:$8 sm:$0xf0]  }
  0x60   :  { %v6668_v37 = vld [vmem:[%s11810_s0 + $0x584] ss:$8 sm:$0xf0]   ;;  %v6709_v33 = vld [vmem:[%s11810_s0 + $0xc3] ss:$8 sm:$0xf]   ;;  %v1547_v35 = vsel %vm4_vm0, %v6704_v31, %v6703_v30 }
  0x61   :  { %v6677_v38 = vld [vmem:[%s11810_s0 + $0x644] ss:$8 sm:$0xf]   ;;  %v1229_v39 = vsel %vm4_vm0, %v6668_v37, %v6667_v34  ;;  %v6710_v34 = vld [vmem:[%s11810_s0 + $0xc3] ss:$8 sm:$0xf0]  }
  0x62   :  { %v6678_v40 = vld [vmem:[%s11810_s0 + $0x644] ss:$8 sm:$0xf0]   ;;  %v1231_v42 = vsel %vm483_vm1, %v1229_v39, %v1223_v36  ;;  %v6707_v36 = vld [vmem:[%s11810_s0 + $0x83] ss:$8 sm:$0xf]  }
  0x63   :  { %v6679_v41 = vld [vmem:[%s11810_s0 + $0x644] ss:$8 sm:$0xf]   ;;  %v1325_v43 = vsel %vm4_vm0, %v6678_v40, %v6677_v38  ;;  %1232 = vrot.lane.b32.xlu0 %v1231_v42, %s7339_s24  ;;  %v6708_v37 = vld [vmem:[%s11810_s0 + $0x83] ss:$8 sm:$0xf0]   ;;  %v1597_v38 = vsel %vm4_vm0, %v6710_v34, %v6709_v33 }
  0x64   :  { %v6680_v44 = vld [vmem:[%s11810_s0 + $0x644] ss:$8 sm:$0xf0]   ;;  %v6713_v39 = vld [vmem:[%s11810_s0 + $0x143] ss:$8 sm:$0xf]  }
  0x65   :  { %v6673_v45 = vld [vmem:[%s11810_s0 + $0x604] ss:$8 sm:$0xf]   ;;  %v1331_v46 = vsel %vm4_vm0, %v6680_v44, %v6679_v41  ;;  %v6714_v40 = vld [vmem:[%s11810_s0 + $0x143] ss:$8 sm:$0xf0]   ;;  %v1580_v41 = vsel %vm4_vm0, %v6708_v37, %v6707_v36 }
  0x66   :  { %v6674_v47 = vld [vmem:[%s11810_s0 + $0x604] ss:$8 sm:$0xf0]   ;;  %v1333_v49 = vsel %vm483_vm1, %v1331_v46, %v1325_v43  ;;  %v6711_v42 = vld [vmem:[%s11810_s0 + $0x103] ss:$8 sm:$0xf]   ;;  %v1631_v44 = vsel %vm4_vm0, %v6714_v40, %v6713_v39 }
  0x67   :  { %v6675_v48 = vld [vmem:[%s11810_s0 + $0x604] ss:$8 sm:$0xf]   ;;  %v1291_v50 = vsel %vm4_vm0, %v6674_v47, %v6673_v45  ;;  %1334 = vrot.lane.b32.xlu1 %v1333_v49, %s7339_s24  ;;  %v6712_v43 = vld [vmem:[%s11810_s0 + $0x103] ss:$8 sm:$0xf0]  }
  0x68   :  { %v6676_v51 = vld [vmem:[%s11810_s0 + $0x604] ss:$8 sm:$0xf0]   ;;  %v6717_v45 = vld [vmem:[%s11810_s0 + $0x1c3] ss:$8 sm:$0xf]   ;;  %v1614_v47 = vsel %vm4_vm0, %v6712_v43, %v6711_v42 }
  0x69   :  { %v6685_v52 = vld [vmem:[%s11810_s0 + $0x6c4] ss:$8 sm:$0xf]   ;;  %v1297_v53 = vsel %vm4_vm0, %v6676_v51, %v6675_v48  ;;  %v6718_v46 = vld [vmem:[%s11810_s0 + $0x1c3] ss:$8 sm:$0xf0]  }
  0x6a   :  { %v6686_v54 = vld [vmem:[%s11810_s0 + $0x6c4] ss:$8 sm:$0xf0]   ;;  %v1299_v56 = vsel %vm483_vm1, %v1297_v53, %v1291_v50  ;;  %v6715_v48 = vld [vmem:[%s11810_s0 + $0x183] ss:$8 sm:$0xf]   ;;  %v1665_v50 = vsel %vm4_vm0, %v6718_v46, %v6717_v45 }
  0x6b   :  { %v6687_v55 = vld [vmem:[%s11810_s0 + $0x6c4] ss:$8 sm:$0xf]   ;;  %v1393_v57 = vsel %vm4_vm0, %v6686_v54, %v6685_v52  ;;  %1300 = vrot.lane.b32.xlu0 %v1299_v56, %s7339_s24  ;;  %v6716_v49 = vld [vmem:[%s11810_s0 + $0x183] ss:$8 sm:$0xf0]  }
  0x6c   :  { %v6688_v58 = vld [vmem:[%s11810_s0 + $0x6c4] ss:$8 sm:$0xf0]   ;;  %v6721_v51 = vld [vmem:[%s11810_s0 + $0x243] ss:$8 sm:$0xf]   ;;  %v1648_v53 = vsel %vm4_vm0, %v6716_v49, %v6715_v48 }
  0x6d   :  { %v6681_v59 = vld [vmem:[%s11810_s0 + $0x684] ss:$8 sm:$0xf]   ;;  %v1399_v60 = vsel %vm4_vm0, %v6688_v58, %v6687_v55  ;;  %v6722_v52 = vld [vmem:[%s11810_s0 + $0x243] ss:$8 sm:$0xf0]  }
  0x6e   :  { %v6682_v61 = vld [vmem:[%s11810_s0 + $0x684] ss:$8 sm:$0xf0]   ;;  %v1401_v63 = vsel %vm483_vm1, %v1399_v60, %v1393_v57  ;;  %v6719_v54 = vld [vmem:[%s11810_s0 + $0x203] ss:$8 sm:$0xf]   ;;  %v1699_v56 = vsel %vm4_vm0, %v6722_v52, %v6721_v51 }
  0x6f   :  { %v6683_v62 = vld [vmem:[%s11810_s0 + $0x684] ss:$8 sm:$0xf]   ;;  %v1359_v0 = vsel %vm4_vm0, %v6682_v61, %v6681_v59  ;;  %1402 = vrot.lane.b32.xlu1 %v1401_v63, %s7339_s24  ;;  %v6720_v55 = vld [vmem:[%s11810_s0 + $0x203] ss:$8 sm:$0xf0]  }
  0x70   :  { %v6684_v1 = vld [vmem:[%s11810_s0 + $0x684] ss:$8 sm:$0xf0]   ;;  %v6725_v57 = vld [vmem:[%s11810_s0 + $0x2c3] ss:$8 sm:$0xf]   ;;  %v1682_v59 = vsel %vm4_vm0, %v6720_v55, %v6719_v54 }
  0x71   :  { %v6693_v2 = vld [vmem:[%s11810_s0 + $0x744] ss:$8 sm:$0xf]   ;;  %v1365_v3 = vsel %vm4_vm0, %v6684_v1, %v6683_v62  ;;  %v6726_v58 = vld [vmem:[%s11810_s0 + $0x2c3] ss:$8 sm:$0xf0]  }
  0x72   :  { %v6694_v4 = vld [vmem:[%s11810_s0 + $0x744] ss:$8 sm:$0xf0]   ;;  %v1367_v6 = vsel %vm483_vm1, %v1365_v3, %v1359_v0  ;;  %v6723_v60 = vld [vmem:[%s11810_s0 + $0x283] ss:$8 sm:$0xf]   ;;  %v1733_v62 = vsel %vm4_vm0, %v6726_v58, %v6725_v57 }
  0x73   :  { %v6695_v5 = vld [vmem:[%s11810_s0 + $0x744] ss:$8 sm:$0xf]   ;;  %v1461_v7 = vsel %vm4_vm0, %v6694_v4, %v6693_v2  ;;  %1368 = vrot.lane.b32.xlu0 %v1367_v6, %s7339_s24  ;;  %v6724_v61 = vld [vmem:[%s11810_s0 + $0x283] ss:$8 sm:$0xf0]  }
  0x74   :  { %v6696_v8 = vld [vmem:[%s11810_s0 + $0x744] ss:$8 sm:$0xf0]   ;;  %v6729_v63 = vld [vmem:[%s11810_s0 + $0x343] ss:$8 sm:$0xf]   ;;  %v1716_v1 = vsel %vm4_vm0, %v6724_v61, %v6723_v60 }
  0x75   :  { %v6689_v9 = vld [vmem:[%s11810_s0 + $0x704] ss:$8 sm:$0xf]   ;;  %v1467_v10 = vsel %vm4_vm0, %v6696_v8, %v6695_v5  ;;  %v6730_v0 = vld [vmem:[%s11810_s0 + $0x343] ss:$8 sm:$0xf0]  }
  0x76   :  { %v6690_v11 = vld [vmem:[%s11810_s0 + $0x704] ss:$8 sm:$0xf0]   ;;  %v1469_v13 = vsel %vm483_vm1, %v1467_v10, %v1461_v7  ;;  %v6727_v2 = vld [vmem:[%s11810_s0 + $0x303] ss:$8 sm:$0xf]   ;;  %v1767_v4 = vsel %vm4_vm0, %v6730_v0, %v6729_v63 }
  0x77   :  { %v6691_v12 = vld [vmem:[%s11810_s0 + $0x704] ss:$8 sm:$0xf]   ;;  %v1427_v14 = vsel %vm4_vm0, %v6690_v11, %v6689_v9  ;;  %1470 = vrot.lane.b32.xlu1 %v1469_v13, %s7339_s24  ;;  %v6728_v3 = vld [vmem:[%s11810_s0 + $0x303] ss:$8 sm:$0xf0]  }
  0x78   :  { %v6692_v15 = vld [vmem:[%s11810_s0 + $0x704] ss:$8 sm:$0xf0]   ;;  %v6733_v5 = vld [vmem:[%s11810_s0 + $0x3c3] ss:$8 sm:$0xf]   ;;  %v1750_v7 = vsel %vm4_vm0, %v6728_v3, %v6727_v2 }
  0x79   :  { %v6701_v16 = vld [vmem:[%s11810_s0 + $0x7c4] ss:$8 sm:$0xf]   ;;  %v1433_v17 = vsel %vm4_vm0, %v6692_v15, %v6691_v12  ;;  %v6734_v6 = vld [vmem:[%s11810_s0 + $0x3c3] ss:$8 sm:$0xf0]  }
  0x7a   :  { %v6702_v18 = vld [vmem:[%s11810_s0 + $0x7c4] ss:$8 sm:$0xf]   ;;  %v1435_v20 = vsel %vm483_vm1, %v1433_v17, %v1427_v14  ;;  %v6731_v8 = vld [vmem:[%s11810_s0 + $0x383] ss:$8 sm:$0xf]   ;;  %v1801_v10 = vsel %vm4_vm0, %v6734_v6, %v6733_v5 }
  0x7b   :  { %v6697_v19 = vld [vmem:[%s11810_s0 + $0x784] ss:$8 sm:$0xf]   ;;  %v1529_v21 = vsel %vm483_vm1, %v6702_v18, %v6701_v16  ;;  %1436 = vrot.lane.b32.xlu0 %v1435_v20, %s7339_s24  ;;  %v6732_v9 = vld [vmem:[%s11810_s0 + $0x383] ss:$8 sm:$0xf0]  }
  0x7c   :  { %v6698_v22 = vld [vmem:[%s11810_s0 + $0x784] ss:$8 sm:$0xf0]   ;;  %1530 = vrot.lane.b32.xlu1 %v1529_v21, %s7339_s24  ;;  %v6737_v11 = vld [vmem:[%s11810_s0 + $0x443] ss:$8 sm:$0xf]   ;;  %v1784_v13 = vsel %vm4_vm0, %v6732_v9, %v6731_v8 }
  0x7d   :  { %v6699_v23 = vld [vmem:[%s11810_s0 + $0x784] ss:$8 sm:$0xf]   ;;  %v1495_v24 = vsel %vm4_vm0, %v6698_v22, %v6697_v19  ;;  %v6738_v12 = vld [vmem:[%s11810_s0 + $0x443] ss:$8 sm:$0xf0]   ;;  %v8093_v52 = vpop.permute.xlu0 %485  }
  0x7e   :  { %v6700_v25 = vld [vmem:[%s11810_s0 + $0x784] ss:$8 sm:$0xf0]   ;;  %v6735_v14 = vld [vmem:[%s11810_s0 + $0x403] ss:$8 sm:$0xf]   ;;  %v1835_v16 = vsel %vm4_vm0, %v6738_v12, %v6737_v11 }
  0x7f   :  { %v1501_v26 = vsel %vm4_vm0, %v6700_v25, %v6699_v23  ;;  %v6736_v15 = vld [vmem:[%s11810_s0 + $0x403] ss:$8 sm:$0xf0]   ;;  %v6516_v54 = vld [vmem:[%s11810_s0 + $0x40] ss:$8 sm:$0xf]  }
  0x80   :  { %v1503_v29 = vsel %vm483_vm1, %v1501_v26, %v1495_v24  ;;  %1564 = vrot.lane.b32.xlu1 %v1563_v32, %s7340_s17  ;;  %v6741_v17 = vld [vmem:[%s11810_s0 + $0x4c3] ss:$8 sm:$0xf]   ;;  %v1818_v19 = vsel %vm4_vm0, %v6736_v15, %v6735_v14  ;;  %v3_v60 = vld [vmem:[%s11810_s0] ss:$8 sm:$0xf0]  }
  0x81   :  { %1504 = vrot.lane.b32.xlu0 %v1503_v29, %s7339_s24  ;;  %v6742_v18 = vld [vmem:[%s11810_s0 + $0x4c3] ss:$8 sm:$0xf0]   ;;  %v6768_v3 = vld [vmem:[%s11810_s0 + $0x47] ss:$8 sm:$0xf]  }
  0x82   :  { %v6739_v20 = vld [vmem:[%s11810_s0 + $0x483] ss:$8 sm:$0xf]   ;;  %v1869_v22 = vsel %vm4_vm0, %v6742_v18, %v6741_v17  ;;  %v6520_v5 = vld [vmem:[%s11810_s0 + $0xc0] ss:$8 sm:$0xf]  }
  0x83   :  { %v6740_v21 = vld [vmem:[%s11810_s0 + $0x483] ss:$8 sm:$0xf0]   ;;  %v6521_v6 = vld [vmem:[%s11810_s0 + $0xc0] ss:$8 sm:$0xf0]  }
  0x84   :  { %1598 = vrot.lane.b32.xlu1 %v1597_v38, %s7340_s17  ;;  %v6745_v23 = vld [vmem:[%s11810_s0 + $0x543] ss:$8 sm:$0xf]   ;;  %v1852_v25 = vsel %vm4_vm0, %v6740_v21, %v6739_v20  ;;  %v49_v8 = vsel %vm4_vm0, %v6521_v6, %v6520_v5  ;;  %v6518_v9 = vld [vmem:[%s11810_s0 + $0x80] ss:$8 sm:$0xf]  }
  0x85   :  { %1548 = vrot.lane.b32.xlu0 %v1547_v35, %s7340_s17  ;;  %v6746_v24 = vld [vmem:[%s11810_s0 + $0x543] ss:$8 sm:$0xf0]   ;;  %v8131_v2 = vpop.permute.xlu0 %518   ;;  %v6766_v12 = vld [vmem:[%s11810_s0 + $0x7] ss:$8 sm:$0xf]  }
  0x86   :  { %v6743_v26 = vld [vmem:[%s11810_s0 + $0x503] ss:$8 sm:$0xf]   ;;  %v1903_v28 = vsel %vm4_vm0, %v6746_v24, %v6745_v23  ;;  %52 = vst.msk [vmem:[#allocation0 + $0xc0] sm:$0x3] %vm6_vm2, %v49_v8  }
  0x87   :  { %v6744_v27 = vld [vmem:[%s11810_s0 + $0x503] ss:$8 sm:$0xf0]   ;;  %54 = vst.msk [vmem:[#allocation0 + $0xce] sm:$0xc] %vm6_vm2, %v49_v8  }
  0x88   :  { %1632 = vrot.lane.b32.xlu1 %v1631_v44, %s7340_s17  ;;  %v6749_v29 = vld [vmem:[%s11810_s0 + $0x5c3] ss:$8 sm:$0xf]   ;;  %v1886_v31 = vsel %vm4_vm0, %v6744_v27, %v6743_v26  ;;  %56 = vst.msk [vmem:[#allocation0 + $0xdc] sm:$0x30] %vm6_vm2, %v49_v8  }
  0x89   :  { %1581 = vrot.lane.b32.xlu0 %v1580_v41, %s7340_s17  ;;  %v6750_v30 = vld [vmem:[%s11810_s0 + $0x5c3] ss:$8 sm:$0xf0]   ;;  %58 = vst.msk [vmem:[#allocation0 + $0xea] sm:$0xc0] %vm6_vm2, %v49_v8  }
  0x8a   :  { %v6747_v32 = vld [vmem:[%s11810_s0 + $0x583] ss:$8 sm:$0xf]   ;;  %v1937_v34 = vsel %vm4_vm0, %v6750_v30, %v6749_v29  ;;  %v6773_v17 = vld [vmem:[%s11810_s0 + $0xc7] ss:$8 sm:$0xf0]  }
  0x8b   :  { %v6748_v33 = vld [vmem:[%s11810_s0 + $0x583] ss:$8 sm:$0xf0]   ;;  %v6525_v20 = vld [vmem:[%s11810_s0 + $0x140] ss:$8 sm:$0xf0]  }
  0x8c   :  { %1666 = vrot.lane.b32.xlu1 %v1665_v50, %s7340_s17  ;;  %v6753_v35 = vld [vmem:[%s11810_s0 + $0x643] ss:$8 sm:$0xf]   ;;  %v1920_v37 = vsel %vm4_vm0, %v6748_v33, %v6747_v32  ;;  %v6522_v23 = vld [vmem:[%s11810_s0 + $0x100] ss:$8 sm:$0xf]  }
  0x8d   :  { %1615 = vrot.lane.b32.xlu0 %v1614_v47, %s7340_s17  ;;  %v6754_v36 = vld [vmem:[%s11810_s0 + $0x643] ss:$8 sm:$0xf0]   ;;  %v8081_v47 = vpop.permute.xlu1 %552   ;;  %v8188_v15 = vpop.permute.xlu0 %620   ;;  %v6523_v24 = vld [vmem:[%s11810_s0 + $0x100] ss:$8 sm:$0xf0]  }
  0x8e   :  { %v6751_v38 = vld [vmem:[%s11810_s0 + $0x603] ss:$8 sm:$0xf]   ;;  %v1971_v40 = vsel %vm4_vm0, %v6754_v36, %v6753_v35  ;;  %v6770_v26 = vld [vmem:[%s11810_s0 + $0x87] ss:$8 sm:$0xf]  }
  0x8f   :  { %v6752_v39 = vld [vmem:[%s11810_s0 + $0x603] ss:$8 sm:$0xf0]   ;;  %v6771_v27 = vld [vmem:[%s11810_s0 + $0x87] ss:$8 sm:$0xf0]  }
  0x90   :  { %1700 = vrot.lane.b32.xlu1 %v1699_v56, %s7340_s17  ;;  %v6757_v41 = vld [vmem:[%s11810_s0 + $0x6c3] ss:$8 sm:$0xf]   ;;  %v1954_v43 = vsel %vm4_vm0, %v6752_v39, %v6751_v38  ;;  %v6517_v56 = vld [vmem:[%s11810_s0 + $0x40] ss:$8 sm:$0xf0]   ;;  %v2116_v39 = vsel %vm4_vm0, %v6771_v27, %v6770_v26 }
  0x91   :  { %1649 = vrot.lane.b32.xlu0 %v1648_v53, %s7340_s17  ;;  %v6758_v42 = vld [vmem:[%s11810_s0 + $0x6c3] ss:$8 sm:$0xf0]   ;;  %v8107_v57 = vpop.permute.xlu1 %586   ;;  %v19_v58 = vsel %vm4_vm0, %v6517_v56, %v6516_v54  ;;  %v6776_v30 = vld [vmem:[%s11810_s0 + $0x147] ss:$8 sm:$0xf]  }
  0x92   :  { %v6755_v44 = vld [vmem:[%s11810_s0 + $0x683] ss:$8 sm:$0xf]   ;;  %v2005_v46 = vsel %vm4_vm0, %v6758_v42, %v6757_v41  ;;  %22 = vst.msk [vmem:[#allocation0 + $0x40] sm:$0x3] %vm6_vm2, %v19_v58  }
  0x93   :  { %v6756_v45 = vld [vmem:[%s11810_s0 + $0x683] ss:$8 sm:$0xf0]   ;;  %24 = vst.msk [vmem:[#allocation0 + $0x4e] sm:$0xc] %vm6_vm2, %v19_v58  }
  0x94   :  { %1734 = vrot.lane.b32.xlu1 %v1733_v62, %s7340_s17  ;;  %v6761_v48 = vld [vmem:[%s11810_s0 + $0x743] ss:$8 sm:$0xf]   ;;  %v1988_v50 = vsel %vm4_vm0, %v6756_v45, %v6755_v44  ;;  %26 = vst.msk [vmem:[#allocation0 + $0x5c] sm:$0x30] %vm6_vm2, %v19_v58  }
  0x95   :  { %1683 = vrot.lane.b32.xlu0 %v1682_v59, %s7340_s17  ;;  %v6762_v49 = vld [vmem:[%s11810_s0 + $0x743] ss:$8 sm:$0xf0]   ;;  %v2_v59 = vld [vmem:[%s11810_s0] ss:$8 sm:$0xf]   ;;  %v8246_v29 = vpop.permute.xlu0 %688  }
  0x96   :  { %v6759_v51 = vld [vmem:[%s11810_s0 + $0x703] ss:$8 sm:$0xf]   ;;  %v2039_v55 = vsel %vm4_vm0, %v6762_v49, %v6761_v48  ;;  %28 = vst.msk [vmem:[#allocation0 + $0x6a] sm:$0xc0] %vm6_vm2, %v19_v58  }
  0x97   :  { %v6760_v53 = vld [vmem:[%s11810_s0 + $0x703] ss:$8 sm:$0xf0]   ;;  %531 = vst.msk [vmem:[#allocation0 + $0x40] sm:$0x3] %vm496_vm3, %v8131_v2  }
  0x98   :  { %1768 = vrot.lane.b32.xlu1 %v1767_v4, %s7340_s17  ;;  %v2022_v61 = vsel %vm4_vm0, %v6760_v53, %v6759_v51  ;;  %v6765_v62 = vld [vmem:[%s11810_s0 + $0x7c3] ss:$8 sm:$0xf]   ;;  %v6769_v4 = vld [vmem:[%s11810_s0 + $0x47] ss:$8 sm:$0xf0]  }
  0x99   :  { %1717 = vrot.lane.b32.xlu0 %v1716_v1, %s7340_s17  ;;  %v6763_v63 = vld [vmem:[%s11810_s0 + $0x783] ss:$8 sm:$0xf]   ;;  %v5_v1 = vsel %vm4_vm0, %v3_v60, %v2_v59  ;;  %533 = vst.msk [vmem:[#allocation0 + $0x4e] sm:$0xc] %vm496_vm3, %v8131_v2   ;;  %v2099_v18 = vsel %vm4_vm0, %v6769_v4, %v6768_v3 }
  0x9a   :  { %v6764_v0 = vld [vmem:[%s11810_s0 + $0x783] ss:$8 sm:$0xf0]   ;;  %7 = vst.msk [vmem:[#allocation0] sm:$0x3] %vm6_vm2, %v5_v1  }
  0x9b   :  { %9 = vst.msk [vmem:[#allocation0 + $0xe] sm:$0xc] %vm6_vm2, %v5_v1   ;;  %11 = vst.msk [vmem:[#allocation0 + $0x1c] sm:$0x30] %vm6_vm2, %v5_v1   ;;  %v2056_v11 = vsel %vm4_vm0, %v6764_v0, %v6763_v63 }
  0x9c   :  { %1802 = vrot.lane.b32.xlu1 %v1801_v10, %s7340_s17  ;;  %13 = vst.msk [vmem:[#allocation0 + $0x2a] sm:$0xc0] %vm6_vm2, %v5_v1   ;;  %v6519_v10 = vld [vmem:[%s11810_s0 + $0x80] ss:$8 sm:$0xf0]  }
  0x9d   :  { %1751 = vrot.lane.b32.xlu0 %v1750_v7, %s7340_s17  ;;  %535 = vst.msk [vmem:[#allocation0 + $0x5c] sm:$0x30] %vm496_vm3, %v8131_v2   ;;  %537 = vst.msk [vmem:[#allocation0 + $0x6a] sm:$0xc0] %vm496_vm3, %v8131_v2   ;;  %v8167_v7 = vpop.permute.xlu1 %654   ;;  %v34_v14 = vsel %vm4_vm0, %v6519_v10, %v6518_v9 }
  0x9e   :  { %497 = vst.msk [vmem:[#allocation0] sm:$0x3] %vm496_vm3, %v8093_v52   ;;  %499 = vst.msk [vmem:[#allocation0 + $0xe] sm:$0xc] %vm496_vm3, %v8093_v52  }
  0x9f   :  { %501 = vst.msk [vmem:[#allocation0 + $0x1c] sm:$0x30] %vm496_vm3, %v8093_v52   ;;  %503 = vst.msk [vmem:[#allocation0 + $0x2a] sm:$0xc0] %vm496_vm3, %v8093_v52  }
  0xa0   :  { %1836 = vrot.lane.b32.xlu1 %v1835_v16, %s7340_s17  ;;  %v6772_v16 = vld [vmem:[%s11810_s0 + $0xc7] ss:$8 sm:$0xf]   ;;  %599 = vst.msk [vmem:[#allocation0 + $0xc0] sm:$0x3] %vm496_vm3, %v8107_v57  }
  0xa1   :  { %1785 = vrot.lane.b32.xlu0 %v1784_v13, %s7340_s17  ;;  %v6767_v13 = vld [vmem:[%s11810_s0 + $0x7] ss:$8 sm:$0xf0]   ;;  %601 = vst.msk [vmem:[#allocation0 + $0xce] sm:$0xc] %vm496_vm3, %v8107_v57   ;;  %v8225_v21 = vpop.permute.xlu1 %722   ;;  %v2133_v32 = vsel %vm4_vm0, %v6773_v17, %v6772_v16 }
  0xa2   :  { %603 = vst.msk [vmem:[#allocation0 + $0xdc] sm:$0x30] %vm496_vm3, %v8107_v57   ;;  %605 = vst.msk [vmem:[#allocation0 + $0xea] sm:$0xc0] %vm496_vm3, %v8107_v57  }
  0xa3   :  { %37 = vst.msk [vmem:[#allocation0 + $0x80] sm:$0x3] %vm6_vm2, %v34_v14   ;;  %39 = vst.msk [vmem:[#allocation0 + $0x8e] sm:$0xc] %vm6_vm2, %v34_v14  }
  0xa4   :  { %1870 = vrot.lane.b32.xlu1 %v1869_v22, %s7340_s17  ;;  %41 = vst.msk [vmem:[#allocation0 + $0x9c] sm:$0x30] %vm6_vm2, %v34_v14   ;;  %43 = vst.msk [vmem:[#allocation0 + $0xaa] sm:$0xc0] %vm6_vm2, %v34_v14  }
  0xa5   :  { %1819 = vrot.lane.b32.xlu0 %v1818_v19, %s7340_s17  ;;  %565 = vst.msk [vmem:[#allocation0 + $0x80] sm:$0x3] %vm496_vm3, %v8081_v47   ;;  %567 = vst.msk [vmem:[#allocation0 + $0x8e] sm:$0xc] %vm496_vm3, %v8081_v47   ;;  %v8283_v35 = vpop.permute.xlu1 %790  }
  0xa6   :  { %569 = vst.msk [vmem:[#allocation0 + $0x9c] sm:$0x30] %vm496_vm3, %v8081_v47   ;;  %571 = vst.msk [vmem:[#allocation0 + $0xaa] sm:$0xc0] %vm496_vm3, %v8081_v47  }
  0xa7   :  { %v6524_v19 = vld [vmem:[%s11810_s0 + $0x140] ss:$8 sm:$0xf]   ;;  %v6777_v36 = vld [vmem:[%s11810_s0 + $0x147] ss:$8 sm:$0xf0]  }
  0xa8   :  { %1904 = vrot.lane.b32.xlu1 %v1903_v28, %s7340_s17  ;;  %v79_v22 = vsel %vm4_vm0, %v6525_v20, %v6524_v19  ;;  %v64_v28 = vsel %vm4_vm0, %v6523_v24, %v6522_v23  ;;  %v6529_v33 = vld [vmem:[%s11810_s0 + $0x1c0] ss:$8 sm:$0xf0]   ;;  %v6775_v41 = vld [vmem:[%s11810_s0 + $0x107] ss:$8 sm:$0xf0]  }
  0xa9   :  { %1853 = vrot.lane.b32.xlu0 %v1852_v25, %s7340_s17  ;;  %v2082_v25 = vsel %vm4_vm0, %v6767_v13, %v6766_v12  ;;  %82 = vst.msk [vmem:[#allocation0 + $0x140] sm:$0x3] %vm6_vm2, %v79_v22   ;;  %84 = vst.msk [vmem:[#allocation0 + $0x14e] sm:$0xc] %vm6_vm2, %v79_v22  }
  0xaa   :  { %86 = vst.msk [vmem:[#allocation0 + $0x15c] sm:$0x30] %vm6_vm2, %v79_v22   ;;  %88 = vst.msk [vmem:[#allocation0 + $0x16a] sm:$0xc0] %vm6_vm2, %v79_v22  }
  0xab   :  { %667 = vst.msk [vmem:[#allocation0 + $0x140] sm:$0x3] %vm496_vm3, %v8167_v7   ;;  %669 = vst.msk [vmem:[#allocation0 + $0x14e] sm:$0xc] %vm496_vm3, %v8167_v7  }
  0xac   :  { %1938 = vrot.lane.b32.xlu1 %v1937_v34, %s7340_s17  ;;  %671 = vst.msk [vmem:[#allocation0 + $0x15c] sm:$0x30] %vm496_vm3, %v8167_v7   ;;  %673 = vst.msk [vmem:[#allocation0 + $0x16a] sm:$0xc0] %vm496_vm3, %v8167_v7  }
  0xad   :  { %1887 = vrot.lane.b32.xlu0 %v1886_v31, %s7340_s17  ;;  %67 = vst.msk [vmem:[#allocation0 + $0x100] sm:$0x3] %vm6_vm2, %v64_v28   ;;  %69 = vst.msk [vmem:[#allocation0 + $0x10e] sm:$0xc] %vm6_vm2, %v64_v28  }
  0xae   :  { %71 = vst.msk [vmem:[#allocation0 + $0x11c] sm:$0x30] %vm6_vm2, %v64_v28   ;;  %73 = vst.msk [vmem:[#allocation0 + $0x12a] sm:$0xc0] %vm6_vm2, %v64_v28  }
  0xaf   :  { %v6528_v31 = vld [vmem:[%s11810_s0 + $0x1c0] ss:$8 sm:$0xf]   ;;  %633 = vst.msk [vmem:[#allocation0 + $0x100] sm:$0x3] %vm496_vm3, %v8188_v15  }
  0xb0   :  { %1972 = vrot.lane.b32.xlu1 %v1971_v40, %s7340_s17  ;;  %635 = vst.msk [vmem:[#allocation0 + $0x10e] sm:$0xc] %vm496_vm3, %v8188_v15   ;;  %637 = vst.msk [vmem:[#allocation0 + $0x11c] sm:$0x30] %vm496_vm3, %v8188_v15  }
  0xb1   :  { %1921 = vrot.lane.b32.xlu0 %v1920_v37, %s7340_s17  ;;  %639 = vst.msk [vmem:[#allocation0 + $0x12a] sm:$0xc0] %vm496_vm3, %v8188_v15   ;;  %v6526_v34 = vld [vmem:[%s11810_s0 + $0x180] ss:$8 sm:$0xf]   ;;  %v109_v37 = vsel %vm4_vm0, %v6529_v33, %v6528_v31 }
  0xb2   :  { %v6527_v38 = vld [vmem:[%s11810_s0 + $0x180] ss:$8 sm:$0xf0]   ;;  %v6774_v40 = vld [vmem:[%s11810_s0 + $0x107] ss:$8 sm:$0xf]  }
  0xb3   :  { %112 = vst.msk [vmem:[#allocation0 + $0x1c0] sm:$0x3] %vm6_vm2, %v109_v37   ;;  %114 = vst.msk [vmem:[#allocation0 + $0x1ce] sm:$0xc] %vm6_vm2, %v109_v37   ;;  %v94_v42 = vsel %vm4_vm0, %v6527_v38, %v6526_v34 }
  0xb4   :  { %2006 = vrot.lane.b32.xlu1 %v2005_v46, %s7340_s17  ;;  %116 = vst.msk [vmem:[#allocation0 + $0x1dc] sm:$0x30] %vm6_vm2, %v109_v37   ;;  %118 = vst.msk [vmem:[#allocation0 + $0x1ea] sm:$0xc0] %vm6_vm2, %v109_v37   ;;  %v2167_v46 = vsel %vm4_vm0, %v6777_v36, %v6776_v30 }
  0xb5   :  { %1955 = vrot.lane.b32.xlu0 %v1954_v43, %s7340_s17  ;;  %v8304_v43 = vpop.permute.xlu0 %756   ;;  %v6780_v44 = vld [vmem:[%s11810_s0 + $0x1c7] ss:$8 sm:$0xf]   ;;  %735 = vst.msk [vmem:[#allocation0 + $0x1c0] sm:$0x3] %vm496_vm3, %v8225_v21  }
  0xb6   :  { %737 = vst.msk [vmem:[#allocation0 + $0x1ce] sm:$0xc] %vm496_vm3, %v8225_v21   ;;  %739 = vst.msk [vmem:[#allocation0 + $0x1dc] sm:$0x30] %vm496_vm3, %v8225_v21  }
  0xb7   :  { %741 = vst.msk [vmem:[#allocation0 + $0x1ea] sm:$0xc0] %vm496_vm3, %v8225_v21   ;;  %v6532_v45 = vld [vmem:[%s11810_s0 + $0x240] ss:$8 sm:$0xf]  }
  0xb8   :  { %2040 = vrot.lane.b32.xlu1 %v2039_v55, %s7340_s17  ;;  %97 = vst.msk [vmem:[#allocation0 + $0x180] sm:$0x3] %vm6_vm2, %v94_v42   ;;  %99 = vst.msk [vmem:[#allocation0 + $0x18e] sm:$0xc] %vm6_vm2, %v94_v42   ;;  %v2150_v55 = vsel %vm4_vm0, %v6775_v41, %v6774_v40 }
  0xb9   :  { %1989 = vrot.lane.b32.xlu0 %v1988_v50, %s7340_s17  ;;  %101 = vst.msk [vmem:[#allocation0 + $0x19c] sm:$0x30] %vm6_vm2, %v94_v42   ;;  %103 = vst.msk [vmem:[#allocation0 + $0x1aa] sm:$0xc0] %vm6_vm2, %v94_v42   ;;  %v8341_v50 = vpop.permute.xlu1 %858   ;;  %v8362_v60 = vpop.permute.xlu0 %824  }
  0xba   :  { %701 = vst.msk [vmem:[#allocation0 + $0x180] sm:$0x3] %vm496_vm3, %v8246_v29   ;;  %703 = vst.msk [vmem:[#allocation0 + $0x18e] sm:$0xc] %vm496_vm3, %v8246_v29  }
  0xbb   :  { %705 = vst.msk [vmem:[#allocation0 + $0x19c] sm:$0x30] %vm496_vm3, %v8246_v29   ;;  %707 = vst.msk [vmem:[#allocation0 + $0x1aa] sm:$0xc0] %vm496_vm3, %v8246_v29  }
  0xbc   :  { %2070 = vrot.lane.b32.xlu1 %v6765_v62, %s7340_s17  ;;  %v6533_v48 = vld [vmem:[%s11810_s0 + $0x240] ss:$8 sm:$0xf0]   ;;  %v6781_v51 = vld [vmem:[%s11810_s0 + $0x1c7] ss:$8 sm:$0xf0]  }
  0xbd   :  { %2023 = vrot.lane.b32.xlu0 %v2022_v61, %s7340_s17  ;;  %v6530_v49 = vld [vmem:[%s11810_s0 + $0x200] ss:$8 sm:$0xf]   ;;  %v139_v53 = vsel %vm4_vm0, %v6533_v48, %v6532_v45  ;;  %v6778_v56 = vld [vmem:[%s11810_s0 + $0x187] ss:$8 sm:$0xf]   ;;  %v2201_v63 = vsel %vm4_vm0, %v6781_v51, %v6780_v44  ;;  %v8399_v3 = vpop.permute.xlu1 %926   ;;  %v8420_v12 = vpop.permute.xlu0 %892  }
  0xbe   :  { %v6531_v54 = vld [vmem:[%s11810_s0 + $0x200] ss:$8 sm:$0xf0]   ;;  %v6779_v58 = vld [vmem:[%s11810_s0 + $0x187] ss:$8 sm:$0xf0]  }
  0xbf   :  { %142 = vst.msk [vmem:[#allocation0 + $0x240] sm:$0x3] %vm6_vm2, %v139_v53   ;;  %144 = vst.msk [vmem:[#allocation0 + $0x24e] sm:$0xc] %vm6_vm2, %v139_v53   ;;  %v124_v59 = vsel %vm4_vm0, %v6531_v54, %v6530_v49  ;;  %v2184_v8 = vsel %vm4_vm0, %v6779_v58, %v6778_v56 }
  0xc0   :  { %2100 = vrot.lane.b32.xlu1 %v2099_v18, %s7341_s3  ;;  %146 = vst.msk [vmem:[#allocation0 + $0x25c] sm:$0x30] %vm6_vm2, %v139_v53   ;;  %148 = vst.msk [vmem:[#allocation0 + $0x26a] sm:$0xc0] %vm6_vm2, %v139_v53  }
  0xc1   :  { %2057 = vrot.lane.b32.xlu0 %v2056_v11, %s7340_s17  ;;  %v6784_v61 = vld [vmem:[%s11810_s0 + $0x247] ss:$8 sm:$0xf]   ;;  %803 = vst.msk [vmem:[#allocation0 + $0x240] sm:$0x3] %vm496_vm3, %v8283_v35   ;;  %v8457_v19 = vpop.permute.xlu1 %994   ;;  %v8478_v28 = vpop.permute.xlu0 %960  }
  0xc2   :  { %805 = vst.msk [vmem:[#allocation0 + $0x24e] sm:$0xc] %vm496_vm3, %v8283_v35   ;;  %807 = vst.msk [vmem:[#allocation0 + $0x25c] sm:$0x30] %vm496_vm3, %v8283_v35  }
  0xc3   :  { %809 = vst.msk [vmem:[#allocation0 + $0x26a] sm:$0xc0] %vm496_vm3, %v8283_v35   ;;  %v6536_v62 = vld [vmem:[%s11810_s0 + $0x2c0] ss:$8 sm:$0xf]  }
  0xc4   :  { %2134 = vrot.lane.b32.xlu1 %v2133_v32, %s7341_s3  ;;  %127 = vst.msk [vmem:[#allocation0 + $0x200] sm:$0x3] %vm6_vm2, %v124_v59   ;;  %129 = vst.msk [vmem:[#allocation0 + $0x20e] sm:$0xc] %vm6_vm2, %v124_v59  }
  0xc5   :  { %2083 = vrot.lane.b32.xlu0 %v2082_v25, %s7341_s3  ;;  %131 = vst.msk [vmem:[#allocation0 + $0x21c] sm:$0x30] %vm6_vm2, %v124_v59   ;;  %133 = vst.msk [vmem:[#allocation0 + $0x22a] sm:$0xc0] %vm6_vm2, %v124_v59   ;;  %v8515_v36 = vpop.permute.xlu1 %1062   ;;  %v8536_v45 = vpop.permute.xlu0 %1028  }
  0xc6   :  { %769 = vst.msk [vmem:[#allocation0 + $0x200] sm:$0x3] %vm496_vm3, %v8304_v43   ;;  %771 = vst.msk [vmem:[#allocation0 + $0x20e] sm:$0xc] %vm496_vm3, %v8304_v43  }
  0xc7   :  { %773 = vst.msk [vmem:[#allocation0 + $0x21c] sm:$0x30] %vm496_vm3, %v8304_v43   ;;  %775 = vst.msk [vmem:[#allocation0 + $0x22a] sm:$0xc0] %vm496_vm3, %v8304_v43  }
  0xc8   :  { %2168 = vrot.lane.b32.xlu1 %v2167_v46, %s7341_s3  ;;  %v6537_v0 = vld [vmem:[%s11810_s0 + $0x2c0] ss:$8 sm:$0xf0]   ;;  %v6785_v4 = vld [vmem:[%s11810_s0 + $0x247] ss:$8 sm:$0xf0]  }
  0xc9   :  { %2117 = vrot.lane.b32.xlu0 %v2116_v39, %s7341_s3  ;;  %v6534_v1 = vld [vmem:[%s11810_s0 + $0x280] ss:$8 sm:$0xf]   ;;  %v169_v5 = vsel %vm4_vm0, %v6537_v0, %v6536_v62  ;;  %v6782_v9 = vld [vmem:[%s11810_s0 + $0x207] ss:$8 sm:$0xf]   ;;  %v2235_v16 = vsel %vm4_vm0, %v6785_v4, %v6784_v61  ;;  %v8573_v54 = vpop.permute.xlu1 %1130   ;;  %v8594_v0 = vpop.permute.xlu0 %1096  }
  0xca   :  { %v6535_v6 = vld [vmem:[%s11810_s0 + $0x280] ss:$8 sm:$0xf0]   ;;  %v6783_v10 = vld [vmem:[%s11810_s0 + $0x207] ss:$8 sm:$0xf0]  }
  0xcb   :  { %172 = vst.msk [vmem:[#allocation0 + $0x2c0] sm:$0x3] %vm6_vm2, %v169_v5   ;;  %174 = vst.msk [vmem:[#allocation0 + $0x2ce] sm:$0xc] %vm6_vm2, %v169_v5   ;;  %v154_v11 = vsel %vm4_vm0, %v6535_v6, %v6534_v1  ;;  %v2218_v24 = vsel %vm4_vm0, %v6783_v10, %v6782_v9 }
  0xcc   :  { %176 = vst.msk [vmem:[#allocation0 + $0x2dc] sm:$0x30] %vm6_vm2, %v169_v5   ;;  %178 = vst.msk [vmem:[#allocation0 + $0x2ea] sm:$0xc0] %vm6_vm2, %v169_v5   ;;  %2202 = vrot.lane.b32.xlu1 %v2201_v63, %s7341_s3 }
  0xcd   :  { %2151 = vrot.lane.b32.xlu0 %v2150_v55, %s7341_s3  ;;  %v6788_v13 = vld [vmem:[%s11810_s0 + $0x2c7] ss:$8 sm:$0xf]   ;;  %871 = vst.msk [vmem:[#allocation0 + $0x2c0] sm:$0x3] %vm496_vm3, %v8341_v50   ;;  %v8631_v9 = vpop.permute.xlu1 %1198  }
  0xce   :  { %873 = vst.msk [vmem:[#allocation0 + $0x2ce] sm:$0xc] %vm496_vm3, %v8341_v50   ;;  %875 = vst.msk [vmem:[#allocation0 + $0x2dc] sm:$0x30] %vm496_vm3, %v8341_v50  }
  0xcf   :  { %877 = vst.msk [vmem:[#allocation0 + $0x2ea] sm:$0xc0] %vm496_vm3, %v8341_v50   ;;  %v6540_v14 = vld [vmem:[%s11810_s0 + $0x340] ss:$8 sm:$0xf]  }
  0xd0   :  { %157 = vst.msk [vmem:[#allocation0 + $0x280] sm:$0x3] %vm6_vm2, %v154_v11   ;;  %159 = vst.msk [vmem:[#allocation0 + $0x28e] sm:$0xc] %vm6_vm2, %v154_v11   ;;  %2236 = vrot.lane.b32.xlu1 %v2235_v16, %s7341_s3 }
  0xd1   :  { %161 = vst.msk [vmem:[#allocation0 + $0x29c] sm:$0x30] %vm6_vm2, %v154_v11   ;;  %163 = vst.msk [vmem:[#allocation0 + $0x2aa] sm:$0xc0] %vm6_vm2, %v154_v11   ;;  %2185 = vrot.lane.b32.xlu0 %v2184_v8, %s7341_s3 }
  0xd2   :  { %837 = vst.msk [vmem:[#allocation0 + $0x280] sm:$0x3] %vm496_vm3, %v8362_v60   ;;  %839 = vst.msk [vmem:[#allocation0 + $0x28e] sm:$0xc] %vm496_vm3, %v8362_v60  }
  0xd3   :  { %841 = vst.msk [vmem:[#allocation0 + $0x29c] sm:$0x30] %vm496_vm3, %v8362_v60   ;;  %843 = vst.msk [vmem:[#allocation0 + $0x2aa] sm:$0xc0] %vm496_vm3, %v8362_v60  }
  0xd4   :  { %v6541_v17 = vld [vmem:[%s11810_s0 + $0x340] ss:$8 sm:$0xf0]   ;;  %v6789_v20 = vld [vmem:[%s11810_s0 + $0x2c7] ss:$8 sm:$0xf0]  }
  0xd5   :  { %v6538_v18 = vld [vmem:[%s11810_s0 + $0x300] ss:$8 sm:$0xf]   ;;  %v199_v22 = vsel %vm4_vm0, %v6541_v17, %v6540_v14  ;;  %v6786_v25 = vld [vmem:[%s11810_s0 + $0x287] ss:$8 sm:$0xf]   ;;  %v2269_v32 = vsel %vm4_vm0, %v6789_v20, %v6788_v13  ;;  %2219 = vrot.lane.b32.xlu0 %v2218_v24, %s7341_s3  ;;  %v8652_v20 = vpop.permute.xlu0 %1164  }
  0xd6   :  { %v6539_v23 = vld [vmem:[%s11810_s0 + $0x300] ss:$8 sm:$0xf0]   ;;  %v6787_v26 = vld [vmem:[%s11810_s0 + $0x287] ss:$8 sm:$0xf0]   ;;  %2270 = vrot.lane.b32.xlu1 %v2269_v32, %s7341_s3 }
  0xd7   :  { %202 = vst.msk [vmem:[#allocation0 + $0x340] sm:$0x3] %vm6_vm2, %v199_v22   ;;  %204 = vst.msk [vmem:[#allocation0 + $0x34e] sm:$0xc] %vm6_vm2, %v199_v22   ;;  %v184_v27 = vsel %vm4_vm0, %v6539_v23, %v6538_v18  ;;  %v2252_v40 = vsel %vm4_vm0, %v6787_v26, %v6786_v25 }
  0xd8   :  { %206 = vst.msk [vmem:[#allocation0 + $0x35c] sm:$0x30] %vm6_vm2, %v199_v22   ;;  %208 = vst.msk [vmem:[#allocation0 + $0x36a] sm:$0xc0] %vm6_vm2, %v199_v22  }
  0xd9   :  { %v6792_v30 = vld [vmem:[%s11810_s0 + $0x347] ss:$8 sm:$0xf]   ;;  %939 = vst.msk [vmem:[#allocation0 + $0x340] sm:$0x3] %vm496_vm3, %v8399_v3   ;;  %2253 = vrot.lane.b32.xlu0 %v2252_v40, %s7341_s3 }
  0xda   :  { %941 = vst.msk [vmem:[#allocation0 + $0x34e] sm:$0xc] %vm496_vm3, %v8399_v3   ;;  %943 = vst.msk [vmem:[#allocation0 + $0x35c] sm:$0x30] %vm496_vm3, %v8399_v3  }
  0xdb   :  { %945 = vst.msk [vmem:[#allocation0 + $0x36a] sm:$0xc0] %vm496_vm3, %v8399_v3   ;;  %v6544_v31 = vld [vmem:[%s11810_s0 + $0x3c0] ss:$8 sm:$0xf]  }
  0xdc   :  { %187 = vst.msk [vmem:[#allocation0 + $0x300] sm:$0x3] %vm6_vm2, %v184_v27   ;;  %189 = vst.msk [vmem:[#allocation0 + $0x30e] sm:$0xc] %vm6_vm2, %v184_v27  }
  0xdd   :  { %191 = vst.msk [vmem:[#allocation0 + $0x31c] sm:$0x30] %vm6_vm2, %v184_v27   ;;  %193 = vst.msk [vmem:[#allocation0 + $0x32a] sm:$0xc0] %vm6_vm2, %v184_v27   ;;  %v8689_v27 = vpop.permute.xlu1 %1266  }
  0xde   :  { %905 = vst.msk [vmem:[#allocation0 + $0x300] sm:$0x3] %vm496_vm3, %v8420_v12   ;;  %907 = vst.msk [vmem:[#allocation0 + $0x30e] sm:$0xc] %vm496_vm3, %v8420_v12  }
  0xdf   :  { %909 = vst.msk [vmem:[#allocation0 + $0x31c] sm:$0x30] %vm496_vm3, %v8420_v12   ;;  %911 = vst.msk [vmem:[#allocation0 + $0x32a] sm:$0xc0] %vm496_vm3, %v8420_v12  }
  0xe0   :  { %v6545_v33 = vld [vmem:[%s11810_s0 + $0x3c0] ss:$8 sm:$0xf0]   ;;  %v6793_v37 = vld [vmem:[%s11810_s0 + $0x347] ss:$8 sm:$0xf0]  }
  0xe1   :  { %v6542_v34 = vld [vmem:[%s11810_s0 + $0x380] ss:$8 sm:$0xf]   ;;  %v229_v38 = vsel %vm4_vm0, %v6545_v33, %v6544_v31  ;;  %v6790_v41 = vld [vmem:[%s11810_s0 + $0x307] ss:$8 sm:$0xf]   ;;  %v2303_v49 = vsel %vm4_vm0, %v6793_v37, %v6792_v30 }
  0xe2   :  { %v6543_v39 = vld [vmem:[%s11810_s0 + $0x380] ss:$8 sm:$0xf0]   ;;  %v6791_v42 = vld [vmem:[%s11810_s0 + $0x307] ss:$8 sm:$0xf0]   ;;  %2304 = vrot.lane.b32.xlu1 %v2303_v49, %s7341_s3 }
  0xe3   :  { %232 = vst.msk [vmem:[#allocation0 + $0x3c0] sm:$0x3] %vm6_vm2, %v229_v38   ;;  %234 = vst.msk [vmem:[#allocation0 + $0x3ce] sm:$0xc] %vm6_vm2, %v229_v38   ;;  %v214_v44 = vsel %vm4_vm0, %v6543_v39, %v6542_v34  ;;  %v2286_v59 = vsel %vm4_vm0, %v6791_v42, %v6790_v41  ;;  %v8710_v39 = vpop.permute.xlu0 %1232  }
  0xe4   :  { %236 = vst.msk [vmem:[#allocation0 + $0x3dc] sm:$0x30] %vm6_vm2, %v229_v38   ;;  %238 = vst.msk [vmem:[#allocation0 + $0x3ea] sm:$0xc0] %vm6_vm2, %v229_v38   ;;  %2287 = vrot.lane.b32.xlu0 %v2286_v59, %s7341_s3 }
  0xe5   :  { %v6796_v46 = vld [vmem:[%s11810_s0 + $0x3c7] ss:$8 sm:$0xf]   ;;  %1007 = vst.msk [vmem:[#allocation0 + $0x3c0] sm:$0x3] %vm496_vm3, %v8457_v19  }
  0xe6   :  { %1009 = vst.msk [vmem:[#allocation0 + $0x3ce] sm:$0xc] %vm496_vm3, %v8457_v19   ;;  %1011 = vst.msk [vmem:[#allocation0 + $0x3dc] sm:$0x30] %vm496_vm3, %v8457_v19  }
  0xe7   :  { %1013 = vst.msk [vmem:[#allocation0 + $0x3ea] sm:$0xc0] %vm496_vm3, %v8457_v19   ;;  %v6548_v48 = vld [vmem:[%s11810_s0 + $0x440] ss:$8 sm:$0xf]  }
  0xe8   :  { %217 = vst.msk [vmem:[#allocation0 + $0x380] sm:$0x3] %vm6_vm2, %v214_v44   ;;  %219 = vst.msk [vmem:[#allocation0 + $0x38e] sm:$0xc] %vm6_vm2, %v214_v44  }
  0xe9   :  { %221 = vst.msk [vmem:[#allocation0 + $0x39c] sm:$0x30] %vm6_vm2, %v214_v44   ;;  %223 = vst.msk [vmem:[#allocation0 + $0x3aa] sm:$0xc0] %vm6_vm2, %v214_v44  }
  0xea   :  { %973 = vst.msk [vmem:[#allocation0 + $0x380] sm:$0x3] %vm496_vm3, %v8478_v28   ;;  %975 = vst.msk [vmem:[#allocation0 + $0x38e] sm:$0xc] %vm496_vm3, %v8478_v28  }
  0xeb   :  { %977 = vst.msk [vmem:[#allocation0 + $0x39c] sm:$0x30] %vm496_vm3, %v8478_v28   ;;  %979 = vst.msk [vmem:[#allocation0 + $0x3aa] sm:$0xc0] %vm496_vm3, %v8478_v28  }
  0xec   :  { %v6549_v51 = vld [vmem:[%s11810_s0 + $0x440] ss:$8 sm:$0xf0]   ;;  %v6797_v55 = vld [vmem:[%s11810_s0 + $0x3c7] ss:$8 sm:$0xf0]  }
  0xed   :  { %v6546_v53 = vld [vmem:[%s11810_s0 + $0x400] ss:$8 sm:$0xf]   ;;  %v259_v56 = vsel %vm4_vm0, %v6549_v51, %v6548_v48  ;;  %v6794_v61 = vld [vmem:[%s11810_s0 + $0x387] ss:$8 sm:$0xf]   ;;  %v2337_v5 = vsel %vm4_vm0, %v6797_v55, %v6796_v46  ;;  %v8747_v48 = vpop.permute.xlu1 %1334  }
  0xee   :  { %v6547_v58 = vld [vmem:[%s11810_s0 + $0x400] ss:$8 sm:$0xf0]   ;;  %v6795_v62 = vld [vmem:[%s11810_s0 + $0x387] ss:$8 sm:$0xf0]   ;;  %2338 = vrot.lane.b32.xlu1 %v2337_v5, %s7341_s3 }
  0xef   :  { %262 = vst.msk [vmem:[#allocation0 + $0x440] sm:$0x3] %vm6_vm2, %v259_v56   ;;  %264 = vst.msk [vmem:[#allocation0 + $0x44e] sm:$0xc] %vm6_vm2, %v259_v56   ;;  %v244_v63 = vsel %vm4_vm0, %v6547_v58, %v6546_v53  ;;  %v2320_v14 = vsel %vm4_vm0, %v6795_v62, %v6794_v61  ;;  %v8768_v61 = vpop.permute.xlu0 %1300  }
  0xf0   :  { %266 = vst.msk [vmem:[#allocation0 + $0x45c] sm:$0x30] %vm6_vm2, %v259_v56   ;;  %268 = vst.msk [vmem:[#allocation0 + $0x46a] sm:$0xc0] %vm6_vm2, %v259_v56   ;;  %2321 = vrot.lane.b32.xlu0 %v2320_v14, %s7341_s3 }
  0xf1   :  { %v6800_v1 = vld [vmem:[%s11810_s0 + $0x447] ss:$8 sm:$0xf]   ;;  %1075 = vst.msk [vmem:[#allocation0 + $0x440] sm:$0x3] %vm496_vm3, %v8515_v36  }
  0xf2   :  { %1077 = vst.msk [vmem:[#allocation0 + $0x44e] sm:$0xc] %vm496_vm3, %v8515_v36   ;;  %1079 = vst.msk [vmem:[#allocation0 + $0x45c] sm:$0x30] %vm496_vm3, %v8515_v36  }
  0xf3   :  { %1081 = vst.msk [vmem:[#allocation0 + $0x46a] sm:$0xc0] %vm496_vm3, %v8515_v36   ;;  %v6552_v4 = vld [vmem:[%s11810_s0 + $0x4c0] ss:$8 sm:$0xf]  }
  0xf4   :  { %247 = vst.msk [vmem:[#allocation0 + $0x400] sm:$0x3] %vm6_vm2, %v244_v63   ;;  %249 = vst.msk [vmem:[#allocation0 + $0x40e] sm:$0xc] %vm6_vm2, %v244_v63  }
  0xf5   :  { %251 = vst.msk [vmem:[#allocation0 + $0x41c] sm:$0x30] %vm6_vm2, %v244_v63   ;;  %253 = vst.msk [vmem:[#allocation0 + $0x42a] sm:$0xc0] %vm6_vm2, %v244_v63  }
  0xf6   :  { %1041 = vst.msk [vmem:[#allocation0 + $0x400] sm:$0x3] %vm496_vm3, %v8536_v45   ;;  %1043 = vst.msk [vmem:[#allocation0 + $0x40e] sm:$0xc] %vm496_vm3, %v8536_v45  }
  0xf7   :  { %1045 = vst.msk [vmem:[#allocation0 + $0x41c] sm:$0x30] %vm496_vm3, %v8536_v45   ;;  %1047 = vst.msk [vmem:[#allocation0 + $0x42a] sm:$0xc0] %vm496_vm3, %v8536_v45  }
  0xf8   :  { %v6553_v6 = vld [vmem:[%s11810_s0 + $0x4c0] ss:$8 sm:$0xf0]   ;;  %v6801_v10 = vld [vmem:[%s11810_s0 + $0x447] ss:$8 sm:$0xf0]  }
  0xf9   :  { %v6550_v8 = vld [vmem:[%s11810_s0 + $0x480] ss:$8 sm:$0xf]   ;;  %v289_v11 = vsel %vm4_vm0, %v6553_v6, %v6552_v4  ;;  %v6798_v16 = vld [vmem:[%s11810_s0 + $0x407] ss:$8 sm:$0xf]   ;;  %v2371_v24 = vsel %vm4_vm0, %v6801_v10, %v6800_v1  ;;  %v8805_v6 = vpop.permute.xlu1 %1402  }
  0xfa   :  { %v6551_v13 = vld [vmem:[%s11810_s0 + $0x480] ss:$8 sm:$0xf0]   ;;  %v6799_v17 = vld [vmem:[%s11810_s0 + $0x407] ss:$8 sm:$0xf0]   ;;  %2372 = vrot.lane.b32.xlu1 %v2371_v24, %s7341_s3 }
  0xfb   :  { %292 = vst.msk [vmem:[#allocation0 + $0x4c0] sm:$0x3] %vm6_vm2, %v289_v11   ;;  %294 = vst.msk [vmem:[#allocation0 + $0x4ce] sm:$0xc] %vm6_vm2, %v289_v11   ;;  %v274_v18 = vsel %vm4_vm0, %v6551_v13, %v6550_v8  ;;  %v2354_v33 = vsel %vm4_vm0, %v6799_v17, %v6798_v16 }
  0xfc   :  { %296 = vst.msk [vmem:[#allocation0 + $0x4dc] sm:$0x30] %vm6_vm2, %v289_v11   ;;  %298 = vst.msk [vmem:[#allocation0 + $0x4ea] sm:$0xc0] %vm6_vm2, %v289_v11   ;;  %2355 = vrot.lane.b32.xlu0 %v2354_v33, %s7341_s3 }
  0xfd   :  { %v6804_v22 = vld [vmem:[%s11810_s0 + $0x4c7] ss:$8 sm:$0xf]   ;;  %1143 = vst.msk [vmem:[#allocation0 + $0x4c0] sm:$0x3] %vm496_vm3, %v8573_v54  }
  0xfe   :  { %1145 = vst.msk [vmem:[#allocation0 + $0x4ce] sm:$0xc] %vm496_vm3, %v8573_v54   ;;  %1147 = vst.msk [vmem:[#allocation0 + $0x4dc] sm:$0x30] %vm496_vm3, %v8573_v54  }
  0xff   :  { %1149 = vst.msk [vmem:[#allocation0 + $0x4ea] sm:$0xc0] %vm496_vm3, %v8573_v54   ;;  %v6556_v23 = vld [vmem:[%s11810_s0 + $0x540] ss:$8 sm:$0xf]  }
 0x100   :  { %277 = vst.msk [vmem:[#allocation0 + $0x480] sm:$0x3] %vm6_vm2, %v274_v18   ;;  %279 = vst.msk [vmem:[#allocation0 + $0x48e] sm:$0xc] %vm6_vm2, %v274_v18  }
 0x101   :  { %281 = vst.msk [vmem:[#allocation0 + $0x49c] sm:$0x30] %vm6_vm2, %v274_v18   ;;  %283 = vst.msk [vmem:[#allocation0 + $0x4aa] sm:$0xc0] %vm6_vm2, %v274_v18   ;;  %v8826_v18 = vpop.permute.xlu0 %1368  }
 0x102   :  { %1109 = vst.msk [vmem:[#allocation0 + $0x480] sm:$0x3] %vm496_vm3, %v8594_v0   ;;  %1111 = vst.msk [vmem:[#allocation0 + $0x48e] sm:$0xc] %vm496_vm3, %v8594_v0  }
 0x103   :  { %1113 = vst.msk [vmem:[#allocation0 + $0x49c] sm:$0x30] %vm496_vm3, %v8594_v0   ;;  %1115 = vst.msk [vmem:[#allocation0 + $0x4aa] sm:$0xc0] %vm496_vm3, %v8594_v0  }
 0x104   :  { %v6557_v25 = vld [vmem:[%s11810_s0 + $0x540] ss:$8 sm:$0xf0]   ;;  %v6805_v30 = vld [vmem:[%s11810_s0 + $0x4c7] ss:$8 sm:$0xf0]  }
 0x105   :  { %v6554_v26 = vld [vmem:[%s11810_s0 + $0x500] ss:$8 sm:$0xf]   ;;  %v319_v31 = vsel %vm4_vm0, %v6557_v25, %v6556_v23  ;;  %v6802_v34 = vld [vmem:[%s11810_s0 + $0x487] ss:$8 sm:$0xf]   ;;  %v2405_v42 = vsel %vm4_vm0, %v6805_v30, %v6804_v22  ;;  %v8863_v30 = vpop.permute.xlu1 %1470  }
 0x106   :  { %v6555_v32 = vld [vmem:[%s11810_s0 + $0x500] ss:$8 sm:$0xf0]   ;;  %v6803_v37 = vld [vmem:[%s11810_s0 + $0x487] ss:$8 sm:$0xf0]   ;;  %2406 = vrot.lane.b32.xlu1 %v2405_v42, %s7341_s3 }
 0x107   :  { %322 = vst.msk [vmem:[#allocation0 + $0x540] sm:$0x3] %vm6_vm2, %v319_v31   ;;  %324 = vst.msk [vmem:[#allocation0 + $0x54e] sm:$0xc] %vm6_vm2, %v319_v31   ;;  %v304_v38 = vsel %vm4_vm0, %v6555_v32, %v6554_v26  ;;  %v2388_v55 = vsel %vm4_vm0, %v6803_v37, %v6802_v34 }
 0x108   :  { %326 = vst.msk [vmem:[#allocation0 + $0x55c] sm:$0x30] %vm6_vm2, %v319_v31   ;;  %328 = vst.msk [vmem:[#allocation0 + $0x56a] sm:$0xc0] %vm6_vm2, %v319_v31   ;;  %2389 = vrot.lane.b32.xlu0 %v2388_v55, %s7341_s3 }
 0x109   :  { %v6808_v40 = vld [vmem:[%s11810_s0 + $0x547] ss:$8 sm:$0xf]   ;;  %1211 = vst.msk [vmem:[#allocation0 + $0x540] sm:$0x3] %vm496_vm3, %v8631_v9  }
 0x10a   :  { %1213 = vst.msk [vmem:[#allocation0 + $0x54e] sm:$0xc] %vm496_vm3, %v8631_v9   ;;  %1215 = vst.msk [vmem:[#allocation0 + $0x55c] sm:$0x30] %vm496_vm3, %v8631_v9  }
 0x10b   :  { %1217 = vst.msk [vmem:[#allocation0 + $0x56a] sm:$0xc0] %vm496_vm3, %v8631_v9   ;;  %v6560_v41 = vld [vmem:[%s11810_s0 + $0x5c0] ss:$8 sm:$0xf]  }
 0x10c   :  { %307 = vst.msk [vmem:[#allocation0 + $0x500] sm:$0x3] %vm6_vm2, %v304_v38   ;;  %309 = vst.msk [vmem:[#allocation0 + $0x50e] sm:$0xc] %vm6_vm2, %v304_v38  }
 0x10d   :  { %311 = vst.msk [vmem:[#allocation0 + $0x51c] sm:$0x30] %vm6_vm2, %v304_v38   ;;  %313 = vst.msk [vmem:[#allocation0 + $0x52a] sm:$0xc0] %vm6_vm2, %v304_v38  }
 0x10e   :  { %1177 = vst.msk [vmem:[#allocation0 + $0x500] sm:$0x3] %vm496_vm3, %v8652_v20   ;;  %1179 = vst.msk [vmem:[#allocation0 + $0x50e] sm:$0xc] %vm496_vm3, %v8652_v20  }
 0x10f   :  { %1181 = vst.msk [vmem:[#allocation0 + $0x51c] sm:$0x30] %vm496_vm3, %v8652_v20   ;;  %1183 = vst.msk [vmem:[#allocation0 + $0x52a] sm:$0xc0] %vm496_vm3, %v8652_v20  }
 0x110   :  { %v6561_v44 = vld [vmem:[%s11810_s0 + $0x5c0] ss:$8 sm:$0xf0]   ;;  %v6809_v49 = vld [vmem:[%s11810_s0 + $0x547] ss:$8 sm:$0xf0]  }
 0x111   :  { %v6558_v46 = vld [vmem:[%s11810_s0 + $0x580] ss:$8 sm:$0xf]   ;;  %v349_v51 = vsel %vm4_vm0, %v6561_v44, %v6560_v41  ;;  %v6806_v56 = vld [vmem:[%s11810_s0 + $0x507] ss:$8 sm:$0xf]   ;;  %v2439_v1 = vsel %vm4_vm0, %v6809_v49, %v6808_v40  ;;  %v8884_v41 = vpop.permute.xlu0 %1436  }
 0x112   :  { %v6559_v53 = vld [vmem:[%s11810_s0 + $0x580] ss:$8 sm:$0xf0]   ;;  %v6807_v58 = vld [vmem:[%s11810_s0 + $0x507] ss:$8 sm:$0xf0]   ;;  %2440 = vrot.lane.b32.xlu1 %v2439_v1, %s7341_s3 }
 0x113   :  { %352 = vst.msk [vmem:[#allocation0 + $0x5c0] sm:$0x3] %vm6_vm2, %v349_v51   ;;  %354 = vst.msk [vmem:[#allocation0 + $0x5ce] sm:$0xc] %vm6_vm2, %v349_v51   ;;  %v334_v59 = vsel %vm4_vm0, %v6559_v53, %v6558_v46  ;;  %v2422_v13 = vsel %vm4_vm0, %v6807_v58, %v6806_v56  ;;  %v8921_v53 = vpop.permute.xlu1 %1530  }
 0x114   :  { %356 = vst.msk [vmem:[#allocation0 + $0x5dc] sm:$0x30] %vm6_vm2, %v349_v51   ;;  %358 = vst.msk [vmem:[#allocation0 + $0x5ea] sm:$0xc0] %vm6_vm2, %v349_v51   ;;  %2423 = vrot.lane.b32.xlu0 %v2422_v13, %s7341_s3 }
 0x115   :  { %v6812_v62 = vld [vmem:[%s11810_s0 + $0x5c7] ss:$8 sm:$0xf]   ;;  %1279 = vst.msk [vmem:[#allocation0 + $0x5c0] sm:$0x3] %vm496_vm3, %v8689_v27   ;;  %v8939_v1 = vpop.permute.xlu0 %1504  }
 0x116   :  { %1281 = vst.msk [vmem:[#allocation0 + $0x5ce] sm:$0xc] %vm496_vm3, %v8689_v27   ;;  %1283 = vst.msk [vmem:[#allocation0 + $0x5dc] sm:$0x30] %vm496_vm3, %v8689_v27  }
 0x117   :  { %1285 = vst.msk [vmem:[#allocation0 + $0x5ea] sm:$0xc0] %vm496_vm3, %v8689_v27   ;;  %v6564_v63 = vld [vmem:[%s11810_s0 + $0x640] ss:$8 sm:$0xf]  }
 0x118   :  { %337 = vst.msk [vmem:[#allocation0 + $0x580] sm:$0x3] %vm6_vm2, %v334_v59   ;;  %339 = vst.msk [vmem:[#allocation0 + $0x58e] sm:$0xc] %vm6_vm2, %v334_v59  }
 0x119   :  { %341 = vst.msk [vmem:[#allocation0 + $0x59c] sm:$0x30] %vm6_vm2, %v334_v59   ;;  %343 = vst.msk [vmem:[#allocation0 + $0x5aa] sm:$0xc0] %vm6_vm2, %v334_v59  }
 0x11a   :  { %1245 = vst.msk [vmem:[#allocation0 + $0x580] sm:$0x3] %vm496_vm3, %v8710_v39   ;;  %1247 = vst.msk [vmem:[#allocation0 + $0x58e] sm:$0xc] %vm496_vm3, %v8710_v39  }
 0x11b   :  { %1249 = vst.msk [vmem:[#allocation0 + $0x59c] sm:$0x30] %vm496_vm3, %v8710_v39   ;;  %1251 = vst.msk [vmem:[#allocation0 + $0x5aa] sm:$0xc0] %vm496_vm3, %v8710_v39  }
 0x11c   :  { %v6565_v4 = vld [vmem:[%s11810_s0 + $0x640] ss:$8 sm:$0xf0]   ;;  %v6813_v8 = vld [vmem:[%s11810_s0 + $0x5c7] ss:$8 sm:$0xf0]  }
 0x11d   :  { %v6562_v5 = vld [vmem:[%s11810_s0 + $0x600] ss:$8 sm:$0xf]   ;;  %v379_v10 = vsel %vm4_vm0, %v6565_v4, %v6564_v63  ;;  %v6810_v14 = vld [vmem:[%s11810_s0 + $0x587] ss:$8 sm:$0xf]   ;;  %v2473_v24 = vsel %vm4_vm0, %v6813_v8, %v6812_v62 }
 0x11e   :  { %v6563_v11 = vld [vmem:[%s11810_s0 + $0x600] ss:$8 sm:$0xf0]   ;;  %v6811_v16 = vld [vmem:[%s11810_s0 + $0x587] ss:$8 sm:$0xf0]   ;;  %2474 = vrot.lane.b32.xlu1 %v2473_v24, %s7341_s3 }
 0x11f   :  { %382 = vst.msk [vmem:[#allocation0 + $0x640] sm:$0x3] %vm6_vm2, %v379_v10   ;;  %384 = vst.msk [vmem:[#allocation0 + $0x64e] sm:$0xc] %vm6_vm2, %v379_v10   ;;  %v364_v17 = vsel %vm4_vm0, %v6563_v11, %v6562_v5  ;;  %v2456_v34 = vsel %vm4_vm0, %v6811_v16, %v6810_v14  ;;  %v1549_v16 = vpop.permute.xlu0 %1548  }
 0x120   :  { %386 = vst.msk [vmem:[#allocation0 + $0x65c] sm:$0x30] %vm6_vm2, %v379_v10   ;;  %388 = vst.msk [vmem:[#allocation0 + $0x66a] sm:$0xc0] %vm6_vm2, %v379_v10   ;;  %2457 = vrot.lane.b32.xlu0 %v2456_v34, %s7341_s3  ;;  %v1565_v10 = vpop.permute.xlu1 %1564  }
 0x121   :  { %v6816_v22 = vld [vmem:[%s11810_s0 + $0x647] ss:$8 sm:$0xf]   ;;  %1347 = vst.msk [vmem:[#allocation0 + $0x640] sm:$0x3] %vm496_vm3, %v8747_v48  }
 0x122   :  { %1349 = vst.msk [vmem:[#allocation0 + $0x64e] sm:$0xc] %vm496_vm3, %v8747_v48   ;;  %1351 = vst.msk [vmem:[#allocation0 + $0x65c] sm:$0x30] %vm496_vm3, %v8747_v48  }
 0x123   :  { %1353 = vst.msk [vmem:[#allocation0 + $0x66a] sm:$0xc0] %vm496_vm3, %v8747_v48   ;;  %v6568_v23 = vld [vmem:[%s11810_s0 + $0x6c0] ss:$8 sm:$0xf]  }
 0x124   :  { %367 = vst.msk [vmem:[#allocation0 + $0x600] sm:$0x3] %vm6_vm2, %v364_v17   ;;  %369 = vst.msk [vmem:[#allocation0 + $0x60e] sm:$0xc] %vm6_vm2, %v364_v17   ;;  %v1599_v24 = vpop.permute.xlu1 %1598  }
 0x125   :  { %371 = vst.msk [vmem:[#allocation0 + $0x61c] sm:$0x30] %vm6_vm2, %v364_v17   ;;  %373 = vst.msk [vmem:[#allocation0 + $0x62a] sm:$0xc0] %vm6_vm2, %v364_v17  }
 0x126   :  { %1313 = vst.msk [vmem:[#allocation0 + $0x600] sm:$0x3] %vm496_vm3, %v8768_v61   ;;  %1315 = vst.msk [vmem:[#allocation0 + $0x60e] sm:$0xc] %vm496_vm3, %v8768_v61  }
 0x127   :  { %1317 = vst.msk [vmem:[#allocation0 + $0x61c] sm:$0x30] %vm496_vm3, %v8768_v61   ;;  %1319 = vst.msk [vmem:[#allocation0 + $0x62a] sm:$0xc0] %vm496_vm3, %v8768_v61  }
 0x128   :  { %v6569_v25 = vld [vmem:[%s11810_s0 + $0x6c0] ss:$8 sm:$0xf0]   ;;  %v6817_v31 = vld [vmem:[%s11810_s0 + $0x647] ss:$8 sm:$0xf0]  }
 0x129   :  { %v6566_v26 = vld [vmem:[%s11810_s0 + $0x680] ss:$8 sm:$0xf]   ;;  %v409_v32 = vsel %vm4_vm0, %v6569_v25, %v6568_v23  ;;  %v6814_v37 = vld [vmem:[%s11810_s0 + $0x607] ss:$8 sm:$0xf]   ;;  %v2507_v46 = vsel %vm4_vm0, %v6817_v31, %v6816_v22  ;;  %v1582_v31 = vpop.permute.xlu0 %1581  }
 0x12a   :  { %v6567_v33 = vld [vmem:[%s11810_s0 + $0x680] ss:$8 sm:$0xf0]   ;;  %v6815_v38 = vld [vmem:[%s11810_s0 + $0x607] ss:$8 sm:$0xf0]   ;;  %2508 = vrot.lane.b32.xlu1 %v2507_v46, %s7341_s3 }
 0x12b   :  { %412 = vst.msk [vmem:[#allocation0 + $0x6c0] sm:$0x3] %vm6_vm2, %v409_v32   ;;  %414 = vst.msk [vmem:[#allocation0 + $0x6ce] sm:$0xc] %vm6_vm2, %v409_v32   ;;  %v394_v40 = vsel %vm4_vm0, %v6567_v33, %v6566_v26  ;;  %v2490_v59 = vsel %vm4_vm0, %v6815_v38, %v6814_v37 }
 0x12c   :  { %416 = vst.msk [vmem:[#allocation0 + $0x6dc] sm:$0x30] %vm6_vm2, %v409_v32   ;;  %418 = vst.msk [vmem:[#allocation0 + $0x6ea] sm:$0xc0] %vm6_vm2, %v409_v32   ;;  %2491 = vrot.lane.b32.xlu0 %v2490_v59, %s7341_s3 }
 0x12d   :  { %v6820_v42 = vld [vmem:[%s11810_s0 + $0x6c7] ss:$8 sm:$0xf]   ;;  %1415 = vst.msk [vmem:[#allocation0 + $0x6c0] sm:$0x3] %vm496_vm3, %v8805_v6  }
 0x12e   :  { %1417 = vst.msk [vmem:[#allocation0 + $0x6ce] sm:$0xc] %vm496_vm3, %v8805_v6   ;;  %1419 = vst.msk [vmem:[#allocation0 + $0x6dc] sm:$0x30] %vm496_vm3, %v8805_v6  }
 0x12f   :  { %1421 = vst.msk [vmem:[#allocation0 + $0x6ea] sm:$0xc0] %vm496_vm3, %v8805_v6   ;;  %v6572_v44 = vld [vmem:[%s11810_s0 + $0x740] ss:$8 sm:$0xf]  }
 0x130   :  { %397 = vst.msk [vmem:[#allocation0 + $0x680] sm:$0x3] %vm6_vm2, %v394_v40   ;;  %399 = vst.msk [vmem:[#allocation0 + $0x68e] sm:$0xc] %vm6_vm2, %v394_v40  }
 0x131   :  { %401 = vst.msk [vmem:[#allocation0 + $0x69c] sm:$0x30] %vm6_vm2, %v394_v40   ;;  %403 = vst.msk [vmem:[#allocation0 + $0x6aa] sm:$0xc0] %vm6_vm2, %v394_v40  }
 0x132   :  { %1381 = vst.msk [vmem:[#allocation0 + $0x680] sm:$0x3] %vm496_vm3, %v8826_v18   ;;  %1383 = vst.msk [vmem:[#allocation0 + $0x68e] sm:$0xc] %vm496_vm3, %v8826_v18  }
 0x133   :  { %1385 = vst.msk [vmem:[#allocation0 + $0x69c] sm:$0x30] %vm496_vm3, %v8826_v18   ;;  %1387 = vst.msk [vmem:[#allocation0 + $0x6aa] sm:$0xc0] %vm496_vm3, %v8826_v18  }
 0x134   :  { %v6573_v49 = vld [vmem:[%s11810_s0 + $0x740] ss:$8 sm:$0xf0]   ;;  %v6821_v55 = vld [vmem:[%s11810_s0 + $0x6c7] ss:$8 sm:$0xf0]  }
 0x135   :  { %v6570_v51 = vld [vmem:[%s11810_s0 + $0x700] ss:$8 sm:$0xf]   ;;  %v439_v56 = vsel %vm4_vm0, %v6573_v49, %v6572_v44  ;;  %v6818_v62 = vld [vmem:[%s11810_s0 + $0x687] ss:$8 sm:$0xf]   ;;  %v2541_v8 = vsel %vm4_vm0, %v6821_v55, %v6820_v42 }
 0x136   :  { %v6571_v58 = vld [vmem:[%s11810_s0 + $0x700] ss:$8 sm:$0xf0]   ;;  %442 = vst.msk [vmem:[#allocation0 + $0x740] sm:$0x3] %vm6_vm2, %v439_v56   ;;  %2542 = vrot.lane.b32.xlu1 %v2541_v8, %s7341_s3 }
 0x137   :  { %444 = vst.msk [vmem:[#allocation0 + $0x74e] sm:$0xc] %vm6_vm2, %v439_v56   ;;  %446 = vst.msk [vmem:[#allocation0 + $0x75c] sm:$0x30] %vm6_vm2, %v439_v56   ;;  %v424_v63 = vsel %vm4_vm0, %v6571_v58, %v6570_v51 }
 0x138   :  { %448 = vst.msk [vmem:[#allocation0 + $0x76a] sm:$0xc0] %vm6_vm2, %v439_v56   ;;  %v6819_v4 = vld [vmem:[%s11810_s0 + $0x687] ss:$8 sm:$0xf0]  }
 0x139   :  { %1483 = vst.msk [vmem:[#allocation0 + $0x740] sm:$0x3] %vm496_vm3, %v8863_v30   ;;  %1485 = vst.msk [vmem:[#allocation0 + $0x74e] sm:$0xc] %vm496_vm3, %v8863_v30   ;;  %v2524_v14 = vsel %vm4_vm0, %v6819_v4, %v6818_v62 }
 0x13a   :  { %1487 = vst.msk [vmem:[#allocation0 + $0x75c] sm:$0x30] %vm496_vm3, %v8863_v30   ;;  %1489 = vst.msk [vmem:[#allocation0 + $0x76a] sm:$0xc0] %vm496_vm3, %v8863_v30   ;;  %2525 = vrot.lane.b32.xlu0 %v2524_v14, %s7341_s3 }
 0x13b   :  { %427 = vst.msk [vmem:[#allocation0 + $0x700] sm:$0x3] %vm6_vm2, %v424_v63   ;;  %429 = vst.msk [vmem:[#allocation0 + $0x70e] sm:$0xc] %vm6_vm2, %v424_v63  }
 0x13c   :  { %431 = vst.msk [vmem:[#allocation0 + $0x71c] sm:$0x30] %vm6_vm2, %v424_v63   ;;  %433 = vst.msk [vmem:[#allocation0 + $0x72a] sm:$0xc0] %vm6_vm2, %v424_v63  }
 0x13d   :  { %v6576_v5 = vld [vmem:[%s11810_s0 + $0x7c0] ss:$8 sm:$0xf]   ;;  %1449 = vst.msk [vmem:[#allocation0 + $0x700] sm:$0x3] %vm496_vm3, %v8884_v41  }
 0x13e   :  { %1451 = vst.msk [vmem:[#allocation0 + $0x70e] sm:$0xc] %vm496_vm3, %v8884_v41   ;;  %1453 = vst.msk [vmem:[#allocation0 + $0x71c] sm:$0x30] %vm496_vm3, %v8884_v41  }
 0x13f   :  { %1455 = vst.msk [vmem:[#allocation0 + $0x72a] sm:$0xc0] %vm496_vm3, %v8884_v41   ;;  %v6824_v11 = vld [vmem:[%s11810_s0 + $0x747] ss:$8 sm:$0xf]  }
 0x140   :  { %468 = vst.msk [vmem:[#allocation0 + $0x7c0] sm:$0x3] %vm6_vm2, %v6576_v5   ;;  %470 = vst.msk [vmem:[#allocation0 + $0x7ce] sm:$0xc] %vm6_vm2, %v6576_v5  }
 0x141   :  { %v6825_v13 = vld [vmem:[%s11810_s0 + $0x747] ss:$8 sm:$0xf0]   ;;  %1539 = vst.msk [vmem:[#allocation0 + $0x7c0] sm:$0x3] %vm496_vm3, %v8921_v53  }
 0x142   :  { %1541 = vst.msk [vmem:[#allocation0 + $0x7ce] sm:$0xc] %vm496_vm3, %v8921_v53   ;;  %v6822_v17 = vld [vmem:[%s11810_s0 + $0x707] ss:$8 sm:$0xf]   ;;  %v2575_v23 = vsel %vm4_vm0, %v6825_v13, %v6824_v11 }
 0x143   :  { %1568 = vst.msk [vmem:[#allocation0 + $0x40] sm:$0x3] %vm1550_vm4, %v1565_v10   ;;  %1570 = vst.msk [vmem:[#allocation0 + $0x4e] sm:$0xc] %vm1550_vm4, %v1565_v10   ;;  %2576 = vrot.lane.b32.xlu1 %v2575_v23, %s7341_s3 }
 0x144   :  { %1572 = vst.msk [vmem:[#allocation0 + $0x5c] sm:$0x30] %vm1550_vm4, %v1565_v10   ;;  %1574 = vst.msk [vmem:[#allocation0 + $0x6a] sm:$0xc0] %vm1550_vm4, %v1565_v10  }
 0x145   :  { %v6823_v22 = vld [vmem:[%s11810_s0 + $0x707] ss:$8 sm:$0xf0]   ;;  %1551 = vst.msk [vmem:[#allocation0] sm:$0x3] %vm1550_vm4, %v1549_v16  }
 0x146   :  { %1553 = vst.msk [vmem:[#allocation0 + $0xe] sm:$0xc] %vm1550_vm4, %v1549_v16   ;;  %1555 = vst.msk [vmem:[#allocation0 + $0x1c] sm:$0x30] %vm1550_vm4, %v1549_v16   ;;  %v9005_v25 = vsel %vm4_vm0, %v6823_v22, %v6822_v17 }
 0x147   :  { %1557 = vst.msk [vmem:[#allocation0 + $0x2a] sm:$0xc0] %vm1550_vm4, %v1549_v16   ;;  %1602 = vst.msk [vmem:[#allocation0 + $0xc0] sm:$0x3] %vm1550_vm4, %v1599_v24   ;;  %2559 = vrot.lane.b32.xlu0 %v9005_v25, %s7341_s3 }
 0x148   :  { %1604 = vst.msk [vmem:[#allocation0 + $0xce] sm:$0xc] %vm1550_vm4, %v1599_v24   ;;  %1606 = vst.msk [vmem:[#allocation0 + $0xdc] sm:$0x30] %vm1550_vm4, %v1599_v24  }
 0x149   :  { %1608 = vst.msk [vmem:[#allocation0 + $0xea] sm:$0xc0] %vm1550_vm4, %v1599_v24   ;;  %v9010_v26 = vld [vmem:[%s11810_s0 + $0x787] ss:$8 sm:$0xf]  }
 0x14a   :  { %v9016_v32 = vld [vmem:[%s11810_s0 + $0x787] ss:$8 sm:$0xf0]   ;;  %1585 = vst.msk [vmem:[#allocation0 + $0x80] sm:$0x3] %vm1550_vm4, %v1582_v31  }
 0x14b   :  { %1587 = vst.msk [vmem:[#allocation0 + $0x8e] sm:$0xc] %vm1550_vm4, %v1582_v31   ;;  %1589 = vst.msk [vmem:[#allocation0 + $0x9c] sm:$0x30] %vm1550_vm4, %v1582_v31  }
 0x14c   :  { %1591 = vst.msk [vmem:[#allocation0 + $0xaa] sm:$0xc0] %vm1550_vm4, %v1582_v31   ;;  %v9025_v33 = vld [vmem:[%s11810_s0 + $0x7c7] ss:$8 sm:$0xf]  }
 0x14d   :  { %1534 = vst.msk [vmem:[#allocation0 + $0x7c8] sm:$0x3] %vm487_vm5, %v8921_v53   ;;  %1536 = vst.msk [vmem:[#allocation0 + $0x7d6] sm:$0xc] %vm487_vm5, %v8921_v53   ;;  %2606 = vrot.lane.b32.xlu1 %v9025_v33, %s7341_s3 }
 0x14e   :  { %489 = vst.msk [vmem:[#allocation0 + $0x8] sm:$0x3] %vm487_vm5, %v8093_v52   ;;  %491 = vst.msk [vmem:[#allocation0 + $0x16] sm:$0xc] %vm487_vm5, %v8093_v52  }
 0x14f   :  { %493 = vst.msk [vmem:[#allocation0 + $0x24] sm:$0x30] %vm487_vm5, %v8093_v52   ;;  %495 = vst.msk [vmem:[#allocation0 + $0x32] sm:$0xc0] %vm487_vm5, %v8093_v52  }
 0x150   :  { %522 = vst.msk [vmem:[#allocation0 + $0x48] sm:$0x3] %vm487_vm5, %v8131_v2   ;;  %524 = vst.msk [vmem:[#allocation0 + $0x56] sm:$0xc] %vm487_vm5, %v8131_v2  }
 0x151   :  { %526 = vst.msk [vmem:[#allocation0 + $0x64] sm:$0x30] %vm487_vm5, %v8131_v2   ;;  %528 = vst.msk [vmem:[#allocation0 + $0x72] sm:$0xc0] %vm487_vm5, %v8131_v2   ;;  %v2592_v2 = vsel %vm4_vm0, %v9016_v32, %v9010_v26 }
 0x152   :  { %556 = vst.msk [vmem:[#allocation0 + $0x88] sm:$0x3] %vm487_vm5, %v8081_v47   ;;  %558 = vst.msk [vmem:[#allocation0 + $0x96] sm:$0xc] %vm487_vm5, %v8081_v47   ;;  %2593 = vrot.lane.b32.xlu0 %v2592_v2, %s7341_s3 }
 0x153   :  { %560 = vst.msk [vmem:[#allocation0 + $0xa4] sm:$0x30] %vm487_vm5, %v8081_v47   ;;  %562 = vst.msk [vmem:[#allocation0 + $0xb2] sm:$0xc0] %vm487_vm5, %v8081_v47   ;;  %v1633_v47 = vpop.permute.xlu1 %1632  }
 0x154   :  { %590 = vst.msk [vmem:[#allocation0 + $0xc8] sm:$0x3] %vm487_vm5, %v8107_v57   ;;  %592 = vst.msk [vmem:[#allocation0 + $0xd6] sm:$0xc] %vm487_vm5, %v8107_v57  }
 0x155   :  { %594 = vst.msk [vmem:[#allocation0 + $0xe4] sm:$0x30] %vm487_vm5, %v8107_v57   ;;  %596 = vst.msk [vmem:[#allocation0 + $0xf2] sm:$0xc0] %vm487_vm5, %v8107_v57  }
 0x156   :  { %624 = vst.msk [vmem:[#allocation0 + $0x108] sm:$0x3] %vm487_vm5, %v8188_v15   ;;  %626 = vst.msk [vmem:[#allocation0 + $0x116] sm:$0xc] %vm487_vm5, %v8188_v15  }
 0x157   :  { %628 = vst.msk [vmem:[#allocation0 + $0x124] sm:$0x30] %vm487_vm5, %v8188_v15   ;;  %630 = vst.msk [vmem:[#allocation0 + $0x132] sm:$0xc0] %vm487_vm5, %v8188_v15  }
 0x158   :  { %658 = vst.msk [vmem:[#allocation0 + $0x148] sm:$0x3] %vm487_vm5, %v8167_v7   ;;  %660 = vst.msk [vmem:[#allocation0 + $0x156] sm:$0xc] %vm487_vm5, %v8167_v7  }
 0x159   :  { %662 = vst.msk [vmem:[#allocation0 + $0x164] sm:$0x30] %vm487_vm5, %v8167_v7   ;;  %664 = vst.msk [vmem:[#allocation0 + $0x172] sm:$0xc0] %vm487_vm5, %v8167_v7   ;;  %v1616_v7 = vpop.permute.xlu0 %1615  }
 0x15a   :  { %692 = vst.msk [vmem:[#allocation0 + $0x188] sm:$0x3] %vm487_vm5, %v8246_v29   ;;  %694 = vst.msk [vmem:[#allocation0 + $0x196] sm:$0xc] %vm487_vm5, %v8246_v29  }
 0x15b   :  { %696 = vst.msk [vmem:[#allocation0 + $0x1a4] sm:$0x30] %vm487_vm5, %v8246_v29   ;;  %698 = vst.msk [vmem:[#allocation0 + $0x1b2] sm:$0xc0] %vm487_vm5, %v8246_v29  }
 0x15c   :  { %726 = vst.msk [vmem:[#allocation0 + $0x1c8] sm:$0x3] %vm487_vm5, %v8225_v21   ;;  %728 = vst.msk [vmem:[#allocation0 + $0x1d6] sm:$0xc] %vm487_vm5, %v8225_v21  }
 0x15d   :  { %730 = vst.msk [vmem:[#allocation0 + $0x1e4] sm:$0x30] %vm487_vm5, %v8225_v21   ;;  %732 = vst.msk [vmem:[#allocation0 + $0x1f2] sm:$0xc0] %vm487_vm5, %v8225_v21  }
 0x15e   :  { %760 = vst.msk [vmem:[#allocation0 + $0x208] sm:$0x3] %vm487_vm5, %v8304_v43   ;;  %762 = vst.msk [vmem:[#allocation0 + $0x216] sm:$0xc] %vm487_vm5, %v8304_v43  }
 0x15f   :  { %764 = vst.msk [vmem:[#allocation0 + $0x224] sm:$0x30] %vm487_vm5, %v8304_v43   ;;  %766 = vst.msk [vmem:[#allocation0 + $0x232] sm:$0xc0] %vm487_vm5, %v8304_v43  }
 0x160   :  { %794 = vst.msk [vmem:[#allocation0 + $0x248] sm:$0x3] %vm487_vm5, %v8283_v35   ;;  %796 = vst.msk [vmem:[#allocation0 + $0x256] sm:$0xc] %vm487_vm5, %v8283_v35  }
 0x161   :  { %798 = vst.msk [vmem:[#allocation0 + $0x264] sm:$0x30] %vm487_vm5, %v8283_v35   ;;  %800 = vst.msk [vmem:[#allocation0 + $0x272] sm:$0xc0] %vm487_vm5, %v8283_v35   ;;  %v1667_v35 = vpop.permute.xlu1 %1666  }
 0x162   :  { %828 = vst.msk [vmem:[#allocation0 + $0x288] sm:$0x3] %vm487_vm5, %v8362_v60   ;;  %830 = vst.msk [vmem:[#allocation0 + $0x296] sm:$0xc] %vm487_vm5, %v8362_v60  }
 0x163   :  { %832 = vst.msk [vmem:[#allocation0 + $0x2a4] sm:$0x30] %vm487_vm5, %v8362_v60   ;;  %834 = vst.msk [vmem:[#allocation0 + $0x2b2] sm:$0xc0] %vm487_vm5, %v8362_v60  }
 0x164   :  { %862 = vst.msk [vmem:[#allocation0 + $0x2c8] sm:$0x3] %vm487_vm5, %v8341_v50   ;;  %864 = vst.msk [vmem:[#allocation0 + $0x2d6] sm:$0xc] %vm487_vm5, %v8341_v50  }
 0x165   :  { %866 = vst.msk [vmem:[#allocation0 + $0x2e4] sm:$0x30] %vm487_vm5, %v8341_v50   ;;  %868 = vst.msk [vmem:[#allocation0 + $0x2f2] sm:$0xc0] %vm487_vm5, %v8341_v50  }
 0x166   :  { %896 = vst.msk [vmem:[#allocation0 + $0x308] sm:$0x3] %vm487_vm5, %v8420_v12   ;;  %898 = vst.msk [vmem:[#allocation0 + $0x316] sm:$0xc] %vm487_vm5, %v8420_v12  }
 0x167   :  { %900 = vst.msk [vmem:[#allocation0 + $0x324] sm:$0x30] %vm487_vm5, %v8420_v12   ;;  %902 = vst.msk [vmem:[#allocation0 + $0x332] sm:$0xc0] %vm487_vm5, %v8420_v12  }
 0x168   :  { %930 = vst.msk [vmem:[#allocation0 + $0x348] sm:$0x3] %vm487_vm5, %v8399_v3   ;;  %932 = vst.msk [vmem:[#allocation0 + $0x356] sm:$0xc] %vm487_vm5, %v8399_v3  }
 0x169   :  { %934 = vst.msk [vmem:[#allocation0 + $0x364] sm:$0x30] %vm487_vm5, %v8399_v3   ;;  %936 = vst.msk [vmem:[#allocation0 + $0x372] sm:$0xc0] %vm487_vm5, %v8399_v3   ;;  %v1650_v3 = vpop.permute.xlu0 %1649  }
 0x16a   :  { %964 = vst.msk [vmem:[#allocation0 + $0x388] sm:$0x3] %vm487_vm5, %v8478_v28   ;;  %966 = vst.msk [vmem:[#allocation0 + $0x396] sm:$0xc] %vm487_vm5, %v8478_v28  }
 0x16b   :  { %968 = vst.msk [vmem:[#allocation0 + $0x3a4] sm:$0x30] %vm487_vm5, %v8478_v28   ;;  %970 = vst.msk [vmem:[#allocation0 + $0x3b2] sm:$0xc0] %vm487_vm5, %v8478_v28  }
 0x16c   :  { %998 = vst.msk [vmem:[#allocation0 + $0x3c8] sm:$0x3] %vm487_vm5, %v8457_v19   ;;  %1000 = vst.msk [vmem:[#allocation0 + $0x3d6] sm:$0xc] %vm487_vm5, %v8457_v19  }
 0x16d   :  { %1002 = vst.msk [vmem:[#allocation0 + $0x3e4] sm:$0x30] %vm487_vm5, %v8457_v19   ;;  %1004 = vst.msk [vmem:[#allocation0 + $0x3f2] sm:$0xc0] %vm487_vm5, %v8457_v19  }
 0x16e   :  { %1032 = vst.msk [vmem:[#allocation0 + $0x408] sm:$0x3] %vm487_vm5, %v8536_v45   ;;  %1034 = vst.msk [vmem:[#allocation0 + $0x416] sm:$0xc] %vm487_vm5, %v8536_v45  }
 0x16f   :  { %1036 = vst.msk [vmem:[#allocation0 + $0x424] sm:$0x30] %vm487_vm5, %v8536_v45   ;;  %1038 = vst.msk [vmem:[#allocation0 + $0x432] sm:$0xc0] %vm487_vm5, %v8536_v45  }
 0x170   :  { %1066 = vst.msk [vmem:[#allocation0 + $0x448] sm:$0x3] %vm487_vm5, %v8515_v36   ;;  %1068 = vst.msk [vmem:[#allocation0 + $0x456] sm:$0xc] %vm487_vm5, %v8515_v36  }
 0x171   :  { %1070 = vst.msk [vmem:[#allocation0 + $0x464] sm:$0x30] %vm487_vm5, %v8515_v36   ;;  %1072 = vst.msk [vmem:[#allocation0 + $0x472] sm:$0xc0] %vm487_vm5, %v8515_v36   ;;  %v1701_v36 = vpop.permute.xlu1 %1700  }
 0x172   :  { %1100 = vst.msk [vmem:[#allocation0 + $0x488] sm:$0x3] %vm487_vm5, %v8594_v0   ;;  %1102 = vst.msk [vmem:[#allocation0 + $0x496] sm:$0xc] %vm487_vm5, %v8594_v0  }
 0x173   :  { %1104 = vst.msk [vmem:[#allocation0 + $0x4a4] sm:$0x30] %vm487_vm5, %v8594_v0   ;;  %1106 = vst.msk [vmem:[#allocation0 + $0x4b2] sm:$0xc0] %vm487_vm5, %v8594_v0  }
 0x174   :  { %1134 = vst.msk [vmem:[#allocation0 + $0x4c8] sm:$0x3] %vm487_vm5, %v8573_v54   ;;  %1136 = vst.msk [vmem:[#allocation0 + $0x4d6] sm:$0xc] %vm487_vm5, %v8573_v54  }
 0x175   :  { %1138 = vst.msk [vmem:[#allocation0 + $0x4e4] sm:$0x30] %vm487_vm5, %v8573_v54   ;;  %1140 = vst.msk [vmem:[#allocation0 + $0x4f2] sm:$0xc0] %vm487_vm5, %v8573_v54  }
 0x176   :  { %1168 = vst.msk [vmem:[#allocation0 + $0x508] sm:$0x3] %vm487_vm5, %v8652_v20   ;;  %1170 = vst.msk [vmem:[#allocation0 + $0x516] sm:$0xc] %vm487_vm5, %v8652_v20  }
 0x177   :  { %1172 = vst.msk [vmem:[#allocation0 + $0x524] sm:$0x30] %vm487_vm5, %v8652_v20   ;;  %1174 = vst.msk [vmem:[#allocation0 + $0x532] sm:$0xc0] %vm487_vm5, %v8652_v20  }
 0x178   :  { %1202 = vst.msk [vmem:[#allocation0 + $0x548] sm:$0x3] %vm487_vm5, %v8631_v9   ;;  %1204 = vst.msk [vmem:[#allocation0 + $0x556] sm:$0xc] %vm487_vm5, %v8631_v9  }
 0x179   :  { %1206 = vst.msk [vmem:[#allocation0 + $0x564] sm:$0x30] %vm487_vm5, %v8631_v9   ;;  %1208 = vst.msk [vmem:[#allocation0 + $0x572] sm:$0xc0] %vm487_vm5, %v8631_v9   ;;  %v1684_v9 = vpop.permute.xlu0 %1683  }
 0x17a   :  { %1236 = vst.msk [vmem:[#allocation0 + $0x588] sm:$0x3] %vm487_vm5, %v8710_v39   ;;  %1238 = vst.msk [vmem:[#allocation0 + $0x596] sm:$0xc] %vm487_vm5, %v8710_v39  }
 0x17b   :  { %1240 = vst.msk [vmem:[#allocation0 + $0x5a4] sm:$0x30] %vm487_vm5, %v8710_v39   ;;  %1242 = vst.msk [vmem:[#allocation0 + $0x5b2] sm:$0xc0] %vm487_vm5, %v8710_v39  }
 0x17c   :  { %1270 = vst.msk [vmem:[#allocation0 + $0x5c8] sm:$0x3] %vm487_vm5, %v8689_v27   ;;  %1272 = vst.msk [vmem:[#allocation0 + $0x5d6] sm:$0xc] %vm487_vm5, %v8689_v27  }
 0x17d   :  { %1274 = vst.msk [vmem:[#allocation0 + $0x5e4] sm:$0x30] %vm487_vm5, %v8689_v27   ;;  %1276 = vst.msk [vmem:[#allocation0 + $0x5f2] sm:$0xc0] %vm487_vm5, %v8689_v27  }
 0x17e   :  { %1304 = vst.msk [vmem:[#allocation0 + $0x608] sm:$0x3] %vm487_vm5, %v8768_v61   ;;  %1306 = vst.msk [vmem:[#allocation0 + $0x616] sm:$0xc] %vm487_vm5, %v8768_v61  }
 0x17f   :  { %1308 = vst.msk [vmem:[#allocation0 + $0x624] sm:$0x30] %vm487_vm5, %v8768_v61   ;;  %1310 = vst.msk [vmem:[#allocation0 + $0x632] sm:$0xc0] %vm487_vm5, %v8768_v61  }
 0x180   :  { %1338 = vst.msk [vmem:[#allocation0 + $0x648] sm:$0x3] %vm487_vm5, %v8747_v48   ;;  %1340 = vst.msk [vmem:[#allocation0 + $0x656] sm:$0xc] %vm487_vm5, %v8747_v48  }
 0x181   :  { %1342 = vst.msk [vmem:[#allocation0 + $0x664] sm:$0x30] %vm487_vm5, %v8747_v48   ;;  %1344 = vst.msk [vmem:[#allocation0 + $0x672] sm:$0xc0] %vm487_vm5, %v8747_v48   ;;  %v1735_v48 = vpop.permute.xlu1 %1734  }
 0x182   :  { %1372 = vst.msk [vmem:[#allocation0 + $0x688] sm:$0x3] %vm487_vm5, %v8826_v18   ;;  %1374 = vst.msk [vmem:[#allocation0 + $0x696] sm:$0xc] %vm487_vm5, %v8826_v18  }
 0x183   :  { %1376 = vst.msk [vmem:[#allocation0 + $0x6a4] sm:$0x30] %vm487_vm5, %v8826_v18   ;;  %1378 = vst.msk [vmem:[#allocation0 + $0x6b2] sm:$0xc0] %vm487_vm5, %v8826_v18  }
 0x184   :  { %1406 = vst.msk [vmem:[#allocation0 + $0x6c8] sm:$0x3] %vm487_vm5, %v8805_v6   ;;  %1408 = vst.msk [vmem:[#allocation0 + $0x6d6] sm:$0xc] %vm487_vm5, %v8805_v6  }
 0x185   :  { %1410 = vst.msk [vmem:[#allocation0 + $0x6e4] sm:$0x30] %vm487_vm5, %v8805_v6   ;;  %1412 = vst.msk [vmem:[#allocation0 + $0x6f2] sm:$0xc0] %vm487_vm5, %v8805_v6   ;;  %v1769_v40 = vpop.permute.xlu1 %1768  }
 0x186   :  { %1440 = vst.msk [vmem:[#allocation0 + $0x708] sm:$0x3] %vm487_vm5, %v8884_v41   ;;  %1442 = vst.msk [vmem:[#allocation0 + $0x716] sm:$0xc] %vm487_vm5, %v8884_v41  }
 0x187   :  { %1444 = vst.msk [vmem:[#allocation0 + $0x724] sm:$0x30] %vm487_vm5, %v8884_v41   ;;  %1446 = vst.msk [vmem:[#allocation0 + $0x732] sm:$0xc0] %vm487_vm5, %v8884_v41  }
 0x188   :  { %1474 = vst.msk [vmem:[#allocation0 + $0x748] sm:$0x3] %vm487_vm5, %v8863_v30   ;;  %1476 = vst.msk [vmem:[#allocation0 + $0x756] sm:$0xc] %vm487_vm5, %v8863_v30  }
 0x189   :  { %1478 = vst.msk [vmem:[#allocation0 + $0x764] sm:$0x30] %vm487_vm5, %v8863_v30   ;;  %1480 = vst.msk [vmem:[#allocation0 + $0x772] sm:$0xc0] %vm487_vm5, %v8863_v30   ;;  %v1718_v30 = vpop.permute.xlu0 %1717   ;;  %v1803_v55 = vpop.permute.xlu1 %1802  }
 0x18a   :  { %1508 = vst.msk [vmem:[#allocation0 + $0x788] sm:$0x3] %vm487_vm5, %v8939_v1   ;;  %1510 = vst.msk [vmem:[#allocation0 + $0x796] sm:$0xc] %vm487_vm5, %v8939_v1  }
 0x18b   :  { %1512 = vst.msk [vmem:[#allocation0 + $0x7a4] sm:$0x30] %vm487_vm5, %v8939_v1   ;;  %1514 = vst.msk [vmem:[#allocation0 + $0x7b2] sm:$0xc0] %vm487_vm5, %v8939_v1  }
 0x18c   :  { %v6831_v52 = vld [vmem:[%s11810_s0 + $0x42] ss:$8 sm:$0xf]   ;;  %1636 = vst.msk [vmem:[#allocation0 + $0x140] sm:$0x3] %vm1550_vm4, %v1633_v47  }
 0x18d   :  { %v6832_v57 = vld [vmem:[%s11810_s0 + $0x42] ss:$8 sm:$0xf0]   ;;  %1638 = vst.msk [vmem:[#allocation0 + $0x14e] sm:$0xc] %vm1550_vm4, %v1633_v47   ;;  %v1752_v46 = vpop.permute.xlu0 %1751   ;;  %v1837_v8 = vpop.permute.xlu1 %1836  }
 0x18e   :  { %1640 = vst.msk [vmem:[#allocation0 + $0x15c] sm:$0x30] %vm1550_vm4, %v1633_v47   ;;  %1642 = vst.msk [vmem:[#allocation0 + $0x16a] sm:$0xc0] %vm1550_vm4, %v1633_v47   ;;  %v2634_v29 = vsel %vm4_vm0, %v6832_v57, %v6831_v52 }
 0x18f   :  { %v6829_v15 = vld [vmem:[%s11810_s0 + $0x2] ss:$8 sm:$0xf]   ;;  %1619 = vst.msk [vmem:[#allocation0 + $0x100] sm:$0x3] %vm1550_vm4, %v1616_v7   ;;  %2635 = vrot.lane.b32.xlu1 %v2634_v29, %s7342_s27 }
 0x190   :  { %v6830_v21 = vld [vmem:[%s11810_s0 + $0x2] ss:$8 sm:$0xf0]   ;;  %1621 = vst.msk [vmem:[#allocation0 + $0x10e] sm:$0xc] %vm1550_vm4, %v1616_v7  }
 0x191   :  { %1623 = vst.msk [vmem:[#allocation0 + $0x11c] sm:$0x30] %vm1550_vm4, %v1616_v7   ;;  %1625 = vst.msk [vmem:[#allocation0 + $0x12a] sm:$0xc0] %vm1550_vm4, %v1616_v7   ;;  %v2618_v60 = vsel %vm4_vm0, %v6830_v21, %v6829_v15  ;;  %v1786_v62 = vpop.permute.xlu0 %1785   ;;  %v1871_v23 = vpop.permute.xlu1 %1870  }
 0x192   :  { %v6835_v43 = vld [vmem:[%s11810_s0 + $0xc2] ss:$8 sm:$0xf]   ;;  %1670 = vst.msk [vmem:[#allocation0 + $0x1c0] sm:$0x3] %vm1550_vm4, %v1667_v35   ;;  %2619 = vrot.lane.b32.xlu0 %v2618_v60, %s7342_s27 }
 0x193   :  { %v6836_v50 = vld [vmem:[%s11810_s0 + $0xc2] ss:$8 sm:$0xf0]   ;;  %1672 = vst.msk [vmem:[#allocation0 + $0x1ce] sm:$0xc] %vm1550_vm4, %v1667_v35  }
 0x194   :  { %1674 = vst.msk [vmem:[#allocation0 + $0x1dc] sm:$0x30] %vm1550_vm4, %v1667_v35   ;;  %1676 = vst.msk [vmem:[#allocation0 + $0x1ea] sm:$0xc0] %vm1550_vm4, %v1667_v35   ;;  %v2668_v28 = vsel %vm4_vm0, %v6836_v50, %v6835_v43 }
 0x195   :  { %v6833_v12 = vld [vmem:[%s11810_s0 + $0x82] ss:$8 sm:$0xf]   ;;  %1653 = vst.msk [vmem:[#allocation0 + $0x180] sm:$0x3] %vm1550_vm4, %v1650_v3   ;;  %2669 = vrot.lane.b32.xlu1 %v2668_v28, %s7342_s27  ;;  %v1820_v14 = vpop.permute.xlu0 %1819   ;;  %v1905_v52 = vpop.permute.xlu1 %1904  }
 0x196   :  { %v6834_v19 = vld [vmem:[%s11810_s0 + $0x82] ss:$8 sm:$0xf0]   ;;  %1655 = vst.msk [vmem:[#allocation0 + $0x18e] sm:$0xc] %vm1550_vm4, %v1650_v3  }
 0x197   :  { %1657 = vst.msk [vmem:[#allocation0 + $0x19c] sm:$0x30] %vm1550_vm4, %v1650_v3   ;;  %1659 = vst.msk [vmem:[#allocation0 + $0x1aa] sm:$0xc0] %vm1550_vm4, %v1650_v3   ;;  %v2651_v0 = vsel %vm4_vm0, %v6834_v19, %v6833_v12 }
 0x198   :  { %v6839_v45 = vld [vmem:[%s11810_s0 + $0x142] ss:$8 sm:$0xf]   ;;  %1704 = vst.msk [vmem:[#allocation0 + $0x240] sm:$0x3] %vm1550_vm4, %v1701_v36   ;;  %2652 = vrot.lane.b32.xlu0 %v2651_v0, %s7342_s27 }
 0x199   :  { %v6840_v54 = vld [vmem:[%s11810_s0 + $0x142] ss:$8 sm:$0xf0]   ;;  %1706 = vst.msk [vmem:[#allocation0 + $0x24e] sm:$0xc] %vm1550_vm4, %v1701_v36   ;;  %v1854_v31 = vpop.permute.xlu0 %1853   ;;  %v1939_v43 = vpop.permute.xlu1 %1938  }
 0x19a   :  { %1708 = vst.msk [vmem:[#allocation0 + $0x25c] sm:$0x30] %vm1550_vm4, %v1701_v36   ;;  %1710 = vst.msk [vmem:[#allocation0 + $0x26a] sm:$0xc0] %vm1550_vm4, %v1701_v36   ;;  %v2702_v39 = vsel %vm4_vm0, %v6840_v54, %v6839_v45 }
 0x19b   :  { %v6837_v20 = vld [vmem:[%s11810_s0 + $0x102] ss:$8 sm:$0xf]   ;;  %1687 = vst.msk [vmem:[#allocation0 + $0x200] sm:$0x3] %vm1550_vm4, %v1684_v9   ;;  %2703 = vrot.lane.b32.xlu1 %v2702_v39, %s7342_s27 }
 0x19c   :  { %v6838_v27 = vld [vmem:[%s11810_s0 + $0x102] ss:$8 sm:$0xf0]   ;;  %1689 = vst.msk [vmem:[#allocation0 + $0x20e] sm:$0xc] %vm1550_vm4, %v1684_v9  }
 0x19d   :  { %1691 = vst.msk [vmem:[#allocation0 + $0x21c] sm:$0x30] %vm1550_vm4, %v1684_v9   ;;  %1693 = vst.msk [vmem:[#allocation0 + $0x22a] sm:$0xc0] %vm1550_vm4, %v1684_v9   ;;  %v2685_v18 = vsel %vm4_vm0, %v6838_v27, %v6837_v20  ;;  %v1888_v15 = vpop.permute.xlu0 %1887   ;;  %v1973_v45 = vpop.permute.xlu1 %1972  }
 0x19e   :  { %v6843_v61 = vld [vmem:[%s11810_s0 + $0x1c2] ss:$8 sm:$0xf]   ;;  %1738 = vst.msk [vmem:[#allocation0 + $0x2c0] sm:$0x3] %vm1550_vm4, %v1735_v48   ;;  %2686 = vrot.lane.b32.xlu0 %v2685_v18, %s7342_s27 }
 0x19f   :  { %v6844_v6 = vld [vmem:[%s11810_s0 + $0x1c2] ss:$8 sm:$0xf0]   ;;  %1740 = vst.msk [vmem:[#allocation0 + $0x2ce] sm:$0xc] %vm1550_vm4, %v1735_v48  }
 0x1a0   :  { %1742 = vst.msk [vmem:[#allocation0 + $0x2dc] sm:$0x30] %vm1550_vm4, %v1735_v48   ;;  %1744 = vst.msk [vmem:[#allocation0 + $0x2ea] sm:$0xc0] %vm1550_vm4, %v1735_v48   ;;  %v2736_v38 = vsel %vm4_vm0, %v6844_v6, %v6843_v61 }
 0x1a1   :  { %v6841_v34 = vld [vmem:[%s11810_s0 + $0x182] ss:$8 sm:$0xf]   ;;  %1721 = vst.msk [vmem:[#allocation0 + $0x280] sm:$0x3] %vm1550_vm4, %v1718_v30   ;;  %2737 = vrot.lane.b32.xlu1 %v2736_v38, %s7342_s27  ;;  %v1922_v12 = vpop.permute.xlu0 %1921   ;;  %v2007_v61 = vpop.permute.xlu1 %2006  }
 0x1a2   :  { %v6842_v37 = vld [vmem:[%s11810_s0 + $0x182] ss:$8 sm:$0xf0]   ;;  %1723 = vst.msk [vmem:[#allocation0 + $0x28e] sm:$0xc] %vm1550_vm4, %v1718_v30  }
 0x1a3   :  { %1725 = vst.msk [vmem:[#allocation0 + $0x29c] sm:$0x30] %vm1550_vm4, %v1718_v30   ;;  %1727 = vst.msk [vmem:[#allocation0 + $0x2aa] sm:$0xc0] %vm1550_vm4, %v1718_v30   ;;  %v2719_v44 = vsel %vm4_vm0, %v6842_v37, %v6841_v34 }
 0x1a4   :  { %v6847_v41 = vld [vmem:[%s11810_s0 + $0x242] ss:$8 sm:$0xf]   ;;  %1772 = vst.msk [vmem:[#allocation0 + $0x340] sm:$0x3] %vm1550_vm4, %v1769_v40   ;;  %2720 = vrot.lane.b32.xlu0 %v2719_v44, %s7342_s27 }
 0x1a5   :  { %v6848_v42 = vld [vmem:[%s11810_s0 + $0x242] ss:$8 sm:$0xf0]   ;;  %1774 = vst.msk [vmem:[#allocation0 + $0x34e] sm:$0xc] %vm1550_vm4, %v1769_v40   ;;  %v1956_v20 = vpop.permute.xlu0 %1955  }
 0x1a6   :  { %1776 = vst.msk [vmem:[#allocation0 + $0x35c] sm:$0x30] %vm1550_vm4, %v1769_v40   ;;  %1778 = vst.msk [vmem:[#allocation0 + $0x36a] sm:$0xc0] %vm1550_vm4, %v1769_v40   ;;  %v2770_v53 = vsel %vm4_vm0, %v6848_v42, %v6847_v41  ;;  %v2041_v41 = vpop.permute.xlu1 %2040  }
 0x1a7   :  { %v6845_v49 = vld [vmem:[%s11810_s0 + $0x202] ss:$8 sm:$0xf]   ;;  %1755 = vst.msk [vmem:[#allocation0 + $0x300] sm:$0x3] %vm1550_vm4, %v1752_v46   ;;  %2771 = vrot.lane.b32.xlu1 %v2770_v53, %s7342_s27 }
 0x1a8   :  { %v6846_v51 = vld [vmem:[%s11810_s0 + $0x202] ss:$8 sm:$0xf0]   ;;  %1757 = vst.msk [vmem:[#allocation0 + $0x30e] sm:$0xc] %vm1550_vm4, %v1752_v46  }
 0x1a9   :  { %1759 = vst.msk [vmem:[#allocation0 + $0x31c] sm:$0x30] %vm1550_vm4, %v1752_v46   ;;  %1761 = vst.msk [vmem:[#allocation0 + $0x32a] sm:$0xc0] %vm1550_vm4, %v1752_v46   ;;  %v2753_v59 = vsel %vm4_vm0, %v6846_v51, %v6845_v49  ;;  %v1990_v34 = vpop.permute.xlu0 %1989  }
 0x1aa   :  { %v6851_v56 = vld [vmem:[%s11810_s0 + $0x2c2] ss:$8 sm:$0xf]   ;;  %1806 = vst.msk [vmem:[#allocation0 + $0x3c0] sm:$0x3] %vm1550_vm4, %v1803_v55   ;;  %2754 = vrot.lane.b32.xlu0 %v2753_v59, %s7342_s27 }
 0x1ab   :  { %v6852_v58 = vld [vmem:[%s11810_s0 + $0x2c2] ss:$8 sm:$0xf0]   ;;  %1808 = vst.msk [vmem:[#allocation0 + $0x3ce] sm:$0xc] %vm1550_vm4, %v1803_v55  }
 0x1ac   :  { %1810 = vst.msk [vmem:[#allocation0 + $0x3dc] sm:$0x30] %vm1550_vm4, %v1803_v55   ;;  %1812 = vst.msk [vmem:[#allocation0 + $0x3ea] sm:$0xc0] %vm1550_vm4, %v1803_v55   ;;  %v2804_v5 = vsel %vm4_vm0, %v6852_v58, %v6851_v56  ;;  %v2071_v56 = vpop.permute.xlu1 %2070  }
 0x1ad   :  { %v6849_v63 = vld [vmem:[%s11810_s0 + $0x282] ss:$8 sm:$0xf]   ;;  %1789 = vst.msk [vmem:[#allocation0 + $0x380] sm:$0x3] %vm1550_vm4, %v1786_v62   ;;  %2805 = vrot.lane.b32.xlu1 %v2804_v5, %s7342_s27  ;;  %v2024_v49 = vpop.permute.xlu0 %2023  }
 0x1ae   :  { %v6850_v4 = vld [vmem:[%s11810_s0 + $0x282] ss:$8 sm:$0xf0]   ;;  %1791 = vst.msk [vmem:[#allocation0 + $0x38e] sm:$0xc] %vm1550_vm4, %v1786_v62  }
 0x1af   :  { %1793 = vst.msk [vmem:[#allocation0 + $0x39c] sm:$0x30] %vm1550_vm4, %v1786_v62   ;;  %1795 = vst.msk [vmem:[#allocation0 + $0x3aa] sm:$0xc0] %vm1550_vm4, %v1786_v62   ;;  %v2787_v13 = vsel %vm4_vm0, %v6850_v4, %v6849_v63 }
 0x1b0   :  { %v6855_v10 = vld [vmem:[%s11810_s0 + $0x342] ss:$8 sm:$0xf]   ;;  %1840 = vst.msk [vmem:[#allocation0 + $0x440] sm:$0x3] %vm1550_vm4, %v1837_v8   ;;  %2788 = vrot.lane.b32.xlu0 %v2787_v13, %s7342_s27  ;;  %v2101_v13 = vpop.permute.xlu1 %2100  }
 0x1b1   :  { %v6856_v11 = vld [vmem:[%s11810_s0 + $0x342] ss:$8 sm:$0xf0]   ;;  %1842 = vst.msk [vmem:[#allocation0 + $0x44e] sm:$0xc] %vm1550_vm4, %v1837_v8   ;;  %v2058_v4 = vpop.permute.xlu0 %2057  }
 0x1b2   :  { %1844 = vst.msk [vmem:[#allocation0 + $0x45c] sm:$0x30] %vm1550_vm4, %v1837_v8   ;;  %1846 = vst.msk [vmem:[#allocation0 + $0x46a] sm:$0xc0] %vm1550_vm4, %v1837_v8   ;;  %v2838_v22 = vsel %vm4_vm0, %v6856_v11, %v6855_v10 }
 0x1b3   :  { %v6853_v16 = vld [vmem:[%s11810_s0 + $0x302] ss:$8 sm:$0xf]   ;;  %1823 = vst.msk [vmem:[#allocation0 + $0x400] sm:$0x3] %vm1550_vm4, %v1820_v14   ;;  %2839 = vrot.lane.b32.xlu1 %v2838_v22, %s7342_s27 }
 0x1b4   :  { %v6854_v17 = vld [vmem:[%s11810_s0 + $0x302] ss:$8 sm:$0xf0]   ;;  %1825 = vst.msk [vmem:[#allocation0 + $0x40e] sm:$0xc] %vm1550_vm4, %v1820_v14  }
 0x1b5   :  { %1827 = vst.msk [vmem:[#allocation0 + $0x41c] sm:$0x30] %vm1550_vm4, %v1820_v14   ;;  %1829 = vst.msk [vmem:[#allocation0 + $0x42a] sm:$0xc0] %vm1550_vm4, %v1820_v14   ;;  %v2821_v26 = vsel %vm4_vm0, %v6854_v17, %v6853_v16 }
 0x1b6   :  { %v6859_v24 = vld [vmem:[%s11810_s0 + $0x3c2] ss:$8 sm:$0xf]   ;;  %1874 = vst.msk [vmem:[#allocation0 + $0x4c0] sm:$0x3] %vm1550_vm4, %v1871_v23   ;;  %2822 = vrot.lane.b32.xlu0 %v2821_v26, %s7342_s27 }
 0x1b7   :  { %v6860_v25 = vld [vmem:[%s11810_s0 + $0x3c2] ss:$8 sm:$0xf0]   ;;  %1876 = vst.msk [vmem:[#allocation0 + $0x4ce] sm:$0xc] %vm1550_vm4, %v1871_v23  }
 0x1b8   :  { %1878 = vst.msk [vmem:[#allocation0 + $0x4dc] sm:$0x30] %vm1550_vm4, %v1871_v23   ;;  %1880 = vst.msk [vmem:[#allocation0 + $0x4ea] sm:$0xc0] %vm1550_vm4, %v1871_v23   ;;  %v2872_v47 = vsel %vm4_vm0, %v6860_v25, %v6859_v24  ;;  %v2084_v23 = vpop.permute.xlu0 %2083  }
 0x1b9   :  { %v6857_v32 = vld [vmem:[%s11810_s0 + $0x382] ss:$8 sm:$0xf]   ;;  %1857 = vst.msk [vmem:[#allocation0 + $0x480] sm:$0x3] %vm1550_vm4, %v1854_v31   ;;  %2873 = vrot.lane.b32.xlu1 %v2872_v47, %s7342_s27 }
 0x1ba   :  { %v6858_v33 = vld [vmem:[%s11810_s0 + $0x382] ss:$8 sm:$0xf0]   ;;  %1859 = vst.msk [vmem:[#allocation0 + $0x48e] sm:$0xc] %vm1550_vm4, %v1854_v31  }
 0x1bb   :  { %1861 = vst.msk [vmem:[#allocation0 + $0x49c] sm:$0x30] %vm1550_vm4, %v1854_v31   ;;  %1863 = vst.msk [vmem:[#allocation0 + $0x4aa] sm:$0xc0] %vm1550_vm4, %v1854_v31   ;;  %v2855_v7 = vsel %vm4_vm0, %v6858_v33, %v6857_v32 }
 0x1bc   :  { %v6863_v57 = vld [vmem:[%s11810_s0 + $0x442] ss:$8 sm:$0xf]   ;;  %1908 = vst.msk [vmem:[#allocation0 + $0x540] sm:$0x3] %vm1550_vm4, %v1905_v52   ;;  %2856 = vrot.lane.b32.xlu0 %v2855_v7, %s7342_s27  ;;  %v2118_v32 = vpop.permute.xlu0 %2117  }
 0x1bd   :  { %v6864_v2 = vld [vmem:[%s11810_s0 + $0x442] ss:$8 sm:$0xf0]   ;;  %1910 = vst.msk [vmem:[#allocation0 + $0x54e] sm:$0xc] %vm1550_vm4, %v1905_v52  }
 0x1be   :  { %1912 = vst.msk [vmem:[#allocation0 + $0x55c] sm:$0x30] %vm1550_vm4, %v1905_v52   ;;  %1914 = vst.msk [vmem:[#allocation0 + $0x56a] sm:$0xc0] %vm1550_vm4, %v1905_v52   ;;  %v2906_v35 = vsel %vm4_vm0, %v6864_v2, %v6863_v57 }
 0x1bf   :  { %v6861_v21 = vld [vmem:[%s11810_s0 + $0x402] ss:$8 sm:$0xf]   ;;  %1891 = vst.msk [vmem:[#allocation0 + $0x500] sm:$0x3] %vm1550_vm4, %v1888_v15   ;;  %2907 = vrot.lane.b32.xlu1 %v2906_v35, %s7342_s27 }
 0x1c0   :  { %v6862_v29 = vld [vmem:[%s11810_s0 + $0x402] ss:$8 sm:$0xf0]   ;;  %1893 = vst.msk [vmem:[#allocation0 + $0x50e] sm:$0xc] %vm1550_vm4, %v1888_v15  }
 0x1c1   :  { %1895 = vst.msk [vmem:[#allocation0 + $0x51c] sm:$0x30] %vm1550_vm4, %v1888_v15   ;;  %1897 = vst.msk [vmem:[#allocation0 + $0x52a] sm:$0xc0] %vm1550_vm4, %v1888_v15   ;;  %v2889_v3 = vsel %vm4_vm0, %v6862_v29, %v6861_v21  ;;  %v2152_v21 = vpop.permute.xlu0 %2151  }
 0x1c2   :  { %v6867_v50 = vld [vmem:[%s11810_s0 + $0x4c2] ss:$8 sm:$0xf]   ;;  %1942 = vst.msk [vmem:[#allocation0 + $0x5c0] sm:$0x3] %vm1550_vm4, %v1939_v43   ;;  %2890 = vrot.lane.b32.xlu0 %v2889_v3, %s7342_s27 }
 0x1c3   :  { %v6868_v60 = vld [vmem:[%s11810_s0 + $0x4c2] ss:$8 sm:$0xf0]   ;;  %1944 = vst.msk [vmem:[#allocation0 + $0x5ce] sm:$0xc] %vm1550_vm4, %v1939_v43  }
 0x1c4   :  { %1946 = vst.msk [vmem:[#allocation0 + $0x5dc] sm:$0x30] %vm1550_vm4, %v1939_v43   ;;  %1948 = vst.msk [vmem:[#allocation0 + $0x5ea] sm:$0xc0] %vm1550_vm4, %v1939_v43   ;;  %v2940_v36 = vsel %vm4_vm0, %v6868_v60, %v6867_v50 }
 0x1c5   :  { %v6865_v19 = vld [vmem:[%s11810_s0 + $0x482] ss:$8 sm:$0xf]   ;;  %1925 = vst.msk [vmem:[#allocation0 + $0x580] sm:$0x3] %vm1550_vm4, %v1922_v12   ;;  %2941 = vrot.lane.b32.xlu1 %v2940_v36, %s7342_s27 }
 0x1c6   :  { %v6866_v28 = vld [vmem:[%s11810_s0 + $0x482] ss:$8 sm:$0xf0]   ;;  %1927 = vst.msk [vmem:[#allocation0 + $0x58e] sm:$0xc] %vm1550_vm4, %v1922_v12  }
 0x1c7   :  { %1929 = vst.msk [vmem:[#allocation0 + $0x59c] sm:$0x30] %vm1550_vm4, %v1922_v12   ;;  %1931 = vst.msk [vmem:[#allocation0 + $0x5aa] sm:$0xc0] %vm1550_vm4, %v1922_v12   ;;  %v2923_v9 = vsel %vm4_vm0, %v6866_v28, %v6865_v19  ;;  %v2186_v19 = vpop.permute.xlu0 %2185  }
 0x1c8   :  { %v6871_v54 = vld [vmem:[%s11810_s0 + $0x542] ss:$8 sm:$0xf]   ;;  %1976 = vst.msk [vmem:[#allocation0 + $0x640] sm:$0x3] %vm1550_vm4, %v1973_v45   ;;  %2924 = vrot.lane.b32.xlu0 %v2923_v9, %s7342_s27 }
 0x1c9   :  { %v6872_v0 = vld [vmem:[%s11810_s0 + $0x542] ss:$8 sm:$0xf0]   ;;  %1978 = vst.msk [vmem:[#allocation0 + $0x64e] sm:$0xc] %vm1550_vm4, %v1973_v45  }
 0x1ca   :  { %1980 = vst.msk [vmem:[#allocation0 + $0x65c] sm:$0x30] %vm1550_vm4, %v1973_v45   ;;  %1982 = vst.msk [vmem:[#allocation0 + $0x66a] sm:$0xc0] %vm1550_vm4, %v1973_v45   ;;  %v2974_v48 = vsel %vm4_vm0, %v6872_v0, %v6871_v54 }
 0x1cb   :  { %v6869_v27 = vld [vmem:[%s11810_s0 + $0x502] ss:$8 sm:$0xf]   ;;  %1959 = vst.msk [vmem:[#allocation0 + $0x600] sm:$0x3] %vm1550_vm4, %v1956_v20   ;;  %2975 = vrot.lane.b32.xlu1 %v2974_v48, %s7342_s27 }
 0x1cc   :  { %v6870_v39 = vld [vmem:[%s11810_s0 + $0x502] ss:$8 sm:$0xf0]   ;;  %1961 = vst.msk [vmem:[#allocation0 + $0x60e] sm:$0xc] %vm1550_vm4, %v1956_v20  }
 0x1cd   :  { %1963 = vst.msk [vmem:[#allocation0 + $0x61c] sm:$0x30] %vm1550_vm4, %v1956_v20   ;;  %1965 = vst.msk [vmem:[#allocation0 + $0x62a] sm:$0xc0] %vm1550_vm4, %v1956_v20   ;;  %v2957_v30 = vsel %vm4_vm0, %v6870_v39, %v6869_v27  ;;  %v2220_v27 = vpop.permute.xlu0 %2219  }
 0x1ce   :  { %v6875_v6 = vld [vmem:[%s11810_s0 + $0x5c2] ss:$8 sm:$0xf]   ;;  %2010 = vst.msk [vmem:[#allocation0 + $0x6c0] sm:$0x3] %vm1550_vm4, %v2007_v61   ;;  %2958 = vrot.lane.b32.xlu0 %v2957_v30, %s7342_s27 }
 0x1cf   :  { %v6876_v18 = vld [vmem:[%s11810_s0 + $0x5c2] ss:$8 sm:$0xf0]   ;;  %2012 = vst.msk [vmem:[#allocation0 + $0x6ce] sm:$0xc] %vm1550_vm4, %v2007_v61  }
 0x1d0   :  { %2014 = vst.msk [vmem:[#allocation0 + $0x6dc] sm:$0x30] %vm1550_vm4, %v2007_v61   ;;  %2016 = vst.msk [vmem:[#allocation0 + $0x6ea] sm:$0xc0] %vm1550_vm4, %v2007_v61   ;;  %v3008_v40 = vsel %vm4_vm0, %v6876_v18, %v6875_v6 }
 0x1d1   :  { %v6873_v37 = vld [vmem:[%s11810_s0 + $0x582] ss:$8 sm:$0xf]   ;;  %1993 = vst.msk [vmem:[#allocation0 + $0x680] sm:$0x3] %vm1550_vm4, %v1990_v34   ;;  %3009 = vrot.lane.b32.xlu1 %v3008_v40, %s7342_s27 }
 0x1d2   :  { %v6874_v38 = vld [vmem:[%s11810_s0 + $0x582] ss:$8 sm:$0xf0]   ;;  %1995 = vst.msk [vmem:[#allocation0 + $0x68e] sm:$0xc] %vm1550_vm4, %v1990_v34  }
 0x1d3   :  { %1997 = vst.msk [vmem:[#allocation0 + $0x69c] sm:$0x30] %vm1550_vm4, %v1990_v34   ;;  %1999 = vst.msk [vmem:[#allocation0 + $0x6aa] sm:$0xc0] %vm1550_vm4, %v1990_v34   ;;  %v2991_v46 = vsel %vm4_vm0, %v6874_v38, %v6873_v37  ;;  %v2254_v37 = vpop.permute.xlu0 %2253  }
 0x1d4   :  { %v6879_v42 = vld [vmem:[%s11810_s0 + $0x642] ss:$8 sm:$0xf]   ;;  %2044 = vst.msk [vmem:[#allocation0 + $0x740] sm:$0x3] %vm1550_vm4, %v2041_v41   ;;  %2992 = vrot.lane.b32.xlu0 %v2991_v46, %s7342_s27 }
 0x1d5   :  { %v6880_v44 = vld [vmem:[%s11810_s0 + $0x642] ss:$8 sm:$0xf0]   ;;  %2046 = vst.msk [vmem:[#allocation0 + $0x74e] sm:$0xc] %vm1550_vm4, %v2041_v41  }
 0x1d6   :  { %2048 = vst.msk [vmem:[#allocation0 + $0x75c] sm:$0x30] %vm1550_vm4, %v2041_v41   ;;  %2050 = vst.msk [vmem:[#allocation0 + $0x76a] sm:$0xc0] %vm1550_vm4, %v2041_v41   ;;  %v3042_v55 = vsel %vm4_vm0, %v6880_v44, %v6879_v42 }
 0x1d7   :  { %v6877_v51 = vld [vmem:[%s11810_s0 + $0x602] ss:$8 sm:$0xf]   ;;  %2027 = vst.msk [vmem:[#allocation0 + $0x700] sm:$0x3] %vm1550_vm4, %v2024_v49   ;;  %3043 = vrot.lane.b32.xlu1 %v3042_v55, %s7342_s27 }
 0x1d8   :  { %v6878_v53 = vld [vmem:[%s11810_s0 + $0x602] ss:$8 sm:$0xf0]   ;;  %2029 = vst.msk [vmem:[#allocation0 + $0x70e] sm:$0xc] %vm1550_vm4, %v2024_v49  }
 0x1d9   :  { %2031 = vst.msk [vmem:[#allocation0 + $0x71c] sm:$0x30] %vm1550_vm4, %v2024_v49   ;;  %2033 = vst.msk [vmem:[#allocation0 + $0x72a] sm:$0xc0] %vm1550_vm4, %v2024_v49   ;;  %v3025_v62 = vsel %vm4_vm0, %v6878_v53, %v6877_v51  ;;  %v2288_v51 = vpop.permute.xlu0 %2287  }
 0x1da   :  { %v6883_v58 = vld [vmem:[%s11810_s0 + $0x6c2] ss:$8 sm:$0xf]   ;;  %2074 = vst.msk [vmem:[#allocation0 + $0x7c0] sm:$0x3] %vm1550_vm4, %v2071_v56   ;;  %3026 = vrot.lane.b32.xlu0 %v3025_v62, %s7342_s27 }
 0x1db   :  { %v6884_v59 = vld [vmem:[%s11810_s0 + $0x6c2] ss:$8 sm:$0xf0]   ;;  %2076 = vst.msk [vmem:[#allocation0 + $0x7ce] sm:$0xc] %vm1550_vm4, %v2071_v56  }
 0x1dc   :  { %v6881_v63 = vld [vmem:[%s11810_s0 + $0x682] ss:$8 sm:$0xf]   ;;  %v3076_v8 = vsel %vm4_vm0, %v6884_v59, %v6883_v58  ;;  %v6574_v11 = vld [vmem:[%s11810_s0 + $0x780] ss:$8 sm:$0xf]  }
 0x1dd   :  { %v6882_v5 = vld [vmem:[%s11810_s0 + $0x682] ss:$8 sm:$0xf0]   ;;  %v6575_v16 = vld [vmem:[%s11810_s0 + $0x780] ss:$8 sm:$0xf0]   ;;  %3077 = vrot.lane.b32.xlu1 %v3076_v8, %s7342_s27 }
 0x1de   :  { %v6887_v10 = vld [vmem:[%s11810_s0 + $0x742] ss:$8 sm:$0xf]   ;;  %v3059_v17 = vsel %vm4_vm0, %v6882_v5, %v6881_v63  ;;  %2104 = vst.msk [vmem:[#allocation0 + $0x48] sm:$0x3] %vm2085_vm6, %v2101_v13   ;;  %v454_v22 = vsel %vm4_vm0, %v6575_v16, %v6574_v11 }
 0x1df   :  { %v6888_v14 = vld [vmem:[%s11810_s0 + $0x742] ss:$8 sm:$0xf0]   ;;  %2106 = vst.msk [vmem:[#allocation0 + $0x56] sm:$0xc] %vm2085_vm6, %v2101_v13   ;;  %3060 = vrot.lane.b32.xlu0 %v3059_v17, %s7342_s27 }
 0x1e0   :  { %2108 = vst.msk [vmem:[#allocation0 + $0x64] sm:$0x30] %vm2085_vm6, %v2101_v13   ;;  %2110 = vst.msk [vmem:[#allocation0 + $0x72] sm:$0xc0] %vm2085_vm6, %v2101_v13   ;;  %v3110_v26 = vsel %vm4_vm0, %v6888_v14, %v6887_v10 }
 0x1e1   :  { %v6885_v24 = vld [vmem:[%s11810_s0 + $0x702] ss:$8 sm:$0xf]   ;;  %457 = vst.msk [vmem:[#allocation0 + $0x780] sm:$0x3] %vm6_vm2, %v454_v22   ;;  %3111 = vrot.lane.b32.xlu1 %v3110_v26, %s7342_s27 }
 0x1e2   :  { %v6886_v25 = vld [vmem:[%s11810_s0 + $0x702] ss:$8 sm:$0xf0]   ;;  %459 = vst.msk [vmem:[#allocation0 + $0x78e] sm:$0xc] %vm6_vm2, %v454_v22  }
 0x1e3   :  { %461 = vst.msk [vmem:[#allocation0 + $0x79c] sm:$0x30] %vm6_vm2, %v454_v22   ;;  %463 = vst.msk [vmem:[#allocation0 + $0x7aa] sm:$0xc0] %vm6_vm2, %v454_v22   ;;  %v3093_v31 = vsel %vm4_vm0, %v6886_v25, %v6885_v24 }
 0x1e4   :  { %2087 = vst.msk [vmem:[#allocation0 + $0x8] sm:$0x3] %vm2085_vm6, %v2084_v23   ;;  %2089 = vst.msk [vmem:[#allocation0 + $0x16] sm:$0xc] %vm2085_vm6, %v2084_v23   ;;  %3094 = vrot.lane.b32.xlu0 %v3093_v31, %s7342_s27 }
 0x1e5   :  { %2091 = vst.msk [vmem:[#allocation0 + $0x24] sm:$0x30] %vm2085_vm6, %v2084_v23   ;;  %2093 = vst.msk [vmem:[#allocation0 + $0x32] sm:$0xc0] %vm2085_vm6, %v2084_v23  }
 0x1e6   :  { %1517 = vst.msk [vmem:[#allocation0 + $0x780] sm:$0x3] %vm496_vm3, %v8939_v1   ;;  %1519 = vst.msk [vmem:[#allocation0 + $0x78e] sm:$0xc] %vm496_vm3, %v8939_v1  }
 0x1e7   :  { %1521 = vst.msk [vmem:[#allocation0 + $0x79c] sm:$0x30] %vm496_vm3, %v8939_v1   ;;  %1523 = vst.msk [vmem:[#allocation0 + $0x7aa] sm:$0xc0] %vm496_vm3, %v8939_v1   ;;  %v2135_v1 = vpop.permute.xlu1 %2134  }
 0x1e8   :  { %2061 = vst.msk [vmem:[#allocation0 + $0x780] sm:$0x3] %vm1550_vm4, %v2058_v4   ;;  %2063 = vst.msk [vmem:[#allocation0 + $0x78e] sm:$0xc] %vm1550_vm4, %v2058_v4  }
 0x1e9   :  { %2065 = vst.msk [vmem:[#allocation0 + $0x79c] sm:$0x30] %vm1550_vm4, %v2058_v4   ;;  %2067 = vst.msk [vmem:[#allocation0 + $0x7aa] sm:$0xc0] %vm1550_vm4, %v2058_v4   ;;  %v2322_v4 = vpop.permute.xlu0 %2321  }
 0x1ea   :  { %2138 = vst.msk [vmem:[#allocation0 + $0xc8] sm:$0x3] %vm2085_vm6, %v2135_v1   ;;  %2140 = vst.msk [vmem:[#allocation0 + $0xd6] sm:$0xc] %vm2085_vm6, %v2135_v1  }
 0x1eb   :  { %2142 = vst.msk [vmem:[#allocation0 + $0xe4] sm:$0x30] %vm2085_vm6, %v2135_v1   ;;  %2144 = vst.msk [vmem:[#allocation0 + $0xf2] sm:$0xc0] %vm2085_vm6, %v2135_v1   ;;  %v2169_v57 = vpop.permute.xlu1 %2168  }
 0x1ec   :  { %v6889_v33 = vld [vmem:[%s11810_s0 + $0x782] ss:$8 sm:$0xf]   ;;  %2121 = vst.msk [vmem:[#allocation0 + $0x88] sm:$0x3] %vm2085_vm6, %v2118_v32  }
 0x1ed   :  { %v6890_v47 = vld [vmem:[%s11810_s0 + $0x782] ss:$8 sm:$0xf0]   ;;  %2123 = vst.msk [vmem:[#allocation0 + $0x96] sm:$0xc] %vm2085_vm6, %v2118_v32   ;;  %v2356_v17 = vpop.permute.xlu0 %2355  }
 0x1ee   :  { %v6891_v52 = vld [vmem:[%s11810_s0 + $0x7c2] ss:$8 sm:$0xf]   ;;  %2125 = vst.msk [vmem:[#allocation0 + $0xa4] sm:$0x30] %vm2085_vm6, %v2118_v32   ;;  %v3127_v15 = vsel %vm4_vm0, %v6890_v47, %v6889_v33 }
 0x1ef   :  { %2127 = vst.msk [vmem:[#allocation0 + $0xb2] sm:$0xc0] %vm2085_vm6, %v2118_v32   ;;  %v6894_v2 = vld [vmem:[%s11810_s0 + $0x46] ss:$8 sm:$0xf]   ;;  %3141 = vrot.lane.b32.xlu1 %v6891_v52, %s7342_s27  ;;  %3128 = vrot.lane.b32.xlu0 %v3127_v15, %s7342_s27  ;;  %v2203_v50 = vpop.permute.xlu1 %2202  }
 0x1f0   :  { %v6895_v7 = vld [vmem:[%s11810_s0 + $0x46] ss:$8 sm:$0xf0]   ;;  %2172 = vst.msk [vmem:[#allocation0 + $0x148] sm:$0x3] %vm2085_vm6, %v2169_v57  }
 0x1f1   :  { %2174 = vst.msk [vmem:[#allocation0 + $0x156] sm:$0xc] %vm2085_vm6, %v2169_v57   ;;  %2176 = vst.msk [vmem:[#allocation0 + $0x164] sm:$0x30] %vm2085_vm6, %v2169_v57   ;;  %v3170_v43 = vsel %vm4_vm0, %v6895_v7, %v6894_v2  ;;  %v2390_v32 = vpop.permute.xlu0 %2389  }
 0x1f2   :  { %2178 = vst.msk [vmem:[#allocation0 + $0x172] sm:$0xc0] %vm2085_vm6, %v2169_v57   ;;  %v6892_v29 = vld [vmem:[%s11810_s0 + $0x6] ss:$8 sm:$0xf]  }
 0x1f3   :  { %v6893_v35 = vld [vmem:[%s11810_s0 + $0x6] ss:$8 sm:$0xf0]   ;;  %2155 = vst.msk [vmem:[#allocation0 + $0x108] sm:$0x3] %vm2085_vm6, %v2152_v21   ;;  %3171 = vrot.lane.b32.xlu1 %v3170_v43, %s7343_s16  ;;  %v2237_v54 = vpop.permute.xlu1 %2236  }
 0x1f4   :  { %2157 = vst.msk [vmem:[#allocation0 + $0x116] sm:$0xc] %vm2085_vm6, %v2152_v21   ;;  %2159 = vst.msk [vmem:[#allocation0 + $0x124] sm:$0x30] %vm2085_vm6, %v2152_v21   ;;  %v3153_v12 = vsel %vm4_vm0, %v6893_v35, %v6892_v29 }
 0x1f5   :  { %2161 = vst.msk [vmem:[#allocation0 + $0x132] sm:$0xc0] %vm2085_vm6, %v2152_v21   ;;  %v6898_v60 = vld [vmem:[%s11810_s0 + $0xc6] ss:$8 sm:$0xf]   ;;  %3154 = vrot.lane.b32.xlu0 %v3153_v12, %s7343_s16  ;;  %v2424_v21 = vpop.permute.xlu0 %2423  }
 0x1f6   :  { %v6899_v3 = vld [vmem:[%s11810_s0 + $0xc6] ss:$8 sm:$0xf0]   ;;  %2206 = vst.msk [vmem:[#allocation0 + $0x1c8] sm:$0x3] %vm2085_vm6, %v2203_v50  }
 0x1f7   :  { %2208 = vst.msk [vmem:[#allocation0 + $0x1d6] sm:$0xc] %vm2085_vm6, %v2203_v50   ;;  %2210 = vst.msk [vmem:[#allocation0 + $0x1e4] sm:$0x30] %vm2085_vm6, %v2203_v50   ;;  %v3204_v45 = vsel %vm4_vm0, %v6899_v3, %v6898_v60  ;;  %v2271_v6 = vpop.permute.xlu1 %2270  }
 0x1f8   :  { %2212 = vst.msk [vmem:[#allocation0 + $0x1f2] sm:$0xc0] %vm2085_vm6, %v2203_v50   ;;  %v6896_v28 = vld [vmem:[%s11810_s0 + $0x86] ss:$8 sm:$0xf]   ;;  %3205 = vrot.lane.b32.xlu1 %v3204_v45, %s7343_s16 }
 0x1f9   :  { %v6897_v36 = vld [vmem:[%s11810_s0 + $0x86] ss:$8 sm:$0xf0]   ;;  %2189 = vst.msk [vmem:[#allocation0 + $0x188] sm:$0x3] %vm2085_vm6, %v2186_v19  }
 0x1fa   :  { %2191 = vst.msk [vmem:[#allocation0 + $0x196] sm:$0xc] %vm2085_vm6, %v2186_v19   ;;  %2193 = vst.msk [vmem:[#allocation0 + $0x1a4] sm:$0x30] %vm2085_vm6, %v2186_v19   ;;  %v3187_v20 = vsel %vm4_vm0, %v6897_v36, %v6896_v28 }
 0x1fb   :  { %2195 = vst.msk [vmem:[#allocation0 + $0x1b2] sm:$0xc0] %vm2085_vm6, %v2186_v19   ;;  %v6902_v0 = vld [vmem:[%s11810_s0 + $0x146] ss:$8 sm:$0xf]   ;;  %3188 = vrot.lane.b32.xlu0 %v3187_v20, %s7343_s16  ;;  %v2305_v42 = vpop.permute.xlu1 %2304   ;;  %v2458_v19 = vpop.permute.xlu0 %2457  }
 0x1fc   :  { %v6903_v9 = vld [vmem:[%s11810_s0 + $0x146] ss:$8 sm:$0xf0]   ;;  %2240 = vst.msk [vmem:[#allocation0 + $0x248] sm:$0x3] %vm2085_vm6, %v2237_v54  }
 0x1fd   :  { %2242 = vst.msk [vmem:[#allocation0 + $0x256] sm:$0xc] %vm2085_vm6, %v2237_v54   ;;  %2244 = vst.msk [vmem:[#allocation0 + $0x264] sm:$0x30] %vm2085_vm6, %v2237_v54   ;;  %v3238_v61 = vsel %vm4_vm0, %v6903_v9, %v6902_v0 }
 0x1fe   :  { %2246 = vst.msk [vmem:[#allocation0 + $0x272] sm:$0xc0] %vm2085_vm6, %v2237_v54   ;;  %v6900_v39 = vld [vmem:[%s11810_s0 + $0x106] ss:$8 sm:$0xf]   ;;  %3239 = vrot.lane.b32.xlu1 %v3238_v61, %s7343_s16 }
 0x1ff   :  { %v6901_v48 = vld [vmem:[%s11810_s0 + $0x106] ss:$8 sm:$0xf0]   ;;  %2223 = vst.msk [vmem:[#allocation0 + $0x208] sm:$0x3] %vm2085_vm6, %v2220_v27   ;;  %v2339_v58 = vpop.permute.xlu1 %2338  }
 0x200   :  { %2225 = vst.msk [vmem:[#allocation0 + $0x216] sm:$0xc] %vm2085_vm6, %v2220_v27   ;;  %2227 = vst.msk [vmem:[#allocation0 + $0x224] sm:$0x30] %vm2085_vm6, %v2220_v27   ;;  %v3221_v34 = vsel %vm4_vm0, %v6901_v48, %v6900_v39 }
 0x201   :  { %2229 = vst.msk [vmem:[#allocation0 + $0x232] sm:$0xc0] %vm2085_vm6, %v2220_v27   ;;  %v6906_v18 = vld [vmem:[%s11810_s0 + $0x1c6] ss:$8 sm:$0xf]   ;;  %3222 = vrot.lane.b32.xlu0 %v3221_v34, %s7343_s16  ;;  %v2492_v27 = vpop.permute.xlu0 %2491  }
 0x202   :  { %v6907_v30 = vld [vmem:[%s11810_s0 + $0x1c6] ss:$8 sm:$0xf0]   ;;  %2274 = vst.msk [vmem:[#allocation0 + $0x2c8] sm:$0x3] %vm2085_vm6, %v2271_v6  }
 0x203   :  { %2276 = vst.msk [vmem:[#allocation0 + $0x2d6] sm:$0xc] %vm2085_vm6, %v2271_v6   ;;  %2278 = vst.msk [vmem:[#allocation0 + $0x2e4] sm:$0x30] %vm2085_vm6, %v2271_v6   ;;  %v3272_v41 = vsel %vm4_vm0, %v6907_v30, %v6906_v18  ;;  %v2373_v11 = vpop.permute.xlu1 %2372  }
 0x204   :  { %2280 = vst.msk [vmem:[#allocation0 + $0x2f2] sm:$0xc0] %vm2085_vm6, %v2271_v6   ;;  %v6904_v38 = vld [vmem:[%s11810_s0 + $0x186] ss:$8 sm:$0xf]   ;;  %3273 = vrot.lane.b32.xlu1 %v3272_v41, %s7343_s16 }
 0x205   :  { %v6905_v40 = vld [vmem:[%s11810_s0 + $0x186] ss:$8 sm:$0xf0]   ;;  %2257 = vst.msk [vmem:[#allocation0 + $0x288] sm:$0x3] %vm2085_vm6, %v2254_v37  }
 0x206   :  { %2259 = vst.msk [vmem:[#allocation0 + $0x296] sm:$0xc] %vm2085_vm6, %v2254_v37   ;;  %2261 = vst.msk [vmem:[#allocation0 + $0x2a4] sm:$0x30] %vm2085_vm6, %v2254_v37   ;;  %v3255_v49 = vsel %vm4_vm0, %v6905_v40, %v6904_v38 }
 0x207   :  { %2263 = vst.msk [vmem:[#allocation0 + $0x2b2] sm:$0xc0] %vm2085_vm6, %v2254_v37   ;;  %v6910_v44 = vld [vmem:[%s11810_s0 + $0x246] ss:$8 sm:$0xf]   ;;  %3256 = vrot.lane.b32.xlu0 %v3255_v49, %s7343_s16  ;;  %v2407_v25 = vpop.permute.xlu1 %2406   ;;  %v2526_v37 = vpop.permute.xlu0 %2525  }
 0x208   :  { %v6911_v46 = vld [vmem:[%s11810_s0 + $0x246] ss:$8 sm:$0xf0]   ;;  %2308 = vst.msk [vmem:[#allocation0 + $0x348] sm:$0x3] %vm2085_vm6, %v2305_v42  }
 0x209   :  { %2310 = vst.msk [vmem:[#allocation0 + $0x356] sm:$0xc] %vm2085_vm6, %v2305_v42   ;;  %2312 = vst.msk [vmem:[#allocation0 + $0x364] sm:$0x30] %vm2085_vm6, %v2305_v42   ;;  %v3306_v56 = vsel %vm4_vm0, %v6911_v46, %v6910_v44 }
 0x20a   :  { %2314 = vst.msk [vmem:[#allocation0 + $0x372] sm:$0xc0] %vm2085_vm6, %v2305_v42   ;;  %v6908_v53 = vld [vmem:[%s11810_s0 + $0x206] ss:$8 sm:$0xf]   ;;  %3307 = vrot.lane.b32.xlu1 %v3306_v56, %s7343_s16 }
 0x20b   :  { %v6909_v55 = vld [vmem:[%s11810_s0 + $0x206] ss:$8 sm:$0xf0]   ;;  %2291 = vst.msk [vmem:[#allocation0 + $0x308] sm:$0x3] %vm2085_vm6, %v2288_v51   ;;  %v2441_v57 = vpop.permute.xlu1 %2440  }
 0x20c   :  { %2293 = vst.msk [vmem:[#allocation0 + $0x316] sm:$0xc] %vm2085_vm6, %v2288_v51   ;;  %2295 = vst.msk [vmem:[#allocation0 + $0x324] sm:$0x30] %vm2085_vm6, %v2288_v51   ;;  %v3289_v63 = vsel %vm4_vm0, %v6909_v55, %v6908_v53 }
 0x20d   :  { %2297 = vst.msk [vmem:[#allocation0 + $0x332] sm:$0xc0] %vm2085_vm6, %v2288_v51   ;;  %v6914_v59 = vld [vmem:[%s11810_s0 + $0x2c6] ss:$8 sm:$0xf]   ;;  %3290 = vrot.lane.b32.xlu0 %v3289_v63, %s7343_s16  ;;  %v2560_v51 = vpop.permute.xlu0 %2559  }
 0x20e   :  { %v6915_v62 = vld [vmem:[%s11810_s0 + $0x2c6] ss:$8 sm:$0xf0]   ;;  %2342 = vst.msk [vmem:[#allocation0 + $0x3c8] sm:$0x3] %vm2085_vm6, %v2339_v58  }
 0x20f   :  { %2344 = vst.msk [vmem:[#allocation0 + $0x3d6] sm:$0xc] %vm2085_vm6, %v2339_v58   ;;  %2346 = vst.msk [vmem:[#allocation0 + $0x3e4] sm:$0x30] %vm2085_vm6, %v2339_v58   ;;  %v3340_v10 = vsel %vm4_vm0, %v6915_v62, %v6914_v59  ;;  %v2475_v50 = vpop.permute.xlu1 %2474  }
 0x210   :  { %2348 = vst.msk [vmem:[#allocation0 + $0x3f2] sm:$0xc0] %vm2085_vm6, %v2339_v58   ;;  %v6912_v5 = vld [vmem:[%s11810_s0 + $0x286] ss:$8 sm:$0xf]   ;;  %3341 = vrot.lane.b32.xlu1 %v3340_v10, %s7343_s16 }
 0x211   :  { %v6913_v8 = vld [vmem:[%s11810_s0 + $0x286] ss:$8 sm:$0xf0]   ;;  %2325 = vst.msk [vmem:[#allocation0 + $0x388] sm:$0x3] %vm2085_vm6, %v2322_v4  }
 0x212   :  { %2327 = vst.msk [vmem:[#allocation0 + $0x396] sm:$0xc] %vm2085_vm6, %v2322_v4   ;;  %2329 = vst.msk [vmem:[#allocation0 + $0x3a4] sm:$0x30] %vm2085_vm6, %v2322_v4   ;;  %v3323_v16 = vsel %vm4_vm0, %v6913_v8, %v6912_v5  ;;  %v2594_v5 = vpop.permute.xlu0 %2593  }
 0x213   :  { %2331 = vst.msk [vmem:[#allocation0 + $0x3b2] sm:$0xc0] %vm2085_vm6, %v2322_v4   ;;  %v6918_v13 = vld [vmem:[%s11810_s0 + $0x346] ss:$8 sm:$0xf]   ;;  %3324 = vrot.lane.b32.xlu0 %v3323_v16, %s7343_s16  ;;  %v2509_v54 = vpop.permute.xlu1 %2508  }
 0x214   :  { %v6919_v14 = vld [vmem:[%s11810_s0 + $0x346] ss:$8 sm:$0xf0]   ;;  %2376 = vst.msk [vmem:[#allocation0 + $0x448] sm:$0x3] %vm2085_vm6, %v2373_v11  }
 0x215   :  { %2378 = vst.msk [vmem:[#allocation0 + $0x456] sm:$0xc] %vm2085_vm6, %v2373_v11   ;;  %2380 = vst.msk [vmem:[#allocation0 + $0x464] sm:$0x30] %vm2085_vm6, %v2373_v11   ;;  %v3374_v24 = vsel %vm4_vm0, %v6919_v14, %v6918_v13 }
 0x216   :  { %2382 = vst.msk [vmem:[#allocation0 + $0x472] sm:$0xc0] %vm2085_vm6, %v2373_v11   ;;  %v6916_v22 = vld [vmem:[%s11810_s0 + $0x306] ss:$8 sm:$0xf]   ;;  %3375 = vrot.lane.b32.xlu1 %v3374_v24, %s7343_s16 }
 0x217   :  { %v6917_v23 = vld [vmem:[%s11810_s0 + $0x306] ss:$8 sm:$0xf0]   ;;  %2359 = vst.msk [vmem:[#allocation0 + $0x408] sm:$0x3] %vm2085_vm6, %v2356_v17   ;;  %v2543_v6 = vpop.permute.xlu1 %2542  }
 0x218   :  { %2361 = vst.msk [vmem:[#allocation0 + $0x416] sm:$0xc] %vm2085_vm6, %v2356_v17   ;;  %2363 = vst.msk [vmem:[#allocation0 + $0x424] sm:$0x30] %vm2085_vm6, %v2356_v17   ;;  %v3357_v31 = vsel %vm4_vm0, %v6917_v23, %v6916_v22 }
 0x219   :  { %2365 = vst.msk [vmem:[#allocation0 + $0x432] sm:$0xc0] %vm2085_vm6, %v2356_v17   ;;  %v6922_v26 = vld [vmem:[%s11810_s0 + $0x3c6] ss:$8 sm:$0xf]   ;;  %3358 = vrot.lane.b32.xlu0 %v3357_v31, %s7343_s16  ;;  %v2620_v17 = vpop.permute.xlu0 %2619  }
 0x21a   :  { %v6923_v1 = vld [vmem:[%s11810_s0 + $0x3c6] ss:$8 sm:$0xf0]   ;;  %2410 = vst.msk [vmem:[#allocation0 + $0x4c8] sm:$0x3] %vm2085_vm6, %v2407_v25  }
 0x21b   :  { %2412 = vst.msk [vmem:[#allocation0 + $0x4d6] sm:$0xc] %vm2085_vm6, %v2407_v25   ;;  %2414 = vst.msk [vmem:[#allocation0 + $0x4e4] sm:$0x30] %vm2085_vm6, %v2407_v25   ;;  %v3408_v52 = vsel %vm4_vm0, %v6923_v1, %v6922_v26  ;;  %v2577_v42 = vpop.permute.xlu1 %2576  }
 0x21c   :  { %2416 = vst.msk [vmem:[#allocation0 + $0x4f2] sm:$0xc0] %vm2085_vm6, %v2407_v25   ;;  %v6920_v33 = vld [vmem:[%s11810_s0 + $0x386] ss:$8 sm:$0xf]   ;;  %3409 = vrot.lane.b32.xlu1 %v3408_v52, %s7343_s16 }
 0x21d   :  { %v6921_v47 = vld [vmem:[%s11810_s0 + $0x386] ss:$8 sm:$0xf0]   ;;  %2393 = vst.msk [vmem:[#allocation0 + $0x488] sm:$0x3] %vm2085_vm6, %v2390_v32   ;;  %v2653_v1 = vpop.permute.xlu0 %2652  }
 0x21e   :  { %2395 = vst.msk [vmem:[#allocation0 + $0x496] sm:$0xc] %vm2085_vm6, %v2390_v32   ;;  %2397 = vst.msk [vmem:[#allocation0 + $0x4a4] sm:$0x30] %vm2085_vm6, %v2390_v32   ;;  %v3391_v15 = vsel %vm4_vm0, %v6921_v47, %v6920_v33 }
 0x21f   :  { %2399 = vst.msk [vmem:[#allocation0 + $0x4b2] sm:$0xc0] %vm2085_vm6, %v2390_v32   ;;  %v6926_v2 = vld [vmem:[%s11810_s0 + $0x446] ss:$8 sm:$0xf]   ;;  %3392 = vrot.lane.b32.xlu0 %v3391_v15, %s7343_s16  ;;  %v2607_v58 = vpop.permute.xlu1 %2606  }
 0x220   :  { %v6927_v7 = vld [vmem:[%s11810_s0 + $0x446] ss:$8 sm:$0xf0]   ;;  %2444 = vst.msk [vmem:[#allocation0 + $0x548] sm:$0x3] %vm2085_vm6, %v2441_v57  }
 0x221   :  { %2446 = vst.msk [vmem:[#allocation0 + $0x556] sm:$0xc] %vm2085_vm6, %v2441_v57   ;;  %2448 = vst.msk [vmem:[#allocation0 + $0x564] sm:$0x30] %vm2085_vm6, %v2441_v57   ;;  %v3442_v43 = vsel %vm4_vm0, %v6927_v7, %v6926_v2  ;;  %v2687_v7 = vpop.permute.xlu0 %2686  }
 0x222   :  { %2450 = vst.msk [vmem:[#allocation0 + $0x572] sm:$0xc0] %vm2085_vm6, %v2441_v57   ;;  %v6924_v29 = vld [vmem:[%s11810_s0 + $0x406] ss:$8 sm:$0xf]   ;;  %3443 = vrot.lane.b32.xlu1 %v3442_v43, %s7343_s16 }
 0x223   :  { %v6925_v35 = vld [vmem:[%s11810_s0 + $0x406] ss:$8 sm:$0xf0]   ;;  %2427 = vst.msk [vmem:[#allocation0 + $0x508] sm:$0x3] %vm2085_vm6, %v2424_v21   ;;  %v2636_v11 = vpop.permute.xlu1 %2635  }
 0x224   :  { %2429 = vst.msk [vmem:[#allocation0 + $0x516] sm:$0xc] %vm2085_vm6, %v2424_v21   ;;  %2431 = vst.msk [vmem:[#allocation0 + $0x524] sm:$0x30] %vm2085_vm6, %v2424_v21   ;;  %v3425_v12 = vsel %vm4_vm0, %v6925_v35, %v6924_v29 }
 0x225   :  { %2433 = vst.msk [vmem:[#allocation0 + $0x532] sm:$0xc0] %vm2085_vm6, %v2424_v21   ;;  %v6930_v60 = vld [vmem:[%s11810_s0 + $0x4c6] ss:$8 sm:$0xf]   ;;  %3426 = vrot.lane.b32.xlu0 %v3425_v12, %s7343_s16 }
 0x226   :  { %v6931_v3 = vld [vmem:[%s11810_s0 + $0x4c6] ss:$8 sm:$0xf0]   ;;  %2478 = vst.msk [vmem:[#allocation0 + $0x5c8] sm:$0x3] %vm2085_vm6, %v2475_v50  }
 0x227   :  { %2480 = vst.msk [vmem:[#allocation0 + $0x5d6] sm:$0xc] %vm2085_vm6, %v2475_v50   ;;  %2482 = vst.msk [vmem:[#allocation0 + $0x5e4] sm:$0x30] %vm2085_vm6, %v2475_v50   ;;  %v3476_v45 = vsel %vm4_vm0, %v6931_v3, %v6930_v60  ;;  %v2670_v25 = vpop.permute.xlu1 %2669   ;;  %v2721_v3 = vpop.permute.xlu0 %2720  }
 0x228   :  { %2484 = vst.msk [vmem:[#allocation0 + $0x5f2] sm:$0xc0] %vm2085_vm6, %v2475_v50   ;;  %v6928_v28 = vld [vmem:[%s11810_s0 + $0x486] ss:$8 sm:$0xf]   ;;  %3477 = vrot.lane.b32.xlu1 %v3476_v45, %s7343_s16 }
 0x229   :  { %v6929_v36 = vld [vmem:[%s11810_s0 + $0x486] ss:$8 sm:$0xf0]   ;;  %2461 = vst.msk [vmem:[#allocation0 + $0x588] sm:$0x3] %vm2085_vm6, %v2458_v19  }
 0x22a   :  { %2463 = vst.msk [vmem:[#allocation0 + $0x596] sm:$0xc] %vm2085_vm6, %v2458_v19   ;;  %2465 = vst.msk [vmem:[#allocation0 + $0x5a4] sm:$0x30] %vm2085_vm6, %v2458_v19   ;;  %v3459_v20 = vsel %vm4_vm0, %v6929_v36, %v6928_v28 }
 0x22b   :  { %2467 = vst.msk [vmem:[#allocation0 + $0x5b2] sm:$0xc0] %vm2085_vm6, %v2458_v19   ;;  %v6934_v0 = vld [vmem:[%s11810_s0 + $0x546] ss:$8 sm:$0xf]   ;;  %3460 = vrot.lane.b32.xlu0 %v3459_v20, %s7343_s16  ;;  %v2704_v47 = vpop.permute.xlu1 %2703  }
 0x22c   :  { %v6935_v9 = vld [vmem:[%s11810_s0 + $0x546] ss:$8 sm:$0xf0]   ;;  %2512 = vst.msk [vmem:[#allocation0 + $0x648] sm:$0x3] %vm2085_vm6, %v2509_v54  }
 0x22d   :  { %2514 = vst.msk [vmem:[#allocation0 + $0x656] sm:$0xc] %vm2085_vm6, %v2509_v54   ;;  %2516 = vst.msk [vmem:[#allocation0 + $0x664] sm:$0x30] %vm2085_vm6, %v2509_v54   ;;  %v3510_v61 = vsel %vm4_vm0, %v6935_v9, %v6934_v0  ;;  %v2755_v9 = vpop.permute.xlu0 %2754  }
 0x22e   :  { %2518 = vst.msk [vmem:[#allocation0 + $0x672] sm:$0xc0] %vm2085_vm6, %v2509_v54   ;;  %v6932_v39 = vld [vmem:[%s11810_s0 + $0x506] ss:$8 sm:$0xf]   ;;  %3511 = vrot.lane.b32.xlu1 %v3510_v61, %s7343_s16 }
 0x22f   :  { %v6933_v48 = vld [vmem:[%s11810_s0 + $0x506] ss:$8 sm:$0xf0]   ;;  %2495 = vst.msk [vmem:[#allocation0 + $0x608] sm:$0x3] %vm2085_vm6, %v2492_v27   ;;  %v2738_v35 = vpop.permute.xlu1 %2737  }
 0x230   :  { %2497 = vst.msk [vmem:[#allocation0 + $0x616] sm:$0xc] %vm2085_vm6, %v2492_v27   ;;  %2499 = vst.msk [vmem:[#allocation0 + $0x624] sm:$0x30] %vm2085_vm6, %v2492_v27   ;;  %v3493_v34 = vsel %vm4_vm0, %v6933_v48, %v6932_v39 }
 0x231   :  { %2501 = vst.msk [vmem:[#allocation0 + $0x632] sm:$0xc0] %vm2085_vm6, %v2492_v27   ;;  %v6938_v18 = vld [vmem:[%s11810_s0 + $0x5c6] ss:$8 sm:$0xf]   ;;  %3494 = vrot.lane.b32.xlu0 %v3493_v34, %s7343_s16 }
 0x232   :  { %v6939_v30 = vld [vmem:[%s11810_s0 + $0x5c6] ss:$8 sm:$0xf0]   ;;  %2546 = vst.msk [vmem:[#allocation0 + $0x6c8] sm:$0x3] %vm2085_vm6, %v2543_v6  }
 0x233   :  { %2548 = vst.msk [vmem:[#allocation0 + $0x6d6] sm:$0xc] %vm2085_vm6, %v2543_v6   ;;  %2550 = vst.msk [vmem:[#allocation0 + $0x6e4] sm:$0x30] %vm2085_vm6, %v2543_v6   ;;  %v3544_v41 = vsel %vm4_vm0, %v6939_v30, %v6938_v18  ;;  %v2772_v36 = vpop.permute.xlu1 %2771   ;;  %v2789_v30 = vpop.permute.xlu0 %2788  }
 0x234   :  { %2552 = vst.msk [vmem:[#allocation0 + $0x6f2] sm:$0xc0] %vm2085_vm6, %v2543_v6   ;;  %v6936_v38 = vld [vmem:[%s11810_s0 + $0x586] ss:$8 sm:$0xf]   ;;  %3545 = vrot.lane.b32.xlu1 %v3544_v41, %s7343_s16 }
 0x235   :  { %v6937_v40 = vld [vmem:[%s11810_s0 + $0x586] ss:$8 sm:$0xf0]   ;;  %2529 = vst.msk [vmem:[#allocation0 + $0x688] sm:$0x3] %vm2085_vm6, %v2526_v37  }
 0x236   :  { %2531 = vst.msk [vmem:[#allocation0 + $0x696] sm:$0xc] %vm2085_vm6, %v2526_v37   ;;  %2533 = vst.msk [vmem:[#allocation0 + $0x6a4] sm:$0x30] %vm2085_vm6, %v2526_v37   ;;  %v3527_v49 = vsel %vm4_vm0, %v6937_v40, %v6936_v38 }
 0x237   :  { %2535 = vst.msk [vmem:[#allocation0 + $0x6b2] sm:$0xc0] %vm2085_vm6, %v2526_v37   ;;  %v6942_v44 = vld [vmem:[%s11810_s0 + $0x646] ss:$8 sm:$0xf]   ;;  %3528 = vrot.lane.b32.xlu0 %v3527_v49, %s7343_s16  ;;  %v2806_v48 = vpop.permute.xlu1 %2805  }
 0x238   :  { %v6943_v46 = vld [vmem:[%s11810_s0 + $0x646] ss:$8 sm:$0xf0]   ;;  %2580 = vst.msk [vmem:[#allocation0 + $0x748] sm:$0x3] %vm2085_vm6, %v2577_v42  }
 0x239   :  { %2582 = vst.msk [vmem:[#allocation0 + $0x756] sm:$0xc] %vm2085_vm6, %v2577_v42   ;;  %2584 = vst.msk [vmem:[#allocation0 + $0x764] sm:$0x30] %vm2085_vm6, %v2577_v42   ;;  %v3578_v56 = vsel %vm4_vm0, %v6943_v46, %v6942_v44  ;;  %v2823_v46 = vpop.permute.xlu0 %2822  }
 0x23a   :  { %2586 = vst.msk [vmem:[#allocation0 + $0x772] sm:$0xc0] %vm2085_vm6, %v2577_v42   ;;  %v6940_v53 = vld [vmem:[%s11810_s0 + $0x606] ss:$8 sm:$0xf]   ;;  %3579 = vrot.lane.b32.xlu1 %v3578_v56, %s7343_s16 }
 0x23b   :  { %v6941_v55 = vld [vmem:[%s11810_s0 + $0x606] ss:$8 sm:$0xf0]   ;;  %2563 = vst.msk [vmem:[#allocation0 + $0x708] sm:$0x3] %vm2085_vm6, %v2560_v51   ;;  %v2840_v40 = vpop.permute.xlu1 %2839  }
 0x23c   :  { %2565 = vst.msk [vmem:[#allocation0 + $0x716] sm:$0xc] %vm2085_vm6, %v2560_v51   ;;  %2567 = vst.msk [vmem:[#allocation0 + $0x724] sm:$0x30] %vm2085_vm6, %v2560_v51   ;;  %v3561_v63 = vsel %vm4_vm0, %v6941_v55, %v6940_v53 }
 0x23d   :  { %2569 = vst.msk [vmem:[#allocation0 + $0x732] sm:$0xc0] %vm2085_vm6, %v2560_v51   ;;  %v6946_v59 = vld [vmem:[%s11810_s0 + $0x6c6] ss:$8 sm:$0xf]   ;;  %3562 = vrot.lane.b32.xlu0 %v3561_v63, %s7343_s16 }
 0x23e   :  { %v6947_v62 = vld [vmem:[%s11810_s0 + $0x6c6] ss:$8 sm:$0xf0]   ;;  %2610 = vst.msk [vmem:[#allocation0 + $0x7c8] sm:$0x3] %vm2085_vm6, %v2607_v58  }
 0x23f   :  { %2612 = vst.msk [vmem:[#allocation0 + $0x7d6] sm:$0xc] %vm2085_vm6, %v2607_v58   ;;  %v6944_v4 = vld [vmem:[%s11810_s0 + $0x686] ss:$8 sm:$0xf]   ;;  %v3612_v10 = vsel %vm4_vm0, %v6947_v62, %v6946_v59  ;;  %v2874_v55 = vpop.permute.xlu1 %2873   ;;  %v2857_v62 = vpop.permute.xlu0 %2856  }
 0x240   :  { %v6945_v8 = vld [vmem:[%s11810_s0 + $0x686] ss:$8 sm:$0xf0]   ;;  %2597 = vst.msk [vmem:[#allocation0 + $0x788] sm:$0x3] %vm2085_vm6, %v2594_v5   ;;  %3613 = vrot.lane.b32.xlu1 %v3612_v10, %s7343_s16 }
 0x241   :  { %2599 = vst.msk [vmem:[#allocation0 + $0x796] sm:$0xc] %vm2085_vm6, %v2594_v5   ;;  %2601 = vst.msk [vmem:[#allocation0 + $0x7a4] sm:$0x30] %vm2085_vm6, %v2594_v5   ;;  %v3595_v16 = vsel %vm4_vm0, %v6945_v8, %v6944_v4 }
 0x242   :  { %2603 = vst.msk [vmem:[#allocation0 + $0x7b2] sm:$0xc0] %vm2085_vm6, %v2594_v5   ;;  %v6950_v13 = vld [vmem:[%s11810_s0 + $0x746] ss:$8 sm:$0xf]   ;;  %3596 = vrot.lane.b32.xlu0 %v3595_v16, %s7343_s16 }
 0x243   :  { %v6951_v14 = vld [vmem:[%s11810_s0 + $0x746] ss:$8 sm:$0xf0]   ;;  %2639 = vst.msk [vmem:[#allocation0 + $0x40] sm:$0x3] %vm2621_vm7, %v2636_v11   ;;  %v2908_v8 = vpop.permute.xlu1 %2907  }
 0x244   :  { %2641 = vst.msk [vmem:[#allocation0 + $0x4e] sm:$0xc] %vm2621_vm7, %v2636_v11   ;;  %2643 = vst.msk [vmem:[#allocation0 + $0x5c] sm:$0x30] %vm2621_vm7, %v2636_v11   ;;  %v3646_v24 = vsel %vm4_vm0, %v6951_v14, %v6950_v13  ;;  %v2891_v14 = vpop.permute.xlu0 %2890  }
 0x245   :  { %2645 = vst.msk [vmem:[#allocation0 + $0x6a] sm:$0xc0] %vm2621_vm7, %v2636_v11   ;;  %v6948_v22 = vld [vmem:[%s11810_s0 + $0x706] ss:$8 sm:$0xf]   ;;  %3647 = vrot.lane.b32.xlu1 %v3646_v24, %s7343_s16 }
 0x246   :  { %v6949_v23 = vld [vmem:[%s11810_s0 + $0x706] ss:$8 sm:$0xf0]   ;;  %2622 = vst.msk [vmem:[#allocation0] sm:$0x3] %vm2621_vm7, %v2620_v17  }
 0x247   :  { %2624 = vst.msk [vmem:[#allocation0 + $0xe] sm:$0xc] %vm2621_vm7, %v2620_v17   ;;  %2626 = vst.msk [vmem:[#allocation0 + $0x1c] sm:$0x30] %vm2621_vm7, %v2620_v17   ;;  %v3629_v26 = vsel %vm4_vm0, %v6949_v23, %v6948_v22  ;;  %v2942_v23 = vpop.permute.xlu1 %2941  }
 0x248   :  { %2628 = vst.msk [vmem:[#allocation0 + $0x2a] sm:$0xc0] %vm2621_vm7, %v2620_v17   ;;  %2673 = vst.msk [vmem:[#allocation0 + $0xc0] sm:$0x3] %vm2621_vm7, %v2670_v25   ;;  %3630 = vrot.lane.b32.xlu0 %v3629_v26, %s7343_s16 }
 0x249   :  { %2675 = vst.msk [vmem:[#allocation0 + $0xce] sm:$0xc] %vm2621_vm7, %v2670_v25   ;;  %2677 = vst.msk [vmem:[#allocation0 + $0xdc] sm:$0x30] %vm2621_vm7, %v2670_v25  }
 0x24a   :  { %2679 = vst.msk [vmem:[#allocation0 + $0xea] sm:$0xc0] %vm2621_vm7, %v2670_v25   ;;  %v6952_v31 = vld [vmem:[%s11810_s0 + $0x786] ss:$8 sm:$0xf]  }
 0x24b   :  { %v6953_v32 = vld [vmem:[%s11810_s0 + $0x786] ss:$8 sm:$0xf0]   ;;  %2656 = vst.msk [vmem:[#allocation0 + $0x80] sm:$0x3] %vm2621_vm7, %v2653_v1  }
 0x24c   :  { %v6954_v33 = vld [vmem:[%s11810_s0 + $0x7c6] ss:$8 sm:$0xf]   ;;  %2658 = vst.msk [vmem:[#allocation0 + $0x8e] sm:$0xc] %vm2621_vm7, %v2653_v1   ;;  %v3663_v2 = vsel %vm4_vm0, %v6953_v32, %v6952_v31 }
 0x24d   :  { %2660 = vst.msk [vmem:[#allocation0 + $0x9c] sm:$0x30] %vm2621_vm7, %v2653_v1   ;;  %2662 = vst.msk [vmem:[#allocation0 + $0xaa] sm:$0xc0] %vm2621_vm7, %v2653_v1   ;;  %3677 = vrot.lane.b32.xlu1 %v6954_v33, %s7343_s16  ;;  %3664 = vrot.lane.b32.xlu0 %v3663_v2, %s7343_s16  ;;  %v2925_v1 = vpop.permute.xlu0 %2924  }
 0x24e   :  { %v6957_v52 = vld [vmem:[%s11810_s0 + $0x41] ss:$8 sm:$0xf]   ;;  %2707 = vst.msk [vmem:[#allocation0 + $0x140] sm:$0x3] %vm2621_vm7, %v2704_v47  }
 0x24f   :  { %v6958_v57 = vld [vmem:[%s11810_s0 + $0x41] ss:$8 sm:$0xf0]   ;;  %2709 = vst.msk [vmem:[#allocation0 + $0x14e] sm:$0xc] %vm2621_vm7, %v2704_v47  }
 0x250   :  { %2711 = vst.msk [vmem:[#allocation0 + $0x15c] sm:$0x30] %vm2621_vm7, %v2704_v47   ;;  %2713 = vst.msk [vmem:[#allocation0 + $0x16a] sm:$0xc0] %vm2621_vm7, %v2704_v47   ;;  %v3705_v29 = vsel %vm4_vm0, %v6958_v57, %v6957_v52  ;;  %v2976_v47 = vpop.permute.xlu1 %2975  }
 0x251   :  { %v6955_v15 = vld [vmem:[%s11810_s0 + $0x1] ss:$8 sm:$0xf]   ;;  %2690 = vst.msk [vmem:[#allocation0 + $0x100] sm:$0x3] %vm2621_vm7, %v2687_v7   ;;  %3706 = vrot.lane.b32.xlu1 %v3705_v29, %s7344_s2 }
 0x252   :  { %v6956_v21 = vld [vmem:[%s11810_s0 + $0x1] ss:$8 sm:$0xf0]   ;;  %2692 = vst.msk [vmem:[#allocation0 + $0x10e] sm:$0xc] %vm2621_vm7, %v2687_v7  }
 0x253   :  { %2694 = vst.msk [vmem:[#allocation0 + $0x11c] sm:$0x30] %vm2621_vm7, %v2687_v7   ;;  %2696 = vst.msk [vmem:[#allocation0 + $0x12a] sm:$0xc0] %vm2621_vm7, %v2687_v7   ;;  %v3689_v60 = vsel %vm4_vm0, %v6956_v21, %v6955_v15  ;;  %v2959_v7 = vpop.permute.xlu0 %2958  }
 0x254   :  { %v6961_v43 = vld [vmem:[%s11810_s0 + $0xc1] ss:$8 sm:$0xf]   ;;  %2741 = vst.msk [vmem:[#allocation0 + $0x1c0] sm:$0x3] %vm2621_vm7, %v2738_v35   ;;  %3690 = vrot.lane.b32.xlu0 %v3689_v60, %s7344_s2 }
 0x255   :  { %v6962_v50 = vld [vmem:[%s11810_s0 + $0xc1] ss:$8 sm:$0xf0]   ;;  %2743 = vst.msk [vmem:[#allocation0 + $0x1ce] sm:$0xc] %vm2621_vm7, %v2738_v35  }
 0x256   :  { %2745 = vst.msk [vmem:[#allocation0 + $0x1dc] sm:$0x30] %vm2621_vm7, %v2738_v35   ;;  %2747 = vst.msk [vmem:[#allocation0 + $0x1ea] sm:$0xc0] %vm2621_vm7, %v2738_v35   ;;  %v3739_v28 = vsel %vm4_vm0, %v6962_v50, %v6961_v43  ;;  %v3010_v35 = vpop.permute.xlu1 %3009  }
 0x257   :  { %v6959_v12 = vld [vmem:[%s11810_s0 + $0x81] ss:$8 sm:$0xf]   ;;  %2724 = vst.msk [vmem:[#allocation0 + $0x180] sm:$0x3] %vm2621_vm7, %v2721_v3   ;;  %3740 = vrot.lane.b32.xlu1 %v3739_v28, %s7344_s2 }
 0x258   :  { %v6960_v19 = vld [vmem:[%s11810_s0 + $0x81] ss:$8 sm:$0xf0]   ;;  %2726 = vst.msk [vmem:[#allocation0 + $0x18e] sm:$0xc] %vm2621_vm7, %v2721_v3  }
 0x259   :  { %2728 = vst.msk [vmem:[#allocation0 + $0x19c] sm:$0x30] %vm2621_vm7, %v2721_v3   ;;  %2730 = vst.msk [vmem:[#allocation0 + $0x1aa] sm:$0xc0] %vm2621_vm7, %v2721_v3   ;;  %v3722_v0 = vsel %vm4_vm0, %v6960_v19, %v6959_v12  ;;  %v2993_v3 = vpop.permute.xlu0 %2992  }
 0x25a   :  { %v6965_v45 = vld [vmem:[%s11810_s0 + $0x141] ss:$8 sm:$0xf]   ;;  %2775 = vst.msk [vmem:[#allocation0 + $0x240] sm:$0x3] %vm2621_vm7, %v2772_v36   ;;  %3723 = vrot.lane.b32.xlu0 %v3722_v0, %s7344_s2 }
 0x25b   :  { %v6966_v54 = vld [vmem:[%s11810_s0 + $0x141] ss:$8 sm:$0xf0]   ;;  %2777 = vst.msk [vmem:[#allocation0 + $0x24e] sm:$0xc] %vm2621_vm7, %v2772_v36  }
 0x25c   :  { %2779 = vst.msk [vmem:[#allocation0 + $0x25c] sm:$0x30] %vm2621_vm7, %v2772_v36   ;;  %2781 = vst.msk [vmem:[#allocation0 + $0x26a] sm:$0xc0] %vm2621_vm7, %v2772_v36   ;;  %v3773_v39 = vsel %vm4_vm0, %v6966_v54, %v6965_v45  ;;  %v3044_v36 = vpop.permute.xlu1 %3043  }
 0x25d   :  { %v6963_v20 = vld [vmem:[%s11810_s0 + $0x101] ss:$8 sm:$0xf]   ;;  %2758 = vst.msk [vmem:[#allocation0 + $0x200] sm:$0x3] %vm2621_vm7, %v2755_v9   ;;  %3774 = vrot.lane.b32.xlu1 %v3773_v39, %s7344_s2 }
 0x25e   :  { %v6964_v27 = vld [vmem:[%s11810_s0 + $0x101] ss:$8 sm:$0xf0]   ;;  %2760 = vst.msk [vmem:[#allocation0 + $0x20e] sm:$0xc] %vm2621_vm7, %v2755_v9  }
 0x25f   :  { %2762 = vst.msk [vmem:[#allocation0 + $0x21c] sm:$0x30] %vm2621_vm7, %v2755_v9   ;;  %2764 = vst.msk [vmem:[#allocation0 + $0x22a] sm:$0xc0] %vm2621_vm7, %v2755_v9   ;;  %v3756_v18 = vsel %vm4_vm0, %v6964_v27, %v6963_v20  ;;  %v3027_v9 = vpop.permute.xlu0 %3026  }
 0x260   :  { %v6969_v61 = vld [vmem:[%s11810_s0 + $0x1c1] ss:$8 sm:$0xf]   ;;  %2809 = vst.msk [vmem:[#allocation0 + $0x2c0] sm:$0x3] %vm2621_vm7, %v2806_v48   ;;  %3757 = vrot.lane.b32.xlu0 %v3756_v18, %s7344_s2 }
 0x261   :  { %v6970_v6 = vld [vmem:[%s11810_s0 + $0x1c1] ss:$8 sm:$0xf0]   ;;  %2811 = vst.msk [vmem:[#allocation0 + $0x2ce] sm:$0xc] %vm2621_vm7, %v2806_v48  }
 0x262   :  { %2813 = vst.msk [vmem:[#allocation0 + $0x2dc] sm:$0x30] %vm2621_vm7, %v2806_v48   ;;  %2815 = vst.msk [vmem:[#allocation0 + $0x2ea] sm:$0xc0] %vm2621_vm7, %v2806_v48   ;;  %v3807_v38 = vsel %vm4_vm0, %v6970_v6, %v6969_v61  ;;  %v3078_v48 = vpop.permute.xlu1 %3077  }
 0x263   :  { %v6967_v34 = vld [vmem:[%s11810_s0 + $0x181] ss:$8 sm:$0xf]   ;;  %2792 = vst.msk [vmem:[#allocation0 + $0x280] sm:$0x3] %vm2621_vm7, %v2789_v30   ;;  %3808 = vrot.lane.b32.xlu1 %v3807_v38, %s7344_s2 }
 0x264   :  { %v6968_v37 = vld [vmem:[%s11810_s0 + $0x181] ss:$8 sm:$0xf0]   ;;  %2794 = vst.msk [vmem:[#allocation0 + $0x28e] sm:$0xc] %vm2621_vm7, %v2789_v30  }
 0x265   :  { %2796 = vst.msk [vmem:[#allocation0 + $0x29c] sm:$0x30] %vm2621_vm7, %v2789_v30   ;;  %2798 = vst.msk [vmem:[#allocation0 + $0x2aa] sm:$0xc0] %vm2621_vm7, %v2789_v30   ;;  %v3790_v44 = vsel %vm4_vm0, %v6968_v37, %v6967_v34  ;;  %v3061_v30 = vpop.permute.xlu0 %3060  }
 0x266   :  { %v6973_v41 = vld [vmem:[%s11810_s0 + $0x241] ss:$8 sm:$0xf]   ;;  %2843 = vst.msk [vmem:[#allocation0 + $0x340] sm:$0x3] %vm2621_vm7, %v2840_v40   ;;  %3791 = vrot.lane.b32.xlu0 %v3790_v44, %s7344_s2 }
 0x267   :  { %v6974_v42 = vld [vmem:[%s11810_s0 + $0x241] ss:$8 sm:$0xf0]   ;;  %2845 = vst.msk [vmem:[#allocation0 + $0x34e] sm:$0xc] %vm2621_vm7, %v2840_v40  }
 0x268   :  { %2847 = vst.msk [vmem:[#allocation0 + $0x35c] sm:$0x30] %vm2621_vm7, %v2840_v40   ;;  %2849 = vst.msk [vmem:[#allocation0 + $0x36a] sm:$0xc0] %vm2621_vm7, %v2840_v40   ;;  %v3841_v53 = vsel %vm4_vm0, %v6974_v42, %v6973_v41  ;;  %v3112_v40 = vpop.permute.xlu1 %3111  }
 0x269   :  { %v6971_v49 = vld [vmem:[%s11810_s0 + $0x201] ss:$8 sm:$0xf]   ;;  %2826 = vst.msk [vmem:[#allocation0 + $0x300] sm:$0x3] %vm2621_vm7, %v2823_v46   ;;  %3842 = vrot.lane.b32.xlu1 %v3841_v53, %s7344_s2 }
 0x26a   :  { %v6972_v51 = vld [vmem:[%s11810_s0 + $0x201] ss:$8 sm:$0xf0]   ;;  %2828 = vst.msk [vmem:[#allocation0 + $0x30e] sm:$0xc] %vm2621_vm7, %v2823_v46  }
 0x26b   :  { %2830 = vst.msk [vmem:[#allocation0 + $0x31c] sm:$0x30] %vm2621_vm7, %v2823_v46   ;;  %2832 = vst.msk [vmem:[#allocation0 + $0x32a] sm:$0xc0] %vm2621_vm7, %v2823_v46   ;;  %v3824_v59 = vsel %vm4_vm0, %v6972_v51, %v6971_v49  ;;  %v3095_v46 = vpop.permute.xlu0 %3094  }
 0x26c   :  { %v6977_v56 = vld [vmem:[%s11810_s0 + $0x2c1] ss:$8 sm:$0xf]   ;;  %2877 = vst.msk [vmem:[#allocation0 + $0x3c0] sm:$0x3] %vm2621_vm7, %v2874_v55   ;;  %3825 = vrot.lane.b32.xlu0 %v3824_v59, %s7344_s2 }
 0x26d   :  { %v6978_v58 = vld [vmem:[%s11810_s0 + $0x2c1] ss:$8 sm:$0xf0]   ;;  %2879 = vst.msk [vmem:[#allocation0 + $0x3ce] sm:$0xc] %vm2621_vm7, %v2874_v55  }
 0x26e   :  { %2881 = vst.msk [vmem:[#allocation0 + $0x3dc] sm:$0x30] %vm2621_vm7, %v2874_v55   ;;  %2883 = vst.msk [vmem:[#allocation0 + $0x3ea] sm:$0xc0] %vm2621_vm7, %v2874_v55   ;;  %v3875_v5 = vsel %vm4_vm0, %v6978_v58, %v6977_v56  ;;  %v3142_v55 = vpop.permute.xlu1 %3141  }
 0x26f   :  { %v6975_v63 = vld [vmem:[%s11810_s0 + $0x281] ss:$8 sm:$0xf]   ;;  %2860 = vst.msk [vmem:[#allocation0 + $0x380] sm:$0x3] %vm2621_vm7, %v2857_v62   ;;  %3876 = vrot.lane.b32.xlu1 %v3875_v5, %s7344_s2 }
 0x270   :  { %v6976_v4 = vld [vmem:[%s11810_s0 + $0x281] ss:$8 sm:$0xf0]   ;;  %2862 = vst.msk [vmem:[#allocation0 + $0x38e] sm:$0xc] %vm2621_vm7, %v2857_v62  }
 0x271   :  { %2864 = vst.msk [vmem:[#allocation0 + $0x39c] sm:$0x30] %vm2621_vm7, %v2857_v62   ;;  %2866 = vst.msk [vmem:[#allocation0 + $0x3aa] sm:$0xc0] %vm2621_vm7, %v2857_v62   ;;  %v3858_v13 = vsel %vm4_vm0, %v6976_v4, %v6975_v63  ;;  %v3129_v62 = vpop.permute.xlu0 %3128  }
 0x272   :  { %v6981_v10 = vld [vmem:[%s11810_s0 + $0x341] ss:$8 sm:$0xf]   ;;  %2911 = vst.msk [vmem:[#allocation0 + $0x440] sm:$0x3] %vm2621_vm7, %v2908_v8   ;;  %3859 = vrot.lane.b32.xlu0 %v3858_v13, %s7344_s2 }
 0x273   :  { %v6982_v11 = vld [vmem:[%s11810_s0 + $0x341] ss:$8 sm:$0xf0]   ;;  %2913 = vst.msk [vmem:[#allocation0 + $0x44e] sm:$0xc] %vm2621_vm7, %v2908_v8  }
 0x274   :  { %2915 = vst.msk [vmem:[#allocation0 + $0x45c] sm:$0x30] %vm2621_vm7, %v2908_v8   ;;  %2917 = vst.msk [vmem:[#allocation0 + $0x46a] sm:$0xc0] %vm2621_vm7, %v2908_v8   ;;  %v3909_v22 = vsel %vm4_vm0, %v6982_v11, %v6981_v10  ;;  %v3172_v8 = vpop.permute.xlu1 %3171  }
 0x275   :  { %v6979_v16 = vld [vmem:[%s11810_s0 + $0x301] ss:$8 sm:$0xf]   ;;  %2894 = vst.msk [vmem:[#allocation0 + $0x400] sm:$0x3] %vm2621_vm7, %v2891_v14   ;;  %3910 = vrot.lane.b32.xlu1 %v3909_v22, %s7344_s2 }
 0x276   :  { %v6980_v17 = vld [vmem:[%s11810_s0 + $0x301] ss:$8 sm:$0xf0]   ;;  %2896 = vst.msk [vmem:[#allocation0 + $0x40e] sm:$0xc] %vm2621_vm7, %v2891_v14  }
 0x277   :  { %2898 = vst.msk [vmem:[#allocation0 + $0x41c] sm:$0x30] %vm2621_vm7, %v2891_v14   ;;  %2900 = vst.msk [vmem:[#allocation0 + $0x42a] sm:$0xc0] %vm2621_vm7, %v2891_v14   ;;  %v3892_v26 = vsel %vm4_vm0, %v6980_v17, %v6979_v16  ;;  %v3155_v14 = vpop.permute.xlu0 %3154  }
 0x278   :  { %v6985_v24 = vld [vmem:[%s11810_s0 + $0x3c1] ss:$8 sm:$0xf]   ;;  %2945 = vst.msk [vmem:[#allocation0 + $0x4c0] sm:$0x3] %vm2621_vm7, %v2942_v23   ;;  %3893 = vrot.lane.b32.xlu0 %v3892_v26, %s7344_s2 }
 0x279   :  { %v6986_v25 = vld [vmem:[%s11810_s0 + $0x3c1] ss:$8 sm:$0xf0]   ;;  %2947 = vst.msk [vmem:[#allocation0 + $0x4ce] sm:$0xc] %vm2621_vm7, %v2942_v23  }
 0x27a   :  { %2949 = vst.msk [vmem:[#allocation0 + $0x4dc] sm:$0x30] %vm2621_vm7, %v2942_v23   ;;  %2951 = vst.msk [vmem:[#allocation0 + $0x4ea] sm:$0xc0] %vm2621_vm7, %v2942_v23   ;;  %v3943_v33 = vsel %vm4_vm0, %v6986_v25, %v6985_v24  ;;  %v3206_v23 = vpop.permute.xlu1 %3205  }
 0x27b   :  { %v6983_v31 = vld [vmem:[%s11810_s0 + $0x381] ss:$8 sm:$0xf]   ;;  %2928 = vst.msk [vmem:[#allocation0 + $0x480] sm:$0x3] %vm2621_vm7, %v2925_v1   ;;  %3944 = vrot.lane.b32.xlu1 %v3943_v33, %s7344_s2  ;;  %v3189_v25 = vpop.permute.xlu0 %3188  }
 0x27c   :  { %v6984_v32 = vld [vmem:[%s11810_s0 + $0x381] ss:$8 sm:$0xf0]   ;;  %2930 = vst.msk [vmem:[#allocation0 + $0x48e] sm:$0xc] %vm2621_vm7, %v2925_v1  }
 0x27d   :  { %2932 = vst.msk [vmem:[#allocation0 + $0x49c] sm:$0x30] %vm2621_vm7, %v2925_v1   ;;  %2934 = vst.msk [vmem:[#allocation0 + $0x4aa] sm:$0xc0] %vm2621_vm7, %v2925_v1   ;;  %v3926_v2 = vsel %vm4_vm0, %v6984_v32, %v6983_v31 }
 0x27e   :  { %v6989_v52 = vld [vmem:[%s11810_s0 + $0x441] ss:$8 sm:$0xf]   ;;  %2979 = vst.msk [vmem:[#allocation0 + $0x540] sm:$0x3] %vm2621_vm7, %v2976_v47   ;;  %3927 = vrot.lane.b32.xlu0 %v3926_v2, %s7344_s2  ;;  %v3240_v32 = vpop.permute.xlu1 %3239  }
 0x27f   :  { %v6990_v57 = vld [vmem:[%s11810_s0 + $0x441] ss:$8 sm:$0xf0]   ;;  %2981 = vst.msk [vmem:[#allocation0 + $0x54e] sm:$0xc] %vm2621_vm7, %v2976_v47  }
 0x280   :  { %2983 = vst.msk [vmem:[#allocation0 + $0x55c] sm:$0x30] %vm2621_vm7, %v2976_v47   ;;  %2985 = vst.msk [vmem:[#allocation0 + $0x56a] sm:$0xc0] %vm2621_vm7, %v2976_v47   ;;  %v3977_v29 = vsel %vm4_vm0, %v6990_v57, %v6989_v52  ;;  %v3223_v57 = vpop.permute.xlu0 %3222  }
 0x281   :  { %v6987_v15 = vld [vmem:[%s11810_s0 + $0x401] ss:$8 sm:$0xf]   ;;  %2962 = vst.msk [vmem:[#allocation0 + $0x500] sm:$0x3] %vm2621_vm7, %v2959_v7   ;;  %3978 = vrot.lane.b32.xlu1 %v3977_v29, %s7344_s2 }
 0x282   :  { %v6988_v21 = vld [vmem:[%s11810_s0 + $0x401] ss:$8 sm:$0xf0]   ;;  %2964 = vst.msk [vmem:[#allocation0 + $0x50e] sm:$0xc] %vm2621_vm7, %v2959_v7  }
 0x283   :  { %2966 = vst.msk [vmem:[#allocation0 + $0x51c] sm:$0x30] %vm2621_vm7, %v2959_v7   ;;  %2968 = vst.msk [vmem:[#allocation0 + $0x52a] sm:$0xc0] %vm2621_vm7, %v2959_v7   ;;  %v3960_v60 = vsel %vm4_vm0, %v6988_v21, %v6987_v15  ;;  %v3274_v21 = vpop.permute.xlu1 %3273  }
 0x284   :  { %v6993_v43 = vld [vmem:[%s11810_s0 + $0x4c1] ss:$8 sm:$0xf]   ;;  %3013 = vst.msk [vmem:[#allocation0 + $0x5c0] sm:$0x3] %vm2621_vm7, %v3010_v35   ;;  %3961 = vrot.lane.b32.xlu0 %v3960_v60, %s7344_s2 }
 0x285   :  { %v6994_v50 = vld [vmem:[%s11810_s0 + $0x4c1] ss:$8 sm:$0xf0]   ;;  %3015 = vst.msk [vmem:[#allocation0 + $0x5ce] sm:$0xc] %vm2621_vm7, %v3010_v35  }
 0x286   :  { %3017 = vst.msk [vmem:[#allocation0 + $0x5dc] sm:$0x30] %vm2621_vm7, %v3010_v35   ;;  %3019 = vst.msk [vmem:[#allocation0 + $0x5ea] sm:$0xc0] %vm2621_vm7, %v3010_v35   ;;  %v4011_v28 = vsel %vm4_vm0, %v6994_v50, %v6993_v43  ;;  %v3257_v50 = vpop.permute.xlu0 %3256  }
 0x287   :  { %v6991_v12 = vld [vmem:[%s11810_s0 + $0x481] ss:$8 sm:$0xf]   ;;  %2996 = vst.msk [vmem:[#allocation0 + $0x580] sm:$0x3] %vm2621_vm7, %v2993_v3   ;;  %4012 = vrot.lane.b32.xlu1 %v4011_v28, %s7344_s2 }
 0x288   :  { %v6992_v19 = vld [vmem:[%s11810_s0 + $0x481] ss:$8 sm:$0xf0]   ;;  %2998 = vst.msk [vmem:[#allocation0 + $0x58e] sm:$0xc] %vm2621_vm7, %v2993_v3  }
 0x289   :  { %3000 = vst.msk [vmem:[#allocation0 + $0x59c] sm:$0x30] %vm2621_vm7, %v2993_v3   ;;  %3002 = vst.msk [vmem:[#allocation0 + $0x5aa] sm:$0xc0] %vm2621_vm7, %v2993_v3   ;;  %v3994_v0 = vsel %vm4_vm0, %v6992_v19, %v6991_v12  ;;  %v3308_v19 = vpop.permute.xlu1 %3307  }
 0x28a   :  { %v6997_v45 = vld [vmem:[%s11810_s0 + $0x541] ss:$8 sm:$0xf]   ;;  %3047 = vst.msk [vmem:[#allocation0 + $0x640] sm:$0x3] %vm2621_vm7, %v3044_v36   ;;  %3995 = vrot.lane.b32.xlu0 %v3994_v0, %s7344_s2 }
 0x28b   :  { %v6998_v54 = vld [vmem:[%s11810_s0 + $0x541] ss:$8 sm:$0xf0]   ;;  %3049 = vst.msk [vmem:[#allocation0 + $0x64e] sm:$0xc] %vm2621_vm7, %v3044_v36  }
 0x28c   :  { %3051 = vst.msk [vmem:[#allocation0 + $0x65c] sm:$0x30] %vm2621_vm7, %v3044_v36   ;;  %3053 = vst.msk [vmem:[#allocation0 + $0x66a] sm:$0xc0] %vm2621_vm7, %v3044_v36   ;;  %v4045_v39 = vsel %vm4_vm0, %v6998_v54, %v6997_v45  ;;  %v3291_v54 = vpop.permute.xlu0 %3290  }
 0x28d   :  { %v6995_v20 = vld [vmem:[%s11810_s0 + $0x501] ss:$8 sm:$0xf]   ;;  %3030 = vst.msk [vmem:[#allocation0 + $0x600] sm:$0x3] %vm2621_vm7, %v3027_v9   ;;  %4046 = vrot.lane.b32.xlu1 %v4045_v39, %s7344_s2 }
 0x28e   :  { %v6996_v27 = vld [vmem:[%s11810_s0 + $0x501] ss:$8 sm:$0xf0]   ;;  %3032 = vst.msk [vmem:[#allocation0 + $0x60e] sm:$0xc] %vm2621_vm7, %v3027_v9  }
 0x28f   :  { %3034 = vst.msk [vmem:[#allocation0 + $0x61c] sm:$0x30] %vm2621_vm7, %v3027_v9   ;;  %3036 = vst.msk [vmem:[#allocation0 + $0x62a] sm:$0xc0] %vm2621_vm7, %v3027_v9   ;;  %v4028_v18 = vsel %vm4_vm0, %v6996_v27, %v6995_v20  ;;  %v3342_v27 = vpop.permute.xlu1 %3341  }
 0x290   :  { %v7001_v61 = vld [vmem:[%s11810_s0 + $0x5c1] ss:$8 sm:$0xf]   ;;  %3081 = vst.msk [vmem:[#allocation0 + $0x6c0] sm:$0x3] %vm2621_vm7, %v3078_v48   ;;  %4029 = vrot.lane.b32.xlu0 %v4028_v18, %s7344_s2 }
 0x291   :  { %v7002_v6 = vld [vmem:[%s11810_s0 + $0x5c1] ss:$8 sm:$0xf0]   ;;  %3083 = vst.msk [vmem:[#allocation0 + $0x6ce] sm:$0xc] %vm2621_vm7, %v3078_v48  }
 0x292   :  { %3085 = vst.msk [vmem:[#allocation0 + $0x6dc] sm:$0x30] %vm2621_vm7, %v3078_v48   ;;  %3087 = vst.msk [vmem:[#allocation0 + $0x6ea] sm:$0xc0] %vm2621_vm7, %v3078_v48   ;;  %v4079_v38 = vsel %vm4_vm0, %v7002_v6, %v7001_v61  ;;  %v3325_v6 = vpop.permute.xlu0 %3324  }
 0x293   :  { %v6999_v34 = vld [vmem:[%s11810_s0 + $0x581] ss:$8 sm:$0xf]   ;;  %3064 = vst.msk [vmem:[#allocation0 + $0x680] sm:$0x3] %vm2621_vm7, %v3061_v30   ;;  %4080 = vrot.lane.b32.xlu1 %v4079_v38, %s7344_s2 }
 0x294   :  { %v7000_v37 = vld [vmem:[%s11810_s0 + $0x581] ss:$8 sm:$0xf0]   ;;  %3066 = vst.msk [vmem:[#allocation0 + $0x68e] sm:$0xc] %vm2621_vm7, %v3061_v30  }
 0x295   :  { %3068 = vst.msk [vmem:[#allocation0 + $0x69c] sm:$0x30] %vm2621_vm7, %v3061_v30   ;;  %3070 = vst.msk [vmem:[#allocation0 + $0x6aa] sm:$0xc0] %vm2621_vm7, %v3061_v30   ;;  %v4062_v44 = vsel %vm4_vm0, %v7000_v37, %v6999_v34  ;;  %v3376_v37 = vpop.permute.xlu1 %3375  }
 0x296   :  { %v7005_v41 = vld [vmem:[%s11810_s0 + $0x641] ss:$8 sm:$0xf]   ;;  %3115 = vst.msk [vmem:[#allocation0 + $0x740] sm:$0x3] %vm2621_vm7, %v3112_v40   ;;  %4063 = vrot.lane.b32.xlu0 %v4062_v44, %s7344_s2 }
 0x297   :  { %v7006_v42 = vld [vmem:[%s11810_s0 + $0x641] ss:$8 sm:$0xf0]   ;;  %3117 = vst.msk [vmem:[#allocation0 + $0x74e] sm:$0xc] %vm2621_vm7, %v3112_v40  }
 0x298   :  { %3119 = vst.msk [vmem:[#allocation0 + $0x75c] sm:$0x30] %vm2621_vm7, %v3112_v40   ;;  %3121 = vst.msk [vmem:[#allocation0 + $0x76a] sm:$0xc0] %vm2621_vm7, %v3112_v40   ;;  %v4113_v53 = vsel %vm4_vm0, %v7006_v42, %v7005_v41  ;;  %v3359_v42 = vpop.permute.xlu0 %3358  }
 0x299   :  { %v7003_v49 = vld [vmem:[%s11810_s0 + $0x601] ss:$8 sm:$0xf]   ;;  %3098 = vst.msk [vmem:[#allocation0 + $0x700] sm:$0x3] %vm2621_vm7, %v3095_v46   ;;  %4114 = vrot.lane.b32.xlu1 %v4113_v53, %s7344_s2 }
 0x29a   :  { %v7004_v51 = vld [vmem:[%s11810_s0 + $0x601] ss:$8 sm:$0xf0]   ;;  %3100 = vst.msk [vmem:[#allocation0 + $0x70e] sm:$0xc] %vm2621_vm7, %v3095_v46  }
 0x29b   :  { %3102 = vst.msk [vmem:[#allocation0 + $0x71c] sm:$0x30] %vm2621_vm7, %v3095_v46   ;;  %3104 = vst.msk [vmem:[#allocation0 + $0x72a] sm:$0xc0] %vm2621_vm7, %v3095_v46   ;;  %v4096_v59 = vsel %vm4_vm0, %v7004_v51, %v7003_v49  ;;  %v3410_v51 = vpop.permute.xlu1 %3409  }
 0x29c   :  { %v7009_v56 = vld [vmem:[%s11810_s0 + $0x6c1] ss:$8 sm:$0xf]   ;;  %3145 = vst.msk [vmem:[#allocation0 + $0x7c0] sm:$0x3] %vm2621_vm7, %v3142_v55   ;;  %4097 = vrot.lane.b32.xlu0 %v4096_v59, %s7344_s2 }
 0x29d   :  { %v7010_v58 = vld [vmem:[%s11810_s0 + $0x6c1] ss:$8 sm:$0xf0]   ;;  %3147 = vst.msk [vmem:[#allocation0 + $0x7ce] sm:$0xc] %vm2621_vm7, %v3142_v55  }
 0x29e   :  { %v7007_v63 = vld [vmem:[%s11810_s0 + $0x681] ss:$8 sm:$0xf]   ;;  %3132 = vst.msk [vmem:[#allocation0 + $0x780] sm:$0x3] %vm2621_vm7, %v3129_v62   ;;  %v4147_v5 = vsel %vm4_vm0, %v7010_v58, %v7009_v56  ;;  %v3393_v58 = vpop.permute.xlu0 %3392  }
 0x29f   :  { %v7008_v4 = vld [vmem:[%s11810_s0 + $0x681] ss:$8 sm:$0xf0]   ;;  %3134 = vst.msk [vmem:[#allocation0 + $0x78e] sm:$0xc] %vm2621_vm7, %v3129_v62   ;;  %4148 = vrot.lane.b32.xlu1 %v4147_v5, %s7344_s2 }
 0x2a0   :  { %3136 = vst.msk [vmem:[#allocation0 + $0x79c] sm:$0x30] %vm2621_vm7, %v3129_v62   ;;  %3138 = vst.msk [vmem:[#allocation0 + $0x7aa] sm:$0xc0] %vm2621_vm7, %v3129_v62   ;;  %v4130_v13 = vsel %vm4_vm0, %v7008_v4, %v7007_v63  ;;  %v3444_v4 = vpop.permute.xlu1 %3443  }
 0x2a1   :  { %v7013_v10 = vld [vmem:[%s11810_s0 + $0x741] ss:$8 sm:$0xf]   ;;  %3175 = vst.msk [vmem:[#allocation0 + $0x48] sm:$0x3] %vm3156_vm8, %v3172_v8   ;;  %4131 = vrot.lane.b32.xlu0 %v4130_v13, %s7344_s2 }
 0x2a2   :  { %v7014_v11 = vld [vmem:[%s11810_s0 + $0x741] ss:$8 sm:$0xf0]   ;;  %3177 = vst.msk [vmem:[#allocation0 + $0x56] sm:$0xc] %vm3156_vm8, %v3172_v8  }
 0x2a3   :  { %3179 = vst.msk [vmem:[#allocation0 + $0x64] sm:$0x30] %vm3156_vm8, %v3172_v8   ;;  %3181 = vst.msk [vmem:[#allocation0 + $0x72] sm:$0xc0] %vm3156_vm8, %v3172_v8   ;;  %v4181_v22 = vsel %vm4_vm0, %v7014_v11, %v7013_v10  ;;  %v3427_v11 = vpop.permute.xlu0 %3426  }
 0x2a4   :  { %v7011_v16 = vld [vmem:[%s11810_s0 + $0x701] ss:$8 sm:$0xf]   ;;  %3158 = vst.msk [vmem:[#allocation0 + $0x8] sm:$0x3] %vm3156_vm8, %v3155_v14   ;;  %4182 = vrot.lane.b32.xlu1 %v4181_v22, %s7344_s2 }
 0x2a5   :  { %v7012_v17 = vld [vmem:[%s11810_s0 + $0x701] ss:$8 sm:$0xf0]   ;;  %3160 = vst.msk [vmem:[#allocation0 + $0x16] sm:$0xc] %vm3156_vm8, %v3155_v14  }
 0x2a6   :  { %3162 = vst.msk [vmem:[#allocation0 + $0x24] sm:$0x30] %vm3156_vm8, %v3155_v14   ;;  %3164 = vst.msk [vmem:[#allocation0 + $0x32] sm:$0xc0] %vm3156_vm8, %v3155_v14   ;;  %v4164_v24 = vsel %vm4_vm0, %v7012_v17, %v7011_v16  ;;  %v3478_v17 = vpop.permute.xlu1 %3477  }
 0x2a7   :  { %3209 = vst.msk [vmem:[#allocation0 + $0xc8] sm:$0x3] %vm3156_vm8, %v3206_v23   ;;  %3211 = vst.msk [vmem:[#allocation0 + $0xd6] sm:$0xc] %vm3156_vm8, %v3206_v23   ;;  %4165 = vrot.lane.b32.xlu0 %v4164_v24, %s7344_s2 }
 0x2a8   :  { %3213 = vst.msk [vmem:[#allocation0 + $0xe4] sm:$0x30] %vm3156_vm8, %v3206_v23   ;;  %3215 = vst.msk [vmem:[#allocation0 + $0xf2] sm:$0xc0] %vm3156_vm8, %v3206_v23  }
 0x2a9   :  { %v7015_v26 = vld [vmem:[%s11810_s0 + $0x781] ss:$8 sm:$0xf]   ;;  %3192 = vst.msk [vmem:[#allocation0 + $0x88] sm:$0x3] %vm3156_vm8, %v3189_v25  }
 0x2aa   :  { %v7016_v1 = vld [vmem:[%s11810_s0 + $0x781] ss:$8 sm:$0xf0]   ;;  %3194 = vst.msk [vmem:[#allocation0 + $0x96] sm:$0xc] %vm3156_vm8, %v3189_v25  }
 0x2ab   :  { %3196 = vst.msk [vmem:[#allocation0 + $0xa4] sm:$0x30] %vm3156_vm8, %v3189_v25   ;;  %3198 = vst.msk [vmem:[#allocation0 + $0xb2] sm:$0xc0] %vm3156_vm8, %v3189_v25   ;;  %v4198_v52 = vsel %vm4_vm0, %v7016_v1, %v7015_v26  ;;  %v3461_v25 = vpop.permute.xlu0 %3460  }
 0x2ac   :  { %v7017_v31 = vld [vmem:[%s11810_s0 + $0x7c1] ss:$8 sm:$0xf]   ;;  %v7020_v33 = vld [vmem:[%s11810_s0 + $0x45] ss:$8 sm:$0xf]   ;;  %4199 = vrot.lane.b32.xlu0 %v4198_v52, %s7344_s2 }
 0x2ad   :  { %v7021_v47 = vld [vmem:[%s11810_s0 + $0x45] ss:$8 sm:$0xf0]   ;;  %3243 = vst.msk [vmem:[#allocation0 + $0x148] sm:$0x3] %vm3156_vm8, %v3240_v32   ;;  %4212 = vrot.lane.b32.xlu1 %v7017_v31, %s7344_s2 }
 0x2ae   :  { %3245 = vst.msk [vmem:[#allocation0 + $0x156] sm:$0xc] %vm3156_vm8, %v3240_v32   ;;  %3247 = vst.msk [vmem:[#allocation0 + $0x164] sm:$0x30] %vm3156_vm8, %v3240_v32   ;;  %v4241_v15 = vsel %vm4_vm0, %v7021_v47, %v7020_v33 }
 0x2af   :  { %3249 = vst.msk [vmem:[#allocation0 + $0x172] sm:$0xc0] %vm3156_vm8, %v3240_v32   ;;  %v7018_v2 = vld [vmem:[%s11810_s0 + $0x5] ss:$8 sm:$0xf]   ;;  %v3512_v32 = vpop.permute.xlu1 %3511  }
 0x2b0   :  { %v7019_v7 = vld [vmem:[%s11810_s0 + $0x5] ss:$8 sm:$0xf0]   ;;  %3226 = vst.msk [vmem:[#allocation0 + $0x108] sm:$0x3] %vm3156_vm8, %v3223_v57  }
 0x2b1   :  { %3228 = vst.msk [vmem:[#allocation0 + $0x116] sm:$0xc] %vm3156_vm8, %v3223_v57   ;;  %3230 = vst.msk [vmem:[#allocation0 + $0x124] sm:$0x30] %vm3156_vm8, %v3223_v57   ;;  %v4224_v43 = vsel %vm4_vm0, %v7019_v7, %v7018_v2  ;;  %4242 = vrot.lane.b32.xlu1 %v4241_v15, %s7345_s15 }
 0x2b2   :  { %3232 = vst.msk [vmem:[#allocation0 + $0x132] sm:$0xc0] %vm3156_vm8, %v3223_v57   ;;  %v7024_v29 = vld [vmem:[%s11810_s0 + $0xc5] ss:$8 sm:$0xf]   ;;  %4225 = vrot.lane.b32.xlu0 %v4224_v43, %s7345_s15  ;;  %v3495_v57 = vpop.permute.xlu0 %3494  }
 0x2b3   :  { %v7025_v35 = vld [vmem:[%s11810_s0 + $0xc5] ss:$8 sm:$0xf0]   ;;  %3277 = vst.msk [vmem:[#allocation0 + $0x1c8] sm:$0x3] %vm3156_vm8, %v3274_v21  }
 0x2b4   :  { %3279 = vst.msk [vmem:[#allocation0 + $0x1d6] sm:$0xc] %vm3156_vm8, %v3274_v21   ;;  %3281 = vst.msk [vmem:[#allocation0 + $0x1e4] sm:$0x30] %vm3156_vm8, %v3274_v21   ;;  %v4275_v12 = vsel %vm4_vm0, %v7025_v35, %v7024_v29 }
 0x2b5   :  { %3283 = vst.msk [vmem:[#allocation0 + $0x1f2] sm:$0xc0] %vm3156_vm8, %v3274_v21   ;;  %v7022_v60 = vld [vmem:[%s11810_s0 + $0x85] ss:$8 sm:$0xf]   ;;  %4276 = vrot.lane.b32.xlu1 %v4275_v12, %s7345_s15  ;;  %v3546_v21 = vpop.permute.xlu1 %3545  }
 0x2b6   :  { %v7023_v3 = vld [vmem:[%s11810_s0 + $0x85] ss:$8 sm:$0xf0]   ;;  %3260 = vst.msk [vmem:[#allocation0 + $0x188] sm:$0x3] %vm3156_vm8, %v3257_v50  }
 0x2b7   :  { %3262 = vst.msk [vmem:[#allocation0 + $0x196] sm:$0xc] %vm3156_vm8, %v3257_v50   ;;  %3264 = vst.msk [vmem:[#allocation0 + $0x1a4] sm:$0x30] %vm3156_vm8, %v3257_v50   ;;  %v4258_v45 = vsel %vm4_vm0, %v7023_v3, %v7022_v60 }
 0x2b8   :  { %3266 = vst.msk [vmem:[#allocation0 + $0x1b2] sm:$0xc0] %vm3156_vm8, %v3257_v50   ;;  %v7028_v28 = vld [vmem:[%s11810_s0 + $0x145] ss:$8 sm:$0xf]   ;;  %4259 = vrot.lane.b32.xlu0 %v4258_v45, %s7345_s15  ;;  %v3529_v50 = vpop.permute.xlu0 %3528  }
 0x2b9   :  { %v7029_v36 = vld [vmem:[%s11810_s0 + $0x145] ss:$8 sm:$0xf0]   ;;  %3311 = vst.msk [vmem:[#allocation0 + $0x248] sm:$0x3] %vm3156_vm8, %v3308_v19  }
 0x2ba   :  { %3313 = vst.msk [vmem:[#allocation0 + $0x256] sm:$0xc] %vm3156_vm8, %v3308_v19   ;;  %3315 = vst.msk [vmem:[#allocation0 + $0x264] sm:$0x30] %vm3156_vm8, %v3308_v19   ;;  %v4309_v20 = vsel %vm4_vm0, %v7029_v36, %v7028_v28 }
 0x2bb   :  { %3317 = vst.msk [vmem:[#allocation0 + $0x272] sm:$0xc0] %vm3156_vm8, %v3308_v19   ;;  %v7026_v0 = vld [vmem:[%s11810_s0 + $0x105] ss:$8 sm:$0xf]   ;;  %4310 = vrot.lane.b32.xlu1 %v4309_v20, %s7345_s15  ;;  %v3580_v19 = vpop.permute.xlu1 %3579  }
 0x2bc   :  { %v7027_v9 = vld [vmem:[%s11810_s0 + $0x105] ss:$8 sm:$0xf0]   ;;  %3294 = vst.msk [vmem:[#allocation0 + $0x208] sm:$0x3] %vm3156_vm8, %v3291_v54  }
 0x2bd   :  { %3296 = vst.msk [vmem:[#allocation0 + $0x216] sm:$0xc] %vm3156_vm8, %v3291_v54   ;;  %3298 = vst.msk [vmem:[#allocation0 + $0x224] sm:$0x30] %vm3156_vm8, %v3291_v54   ;;  %v4292_v61 = vsel %vm4_vm0, %v7027_v9, %v7026_v0 }
 0x2be   :  { %3300 = vst.msk [vmem:[#allocation0 + $0x232] sm:$0xc0] %vm3156_vm8, %v3291_v54   ;;  %v7032_v39 = vld [vmem:[%s11810_s0 + $0x1c5] ss:$8 sm:$0xf]   ;;  %4293 = vrot.lane.b32.xlu0 %v4292_v61, %s7345_s15  ;;  %v3563_v54 = vpop.permute.xlu0 %3562  }
 0x2bf   :  { %v7033_v48 = vld [vmem:[%s11810_s0 + $0x1c5] ss:$8 sm:$0xf0]   ;;  %3345 = vst.msk [vmem:[#allocation0 + $0x2c8] sm:$0x3] %vm3156_vm8, %v3342_v27  }
 0x2c0   :  { %3347 = vst.msk [vmem:[#allocation0 + $0x2d6] sm:$0xc] %vm3156_vm8, %v3342_v27   ;;  %3349 = vst.msk [vmem:[#allocation0 + $0x2e4] sm:$0x30] %vm3156_vm8, %v3342_v27   ;;  %v4343_v34 = vsel %vm4_vm0, %v7033_v48, %v7032_v39 }
 0x2c1   :  { %3351 = vst.msk [vmem:[#allocation0 + $0x2f2] sm:$0xc0] %vm3156_vm8, %v3342_v27   ;;  %v7030_v18 = vld [vmem:[%s11810_s0 + $0x185] ss:$8 sm:$0xf]   ;;  %4344 = vrot.lane.b32.xlu1 %v4343_v34, %s7345_s15  ;;  %v3614_v27 = vpop.permute.xlu1 %3613  }
 0x2c2   :  { %v7031_v30 = vld [vmem:[%s11810_s0 + $0x185] ss:$8 sm:$0xf0]   ;;  %3328 = vst.msk [vmem:[#allocation0 + $0x288] sm:$0x3] %vm3156_vm8, %v3325_v6  }
 0x2c3   :  { %3330 = vst.msk [vmem:[#allocation0 + $0x296] sm:$0xc] %vm3156_vm8, %v3325_v6   ;;  %3332 = vst.msk [vmem:[#allocation0 + $0x2a4] sm:$0x30] %vm3156_vm8, %v3325_v6   ;;  %v4326_v41 = vsel %vm4_vm0, %v7031_v30, %v7030_v18 }
 0x2c4   :  { %3334 = vst.msk [vmem:[#allocation0 + $0x2b2] sm:$0xc0] %vm3156_vm8, %v3325_v6   ;;  %v7036_v38 = vld [vmem:[%s11810_s0 + $0x245] ss:$8 sm:$0xf]   ;;  %4327 = vrot.lane.b32.xlu0 %v4326_v41, %s7345_s15  ;;  %v3597_v6 = vpop.permute.xlu0 %3596  }
 0x2c5   :  { %v7037_v40 = vld [vmem:[%s11810_s0 + $0x245] ss:$8 sm:$0xf0]   ;;  %3379 = vst.msk [vmem:[#allocation0 + $0x348] sm:$0x3] %vm3156_vm8, %v3376_v37  }
 0x2c6   :  { %3381 = vst.msk [vmem:[#allocation0 + $0x356] sm:$0xc] %vm3156_vm8, %v3376_v37   ;;  %3383 = vst.msk [vmem:[#allocation0 + $0x364] sm:$0x30] %vm3156_vm8, %v3376_v37   ;;  %v4377_v49 = vsel %vm4_vm0, %v7037_v40, %v7036_v38 }
 0x2c7   :  { %3385 = vst.msk [vmem:[#allocation0 + $0x372] sm:$0xc0] %vm3156_vm8, %v3376_v37   ;;  %v7034_v44 = vld [vmem:[%s11810_s0 + $0x205] ss:$8 sm:$0xf]   ;;  %4378 = vrot.lane.b32.xlu1 %v4377_v49, %s7345_s15  ;;  %v3648_v37 = vpop.permute.xlu1 %3647  }
 0x2c8   :  { %v7035_v46 = vld [vmem:[%s11810_s0 + $0x205] ss:$8 sm:$0xf0]   ;;  %3362 = vst.msk [vmem:[#allocation0 + $0x308] sm:$0x3] %vm3156_vm8, %v3359_v42  }
 0x2c9   :  { %3364 = vst.msk [vmem:[#allocation0 + $0x316] sm:$0xc] %vm3156_vm8, %v3359_v42   ;;  %3366 = vst.msk [vmem:[#allocation0 + $0x324] sm:$0x30] %vm3156_vm8, %v3359_v42   ;;  %v4360_v56 = vsel %vm4_vm0, %v7035_v46, %v7034_v44 }
 0x2ca   :  { %3368 = vst.msk [vmem:[#allocation0 + $0x332] sm:$0xc0] %vm3156_vm8, %v3359_v42   ;;  %v7040_v53 = vld [vmem:[%s11810_s0 + $0x2c5] ss:$8 sm:$0xf]   ;;  %4361 = vrot.lane.b32.xlu0 %v4360_v56, %s7345_s15  ;;  %v3631_v42 = vpop.permute.xlu0 %3630  }
 0x2cb   :  { %v7041_v55 = vld [vmem:[%s11810_s0 + $0x2c5] ss:$8 sm:$0xf0]   ;;  %3413 = vst.msk [vmem:[#allocation0 + $0x3c8] sm:$0x3] %vm3156_vm8, %v3410_v51  }
 0x2cc   :  { %3415 = vst.msk [vmem:[#allocation0 + $0x3d6] sm:$0xc] %vm3156_vm8, %v3410_v51   ;;  %3417 = vst.msk [vmem:[#allocation0 + $0x3e4] sm:$0x30] %vm3156_vm8, %v3410_v51   ;;  %v4411_v63 = vsel %vm4_vm0, %v7041_v55, %v7040_v53 }
 0x2cd   :  { %3419 = vst.msk [vmem:[#allocation0 + $0x3f2] sm:$0xc0] %vm3156_vm8, %v3410_v51   ;;  %v7038_v59 = vld [vmem:[%s11810_s0 + $0x285] ss:$8 sm:$0xf]   ;;  %4412 = vrot.lane.b32.xlu1 %v4411_v63, %s7345_s15  ;;  %v3678_v51 = vpop.permute.xlu1 %3677  }
 0x2ce   :  { %v7039_v62 = vld [vmem:[%s11810_s0 + $0x285] ss:$8 sm:$0xf0]   ;;  %3396 = vst.msk [vmem:[#allocation0 + $0x388] sm:$0x3] %vm3156_vm8, %v3393_v58  }
 0x2cf   :  { %3398 = vst.msk [vmem:[#allocation0 + $0x396] sm:$0xc] %vm3156_vm8, %v3393_v58   ;;  %3400 = vst.msk [vmem:[#allocation0 + $0x3a4] sm:$0x30] %vm3156_vm8, %v3393_v58   ;;  %v4394_v10 = vsel %vm4_vm0, %v7039_v62, %v7038_v59 }
 0x2d0   :  { %3402 = vst.msk [vmem:[#allocation0 + $0x3b2] sm:$0xc0] %vm3156_vm8, %v3393_v58   ;;  %v7044_v5 = vld [vmem:[%s11810_s0 + $0x345] ss:$8 sm:$0xf]   ;;  %4395 = vrot.lane.b32.xlu0 %v4394_v10, %s7345_s15  ;;  %v3665_v58 = vpop.permute.xlu0 %3664  }
 0x2d1   :  { %v7045_v8 = vld [vmem:[%s11810_s0 + $0x345] ss:$8 sm:$0xf0]   ;;  %3447 = vst.msk [vmem:[#allocation0 + $0x448] sm:$0x3] %vm3156_vm8, %v3444_v4  }
 0x2d2   :  { %3449 = vst.msk [vmem:[#allocation0 + $0x456] sm:$0xc] %vm3156_vm8, %v3444_v4   ;;  %3451 = vst.msk [vmem:[#allocation0 + $0x464] sm:$0x30] %vm3156_vm8, %v3444_v4   ;;  %v4445_v16 = vsel %vm4_vm0, %v7045_v8, %v7044_v5 }
 0x2d3   :  { %3453 = vst.msk [vmem:[#allocation0 + $0x472] sm:$0xc0] %vm3156_vm8, %v3444_v4   ;;  %v7042_v13 = vld [vmem:[%s11810_s0 + $0x305] ss:$8 sm:$0xf]   ;;  %4446 = vrot.lane.b32.xlu1 %v4445_v16, %s7345_s15  ;;  %v3707_v4 = vpop.permute.xlu1 %3706  }
 0x2d4   :  { %v7043_v14 = vld [vmem:[%s11810_s0 + $0x305] ss:$8 sm:$0xf0]   ;;  %3430 = vst.msk [vmem:[#allocation0 + $0x408] sm:$0x3] %vm3156_vm8, %v3427_v11  }
 0x2d5   :  { %3432 = vst.msk [vmem:[#allocation0 + $0x416] sm:$0xc] %vm3156_vm8, %v3427_v11   ;;  %3434 = vst.msk [vmem:[#allocation0 + $0x424] sm:$0x30] %vm3156_vm8, %v3427_v11   ;;  %v4428_v24 = vsel %vm4_vm0, %v7043_v14, %v7042_v13 }
 0x2d6   :  { %3436 = vst.msk [vmem:[#allocation0 + $0x432] sm:$0xc0] %vm3156_vm8, %v3427_v11   ;;  %v7048_v22 = vld [vmem:[%s11810_s0 + $0x3c5] ss:$8 sm:$0xf]   ;;  %4429 = vrot.lane.b32.xlu0 %v4428_v24, %s7345_s15  ;;  %v3691_v11 = vpop.permute.xlu0 %3690  }
 0x2d7   :  { %v7049_v23 = vld [vmem:[%s11810_s0 + $0x3c5] ss:$8 sm:$0xf0]   ;;  %3481 = vst.msk [vmem:[#allocation0 + $0x4c8] sm:$0x3] %vm3156_vm8, %v3478_v17  }
 0x2d8   :  { %3483 = vst.msk [vmem:[#allocation0 + $0x4d6] sm:$0xc] %vm3156_vm8, %v3478_v17   ;;  %3485 = vst.msk [vmem:[#allocation0 + $0x4e4] sm:$0x30] %vm3156_vm8, %v3478_v17   ;;  %v4479_v31 = vsel %vm4_vm0, %v7049_v23, %v7048_v22 }
 0x2d9   :  { %3487 = vst.msk [vmem:[#allocation0 + $0x4f2] sm:$0xc0] %vm3156_vm8, %v3478_v17   ;;  %v7046_v26 = vld [vmem:[%s11810_s0 + $0x385] ss:$8 sm:$0xf]   ;;  %4480 = vrot.lane.b32.xlu1 %v4479_v31, %s7345_s15  ;;  %v3741_v17 = vpop.permute.xlu1 %3740  }
 0x2da   :  { %v7047_v1 = vld [vmem:[%s11810_s0 + $0x385] ss:$8 sm:$0xf0]   ;;  %3464 = vst.msk [vmem:[#allocation0 + $0x488] sm:$0x3] %vm3156_vm8, %v3461_v25   ;;  %v3724_v23 = vpop.permute.xlu0 %3723  }
 0x2db   :  { %3466 = vst.msk [vmem:[#allocation0 + $0x496] sm:$0xc] %vm3156_vm8, %v3461_v25   ;;  %3468 = vst.msk [vmem:[#allocation0 + $0x4a4] sm:$0x30] %vm3156_vm8, %v3461_v25   ;;  %v4462_v52 = vsel %vm4_vm0, %v7047_v1, %v7046_v26 }
 0x2dc   :  { %3470 = vst.msk [vmem:[#allocation0 + $0x4b2] sm:$0xc0] %vm3156_vm8, %v3461_v25   ;;  %v7052_v33 = vld [vmem:[%s11810_s0 + $0x445] ss:$8 sm:$0xf]   ;;  %4463 = vrot.lane.b32.xlu0 %v4462_v52, %s7345_s15 }
 0x2dd   :  { %v7053_v47 = vld [vmem:[%s11810_s0 + $0x445] ss:$8 sm:$0xf0]   ;;  %3515 = vst.msk [vmem:[#allocation0 + $0x548] sm:$0x3] %vm3156_vm8, %v3512_v32  }
 0x2de   :  { %3517 = vst.msk [vmem:[#allocation0 + $0x556] sm:$0xc] %vm3156_vm8, %v3512_v32   ;;  %3519 = vst.msk [vmem:[#allocation0 + $0x564] sm:$0x30] %vm3156_vm8, %v3512_v32   ;;  %v4513_v15 = vsel %vm4_vm0, %v7053_v47, %v7052_v33  ;;  %v3775_v33 = vpop.permute.xlu1 %3774  }
 0x2df   :  { %3521 = vst.msk [vmem:[#allocation0 + $0x572] sm:$0xc0] %vm3156_vm8, %v3512_v32   ;;  %v7050_v2 = vld [vmem:[%s11810_s0 + $0x405] ss:$8 sm:$0xf]   ;;  %4514 = vrot.lane.b32.xlu1 %v4513_v15, %s7345_s15  ;;  %v3758_v15 = vpop.permute.xlu0 %3757  }
 0x2e0   :  { %v7051_v7 = vld [vmem:[%s11810_s0 + $0x405] ss:$8 sm:$0xf0]   ;;  %3498 = vst.msk [vmem:[#allocation0 + $0x508] sm:$0x3] %vm3156_vm8, %v3495_v57  }
 0x2e1   :  { %3500 = vst.msk [vmem:[#allocation0 + $0x516] sm:$0xc] %vm3156_vm8, %v3495_v57   ;;  %3502 = vst.msk [vmem:[#allocation0 + $0x524] sm:$0x30] %vm3156_vm8, %v3495_v57   ;;  %v4496_v43 = vsel %vm4_vm0, %v7051_v7, %v7050_v2 }
 0x2e2   :  { %3504 = vst.msk [vmem:[#allocation0 + $0x532] sm:$0xc0] %vm3156_vm8, %v3495_v57   ;;  %v7056_v29 = vld [vmem:[%s11810_s0 + $0x4c5] ss:$8 sm:$0xf]   ;;  %4497 = vrot.lane.b32.xlu0 %v4496_v43, %s7345_s15 }
 0x2e3   :  { %v7057_v35 = vld [vmem:[%s11810_s0 + $0x4c5] ss:$8 sm:$0xf0]   ;;  %3549 = vst.msk [vmem:[#allocation0 + $0x5c8] sm:$0x3] %vm3156_vm8, %v3546_v21  }
 0x2e4   :  { %3551 = vst.msk [vmem:[#allocation0 + $0x5d6] sm:$0xc] %vm3156_vm8, %v3546_v21   ;;  %3553 = vst.msk [vmem:[#allocation0 + $0x5e4] sm:$0x30] %vm3156_vm8, %v3546_v21   ;;  %v4547_v12 = vsel %vm4_vm0, %v7057_v35, %v7056_v29 }
 0x2e5   :  { %3555 = vst.msk [vmem:[#allocation0 + $0x5f2] sm:$0xc0] %vm3156_vm8, %v3546_v21   ;;  %v7054_v60 = vld [vmem:[%s11810_s0 + $0x485] ss:$8 sm:$0xf]   ;;  %4548 = vrot.lane.b32.xlu1 %v4547_v12, %s7345_s15 }
 0x2e6   :  { %v7055_v3 = vld [vmem:[%s11810_s0 + $0x485] ss:$8 sm:$0xf0]   ;;  %3532 = vst.msk [vmem:[#allocation0 + $0x588] sm:$0x3] %vm3156_vm8, %v3529_v50  }
 0x2e7   :  { %3534 = vst.msk [vmem:[#allocation0 + $0x596] sm:$0xc] %vm3156_vm8, %v3529_v50   ;;  %3536 = vst.msk [vmem:[#allocation0 + $0x5a4] sm:$0x30] %vm3156_vm8, %v3529_v50   ;;  %v4530_v45 = vsel %vm4_vm0, %v7055_v3, %v7054_v60 }
 0x2e8   :  { %3538 = vst.msk [vmem:[#allocation0 + $0x5b2] sm:$0xc0] %vm3156_vm8, %v3529_v50   ;;  %v7060_v28 = vld [vmem:[%s11810_s0 + $0x545] ss:$8 sm:$0xf]   ;;  %4531 = vrot.lane.b32.xlu0 %v4530_v45, %s7345_s15  ;;  %v3809_v50 = vpop.permute.xlu1 %3808  }
 0x2e9   :  { %v7061_v36 = vld [vmem:[%s11810_s0 + $0x545] ss:$8 sm:$0xf0]   ;;  %3583 = vst.msk [vmem:[#allocation0 + $0x648] sm:$0x3] %vm3156_vm8, %v3580_v19  }
 0x2ea   :  { %3585 = vst.msk [vmem:[#allocation0 + $0x656] sm:$0xc] %vm3156_vm8, %v3580_v19   ;;  %3587 = vst.msk [vmem:[#allocation0 + $0x664] sm:$0x30] %vm3156_vm8, %v3580_v19   ;;  %v4581_v20 = vsel %vm4_vm0, %v7061_v36, %v7060_v28  ;;  %v3792_v28 = vpop.permute.xlu0 %3791  }
 0x2eb   :  { %3589 = vst.msk [vmem:[#allocation0 + $0x672] sm:$0xc0] %vm3156_vm8, %v3580_v19   ;;  %v7058_v0 = vld [vmem:[%s11810_s0 + $0x505] ss:$8 sm:$0xf]   ;;  %4582 = vrot.lane.b32.xlu1 %v4581_v20, %s7345_s15 }
 0x2ec   :  { %v7059_v9 = vld [vmem:[%s11810_s0 + $0x505] ss:$8 sm:$0xf0]   ;;  %3566 = vst.msk [vmem:[#allocation0 + $0x608] sm:$0x3] %vm3156_vm8, %v3563_v54  }
 0x2ed   :  { %3568 = vst.msk [vmem:[#allocation0 + $0x616] sm:$0xc] %vm3156_vm8, %v3563_v54   ;;  %3570 = vst.msk [vmem:[#allocation0 + $0x624] sm:$0x30] %vm3156_vm8, %v3563_v54   ;;  %v4564_v61 = vsel %vm4_vm0, %v7059_v9, %v7058_v0  ;;  %v3843_v9 = vpop.permute.xlu1 %3842  }
 0x2ee   :  { %3572 = vst.msk [vmem:[#allocation0 + $0x632] sm:$0xc0] %vm3156_vm8, %v3563_v54   ;;  %v7064_v39 = vld [vmem:[%s11810_s0 + $0x5c5] ss:$8 sm:$0xf]   ;;  %4565 = vrot.lane.b32.xlu0 %v4564_v61, %s7345_s15  ;;  %v3826_v61 = vpop.permute.xlu0 %3825  }
 0x2ef   :  { %v7065_v48 = vld [vmem:[%s11810_s0 + $0x5c5] ss:$8 sm:$0xf0]   ;;  %3617 = vst.msk [vmem:[#allocation0 + $0x6c8] sm:$0x3] %vm3156_vm8, %v3614_v27  }
 0x2f0   :  { %3619 = vst.msk [vmem:[#allocation0 + $0x6d6] sm:$0xc] %vm3156_vm8, %v3614_v27   ;;  %3621 = vst.msk [vmem:[#allocation0 + $0x6e4] sm:$0x30] %vm3156_vm8, %v3614_v27   ;;  %v4615_v34 = vsel %vm4_vm0, %v7065_v48, %v7064_v39 }
 0x2f1   :  { %3623 = vst.msk [vmem:[#allocation0 + $0x6f2] sm:$0xc0] %vm3156_vm8, %v3614_v27   ;;  %v7062_v18 = vld [vmem:[%s11810_s0 + $0x585] ss:$8 sm:$0xf]   ;;  %4616 = vrot.lane.b32.xlu1 %v4615_v34, %s7345_s15 }
 0x2f2   :  { %v7063_v30 = vld [vmem:[%s11810_s0 + $0x585] ss:$8 sm:$0xf0]   ;;  %3600 = vst.msk [vmem:[#allocation0 + $0x688] sm:$0x3] %vm3156_vm8, %v3597_v6  }
 0x2f3   :  { %3602 = vst.msk [vmem:[#allocation0 + $0x696] sm:$0xc] %vm3156_vm8, %v3597_v6   ;;  %3604 = vst.msk [vmem:[#allocation0 + $0x6a4] sm:$0x30] %vm3156_vm8, %v3597_v6   ;;  %v4598_v41 = vsel %vm4_vm0, %v7063_v30, %v7062_v18 }
 0x2f4   :  { %3606 = vst.msk [vmem:[#allocation0 + $0x6b2] sm:$0xc0] %vm3156_vm8, %v3597_v6   ;;  %v7068_v38 = vld [vmem:[%s11810_s0 + $0x645] ss:$8 sm:$0xf]   ;;  %4599 = vrot.lane.b32.xlu0 %v4598_v41, %s7345_s15 }
 0x2f5   :  { %v7069_v40 = vld [vmem:[%s11810_s0 + $0x645] ss:$8 sm:$0xf0]   ;;  %3651 = vst.msk [vmem:[#allocation0 + $0x748] sm:$0x3] %vm3156_vm8, %v3648_v37  }
 0x2f6   :  { %3653 = vst.msk [vmem:[#allocation0 + $0x756] sm:$0xc] %vm3156_vm8, %v3648_v37   ;;  %3655 = vst.msk [vmem:[#allocation0 + $0x764] sm:$0x30] %vm3156_vm8, %v3648_v37   ;;  %v4649_v49 = vsel %vm4_vm0, %v7069_v40, %v7068_v38 }
 0x2f7   :  { %3657 = vst.msk [vmem:[#allocation0 + $0x772] sm:$0xc0] %vm3156_vm8, %v3648_v37   ;;  %v7066_v44 = vld [vmem:[%s11810_s0 + $0x605] ss:$8 sm:$0xf]   ;;  %4650 = vrot.lane.b32.xlu1 %v4649_v49, %s7345_s15  ;;  %v3877_v37 = vpop.permute.xlu1 %3876  }
 0x2f8   :  { %v7067_v46 = vld [vmem:[%s11810_s0 + $0x605] ss:$8 sm:$0xf0]   ;;  %3634 = vst.msk [vmem:[#allocation0 + $0x708] sm:$0x3] %vm3156_vm8, %v3631_v42  }
 0x2f9   :  { %3636 = vst.msk [vmem:[#allocation0 + $0x716] sm:$0xc] %vm3156_vm8, %v3631_v42   ;;  %3638 = vst.msk [vmem:[#allocation0 + $0x724] sm:$0x30] %vm3156_vm8, %v3631_v42   ;;  %v4632_v56 = vsel %vm4_vm0, %v7067_v46, %v7066_v44  ;;  %v3860_v44 = vpop.permute.xlu0 %3859  }
 0x2fa   :  { %3640 = vst.msk [vmem:[#allocation0 + $0x732] sm:$0xc0] %vm3156_vm8, %v3631_v42   ;;  %v7072_v53 = vld [vmem:[%s11810_s0 + $0x6c5] ss:$8 sm:$0xf]   ;;  %4633 = vrot.lane.b32.xlu0 %v4632_v56, %s7345_s15 }
 0x2fb   :  { %v7073_v55 = vld [vmem:[%s11810_s0 + $0x6c5] ss:$8 sm:$0xf0]   ;;  %3681 = vst.msk [vmem:[#allocation0 + $0x7c8] sm:$0x3] %vm3156_vm8, %v3678_v51  }
 0x2fc   :  { %3683 = vst.msk [vmem:[#allocation0 + $0x7d6] sm:$0xc] %vm3156_vm8, %v3678_v51   ;;  %v7070_v59 = vld [vmem:[%s11810_s0 + $0x685] ss:$8 sm:$0xf]   ;;  %v4683_v63 = vsel %vm4_vm0, %v7073_v55, %v7072_v53  ;;  %v3911_v55 = vpop.permute.xlu1 %3910  }
 0x2fd   :  { %v7071_v62 = vld [vmem:[%s11810_s0 + $0x685] ss:$8 sm:$0xf0]   ;;  %3668 = vst.msk [vmem:[#allocation0 + $0x788] sm:$0x3] %vm3156_vm8, %v3665_v58   ;;  %4684 = vrot.lane.b32.xlu1 %v4683_v63, %s7345_s15  ;;  %v3894_v63 = vpop.permute.xlu0 %3893  }
 0x2fe   :  { %3670 = vst.msk [vmem:[#allocation0 + $0x796] sm:$0xc] %vm3156_vm8, %v3665_v58   ;;  %3672 = vst.msk [vmem:[#allocation0 + $0x7a4] sm:$0x30] %vm3156_vm8, %v3665_v58   ;;  %v4666_v10 = vsel %vm4_vm0, %v7071_v62, %v7070_v59 }
 0x2ff   :  { %3674 = vst.msk [vmem:[#allocation0 + $0x7b2] sm:$0xc0] %vm3156_vm8, %v3665_v58   ;;  %v7076_v5 = vld [vmem:[%s11810_s0 + $0x745] ss:$8 sm:$0xf]   ;;  %4667 = vrot.lane.b32.xlu0 %v4666_v10, %s7345_s15 }
 0x300   :  { %v7077_v8 = vld [vmem:[%s11810_s0 + $0x745] ss:$8 sm:$0xf0]   ;;  %3710 = vst.msk [vmem:[#allocation0 + $0x40] sm:$0x3] %vm3692_vm9, %v3707_v4  }
 0x301   :  { %3712 = vst.msk [vmem:[#allocation0 + $0x4e] sm:$0xc] %vm3692_vm9, %v3707_v4   ;;  %3714 = vst.msk [vmem:[#allocation0 + $0x5c] sm:$0x30] %vm3692_vm9, %v3707_v4   ;;  %v4717_v16 = vsel %vm4_vm0, %v7077_v8, %v7076_v5 }
 0x302   :  { %3716 = vst.msk [vmem:[#allocation0 + $0x6a] sm:$0xc0] %vm3692_vm9, %v3707_v4   ;;  %v7074_v13 = vld [vmem:[%s11810_s0 + $0x705] ss:$8 sm:$0xf]   ;;  %4718 = vrot.lane.b32.xlu1 %v4717_v16, %s7345_s15 }
 0x303   :  { %v7075_v14 = vld [vmem:[%s11810_s0 + $0x705] ss:$8 sm:$0xf0]   ;;  %3693 = vst.msk [vmem:[#allocation0] sm:$0x3] %vm3692_vm9, %v3691_v11  }
 0x304   :  { %3695 = vst.msk [vmem:[#allocation0 + $0xe] sm:$0xc] %vm3692_vm9, %v3691_v11   ;;  %3697 = vst.msk [vmem:[#allocation0 + $0x1c] sm:$0x30] %vm3692_vm9, %v3691_v11   ;;  %v4700_v22 = vsel %vm4_vm0, %v7075_v14, %v7074_v13 }
 0x305   :  { %3699 = vst.msk [vmem:[#allocation0 + $0x2a] sm:$0xc0] %vm3692_vm9, %v3691_v11   ;;  %3744 = vst.msk [vmem:[#allocation0 + $0xc0] sm:$0x3] %vm3692_vm9, %v3741_v17   ;;  %4701 = vrot.lane.b32.xlu0 %v4700_v22, %s7345_s15  ;;  %v3945_v11 = vpop.permute.xlu1 %3944   ;;  %v3928_v22 = vpop.permute.xlu0 %3927  }
 0x306   :  { %3746 = vst.msk [vmem:[#allocation0 + $0xce] sm:$0xc] %vm3692_vm9, %v3741_v17   ;;  %3748 = vst.msk [vmem:[#allocation0 + $0xdc] sm:$0x30] %vm3692_vm9, %v3741_v17  }
 0x307   :  { %3750 = vst.msk [vmem:[#allocation0 + $0xea] sm:$0xc0] %vm3692_vm9, %v3741_v17   ;;  %v7078_v24 = vld [vmem:[%s11810_s0 + $0x785] ss:$8 sm:$0xf]  }
 0x308   :  { %v7079_v25 = vld [vmem:[%s11810_s0 + $0x785] ss:$8 sm:$0xf0]   ;;  %3727 = vst.msk [vmem:[#allocation0 + $0x80] sm:$0x3] %vm3692_vm9, %v3724_v23  }
 0x309   :  { %3729 = vst.msk [vmem:[#allocation0 + $0x8e] sm:$0xc] %vm3692_vm9, %v3724_v23   ;;  %3731 = vst.msk [vmem:[#allocation0 + $0x9c] sm:$0x30] %vm3692_vm9, %v3724_v23   ;;  %v4803_v1 = vld [vmem:[#allocation0 + $0x40] sm:$0x3]  ;;  %v4734_v52 = vsel %vm4_vm0, %v7079_v25, %v7078_v24 }
 0x30a   :  { %3733 = vst.msk [vmem:[#allocation0 + $0xaa] sm:$0xc0] %vm3692_vm9, %v3724_v23   ;;  %v7080_v26 = vld [vmem:[%s11810_s0 + $0x7c5] ss:$8 sm:$0xf]   ;;  %4735 = vrot.lane.b32.xlu0 %v4734_v52, %s7345_s15  ;;  %v3962_v52 = vpop.permute.xlu0 %3961  }
 0x30b   :  { %v4815_v31 = vld [vmem:[#allocation0 + $0x50] sm:$0x3]  ;;  %v4827_v32 = vld [vmem:[#allocation0 + $0x60] sm:$0x3]  ;;  %7088 = vst [vmem:[%s11811_s1 + $0x10] sm:$0x3] %v4803_v1  ;;  %4748 = vrot.lane.b32.xlu1 %v7080_v26, %s7345_s15  ;;  %v3979_v1 = vpop.permute.xlu1 %3978  }
 0x30c   :  { %7090 = vst [vmem:[%s11811_s1 + $0x14] sm:$0x3] %v4815_v31  ;;  %7092 = vst [vmem:[%s11811_s1 + $0x18] sm:$0x3] %v4827_v32  ;;  %v4839_v47 = vld [vmem:[#allocation0 + $0x70] sm:$0x3] }
 0x30d   :  { %3778 = vst.msk [vmem:[#allocation0 + $0x140] sm:$0x3] %vm3692_vm9, %v3775_v33   ;;  %3780 = vst.msk [vmem:[#allocation0 + $0x14e] sm:$0xc] %vm3692_vm9, %v3775_v33   ;;  %v4758_v57 = vld [vmem:[#allocation0] sm:$0x3] }
 0x30e   :  { %3782 = vst.msk [vmem:[#allocation0 + $0x15c] sm:$0x30] %vm3692_vm9, %v3775_v33   ;;  %3784 = vst.msk [vmem:[#allocation0 + $0x16a] sm:$0xc0] %vm3692_vm9, %v3775_v33   ;;  %v4767_v2 = vld [vmem:[#allocation0 + $0x10] sm:$0x3] }
 0x30f   :  { %7094 = vst [vmem:[%s11811_s1 + $0x1c] sm:$0x3] %v4839_v47  ;;  %v4779_v7 = vld [vmem:[#allocation0 + $0x20] sm:$0x3]  ;;  %4760 = vst [vmem:[%s11811_s1] sm:$0x3] %v4758_v57 }
 0x310   :  { %7082 = vst [vmem:[%s11811_s1 + $0x4] sm:$0x3] %v4767_v2  ;;  %7084 = vst [vmem:[%s11811_s1 + $0x8] sm:$0x3] %v4779_v7  ;;  %v4791_v21 = vld [vmem:[#allocation0 + $0x30] sm:$0x3] }
 0x311   :  { %3761 = vst.msk [vmem:[#allocation0 + $0x100] sm:$0x3] %vm3692_vm9, %v3758_v15   ;;  %3763 = vst.msk [vmem:[#allocation0 + $0x10e] sm:$0xc] %vm3692_vm9, %v3758_v15   ;;  %v4899_v29 = vld [vmem:[#allocation0 + $0xc0] sm:$0x3] }
 0x312   :  { %3765 = vst.msk [vmem:[#allocation0 + $0x11c] sm:$0x30] %vm3692_vm9, %v3758_v15   ;;  %3767 = vst.msk [vmem:[#allocation0 + $0x12a] sm:$0xc0] %vm3692_vm9, %v3758_v15   ;;  %v4911_v35 = vld [vmem:[#allocation0 + $0xd0] sm:$0x3] }
 0x313   :  { %7086 = vst [vmem:[%s11811_s1 + $0xc] sm:$0x3] %v4791_v21  ;;  %v4923_v43 = vld [vmem:[#allocation0 + $0xe0] sm:$0x3]  ;;  %7104 = vst [vmem:[%s11811_s1 + $0x30] sm:$0x3] %v4899_v29  ;;  %v4013_v21 = vpop.permute.xlu1 %4012  }
 0x314   :  { %7106 = vst [vmem:[%s11811_s1 + $0x34] sm:$0x3] %v4911_v35  ;;  %7108 = vst [vmem:[%s11811_s1 + $0x38] sm:$0x3] %v4923_v43  ;;  %v4935_v60 = vld [vmem:[#allocation0 + $0xf0] sm:$0x3] }
 0x315   :  { %3812 = vst.msk [vmem:[#allocation0 + $0x1c0] sm:$0x3] %vm3692_vm9, %v3809_v50   ;;  %3814 = vst.msk [vmem:[#allocation0 + $0x1ce] sm:$0xc] %vm3692_vm9, %v3809_v50   ;;  %v4851_v3 = vld [vmem:[#allocation0 + $0x80] sm:$0x3] }
 0x316   :  { %3816 = vst.msk [vmem:[#allocation0 + $0x1dc] sm:$0x30] %vm3692_vm9, %v3809_v50   ;;  %3818 = vst.msk [vmem:[#allocation0 + $0x1ea] sm:$0xc0] %vm3692_vm9, %v3809_v50   ;;  %v4863_v12 = vld [vmem:[#allocation0 + $0x90] sm:$0x3] }
 0x317   :  { %7110 = vst [vmem:[%s11811_s1 + $0x3c] sm:$0x3] %v4935_v60  ;;  %v4875_v19 = vld [vmem:[#allocation0 + $0xa0] sm:$0x3]  ;;  %7096 = vst [vmem:[%s11811_s1 + $0x20] sm:$0x3] %v4851_v3  ;;  %v3996_v60 = vpop.permute.xlu0 %3995  }
 0x318   :  { %7098 = vst [vmem:[%s11811_s1 + $0x24] sm:$0x3] %v4863_v12  ;;  %7100 = vst [vmem:[%s11811_s1 + $0x28] sm:$0x3] %v4875_v19  ;;  %v4887_v36 = vld [vmem:[#allocation0 + $0xb0] sm:$0x3] }
 0x319   :  { %3795 = vst.msk [vmem:[#allocation0 + $0x180] sm:$0x3] %vm3692_vm9, %v3792_v28   ;;  %3797 = vst.msk [vmem:[#allocation0 + $0x18e] sm:$0xc] %vm3692_vm9, %v3792_v28   ;;  %v4995_v45 = vld [vmem:[#allocation0 + $0x140] sm:$0x3] }
 0x31a   :  { %3799 = vst.msk [vmem:[#allocation0 + $0x19c] sm:$0x30] %vm3692_vm9, %v3792_v28   ;;  %3801 = vst.msk [vmem:[#allocation0 + $0x1aa] sm:$0xc0] %vm3692_vm9, %v3792_v28   ;;  %v5007_v54 = vld [vmem:[#allocation0 + $0x150] sm:$0x3] }
 0x31b   :  { %7102 = vst [vmem:[%s11811_s1 + $0x2c] sm:$0x3] %v4887_v36  ;;  %v5019_v0 = vld [vmem:[#allocation0 + $0x160] sm:$0x3]  ;;  %7120 = vst [vmem:[%s11811_s1 + $0x50] sm:$0x3] %v4995_v45  ;;  %v4047_v36 = vpop.permute.xlu1 %4046  }
 0x31c   :  { %7122 = vst [vmem:[%s11811_s1 + $0x54] sm:$0x3] %v5007_v54  ;;  %7124 = vst [vmem:[%s11811_s1 + $0x58] sm:$0x3] %v5019_v0  ;;  %v5031_v20 = vld [vmem:[#allocation0 + $0x170] sm:$0x3] }
 0x31d   :  { %3846 = vst.msk [vmem:[#allocation0 + $0x240] sm:$0x3] %vm3692_vm9, %v3843_v9   ;;  %3848 = vst.msk [vmem:[#allocation0 + $0x24e] sm:$0xc] %vm3692_vm9, %v3843_v9   ;;  %v4947_v27 = vld [vmem:[#allocation0 + $0x100] sm:$0x3] }
 0x31e   :  { %3850 = vst.msk [vmem:[#allocation0 + $0x25c] sm:$0x30] %vm3692_vm9, %v3843_v9   ;;  %3852 = vst.msk [vmem:[#allocation0 + $0x26a] sm:$0xc0] %vm3692_vm9, %v3843_v9   ;;  %v4959_v39 = vld [vmem:[#allocation0 + $0x110] sm:$0x3] }
 0x31f   :  { %7126 = vst [vmem:[%s11811_s1 + $0x5c] sm:$0x3] %v5031_v20  ;;  %v4971_v48 = vld [vmem:[#allocation0 + $0x120] sm:$0x3]  ;;  %7112 = vst [vmem:[%s11811_s1 + $0x40] sm:$0x3] %v4947_v27  ;;  %v4030_v20 = vpop.permute.xlu0 %4029  }
 0x320   :  { %7114 = vst [vmem:[%s11811_s1 + $0x44] sm:$0x3] %v4959_v39  ;;  %7116 = vst [vmem:[%s11811_s1 + $0x48] sm:$0x3] %v4971_v48  ;;  %v4983_v6 = vld [vmem:[#allocation0 + $0x130] sm:$0x3] }
 0x321   :  { %3829 = vst.msk [vmem:[#allocation0 + $0x200] sm:$0x3] %vm3692_vm9, %v3826_v61   ;;  %3831 = vst.msk [vmem:[#allocation0 + $0x20e] sm:$0xc] %vm3692_vm9, %v3826_v61   ;;  %v5091_v18 = vld [vmem:[#allocation0 + $0x1c0] sm:$0x3] }
 0x322   :  { %3833 = vst.msk [vmem:[#allocation0 + $0x21c] sm:$0x30] %vm3692_vm9, %v3826_v61   ;;  %3835 = vst.msk [vmem:[#allocation0 + $0x22a] sm:$0xc0] %vm3692_vm9, %v3826_v61   ;;  %v5103_v30 = vld [vmem:[#allocation0 + $0x1d0] sm:$0x3] }
 0x323   :  { %7118 = vst [vmem:[%s11811_s1 + $0x4c] sm:$0x3] %v4983_v6  ;;  %v5115_v34 = vld [vmem:[#allocation0 + $0x1e0] sm:$0x3]  ;;  %7136 = vst [vmem:[%s11811_s1 + $0x70] sm:$0x3] %v5091_v18  ;;  %v4081_v6 = vpop.permute.xlu1 %4080  }
 0x324   :  { %7138 = vst [vmem:[%s11811_s1 + $0x74] sm:$0x3] %v5103_v30  ;;  %7140 = vst [vmem:[%s11811_s1 + $0x78] sm:$0x3] %v5115_v34  ;;  %v5127_v38 = vld [vmem:[#allocation0 + $0x1f0] sm:$0x3] }
 0x325   :  { %3880 = vst.msk [vmem:[#allocation0 + $0x2c0] sm:$0x3] %vm3692_vm9, %v3877_v37   ;;  %3882 = vst.msk [vmem:[#allocation0 + $0x2ce] sm:$0xc] %vm3692_vm9, %v3877_v37   ;;  %v5043_v40 = vld [vmem:[#allocation0 + $0x180] sm:$0x3] }
 0x326   :  { %3884 = vst.msk [vmem:[#allocation0 + $0x2dc] sm:$0x30] %vm3692_vm9, %v3877_v37   ;;  %3886 = vst.msk [vmem:[#allocation0 + $0x2ea] sm:$0xc0] %vm3692_vm9, %v3877_v37   ;;  %v5055_v41 = vld [vmem:[#allocation0 + $0x190] sm:$0x3] }
 0x327   :  { %7142 = vst [vmem:[%s11811_s1 + $0x7c] sm:$0x3] %v5127_v38  ;;  %v5067_v42 = vld [vmem:[#allocation0 + $0x1a0] sm:$0x3]  ;;  %7128 = vst [vmem:[%s11811_s1 + $0x60] sm:$0x3] %v5043_v40  ;;  %v4064_v38 = vpop.permute.xlu0 %4063  }
 0x328   :  { %7130 = vst [vmem:[%s11811_s1 + $0x64] sm:$0x3] %v5055_v41  ;;  %7132 = vst [vmem:[%s11811_s1 + $0x68] sm:$0x3] %v5067_v42  ;;  %v5079_v46 = vld [vmem:[#allocation0 + $0x1b0] sm:$0x3] }
 0x329   :  { %3863 = vst.msk [vmem:[#allocation0 + $0x280] sm:$0x3] %vm3692_vm9, %v3860_v44   ;;  %3865 = vst.msk [vmem:[#allocation0 + $0x28e] sm:$0xc] %vm3692_vm9, %v3860_v44   ;;  %v5187_v49 = vld [vmem:[#allocation0 + $0x240] sm:$0x3] }
 0x32a   :  { %3867 = vst.msk [vmem:[#allocation0 + $0x29c] sm:$0x30] %vm3692_vm9, %v3860_v44   ;;  %3869 = vst.msk [vmem:[#allocation0 + $0x2aa] sm:$0xc0] %vm3692_vm9, %v3860_v44   ;;  %v5199_v51 = vld [vmem:[#allocation0 + $0x250] sm:$0x3] }
 0x32b   :  { %7134 = vst [vmem:[%s11811_s1 + $0x6c] sm:$0x3] %v5079_v46  ;;  %v5211_v53 = vld [vmem:[#allocation0 + $0x260] sm:$0x3]  ;;  %7152 = vst [vmem:[%s11811_s1 + $0x90] sm:$0x3] %v5187_v49  ;;  %v4115_v46 = vpop.permute.xlu1 %4114  }
 0x32c   :  { %7154 = vst [vmem:[%s11811_s1 + $0x94] sm:$0x3] %v5199_v51  ;;  %7156 = vst [vmem:[%s11811_s1 + $0x98] sm:$0x3] %v5211_v53  ;;  %v5223_v56 = vld [vmem:[#allocation0 + $0x270] sm:$0x3] }
 0x32d   :  { %3914 = vst.msk [vmem:[#allocation0 + $0x340] sm:$0x3] %vm3692_vm9, %v3911_v55   ;;  %3916 = vst.msk [vmem:[#allocation0 + $0x34e] sm:$0xc] %vm3692_vm9, %v3911_v55   ;;  %v5139_v58 = vld [vmem:[#allocation0 + $0x200] sm:$0x3] }
 0x32e   :  { %3918 = vst.msk [vmem:[#allocation0 + $0x35c] sm:$0x30] %vm3692_vm9, %v3911_v55   ;;  %3920 = vst.msk [vmem:[#allocation0 + $0x36a] sm:$0xc0] %vm3692_vm9, %v3911_v55   ;;  %v5151_v59 = vld [vmem:[#allocation0 + $0x210] sm:$0x3] }
 0x32f   :  { %7158 = vst [vmem:[%s11811_s1 + $0x9c] sm:$0x3] %v5223_v56  ;;  %v5163_v62 = vld [vmem:[#allocation0 + $0x220] sm:$0x3]  ;;  %7144 = vst [vmem:[%s11811_s1 + $0x80] sm:$0x3] %v5139_v58  ;;  %v4098_v56 = vpop.permute.xlu0 %4097  }
 0x330   :  { %7146 = vst [vmem:[%s11811_s1 + $0x84] sm:$0x3] %v5151_v59  ;;  %7148 = vst [vmem:[%s11811_s1 + $0x88] sm:$0x3] %v5163_v62  ;;  %v5175_v4 = vld [vmem:[#allocation0 + $0x230] sm:$0x3] }
 0x331   :  { %3897 = vst.msk [vmem:[#allocation0 + $0x300] sm:$0x3] %vm3692_vm9, %v3894_v63   ;;  %3899 = vst.msk [vmem:[#allocation0 + $0x30e] sm:$0xc] %vm3692_vm9, %v3894_v63   ;;  %v5283_v5 = vld [vmem:[#allocation0 + $0x2c0] sm:$0x3] }
 0x332   :  { %3901 = vst.msk [vmem:[#allocation0 + $0x31c] sm:$0x30] %vm3692_vm9, %v3894_v63   ;;  %3903 = vst.msk [vmem:[#allocation0 + $0x32a] sm:$0xc0] %vm3692_vm9, %v3894_v63   ;;  %v5295_v8 = vld [vmem:[#allocation0 + $0x2d0] sm:$0x3] }
 0x333   :  { %7150 = vst [vmem:[%s11811_s1 + $0x8c] sm:$0x3] %v5175_v4  ;;  %v5307_v10 = vld [vmem:[#allocation0 + $0x2e0] sm:$0x3]  ;;  %7168 = vst [vmem:[%s11811_s1 + $0xb0] sm:$0x3] %v5283_v5  ;;  %v4149_v4 = vpop.permute.xlu1 %4148  }
 0x334   :  { %7170 = vst [vmem:[%s11811_s1 + $0xb4] sm:$0x3] %v5295_v8  ;;  %7172 = vst [vmem:[%s11811_s1 + $0xb8] sm:$0x3] %v5307_v10  ;;  %v5319_v13 = vld [vmem:[#allocation0 + $0x2f0] sm:$0x3] }
 0x335   :  { %3948 = vst.msk [vmem:[#allocation0 + $0x3c0] sm:$0x3] %vm3692_vm9, %v3945_v11   ;;  %3950 = vst.msk [vmem:[#allocation0 + $0x3ce] sm:$0xc] %vm3692_vm9, %v3945_v11   ;;  %v5235_v14 = vld [vmem:[#allocation0 + $0x280] sm:$0x3] }
 0x336   :  { %3952 = vst.msk [vmem:[#allocation0 + $0x3dc] sm:$0x30] %vm3692_vm9, %v3945_v11   ;;  %3954 = vst.msk [vmem:[#allocation0 + $0x3ea] sm:$0xc0] %vm3692_vm9, %v3945_v11   ;;  %v5247_v16 = vld [vmem:[#allocation0 + $0x290] sm:$0x3] }
 0x337   :  { %7174 = vst [vmem:[%s11811_s1 + $0xbc] sm:$0x3] %v5319_v13  ;;  %v5259_v17 = vld [vmem:[#allocation0 + $0x2a0] sm:$0x3]  ;;  %7160 = vst [vmem:[%s11811_s1 + $0xa0] sm:$0x3] %v5235_v14  ;;  %v4132_v13 = vpop.permute.xlu0 %4131  }
 0x338   :  { %7162 = vst [vmem:[%s11811_s1 + $0xa4] sm:$0x3] %v5247_v16  ;;  %7164 = vst [vmem:[%s11811_s1 + $0xa8] sm:$0x3] %v5259_v17  ;;  %v5271_v23 = vld [vmem:[#allocation0 + $0x2b0] sm:$0x3] }
 0x339   :  { %3931 = vst.msk [vmem:[#allocation0 + $0x380] sm:$0x3] %vm3692_vm9, %v3928_v22   ;;  %3933 = vst.msk [vmem:[#allocation0 + $0x38e] sm:$0xc] %vm3692_vm9, %v3928_v22   ;;  %v5379_v24 = vld [vmem:[#allocation0 + $0x340] sm:$0x3] }
 0x33a   :  { %3935 = vst.msk [vmem:[#allocation0 + $0x39c] sm:$0x30] %vm3692_vm9, %v3928_v22   ;;  %3937 = vst.msk [vmem:[#allocation0 + $0x3aa] sm:$0xc0] %vm3692_vm9, %v3928_v22   ;;  %v5391_v25 = vld [vmem:[#allocation0 + $0x350] sm:$0x3] }
 0x33b   :  { %7166 = vst [vmem:[%s11811_s1 + $0xac] sm:$0x3] %v5271_v23  ;;  %v5403_v26 = vld [vmem:[#allocation0 + $0x360] sm:$0x3]  ;;  %7184 = vst [vmem:[%s11811_s1 + $0xd0] sm:$0x3] %v5379_v24  ;;  %v4183_v23 = vpop.permute.xlu1 %4182  }
 0x33c   :  { %7186 = vst [vmem:[%s11811_s1 + $0xd4] sm:$0x3] %v5391_v25  ;;  %7188 = vst [vmem:[%s11811_s1 + $0xd8] sm:$0x3] %v5403_v26  ;;  %v5415_v31 = vld [vmem:[#allocation0 + $0x370] sm:$0x3] }
 0x33d   :  { %3982 = vst.msk [vmem:[#allocation0 + $0x440] sm:$0x3] %vm3692_vm9, %v3979_v1   ;;  %3984 = vst.msk [vmem:[#allocation0 + $0x44e] sm:$0xc] %vm3692_vm9, %v3979_v1   ;;  %v5331_v32 = vld [vmem:[#allocation0 + $0x300] sm:$0x3] }
 0x33e   :  { %3986 = vst.msk [vmem:[#allocation0 + $0x45c] sm:$0x30] %vm3692_vm9, %v3979_v1   ;;  %3988 = vst.msk [vmem:[#allocation0 + $0x46a] sm:$0xc0] %vm3692_vm9, %v3979_v1   ;;  %v5343_v33 = vld [vmem:[#allocation0 + $0x310] sm:$0x3] }
 0x33f   :  { %7190 = vst [vmem:[%s11811_s1 + $0xdc] sm:$0x3] %v5415_v31  ;;  %v5355_v47 = vld [vmem:[#allocation0 + $0x320] sm:$0x3]  ;;  %7176 = vst [vmem:[%s11811_s1 + $0xc0] sm:$0x3] %v5331_v32  ;;  %v4166_v31 = vpop.permute.xlu0 %4165  }
 0x340   :  { %7178 = vst [vmem:[%s11811_s1 + $0xc4] sm:$0x3] %v5343_v33  ;;  %7180 = vst [vmem:[%s11811_s1 + $0xc8] sm:$0x3] %v5355_v47  ;;  %v5367_v57 = vld [vmem:[#allocation0 + $0x330] sm:$0x3] }
 0x341   :  { %3965 = vst.msk [vmem:[#allocation0 + $0x400] sm:$0x3] %vm3692_vm9, %v3962_v52   ;;  %3967 = vst.msk [vmem:[#allocation0 + $0x40e] sm:$0xc] %vm3692_vm9, %v3962_v52   ;;  %v5475_v2 = vld [vmem:[#allocation0 + $0x3c0] sm:$0x3] }
 0x342   :  { %3969 = vst.msk [vmem:[#allocation0 + $0x41c] sm:$0x30] %vm3692_vm9, %v3962_v52   ;;  %3971 = vst.msk [vmem:[#allocation0 + $0x42a] sm:$0xc0] %vm3692_vm9, %v3962_v52   ;;  %v5487_v7 = vld [vmem:[#allocation0 + $0x3d0] sm:$0x3] }
 0x343   :  { %7182 = vst [vmem:[%s11811_s1 + $0xcc] sm:$0x3] %v5367_v57  ;;  %v5499_v15 = vld [vmem:[#allocation0 + $0x3e0] sm:$0x3]  ;;  %7200 = vst [vmem:[%s11811_s1 + $0xf0] sm:$0x3] %v5475_v2  ;;  %v4213_v57 = vpop.permute.xlu1 %4212  }
 0x344   :  { %7202 = vst [vmem:[%s11811_s1 + $0xf4] sm:$0x3] %v5487_v7  ;;  %7204 = vst [vmem:[%s11811_s1 + $0xf8] sm:$0x3] %v5499_v15  ;;  %v5511_v29 = vld [vmem:[#allocation0 + $0x3f0] sm:$0x3] }
 0x345   :  { %4016 = vst.msk [vmem:[#allocation0 + $0x4c0] sm:$0x3] %vm3692_vm9, %v4013_v21   ;;  %4018 = vst.msk [vmem:[#allocation0 + $0x4ce] sm:$0xc] %vm3692_vm9, %v4013_v21   ;;  %v5427_v35 = vld [vmem:[#allocation0 + $0x380] sm:$0x3] }
 0x346   :  { %4020 = vst.msk [vmem:[#allocation0 + $0x4dc] sm:$0x30] %vm3692_vm9, %v4013_v21   ;;  %4022 = vst.msk [vmem:[#allocation0 + $0x4ea] sm:$0xc0] %vm3692_vm9, %v4013_v21   ;;  %v5439_v43 = vld [vmem:[#allocation0 + $0x390] sm:$0x3] }
 0x347   :  { %7206 = vst [vmem:[%s11811_s1 + $0xfc] sm:$0x3] %v5511_v29  ;;  %v5451_v50 = vld [vmem:[#allocation0 + $0x3a0] sm:$0x3]  ;;  %7192 = vst [vmem:[%s11811_s1 + $0xe0] sm:$0x3] %v5427_v35  ;;  %v4200_v29 = vpop.permute.xlu0 %4199  }
 0x348   :  { %7194 = vst [vmem:[%s11811_s1 + $0xe4] sm:$0x3] %v5439_v43  ;;  %7196 = vst [vmem:[%s11811_s1 + $0xe8] sm:$0x3] %v5451_v50  ;;  %v5463_v3 = vld [vmem:[#allocation0 + $0x3b0] sm:$0x3] }
 0x349   :  { %3999 = vst.msk [vmem:[#allocation0 + $0x480] sm:$0x3] %vm3692_vm9, %v3996_v60   ;;  %4001 = vst.msk [vmem:[#allocation0 + $0x48e] sm:$0xc] %vm3692_vm9, %v3996_v60   ;;  %v5571_v12 = vld [vmem:[#allocation0 + $0x440] sm:$0x3] }
 0x34a   :  { %4003 = vst.msk [vmem:[#allocation0 + $0x49c] sm:$0x30] %vm3692_vm9, %v3996_v60   ;;  %4005 = vst.msk [vmem:[#allocation0 + $0x4aa] sm:$0xc0] %vm3692_vm9, %v3996_v60   ;;  %v5583_v19 = vld [vmem:[#allocation0 + $0x450] sm:$0x3] }
 0x34b   :  { %7198 = vst [vmem:[%s11811_s1 + $0xec] sm:$0x3] %v5463_v3  ;;  %v5595_v28 = vld [vmem:[#allocation0 + $0x460] sm:$0x3]  ;;  %7216 = vst [vmem:[%s11811_s1 + $0x110] sm:$0x3] %v5571_v12  ;;  %v4243_v3 = vpop.permute.xlu1 %4242  }
 0x34c   :  { %7218 = vst [vmem:[%s11811_s1 + $0x114] sm:$0x3] %v5583_v19  ;;  %7220 = vst [vmem:[%s11811_s1 + $0x118] sm:$0x3] %v5595_v28  ;;  %v5607_v45 = vld [vmem:[#allocation0 + $0x470] sm:$0x3] }
 0x34d   :  { %4050 = vst.msk [vmem:[#allocation0 + $0x540] sm:$0x3] %vm3692_vm9, %v4047_v36   ;;  %4052 = vst.msk [vmem:[#allocation0 + $0x54e] sm:$0xc] %vm3692_vm9, %v4047_v36   ;;  %v5523_v54 = vld [vmem:[#allocation0 + $0x400] sm:$0x3] }
 0x34e   :  { %4054 = vst.msk [vmem:[#allocation0 + $0x55c] sm:$0x30] %vm3692_vm9, %v4047_v36   ;;  %4056 = vst.msk [vmem:[#allocation0 + $0x56a] sm:$0xc0] %vm3692_vm9, %v4047_v36   ;;  %v5535_v0 = vld [vmem:[#allocation0 + $0x410] sm:$0x3] }
 0x34f   :  { %7222 = vst [vmem:[%s11811_s1 + $0x11c] sm:$0x3] %v5607_v45  ;;  %v5547_v9 = vld [vmem:[#allocation0 + $0x420] sm:$0x3]  ;;  %7208 = vst [vmem:[%s11811_s1 + $0x100] sm:$0x3] %v5523_v54  ;;  %v4226_v45 = vpop.permute.xlu0 %4225  }
 0x350   :  { %7210 = vst [vmem:[%s11811_s1 + $0x104] sm:$0x3] %v5535_v0  ;;  %7212 = vst [vmem:[%s11811_s1 + $0x108] sm:$0x3] %v5547_v9  ;;  %v5559_v27 = vld [vmem:[#allocation0 + $0x430] sm:$0x3] }
 0x351   :  { %4033 = vst.msk [vmem:[#allocation0 + $0x500] sm:$0x3] %vm3692_vm9, %v4030_v20   ;;  %4035 = vst.msk [vmem:[#allocation0 + $0x50e] sm:$0xc] %vm3692_vm9, %v4030_v20   ;;  %v5667_v39 = vld [vmem:[#allocation0 + $0x4c0] sm:$0x3] }
 0x352   :  { %4037 = vst.msk [vmem:[#allocation0 + $0x51c] sm:$0x30] %vm3692_vm9, %v4030_v20   ;;  %4039 = vst.msk [vmem:[#allocation0 + $0x52a] sm:$0xc0] %vm3692_vm9, %v4030_v20   ;;  %v5679_v48 = vld [vmem:[#allocation0 + $0x4d0] sm:$0x3]  ;;  %v4277_v20 = vpop.permute.xlu1 %4276  }
 0x353   :  { %7214 = vst [vmem:[%s11811_s1 + $0x10c] sm:$0x3] %v5559_v27  ;;  %v5691_v61 = vld [vmem:[#allocation0 + $0x4e0] sm:$0x3]  ;;  %7232 = vst [vmem:[%s11811_s1 + $0x130] sm:$0x3] %v5667_v39 }
 0x354   :  { %7234 = vst [vmem:[%s11811_s1 + $0x134] sm:$0x3] %v5679_v48  ;;  %7236 = vst [vmem:[%s11811_s1 + $0x138] sm:$0x3] %v5691_v61  ;;  %v5703_v18 = vld [vmem:[#allocation0 + $0x4f0] sm:$0x3]  ;;  %v4260_v61 = vpop.permute.xlu0 %4259  }
 0x355   :  { %4084 = vst.msk [vmem:[#allocation0 + $0x5c0] sm:$0x3] %vm3692_vm9, %v4081_v6   ;;  %4086 = vst.msk [vmem:[#allocation0 + $0x5ce] sm:$0xc] %vm3692_vm9, %v4081_v6   ;;  %v5619_v30 = vld [vmem:[#allocation0 + $0x480] sm:$0x3] }
 0x356   :  { %4088 = vst.msk [vmem:[#allocation0 + $0x5dc] sm:$0x30] %vm3692_vm9, %v4081_v6   ;;  %4090 = vst.msk [vmem:[#allocation0 + $0x5ea] sm:$0xc0] %vm3692_vm9, %v4081_v6   ;;  %v5631_v34 = vld [vmem:[#allocation0 + $0x490] sm:$0x3] }
 0x357   :  { %7238 = vst [vmem:[%s11811_s1 + $0x13c] sm:$0x3] %v5703_v18  ;;  %v5643_v37 = vld [vmem:[#allocation0 + $0x4a0] sm:$0x3]  ;;  %7224 = vst [vmem:[%s11811_s1 + $0x120] sm:$0x3] %v5619_v30 }
 0x358   :  { %7226 = vst [vmem:[%s11811_s1 + $0x124] sm:$0x3] %v5631_v34  ;;  %7228 = vst [vmem:[%s11811_s1 + $0x128] sm:$0x3] %v5643_v37  ;;  %v5655_v40 = vld [vmem:[#allocation0 + $0x4b0] sm:$0x3]  ;;  %v4311_v37 = vpop.permute.xlu1 %4310  }
 0x359   :  { %4067 = vst.msk [vmem:[#allocation0 + $0x580] sm:$0x3] %vm3692_vm9, %v4064_v38   ;;  %4069 = vst.msk [vmem:[#allocation0 + $0x58e] sm:$0xc] %vm3692_vm9, %v4064_v38   ;;  %v5763_v41 = vld [vmem:[#allocation0 + $0x540] sm:$0x3] }
 0x35a   :  { %4071 = vst.msk [vmem:[#allocation0 + $0x59c] sm:$0x30] %vm3692_vm9, %v4064_v38   ;;  %4073 = vst.msk [vmem:[#allocation0 + $0x5aa] sm:$0xc0] %vm3692_vm9, %v4064_v38   ;;  %v5775_v42 = vld [vmem:[#allocation0 + $0x550] sm:$0x3] }
 0x35b   :  { %7230 = vst [vmem:[%s11811_s1 + $0x12c] sm:$0x3] %v5655_v40  ;;  %v5787_v44 = vld [vmem:[#allocation0 + $0x560] sm:$0x3]  ;;  %7248 = vst [vmem:[%s11811_s1 + $0x150] sm:$0x3] %v5763_v41 }
 0x35c   :  { %7250 = vst [vmem:[%s11811_s1 + $0x154] sm:$0x3] %v5775_v42  ;;  %7252 = vst [vmem:[%s11811_s1 + $0x158] sm:$0x3] %v5787_v44  ;;  %v5799_v49 = vld [vmem:[#allocation0 + $0x570] sm:$0x3]  ;;  %v4294_v44 = vpop.permute.xlu0 %4293  }
 0x35d   :  { %4118 = vst.msk [vmem:[#allocation0 + $0x640] sm:$0x3] %vm3692_vm9, %v4115_v46   ;;  %4120 = vst.msk [vmem:[#allocation0 + $0x64e] sm:$0xc] %vm3692_vm9, %v4115_v46   ;;  %v5715_v51 = vld [vmem:[#allocation0 + $0x500] sm:$0x3] }
 0x35e   :  { %4122 = vst.msk [vmem:[#allocation0 + $0x65c] sm:$0x30] %vm3692_vm9, %v4115_v46   ;;  %4124 = vst.msk [vmem:[#allocation0 + $0x66a] sm:$0xc0] %vm3692_vm9, %v4115_v46   ;;  %v5727_v53 = vld [vmem:[#allocation0 + $0x510] sm:$0x3] }
 0x35f   :  { %7254 = vst [vmem:[%s11811_s1 + $0x15c] sm:$0x3] %v5799_v49  ;;  %v5739_v55 = vld [vmem:[#allocation0 + $0x520] sm:$0x3]  ;;  %7240 = vst [vmem:[%s11811_s1 + $0x140] sm:$0x3] %v5715_v51 }
 0x360   :  { %7242 = vst [vmem:[%s11811_s1 + $0x144] sm:$0x3] %v5727_v53  ;;  %7244 = vst [vmem:[%s11811_s1 + $0x148] sm:$0x3] %v5739_v55  ;;  %v5751_v58 = vld [vmem:[#allocation0 + $0x530] sm:$0x3]  ;;  %v4345_v55 = vpop.permute.xlu1 %4344  }
 0x361   :  { %4101 = vst.msk [vmem:[#allocation0 + $0x600] sm:$0x3] %vm3692_vm9, %v4098_v56   ;;  %4103 = vst.msk [vmem:[#allocation0 + $0x60e] sm:$0xc] %vm3692_vm9, %v4098_v56   ;;  %v5859_v59 = vld [vmem:[#allocation0 + $0x5c0] sm:$0x3] }
 0x362   :  { %4105 = vst.msk [vmem:[#allocation0 + $0x61c] sm:$0x30] %vm3692_vm9, %v4098_v56   ;;  %4107 = vst.msk [vmem:[#allocation0 + $0x62a] sm:$0xc0] %vm3692_vm9, %v4098_v56   ;;  %v5871_v62 = vld [vmem:[#allocation0 + $0x5d0] sm:$0x3] }
 0x363   :  { %7246 = vst [vmem:[%s11811_s1 + $0x14c] sm:$0x3] %v5751_v58  ;;  %v5883_v63 = vld [vmem:[#allocation0 + $0x5e0] sm:$0x3]  ;;  %7264 = vst [vmem:[%s11811_s1 + $0x170] sm:$0x3] %v5859_v59 }
 0x364   :  { %7266 = vst [vmem:[%s11811_s1 + $0x174] sm:$0x3] %v5871_v62  ;;  %7268 = vst [vmem:[%s11811_s1 + $0x178] sm:$0x3] %v5883_v63  ;;  %v5895_v5 = vld [vmem:[#allocation0 + $0x5f0] sm:$0x3]  ;;  %v4328_v63 = vpop.permute.xlu0 %4327  }
 0x365   :  { %4152 = vst.msk [vmem:[#allocation0 + $0x6c0] sm:$0x3] %vm3692_vm9, %v4149_v4   ;;  %4154 = vst.msk [vmem:[#allocation0 + $0x6ce] sm:$0xc] %vm3692_vm9, %v4149_v4   ;;  %v5811_v8 = vld [vmem:[#allocation0 + $0x580] sm:$0x3] }
 0x366   :  { %4156 = vst.msk [vmem:[#allocation0 + $0x6dc] sm:$0x30] %vm3692_vm9, %v4149_v4   ;;  %4158 = vst.msk [vmem:[#allocation0 + $0x6ea] sm:$0xc0] %vm3692_vm9, %v4149_v4   ;;  %v5823_v10 = vld [vmem:[#allocation0 + $0x590] sm:$0x3] }
 0x367   :  { %7270 = vst [vmem:[%s11811_s1 + $0x17c] sm:$0x3] %v5895_v5  ;;  %v5835_v11 = vld [vmem:[#allocation0 + $0x5a0] sm:$0x3]  ;;  %7256 = vst [vmem:[%s11811_s1 + $0x160] sm:$0x3] %v5811_v8 }
 0x368   :  { %7258 = vst [vmem:[%s11811_s1 + $0x164] sm:$0x3] %v5823_v10  ;;  %7260 = vst [vmem:[%s11811_s1 + $0x168] sm:$0x3] %v5835_v11  ;;  %v5847_v14 = vld [vmem:[#allocation0 + $0x5b0] sm:$0x3]  ;;  %v4379_v11 = vpop.permute.xlu1 %4378  }
 0x369   :  { %4135 = vst.msk [vmem:[#allocation0 + $0x680] sm:$0x3] %vm3692_vm9, %v4132_v13   ;;  %4137 = vst.msk [vmem:[#allocation0 + $0x68e] sm:$0xc] %vm3692_vm9, %v4132_v13   ;;  %v5955_v16 = vld [vmem:[#allocation0 + $0x640] sm:$0x3] }
 0x36a   :  { %4139 = vst.msk [vmem:[#allocation0 + $0x69c] sm:$0x30] %vm3692_vm9, %v4132_v13   ;;  %4141 = vst.msk [vmem:[#allocation0 + $0x6aa] sm:$0xc0] %vm3692_vm9, %v4132_v13   ;;  %v5967_v17 = vld [vmem:[#allocation0 + $0x650] sm:$0x3] }
 0x36b   :  { %7262 = vst [vmem:[%s11811_s1 + $0x16c] sm:$0x3] %v5847_v14  ;;  %v5979_v22 = vld [vmem:[#allocation0 + $0x660] sm:$0x3]  ;;  %7280 = vst [vmem:[%s11811_s1 + $0x190] sm:$0x3] %v5955_v16 }
 0x36c   :  { %7282 = vst [vmem:[%s11811_s1 + $0x194] sm:$0x3] %v5967_v17  ;;  %7284 = vst [vmem:[%s11811_s1 + $0x198] sm:$0x3] %v5979_v22  ;;  %v5991_v24 = vld [vmem:[#allocation0 + $0x670] sm:$0x3]  ;;  %v4362_v22 = vpop.permute.xlu0 %4361  }
 0x36d   :  { %4186 = vst.msk [vmem:[#allocation0 + $0x740] sm:$0x3] %vm3692_vm9, %v4183_v23   ;;  %4188 = vst.msk [vmem:[#allocation0 + $0x74e] sm:$0xc] %vm3692_vm9, %v4183_v23   ;;  %v5907_v25 = vld [vmem:[#allocation0 + $0x600] sm:$0x3] }
 0x36e   :  { %4190 = vst.msk [vmem:[#allocation0 + $0x75c] sm:$0x30] %vm3692_vm9, %v4183_v23   ;;  %4192 = vst.msk [vmem:[#allocation0 + $0x76a] sm:$0xc0] %vm3692_vm9, %v4183_v23   ;;  %v5919_v26 = vld [vmem:[#allocation0 + $0x610] sm:$0x3] }
 0x36f   :  { %7286 = vst [vmem:[%s11811_s1 + $0x19c] sm:$0x3] %v5991_v24  ;;  %v5931_v1 = vld [vmem:[#allocation0 + $0x620] sm:$0x3]  ;;  %7272 = vst [vmem:[%s11811_s1 + $0x180] sm:$0x3] %v5907_v25 }
 0x370   :  { %7274 = vst [vmem:[%s11811_s1 + $0x184] sm:$0x3] %v5919_v26  ;;  %7276 = vst [vmem:[%s11811_s1 + $0x188] sm:$0x3] %v5931_v1  ;;  %v5943_v32 = vld [vmem:[#allocation0 + $0x630] sm:$0x3]  ;;  %v4413_v1 = vpop.permute.xlu1 %4412  }
 0x371   :  { %4169 = vst.msk [vmem:[#allocation0 + $0x700] sm:$0x3] %vm3692_vm9, %v4166_v31   ;;  %4171 = vst.msk [vmem:[#allocation0 + $0x70e] sm:$0xc] %vm3692_vm9, %v4166_v31   ;;  %v6051_v33 = vld [vmem:[#allocation0 + $0x6c0] sm:$0x3] }
 0x372   :  { %4173 = vst.msk [vmem:[#allocation0 + $0x71c] sm:$0x30] %vm3692_vm9, %v4166_v31   ;;  %4175 = vst.msk [vmem:[#allocation0 + $0x72a] sm:$0xc0] %vm3692_vm9, %v4166_v31   ;;  %v6063_v47 = vld [vmem:[#allocation0 + $0x6d0] sm:$0x3] }
 0x373   :  { %7278 = vst [vmem:[%s11811_s1 + $0x18c] sm:$0x3] %v5943_v32  ;;  %v6075_v52 = vld [vmem:[#allocation0 + $0x6e0] sm:$0x3]  ;;  %7296 = vst [vmem:[%s11811_s1 + $0x1b0] sm:$0x3] %v6051_v33 }
 0x374   :  { %7298 = vst [vmem:[%s11811_s1 + $0x1b4] sm:$0x3] %v6063_v47  ;;  %7300 = vst [vmem:[%s11811_s1 + $0x1b8] sm:$0x3] %v6075_v52  ;;  %v6087_v2 = vld [vmem:[#allocation0 + $0x6f0] sm:$0x3]  ;;  %v4396_v52 = vpop.permute.xlu0 %4395  }
 0x375   :  { %4216 = vst.msk [vmem:[#allocation0 + $0x7c0] sm:$0x3] %vm3692_vm9, %v4213_v57   ;;  %4218 = vst.msk [vmem:[#allocation0 + $0x7ce] sm:$0xc] %vm3692_vm9, %v4213_v57   ;;  %v6003_v7 = vld [vmem:[#allocation0 + $0x680] sm:$0x3] }
 0x376   :  { %7302 = vst [vmem:[%s11811_s1 + $0x1bc] sm:$0x3] %v6087_v2  ;;  %v6015_v15 = vld [vmem:[#allocation0 + $0x690] sm:$0x3]  ;;  %v6027_v21 = vld [vmem:[#allocation0 + $0x6a0] sm:$0x3] }
 0x377   :  { %7288 = vst [vmem:[%s11811_s1 + $0x1a0] sm:$0x3] %v6003_v7  ;;  %7290 = vst [vmem:[%s11811_s1 + $0x1a4] sm:$0x3] %v6015_v15  ;;  %v6039_v35 = vld [vmem:[#allocation0 + $0x6b0] sm:$0x3] }
 0x378   :  { %7292 = vst [vmem:[%s11811_s1 + $0x1a8] sm:$0x3] %v6027_v21  ;;  %4203 = vst.msk [vmem:[#allocation0 + $0x780] sm:$0x3] %vm3692_vm9, %v4200_v29   ;;  %v6147_v43 = vld [vmem:[#allocation0 + $0x740] sm:$0x3]  ;;  %v4447_v21 = vpop.permute.xlu1 %4446  }
 0x379   :  { %4205 = vst.msk [vmem:[#allocation0 + $0x78e] sm:$0xc] %vm3692_vm9, %v4200_v29   ;;  %4207 = vst.msk [vmem:[#allocation0 + $0x79c] sm:$0x30] %vm3692_vm9, %v4200_v29   ;;  %v6159_v50 = vld [vmem:[#allocation0 + $0x750] sm:$0x3] }
 0x37a   :  { %4209 = vst.msk [vmem:[#allocation0 + $0x7aa] sm:$0xc0] %vm3692_vm9, %v4200_v29   ;;  %7294 = vst [vmem:[%s11811_s1 + $0x1ac] sm:$0x3] %v6039_v35  ;;  %v6171_v60 = vld [vmem:[#allocation0 + $0x760] sm:$0x3] }
 0x37b   :  { %7312 = vst [vmem:[%s11811_s1 + $0x1d0] sm:$0x3] %v6147_v43  ;;  %7314 = vst [vmem:[%s11811_s1 + $0x1d4] sm:$0x3] %v6159_v50  ;;  %v6183_v12 = vld [vmem:[#allocation0 + $0x770] sm:$0x3] }
 0x37c   :  { %7316 = vst [vmem:[%s11811_s1 + $0x1d8] sm:$0x3] %v6171_v60  ;;  %4246 = vst.msk [vmem:[#allocation0 + $0x48] sm:$0x3] %vm4227_vm10, %v4243_v3   ;;  %v6099_v19 = vld [vmem:[#allocation0 + $0x700] sm:$0x3]  ;;  %v4430_v60 = vpop.permute.xlu0 %4429  }
 0x37d   :  { %4248 = vst.msk [vmem:[#allocation0 + $0x56] sm:$0xc] %vm4227_vm10, %v4243_v3   ;;  %4250 = vst.msk [vmem:[#allocation0 + $0x64] sm:$0x30] %vm4227_vm10, %v4243_v3   ;;  %v6111_v28 = vld [vmem:[#allocation0 + $0x710] sm:$0x3] }
 0x37e   :  { %4252 = vst.msk [vmem:[#allocation0 + $0x72] sm:$0xc0] %vm4227_vm10, %v4243_v3   ;;  %7318 = vst [vmem:[%s11811_s1 + $0x1dc] sm:$0x3] %v6183_v12  ;;  %v6123_v36 = vld [vmem:[#allocation0 + $0x720] sm:$0x3] }
 0x37f   :  { %7304 = vst [vmem:[%s11811_s1 + $0x1c0] sm:$0x3] %v6099_v19  ;;  %7306 = vst [vmem:[%s11811_s1 + $0x1c4] sm:$0x3] %v6111_v28  ;;  %v6135_v54 = vld [vmem:[#allocation0 + $0x730] sm:$0x3] }
 0x380   :  { %7308 = vst [vmem:[%s11811_s1 + $0x1c8] sm:$0x3] %v6123_v36  ;;  %4229 = vst.msk [vmem:[#allocation0 + $0x8] sm:$0x3] %vm4227_vm10, %v4226_v45   ;;  %v6243_v0 = vld [vmem:[#allocation0 + $0x7c0] sm:$0x3]  ;;  %v4481_v36 = vpop.permute.xlu1 %4480  }
 0x381   :  { %4231 = vst.msk [vmem:[#allocation0 + $0x16] sm:$0xc] %vm4227_vm10, %v4226_v45   ;;  %4233 = vst.msk [vmem:[#allocation0 + $0x24] sm:$0x30] %vm4227_vm10, %v4226_v45   ;;  %v6255_v9 = vld [vmem:[#allocation0 + $0x7d0] sm:$0x3] }
 0x382   :  { %4235 = vst.msk [vmem:[#allocation0 + $0x32] sm:$0xc0] %vm4227_vm10, %v4226_v45   ;;  %7310 = vst [vmem:[%s11811_s1 + $0x1cc] sm:$0x3] %v6135_v54  ;;  %v6195_v27 = vld [vmem:[#allocation0 + $0x780] sm:$0x3] }
 0x383   :  { %7328 = vst [vmem:[%s11811_s1 + $0x1f0] sm:$0x3] %v6243_v0  ;;  %7330 = vst [vmem:[%s11811_s1 + $0x1f4] sm:$0x3] %v6255_v9  ;;  %v6207_v39 = vld [vmem:[#allocation0 + $0x790] sm:$0x3] }
 0x384   :  { %4280 = vst.msk [vmem:[#allocation0 + $0xc8] sm:$0x3] %vm4227_vm10, %v4277_v20   ;;  %4282 = vst.msk [vmem:[#allocation0 + $0xd6] sm:$0xc] %vm4227_vm10, %v4277_v20   ;;  %v6219_v48 = vld [vmem:[#allocation0 + $0x7a0] sm:$0x3] }
 0x385   :  { %4284 = vst.msk [vmem:[#allocation0 + $0xe4] sm:$0x30] %vm4227_vm10, %v4277_v20   ;;  %4286 = vst.msk [vmem:[#allocation0 + $0xf2] sm:$0xc0] %vm4227_vm10, %v4277_v20   ;;  %v6231_v6 = vld [vmem:[#allocation0 + $0x7b0] sm:$0x3]  ;;  %v4464_v20 = vpop.permute.xlu0 %4463  }
 0x386   :  { %7320 = vst [vmem:[%s11811_s1 + $0x1e0] sm:$0x3] %v6195_v27  ;;  %7322 = vst [vmem:[%s11811_s1 + $0x1e4] sm:$0x3] %v6207_v39  ;;  %v4809_v18 = vld [vmem:[#allocation0 + $0x48] sm:$0x3] }
 0x387   :  { %7324 = vst [vmem:[%s11811_s1 + $0x1e8] sm:$0x3] %v6219_v48  ;;  %4263 = vst.msk [vmem:[#allocation0 + $0x88] sm:$0x3] %vm4227_vm10, %v4260_v61   ;;  %v4821_v30 = vld [vmem:[#allocation0 + $0x58] sm:$0x3] }
 0x388   :  { %4265 = vst.msk [vmem:[#allocation0 + $0x96] sm:$0xc] %vm4227_vm10, %v4260_v61   ;;  %4267 = vst.msk [vmem:[#allocation0 + $0xa4] sm:$0x30] %vm4227_vm10, %v4260_v61   ;;  %v4833_v34 = vld [vmem:[#allocation0 + $0x68] sm:$0x3] }
 0x389   :  { %4269 = vst.msk [vmem:[#allocation0 + $0xb2] sm:$0xc0] %vm4227_vm10, %v4260_v61   ;;  %7326 = vst [vmem:[%s11811_s1 + $0x1ec] sm:$0x3] %v6231_v6  ;;  %v4845_v38 = vld [vmem:[#allocation0 + $0x78] sm:$0x3]  ;;  %v4515_v6 = vpop.permute.xlu1 %4514  }
 0x38a   :  { %7089 = vst [vmem:[%s11811_s1 + $0x12] sm:$0x3] %v4809_v18  ;;  %7091 = vst [vmem:[%s11811_s1 + $0x16] sm:$0x3] %v4821_v30  ;;  %v4762_v40 = vld [vmem:[#allocation0 + $0x8] sm:$0x3] }
 0x38b   :  { %7093 = vst [vmem:[%s11811_s1 + $0x1a] sm:$0x3] %v4833_v34  ;;  %4314 = vst.msk [vmem:[#allocation0 + $0x148] sm:$0x3] %vm4227_vm10, %v4311_v37   ;;  %v4773_v41 = vld [vmem:[#allocation0 + $0x18] sm:$0x3] }
 0x38c   :  { %4316 = vst.msk [vmem:[#allocation0 + $0x156] sm:$0xc] %vm4227_vm10, %v4311_v37   ;;  %4318 = vst.msk [vmem:[#allocation0 + $0x164] sm:$0x30] %vm4227_vm10, %v4311_v37   ;;  %v4785_v42 = vld [vmem:[#allocation0 + $0x28] sm:$0x3] }
 0x38d   :  { %4320 = vst.msk [vmem:[#allocation0 + $0x172] sm:$0xc0] %vm4227_vm10, %v4311_v37   ;;  %7095 = vst [vmem:[%s11811_s1 + $0x1e] sm:$0x3] %v4845_v38  ;;  %v4797_v46 = vld [vmem:[#allocation0 + $0x38] sm:$0x3]  ;;  %v4498_v38 = vpop.permute.xlu0 %4497  }
 0x38e   :  { %7081 = vst [vmem:[%s11811_s1 + $0x2] sm:$0x3] %v4762_v40  ;;  %7083 = vst [vmem:[%s11811_s1 + $0x6] sm:$0x3] %v4773_v41  ;;  %v4905_v49 = vld [vmem:[#allocation0 + $0xc8] sm:$0x3] }
 0x38f   :  { %7085 = vst [vmem:[%s11811_s1 + $0xa] sm:$0x3] %v4785_v42  ;;  %4297 = vst.msk [vmem:[#allocation0 + $0x108] sm:$0x3] %vm4227_vm10, %v4294_v44   ;;  %v4917_v51 = vld [vmem:[#allocation0 + $0xd8] sm:$0x3] }
 0x390   :  { %4299 = vst.msk [vmem:[#allocation0 + $0x116] sm:$0xc] %vm4227_vm10, %v4294_v44   ;;  %4301 = vst.msk [vmem:[#allocation0 + $0x124] sm:$0x30] %vm4227_vm10, %v4294_v44   ;;  %v4929_v53 = vld [vmem:[#allocation0 + $0xe8] sm:$0x3] }
 0x391   :  { %4303 = vst.msk [vmem:[#allocation0 + $0x132] sm:$0xc0] %vm4227_vm10, %v4294_v44   ;;  %7087 = vst [vmem:[%s11811_s1 + $0xe] sm:$0x3] %v4797_v46  ;;  %v4941_v56 = vld [vmem:[#allocation0 + $0xf8] sm:$0x3]  ;;  %v4549_v46 = vpop.permute.xlu1 %4548  }
 0x392   :  { %7105 = vst [vmem:[%s11811_s1 + $0x32] sm:$0x3] %v4905_v49  ;;  %7107 = vst [vmem:[%s11811_s1 + $0x36] sm:$0x3] %v4917_v51  ;;  %v4857_v58 = vld [vmem:[#allocation0 + $0x88] sm:$0x3] }
 0x393   :  { %7109 = vst [vmem:[%s11811_s1 + $0x3a] sm:$0x3] %v4929_v53  ;;  %4348 = vst.msk [vmem:[#allocation0 + $0x1c8] sm:$0x3] %vm4227_vm10, %v4345_v55   ;;  %v4869_v59 = vld [vmem:[#allocation0 + $0x98] sm:$0x3] }
 0x394   :  { %4350 = vst.msk [vmem:[#allocation0 + $0x1d6] sm:$0xc] %vm4227_vm10, %v4345_v55   ;;  %4352 = vst.msk [vmem:[#allocation0 + $0x1e4] sm:$0x30] %vm4227_vm10, %v4345_v55   ;;  %v4881_v62 = vld [vmem:[#allocation0 + $0xa8] sm:$0x3] }
 0x395   :  { %4354 = vst.msk [vmem:[#allocation0 + $0x1f2] sm:$0xc0] %vm4227_vm10, %v4345_v55   ;;  %7111 = vst [vmem:[%s11811_s1 + $0x3e] sm:$0x3] %v4941_v56  ;;  %v4893_v4 = vld [vmem:[#allocation0 + $0xb8] sm:$0x3]  ;;  %v4532_v56 = vpop.permute.xlu0 %4531  }
 0x396   :  { %7097 = vst [vmem:[%s11811_s1 + $0x22] sm:$0x3] %v4857_v58  ;;  %7099 = vst [vmem:[%s11811_s1 + $0x26] sm:$0x3] %v4869_v59  ;;  %v5001_v5 = vld [vmem:[#allocation0 + $0x148] sm:$0x3] }
 0x397   :  { %7101 = vst [vmem:[%s11811_s1 + $0x2a] sm:$0x3] %v4881_v62  ;;  %4331 = vst.msk [vmem:[#allocation0 + $0x188] sm:$0x3] %vm4227_vm10, %v4328_v63   ;;  %v5013_v8 = vld [vmem:[#allocation0 + $0x158] sm:$0x3] }
 0x398   :  { %4333 = vst.msk [vmem:[#allocation0 + $0x196] sm:$0xc] %vm4227_vm10, %v4328_v63   ;;  %4335 = vst.msk [vmem:[#allocation0 + $0x1a4] sm:$0x30] %vm4227_vm10, %v4328_v63   ;;  %v5025_v10 = vld [vmem:[#allocation0 + $0x168] sm:$0x3] }
 0x399   :  { %4337 = vst.msk [vmem:[#allocation0 + $0x1b2] sm:$0xc0] %vm4227_vm10, %v4328_v63   ;;  %7103 = vst [vmem:[%s11811_s1 + $0x2e] sm:$0x3] %v4893_v4  ;;  %v5037_v13 = vld [vmem:[#allocation0 + $0x178] sm:$0x3]  ;;  %v4583_v4 = vpop.permute.xlu1 %4582  }
 0x39a   :  { %7121 = vst [vmem:[%s11811_s1 + $0x52] sm:$0x3] %v5001_v5  ;;  %7123 = vst [vmem:[%s11811_s1 + $0x56] sm:$0x3] %v5013_v8  ;;  %v4953_v14 = vld [vmem:[#allocation0 + $0x108] sm:$0x3] }
 0x39b   :  { %7125 = vst [vmem:[%s11811_s1 + $0x5a] sm:$0x3] %v5025_v10  ;;  %4382 = vst.msk [vmem:[#allocation0 + $0x248] sm:$0x3] %vm4227_vm10, %v4379_v11   ;;  %v4965_v16 = vld [vmem:[#allocation0 + $0x118] sm:$0x3] }
 0x39c   :  { %4384 = vst.msk [vmem:[#allocation0 + $0x256] sm:$0xc] %vm4227_vm10, %v4379_v11   ;;  %4386 = vst.msk [vmem:[#allocation0 + $0x264] sm:$0x30] %vm4227_vm10, %v4379_v11   ;;  %v4977_v17 = vld [vmem:[#allocation0 + $0x128] sm:$0x3] }
 0x39d   :  { %4388 = vst.msk [vmem:[#allocation0 + $0x272] sm:$0xc0] %vm4227_vm10, %v4379_v11   ;;  %7127 = vst [vmem:[%s11811_s1 + $0x5e] sm:$0x3] %v5037_v13  ;;  %v4989_v23 = vld [vmem:[#allocation0 + $0x138] sm:$0x3]  ;;  %v4566_v13 = vpop.permute.xlu0 %4565  }
 0x39e   :  { %7113 = vst [vmem:[%s11811_s1 + $0x42] sm:$0x3] %v4953_v14  ;;  %7115 = vst [vmem:[%s11811_s1 + $0x46] sm:$0x3] %v4965_v16  ;;  %v5097_v24 = vld [vmem:[#allocation0 + $0x1c8] sm:$0x3] }
 0x39f   :  { %7117 = vst [vmem:[%s11811_s1 + $0x4a] sm:$0x3] %v4977_v17  ;;  %4365 = vst.msk [vmem:[#allocation0 + $0x208] sm:$0x3] %vm4227_vm10, %v4362_v22   ;;  %v5109_v25 = vld [vmem:[#allocation0 + $0x1d8] sm:$0x3] }
 0x3a0   :  { %4367 = vst.msk [vmem:[#allocation0 + $0x216] sm:$0xc] %vm4227_vm10, %v4362_v22   ;;  %4369 = vst.msk [vmem:[#allocation0 + $0x224] sm:$0x30] %vm4227_vm10, %v4362_v22   ;;  %v5121_v26 = vld [vmem:[#allocation0 + $0x1e8] sm:$0x3] }
 0x3a1   :  { %4371 = vst.msk [vmem:[#allocation0 + $0x232] sm:$0xc0] %vm4227_vm10, %v4362_v22   ;;  %7119 = vst [vmem:[%s11811_s1 + $0x4e] sm:$0x3] %v4989_v23  ;;  %v5133_v31 = vld [vmem:[#allocation0 + $0x1f8] sm:$0x3]  ;;  %v4617_v23 = vpop.permute.xlu1 %4616  }
 0x3a2   :  { %7137 = vst [vmem:[%s11811_s1 + $0x72] sm:$0x3] %v5097_v24  ;;  %7139 = vst [vmem:[%s11811_s1 + $0x76] sm:$0x3] %v5109_v25  ;;  %v5049_v32 = vld [vmem:[#allocation0 + $0x188] sm:$0x3] }
 0x3a3   :  { %7141 = vst [vmem:[%s11811_s1 + $0x7a] sm:$0x3] %v5121_v26  ;;  %4416 = vst.msk [vmem:[#allocation0 + $0x2c8] sm:$0x3] %vm4227_vm10, %v4413_v1   ;;  %v5061_v33 = vld [vmem:[#allocation0 + $0x198] sm:$0x3] }
 0x3a4   :  { %4418 = vst.msk [vmem:[#allocation0 + $0x2d6] sm:$0xc] %vm4227_vm10, %v4413_v1   ;;  %4420 = vst.msk [vmem:[#allocation0 + $0x2e4] sm:$0x30] %vm4227_vm10, %v4413_v1   ;;  %v5073_v47 = vld [vmem:[#allocation0 + $0x1a8] sm:$0x3] }
 0x3a5   :  { %4422 = vst.msk [vmem:[#allocation0 + $0x2f2] sm:$0xc0] %vm4227_vm10, %v4413_v1   ;;  %7143 = vst [vmem:[%s11811_s1 + $0x7e] sm:$0x3] %v5133_v31  ;;  %v5085_v57 = vld [vmem:[#allocation0 + $0x1b8] sm:$0x3]  ;;  %v4600_v31 = vpop.permute.xlu0 %4599  }
 0x3a6   :  { %7129 = vst [vmem:[%s11811_s1 + $0x62] sm:$0x3] %v5049_v32  ;;  %7131 = vst [vmem:[%s11811_s1 + $0x66] sm:$0x3] %v5061_v33  ;;  %v5193_v2 = vld [vmem:[#allocation0 + $0x248] sm:$0x3] }
 0x3a7   :  { %7133 = vst [vmem:[%s11811_s1 + $0x6a] sm:$0x3] %v5073_v47  ;;  %4399 = vst.msk [vmem:[#allocation0 + $0x288] sm:$0x3] %vm4227_vm10, %v4396_v52   ;;  %v5205_v7 = vld [vmem:[#allocation0 + $0x258] sm:$0x3] }
 0x3a8   :  { %4401 = vst.msk [vmem:[#allocation0 + $0x296] sm:$0xc] %vm4227_vm10, %v4396_v52   ;;  %4403 = vst.msk [vmem:[#allocation0 + $0x2a4] sm:$0x30] %vm4227_vm10, %v4396_v52   ;;  %v5217_v15 = vld [vmem:[#allocation0 + $0x268] sm:$0x3] }
 0x3a9   :  { %4405 = vst.msk [vmem:[#allocation0 + $0x2b2] sm:$0xc0] %vm4227_vm10, %v4396_v52   ;;  %7135 = vst [vmem:[%s11811_s1 + $0x6e] sm:$0x3] %v5085_v57  ;;  %v5229_v29 = vld [vmem:[#allocation0 + $0x278] sm:$0x3]  ;;  %v4651_v57 = vpop.permute.xlu1 %4650  }
 0x3aa   :  { %7153 = vst [vmem:[%s11811_s1 + $0x92] sm:$0x3] %v5193_v2  ;;  %7155 = vst [vmem:[%s11811_s1 + $0x96] sm:$0x3] %v5205_v7  ;;  %v5145_v35 = vld [vmem:[#allocation0 + $0x208] sm:$0x3] }
 0x3ab   :  { %7157 = vst [vmem:[%s11811_s1 + $0x9a] sm:$0x3] %v5217_v15  ;;  %4450 = vst.msk [vmem:[#allocation0 + $0x348] sm:$0x3] %vm4227_vm10, %v4447_v21   ;;  %v5157_v43 = vld [vmem:[#allocation0 + $0x218] sm:$0x3] }
 0x3ac   :  { %4452 = vst.msk [vmem:[#allocation0 + $0x356] sm:$0xc] %vm4227_vm10, %v4447_v21   ;;  %4454 = vst.msk [vmem:[#allocation0 + $0x364] sm:$0x30] %vm4227_vm10, %v4447_v21   ;;  %v5169_v50 = vld [vmem:[#allocation0 + $0x228] sm:$0x3] }
 0x3ad   :  { %4456 = vst.msk [vmem:[#allocation0 + $0x372] sm:$0xc0] %vm4227_vm10, %v4447_v21   ;;  %7159 = vst [vmem:[%s11811_s1 + $0x9e] sm:$0x3] %v5229_v29  ;;  %v5181_v3 = vld [vmem:[#allocation0 + $0x238] sm:$0x3]  ;;  %v4634_v29 = vpop.permute.xlu0 %4633  }
 0x3ae   :  { %7145 = vst [vmem:[%s11811_s1 + $0x82] sm:$0x3] %v5145_v35  ;;  %7147 = vst [vmem:[%s11811_s1 + $0x86] sm:$0x3] %v5157_v43  ;;  %v5289_v12 = vld [vmem:[#allocation0 + $0x2c8] sm:$0x3] }
 0x3af   :  { %7149 = vst [vmem:[%s11811_s1 + $0x8a] sm:$0x3] %v5169_v50  ;;  %4433 = vst.msk [vmem:[#allocation0 + $0x308] sm:$0x3] %vm4227_vm10, %v4430_v60   ;;  %v5301_v19 = vld [vmem:[#allocation0 + $0x2d8] sm:$0x3] }
 0x3b0   :  { %4435 = vst.msk [vmem:[#allocation0 + $0x316] sm:$0xc] %vm4227_vm10, %v4430_v60   ;;  %4437 = vst.msk [vmem:[#allocation0 + $0x324] sm:$0x30] %vm4227_vm10, %v4430_v60   ;;  %v5313_v28 = vld [vmem:[#allocation0 + $0x2e8] sm:$0x3] }
 0x3b1   :  { %4439 = vst.msk [vmem:[#allocation0 + $0x332] sm:$0xc0] %vm4227_vm10, %v4430_v60   ;;  %7151 = vst [vmem:[%s11811_s1 + $0x8e] sm:$0x3] %v5181_v3  ;;  %v5325_v45 = vld [vmem:[#allocation0 + $0x2f8] sm:$0x3]  ;;  %v4685_v3 = vpop.permute.xlu1 %4684  }
 0x3b2   :  { %7169 = vst [vmem:[%s11811_s1 + $0xb2] sm:$0x3] %v5289_v12  ;;  %7171 = vst [vmem:[%s11811_s1 + $0xb6] sm:$0x3] %v5301_v19  ;;  %v5241_v54 = vld [vmem:[#allocation0 + $0x288] sm:$0x3] }
 0x3b3   :  { %7173 = vst [vmem:[%s11811_s1 + $0xba] sm:$0x3] %v5313_v28  ;;  %4484 = vst.msk [vmem:[#allocation0 + $0x3c8] sm:$0x3] %vm4227_vm10, %v4481_v36   ;;  %v5253_v0 = vld [vmem:[#allocation0 + $0x298] sm:$0x3] }
 0x3b4   :  { %4486 = vst.msk [vmem:[#allocation0 + $0x3d6] sm:$0xc] %vm4227_vm10, %v4481_v36   ;;  %4488 = vst.msk [vmem:[#allocation0 + $0x3e4] sm:$0x30] %vm4227_vm10, %v4481_v36   ;;  %v5265_v9 = vld [vmem:[#allocation0 + $0x2a8] sm:$0x3] }
 0x3b5   :  { %4490 = vst.msk [vmem:[#allocation0 + $0x3f2] sm:$0xc0] %vm4227_vm10, %v4481_v36   ;;  %7175 = vst [vmem:[%s11811_s1 + $0xbe] sm:$0x3] %v5325_v45  ;;  %v5277_v27 = vld [vmem:[#allocation0 + $0x2b8] sm:$0x3]  ;;  %v4668_v45 = vpop.permute.xlu0 %4667  }
 0x3b6   :  { %7161 = vst [vmem:[%s11811_s1 + $0xa2] sm:$0x3] %v5241_v54  ;;  %7163 = vst [vmem:[%s11811_s1 + $0xa6] sm:$0x3] %v5253_v0  ;;  %v5385_v39 = vld [vmem:[#allocation0 + $0x348] sm:$0x3] }
 0x3b7   :  { %7165 = vst [vmem:[%s11811_s1 + $0xaa] sm:$0x3] %v5265_v9  ;;  %4467 = vst.msk [vmem:[#allocation0 + $0x388] sm:$0x3] %vm4227_vm10, %v4464_v20   ;;  %v5397_v48 = vld [vmem:[#allocation0 + $0x358] sm:$0x3] }
 0x3b8   :  { %4469 = vst.msk [vmem:[#allocation0 + $0x396] sm:$0xc] %vm4227_vm10, %v4464_v20   ;;  %4471 = vst.msk [vmem:[#allocation0 + $0x3a4] sm:$0x30] %vm4227_vm10, %v4464_v20   ;;  %v5409_v61 = vld [vmem:[#allocation0 + $0x368] sm:$0x3] }
 0x3b9   :  { %4473 = vst.msk [vmem:[#allocation0 + $0x3b2] sm:$0xc0] %vm4227_vm10, %v4464_v20   ;;  %7167 = vst [vmem:[%s11811_s1 + $0xae] sm:$0x3] %v5277_v27  ;;  %v5421_v18 = vld [vmem:[#allocation0 + $0x378] sm:$0x3]  ;;  %v4719_v27 = vpop.permute.xlu1 %4718  }
 0x3ba   :  { %7185 = vst [vmem:[%s11811_s1 + $0xd2] sm:$0x3] %v5385_v39  ;;  %7187 = vst [vmem:[%s11811_s1 + $0xd6] sm:$0x3] %v5397_v48  ;;  %v5337_v30 = vld [vmem:[#allocation0 + $0x308] sm:$0x3] }
 0x3bb   :  { %7189 = vst [vmem:[%s11811_s1 + $0xda] sm:$0x3] %v5409_v61  ;;  %4518 = vst.msk [vmem:[#allocation0 + $0x448] sm:$0x3] %vm4227_vm10, %v4515_v6   ;;  %v5349_v34 = vld [vmem:[#allocation0 + $0x318] sm:$0x3] }
 0x3bc   :  { %4520 = vst.msk [vmem:[#allocation0 + $0x456] sm:$0xc] %vm4227_vm10, %v4515_v6   ;;  %4522 = vst.msk [vmem:[#allocation0 + $0x464] sm:$0x30] %vm4227_vm10, %v4515_v6   ;;  %v5361_v37 = vld [vmem:[#allocation0 + $0x328] sm:$0x3] }
 0x3bd   :  { %4524 = vst.msk [vmem:[#allocation0 + $0x472] sm:$0xc0] %vm4227_vm10, %v4515_v6   ;;  %7191 = vst [vmem:[%s11811_s1 + $0xde] sm:$0x3] %v5421_v18  ;;  %v5373_v40 = vld [vmem:[#allocation0 + $0x338] sm:$0x3]  ;;  %v4702_v18 = vpop.permute.xlu0 %4701  }
 0x3be   :  { %7177 = vst [vmem:[%s11811_s1 + $0xc2] sm:$0x3] %v5337_v30  ;;  %7179 = vst [vmem:[%s11811_s1 + $0xc6] sm:$0x3] %v5349_v34  ;;  %v5481_v41 = vld [vmem:[#allocation0 + $0x3c8] sm:$0x3] }
 0x3bf   :  { %7181 = vst [vmem:[%s11811_s1 + $0xca] sm:$0x3] %v5361_v37  ;;  %4501 = vst.msk [vmem:[#allocation0 + $0x408] sm:$0x3] %vm4227_vm10, %v4498_v38   ;;  %v5493_v42 = vld [vmem:[#allocation0 + $0x3d8] sm:$0x3] }
 0x3c0   :  { %4503 = vst.msk [vmem:[#allocation0 + $0x416] sm:$0xc] %vm4227_vm10, %v4498_v38   ;;  %4505 = vst.msk [vmem:[#allocation0 + $0x424] sm:$0x30] %vm4227_vm10, %v4498_v38   ;;  %v5505_v44 = vld [vmem:[#allocation0 + $0x3e8] sm:$0x3] }
 0x3c1   :  { %4507 = vst.msk [vmem:[#allocation0 + $0x432] sm:$0xc0] %vm4227_vm10, %v4498_v38   ;;  %7183 = vst [vmem:[%s11811_s1 + $0xce] sm:$0x3] %v5373_v40  ;;  %v5517_v49 = vld [vmem:[#allocation0 + $0x3f8] sm:$0x3]  ;;  %v4749_v40 = vpop.permute.xlu1 %4748  }
 0x3c2   :  { %7201 = vst [vmem:[%s11811_s1 + $0xf2] sm:$0x3] %v5481_v41  ;;  %7203 = vst [vmem:[%s11811_s1 + $0xf6] sm:$0x3] %v5493_v42  ;;  %v5433_v51 = vld [vmem:[#allocation0 + $0x388] sm:$0x3] }
 0x3c3   :  { %7205 = vst [vmem:[%s11811_s1 + $0xfa] sm:$0x3] %v5505_v44  ;;  %4552 = vst.msk [vmem:[#allocation0 + $0x4c8] sm:$0x3] %vm4227_vm10, %v4549_v46   ;;  %v5445_v53 = vld [vmem:[#allocation0 + $0x398] sm:$0x3] }
 0x3c4   :  { %4554 = vst.msk [vmem:[#allocation0 + $0x4d6] sm:$0xc] %vm4227_vm10, %v4549_v46   ;;  %4556 = vst.msk [vmem:[#allocation0 + $0x4e4] sm:$0x30] %vm4227_vm10, %v4549_v46   ;;  %v5457_v55 = vld [vmem:[#allocation0 + $0x3a8] sm:$0x3] }
 0x3c5   :  { %4558 = vst.msk [vmem:[#allocation0 + $0x4f2] sm:$0xc0] %vm4227_vm10, %v4549_v46   ;;  %7207 = vst [vmem:[%s11811_s1 + $0xfe] sm:$0x3] %v5517_v49  ;;  %v5469_v58 = vld [vmem:[#allocation0 + $0x3b8] sm:$0x3]  ;;  %v4736_v49 = vpop.permute.xlu0 %4735  }
 0x3c6   :  { %7193 = vst [vmem:[%s11811_s1 + $0xe2] sm:$0x3] %v5433_v51  ;;  %7195 = vst [vmem:[%s11811_s1 + $0xe6] sm:$0x3] %v5445_v53  ;;  %v5577_v59 = vld [vmem:[#allocation0 + $0x448] sm:$0x3] }
 0x3c7   :  { %7197 = vst [vmem:[%s11811_s1 + $0xea] sm:$0x3] %v5457_v55  ;;  %4535 = vst.msk [vmem:[#allocation0 + $0x488] sm:$0x3] %vm4227_vm10, %v4532_v56   ;;  %v5589_v62 = vld [vmem:[#allocation0 + $0x458] sm:$0x3] }
 0x3c8   :  { %4537 = vst.msk [vmem:[#allocation0 + $0x496] sm:$0xc] %vm4227_vm10, %v4532_v56   ;;  %4539 = vst.msk [vmem:[#allocation0 + $0x4a4] sm:$0x30] %vm4227_vm10, %v4532_v56   ;;  %v5601_v63 = vld [vmem:[#allocation0 + $0x468] sm:$0x3] }
 0x3c9   :  { %4541 = vst.msk [vmem:[#allocation0 + $0x4b2] sm:$0xc0] %vm4227_vm10, %v4532_v56   ;;  %7199 = vst [vmem:[%s11811_s1 + $0xee] sm:$0x3] %v5469_v58  ;;  %v5613_v5 = vld [vmem:[#allocation0 + $0x478] sm:$0x3] }
 0x3ca   :  { %7217 = vst [vmem:[%s11811_s1 + $0x112] sm:$0x3] %v5577_v59  ;;  %7219 = vst [vmem:[%s11811_s1 + $0x116] sm:$0x3] %v5589_v62  ;;  %v5529_v8 = vld [vmem:[#allocation0 + $0x408] sm:$0x3] }
 0x3cb   :  { %7221 = vst [vmem:[%s11811_s1 + $0x11a] sm:$0x3] %v5601_v63  ;;  %4586 = vst.msk [vmem:[#allocation0 + $0x548] sm:$0x3] %vm4227_vm10, %v4583_v4   ;;  %v5541_v10 = vld [vmem:[#allocation0 + $0x418] sm:$0x3] }
 0x3cc   :  { %4588 = vst.msk [vmem:[#allocation0 + $0x556] sm:$0xc] %vm4227_vm10, %v4583_v4   ;;  %4590 = vst.msk [vmem:[#allocation0 + $0x564] sm:$0x30] %vm4227_vm10, %v4583_v4   ;;  %v5553_v11 = vld [vmem:[#allocation0 + $0x428] sm:$0x3] }
 0x3cd   :  { %4592 = vst.msk [vmem:[#allocation0 + $0x572] sm:$0xc0] %vm4227_vm10, %v4583_v4   ;;  %7223 = vst [vmem:[%s11811_s1 + $0x11e] sm:$0x3] %v5613_v5  ;;  %v5565_v14 = vld [vmem:[#allocation0 + $0x438] sm:$0x3] }
 0x3ce   :  { %7209 = vst [vmem:[%s11811_s1 + $0x102] sm:$0x3] %v5529_v8  ;;  %7211 = vst [vmem:[%s11811_s1 + $0x106] sm:$0x3] %v5541_v10  ;;  %v5673_v16 = vld [vmem:[#allocation0 + $0x4c8] sm:$0x3] }
 0x3cf   :  { %7213 = vst [vmem:[%s11811_s1 + $0x10a] sm:$0x3] %v5553_v11  ;;  %4569 = vst.msk [vmem:[#allocation0 + $0x508] sm:$0x3] %vm4227_vm10, %v4566_v13   ;;  %v5685_v17 = vld [vmem:[#allocation0 + $0x4d8] sm:$0x3] }
 0x3d0   :  { %4571 = vst.msk [vmem:[#allocation0 + $0x516] sm:$0xc] %vm4227_vm10, %v4566_v13   ;;  %4573 = vst.msk [vmem:[#allocation0 + $0x524] sm:$0x30] %vm4227_vm10, %v4566_v13   ;;  %v5697_v22 = vld [vmem:[#allocation0 + $0x4e8] sm:$0x3] }
 0x3d1   :  { %4575 = vst.msk [vmem:[#allocation0 + $0x532] sm:$0xc0] %vm4227_vm10, %v4566_v13   ;;  %7215 = vst [vmem:[%s11811_s1 + $0x10e] sm:$0x3] %v5565_v14  ;;  %v5709_v24 = vld [vmem:[#allocation0 + $0x4f8] sm:$0x3] }
 0x3d2   :  { %7233 = vst [vmem:[%s11811_s1 + $0x132] sm:$0x3] %v5673_v16  ;;  %7235 = vst [vmem:[%s11811_s1 + $0x136] sm:$0x3] %v5685_v17  ;;  %v5625_v25 = vld [vmem:[#allocation0 + $0x488] sm:$0x3] }
 0x3d3   :  { %7237 = vst [vmem:[%s11811_s1 + $0x13a] sm:$0x3] %v5697_v22  ;;  %4620 = vst.msk [vmem:[#allocation0 + $0x5c8] sm:$0x3] %vm4227_vm10, %v4617_v23   ;;  %v5637_v26 = vld [vmem:[#allocation0 + $0x498] sm:$0x3] }
 0x3d4   :  { %4622 = vst.msk [vmem:[#allocation0 + $0x5d6] sm:$0xc] %vm4227_vm10, %v4617_v23   ;;  %4624 = vst.msk [vmem:[#allocation0 + $0x5e4] sm:$0x30] %vm4227_vm10, %v4617_v23   ;;  %v5649_v1 = vld [vmem:[#allocation0 + $0x4a8] sm:$0x3] }
 0x3d5   :  { %4626 = vst.msk [vmem:[#allocation0 + $0x5f2] sm:$0xc0] %vm4227_vm10, %v4617_v23   ;;  %7239 = vst [vmem:[%s11811_s1 + $0x13e] sm:$0x3] %v5709_v24  ;;  %v5661_v32 = vld [vmem:[#allocation0 + $0x4b8] sm:$0x3] }
 0x3d6   :  { %7225 = vst [vmem:[%s11811_s1 + $0x122] sm:$0x3] %v5625_v25  ;;  %7227 = vst [vmem:[%s11811_s1 + $0x126] sm:$0x3] %v5637_v26  ;;  %v5769_v33 = vld [vmem:[#allocation0 + $0x548] sm:$0x3] }
 0x3d7   :  { %7229 = vst [vmem:[%s11811_s1 + $0x12a] sm:$0x3] %v5649_v1  ;;  %4603 = vst.msk [vmem:[#allocation0 + $0x588] sm:$0x3] %vm4227_vm10, %v4600_v31   ;;  %v5781_v47 = vld [vmem:[#allocation0 + $0x558] sm:$0x3] }
 0x3d8   :  { %4605 = vst.msk [vmem:[#allocation0 + $0x596] sm:$0xc] %vm4227_vm10, %v4600_v31   ;;  %4607 = vst.msk [vmem:[#allocation0 + $0x5a4] sm:$0x30] %vm4227_vm10, %v4600_v31   ;;  %v5793_v52 = vld [vmem:[#allocation0 + $0x568] sm:$0x3] }
 0x3d9   :  { %4609 = vst.msk [vmem:[#allocation0 + $0x5b2] sm:$0xc0] %vm4227_vm10, %v4600_v31   ;;  %7231 = vst [vmem:[%s11811_s1 + $0x12e] sm:$0x3] %v5661_v32  ;;  %v5805_v2 = vld [vmem:[#allocation0 + $0x578] sm:$0x3] }
 0x3da   :  { %7249 = vst [vmem:[%s11811_s1 + $0x152] sm:$0x3] %v5769_v33  ;;  %7251 = vst [vmem:[%s11811_s1 + $0x156] sm:$0x3] %v5781_v47  ;;  %v5721_v7 = vld [vmem:[#allocation0 + $0x508] sm:$0x3] }
 0x3db   :  { %7253 = vst [vmem:[%s11811_s1 + $0x15a] sm:$0x3] %v5793_v52  ;;  %4654 = vst.msk [vmem:[#allocation0 + $0x648] sm:$0x3] %vm4227_vm10, %v4651_v57   ;;  %v5733_v15 = vld [vmem:[#allocation0 + $0x518] sm:$0x3] }
 0x3dc   :  { %4656 = vst.msk [vmem:[#allocation0 + $0x656] sm:$0xc] %vm4227_vm10, %v4651_v57   ;;  %4658 = vst.msk [vmem:[#allocation0 + $0x664] sm:$0x30] %vm4227_vm10, %v4651_v57   ;;  %v5745_v21 = vld [vmem:[#allocation0 + $0x528] sm:$0x3] }
 0x3dd   :  { %4660 = vst.msk [vmem:[#allocation0 + $0x672] sm:$0xc0] %vm4227_vm10, %v4651_v57   ;;  %7255 = vst [vmem:[%s11811_s1 + $0x15e] sm:$0x3] %v5805_v2  ;;  %v5757_v35 = vld [vmem:[#allocation0 + $0x538] sm:$0x3] }
 0x3de   :  { %7241 = vst [vmem:[%s11811_s1 + $0x142] sm:$0x3] %v5721_v7  ;;  %7243 = vst [vmem:[%s11811_s1 + $0x146] sm:$0x3] %v5733_v15  ;;  %v5865_v43 = vld [vmem:[#allocation0 + $0x5c8] sm:$0x3] }
 0x3df   :  { %7245 = vst [vmem:[%s11811_s1 + $0x14a] sm:$0x3] %v5745_v21  ;;  %4637 = vst.msk [vmem:[#allocation0 + $0x608] sm:$0x3] %vm4227_vm10, %v4634_v29   ;;  %v5877_v50 = vld [vmem:[#allocation0 + $0x5d8] sm:$0x3] }
 0x3e0   :  { %4639 = vst.msk [vmem:[#allocation0 + $0x616] sm:$0xc] %vm4227_vm10, %v4634_v29   ;;  %4641 = vst.msk [vmem:[#allocation0 + $0x624] sm:$0x30] %vm4227_vm10, %v4634_v29   ;;  %v5889_v60 = vld [vmem:[#allocation0 + $0x5e8] sm:$0x3] }
 0x3e1   :  { %4643 = vst.msk [vmem:[#allocation0 + $0x632] sm:$0xc0] %vm4227_vm10, %v4634_v29   ;;  %7247 = vst [vmem:[%s11811_s1 + $0x14e] sm:$0x3] %v5757_v35  ;;  %v5901_v12 = vld [vmem:[#allocation0 + $0x5f8] sm:$0x3] }
 0x3e2   :  { %7265 = vst [vmem:[%s11811_s1 + $0x172] sm:$0x3] %v5865_v43  ;;  %7267 = vst [vmem:[%s11811_s1 + $0x176] sm:$0x3] %v5877_v50  ;;  %v5817_v19 = vld [vmem:[#allocation0 + $0x588] sm:$0x3] }
 0x3e3   :  { %7269 = vst [vmem:[%s11811_s1 + $0x17a] sm:$0x3] %v5889_v60  ;;  %4688 = vst.msk [vmem:[#allocation0 + $0x6c8] sm:$0x3] %vm4227_vm10, %v4685_v3   ;;  %v5829_v28 = vld [vmem:[#allocation0 + $0x598] sm:$0x3] }
 0x3e4   :  { %4690 = vst.msk [vmem:[#allocation0 + $0x6d6] sm:$0xc] %vm4227_vm10, %v4685_v3   ;;  %4692 = vst.msk [vmem:[#allocation0 + $0x6e4] sm:$0x30] %vm4227_vm10, %v4685_v3   ;;  %v5841_v36 = vld [vmem:[#allocation0 + $0x5a8] sm:$0x3] }
 0x3e5   :  { %4694 = vst.msk [vmem:[#allocation0 + $0x6f2] sm:$0xc0] %vm4227_vm10, %v4685_v3   ;;  %7271 = vst [vmem:[%s11811_s1 + $0x17e] sm:$0x3] %v5901_v12  ;;  %v5853_v54 = vld [vmem:[#allocation0 + $0x5b8] sm:$0x3] }
 0x3e6   :  { %7257 = vst [vmem:[%s11811_s1 + $0x162] sm:$0x3] %v5817_v19  ;;  %7259 = vst [vmem:[%s11811_s1 + $0x166] sm:$0x3] %v5829_v28  ;;  %v5961_v0 = vld [vmem:[#allocation0 + $0x648] sm:$0x3] }
 0x3e7   :  { %7261 = vst [vmem:[%s11811_s1 + $0x16a] sm:$0x3] %v5841_v36  ;;  %4671 = vst.msk [vmem:[#allocation0 + $0x688] sm:$0x3] %vm4227_vm10, %v4668_v45   ;;  %v5973_v9 = vld [vmem:[#allocation0 + $0x658] sm:$0x3] }
 0x3e8   :  { %4673 = vst.msk [vmem:[#allocation0 + $0x696] sm:$0xc] %vm4227_vm10, %v4668_v45   ;;  %4675 = vst.msk [vmem:[#allocation0 + $0x6a4] sm:$0x30] %vm4227_vm10, %v4668_v45   ;;  %v5985_v20 = vld [vmem:[#allocation0 + $0x668] sm:$0x3] }
 0x3e9   :  { %4677 = vst.msk [vmem:[#allocation0 + $0x6b2] sm:$0xc0] %vm4227_vm10, %v4668_v45   ;;  %7263 = vst [vmem:[%s11811_s1 + $0x16e] sm:$0x3] %v5853_v54  ;;  %v5997_v39 = vld [vmem:[#allocation0 + $0x678] sm:$0x3] }
 0x3ea   :  { %7281 = vst [vmem:[%s11811_s1 + $0x192] sm:$0x3] %v5961_v0  ;;  %7283 = vst [vmem:[%s11811_s1 + $0x196] sm:$0x3] %v5973_v9  ;;  %v5913_v48 = vld [vmem:[#allocation0 + $0x608] sm:$0x3] }
 0x3eb   :  { %7285 = vst [vmem:[%s11811_s1 + $0x19a] sm:$0x3] %v5985_v20  ;;  %4722 = vst.msk [vmem:[#allocation0 + $0x748] sm:$0x3] %vm4227_vm10, %v4719_v27   ;;  %v5925_v61 = vld [vmem:[#allocation0 + $0x618] sm:$0x3] }
 0x3ec   :  { %4724 = vst.msk [vmem:[#allocation0 + $0x756] sm:$0xc] %vm4227_vm10, %v4719_v27   ;;  %4726 = vst.msk [vmem:[#allocation0 + $0x764] sm:$0x30] %vm4227_vm10, %v4719_v27   ;;  %v5937_v6 = vld [vmem:[#allocation0 + $0x628] sm:$0x3] }
 0x3ed   :  { %4728 = vst.msk [vmem:[#allocation0 + $0x772] sm:$0xc0] %vm4227_vm10, %v4719_v27   ;;  %7287 = vst [vmem:[%s11811_s1 + $0x19e] sm:$0x3] %v5997_v39  ;;  %v5949_v30 = vld [vmem:[#allocation0 + $0x638] sm:$0x3] }
 0x3ee   :  { %7273 = vst [vmem:[%s11811_s1 + $0x182] sm:$0x3] %v5913_v48  ;;  %7275 = vst [vmem:[%s11811_s1 + $0x186] sm:$0x3] %v5925_v61  ;;  %v6057_v34 = vld [vmem:[#allocation0 + $0x6c8] sm:$0x3] }
 0x3ef   :  { %7277 = vst [vmem:[%s11811_s1 + $0x18a] sm:$0x3] %v5937_v6  ;;  %4705 = vst.msk [vmem:[#allocation0 + $0x708] sm:$0x3] %vm4227_vm10, %v4702_v18   ;;  %v6069_v37 = vld [vmem:[#allocation0 + $0x6d8] sm:$0x3] }
 0x3f0   :  { %4707 = vst.msk [vmem:[#allocation0 + $0x716] sm:$0xc] %vm4227_vm10, %v4702_v18   ;;  %4709 = vst.msk [vmem:[#allocation0 + $0x724] sm:$0x30] %vm4227_vm10, %v4702_v18   ;;  %v6081_v38 = vld [vmem:[#allocation0 + $0x6e8] sm:$0x3] }
 0x3f1   :  { %4711 = vst.msk [vmem:[#allocation0 + $0x732] sm:$0xc0] %vm4227_vm10, %v4702_v18   ;;  %7279 = vst [vmem:[%s11811_s1 + $0x18e] sm:$0x3] %v5949_v30  ;;  %v6093_v41 = vld [vmem:[#allocation0 + $0x6f8] sm:$0x3] }
 0x3f2   :  { %7297 = vst [vmem:[%s11811_s1 + $0x1b2] sm:$0x3] %v6057_v34  ;;  %7299 = vst [vmem:[%s11811_s1 + $0x1b6] sm:$0x3] %v6069_v37  ;;  %v6009_v42 = vld [vmem:[#allocation0 + $0x688] sm:$0x3] }
 0x3f3   :  { %7301 = vst [vmem:[%s11811_s1 + $0x1ba] sm:$0x3] %v6081_v38  ;;  %4752 = vst.msk [vmem:[#allocation0 + $0x7c8] sm:$0x3] %vm4227_vm10, %v4749_v40   ;;  %v6021_v44 = vld [vmem:[#allocation0 + $0x698] sm:$0x3] }
 0x3f4   :  { %4754 = vst.msk [vmem:[#allocation0 + $0x7d6] sm:$0xc] %vm4227_vm10, %v4749_v40   ;;  %7303 = vst [vmem:[%s11811_s1 + $0x1be] sm:$0x3] %v6093_v41  ;;  %v6033_v46 = vld [vmem:[#allocation0 + $0x6a8] sm:$0x3] }
 0x3f5   :  { %7289 = vst [vmem:[%s11811_s1 + $0x1a2] sm:$0x3] %v6009_v42  ;;  %7291 = vst [vmem:[%s11811_s1 + $0x1a6] sm:$0x3] %v6021_v44  ;;  %v6045_v51 = vld [vmem:[#allocation0 + $0x6b8] sm:$0x3] }
 0x3f6   :  { %7293 = vst [vmem:[%s11811_s1 + $0x1aa] sm:$0x3] %v6033_v46  ;;  %4739 = vst.msk [vmem:[#allocation0 + $0x788] sm:$0x3] %vm4227_vm10, %v4736_v49   ;;  %v6153_v53 = vld [vmem:[#allocation0 + $0x748] sm:$0x3] }
 0x3f7   :  { %4741 = vst.msk [vmem:[#allocation0 + $0x796] sm:$0xc] %vm4227_vm10, %v4736_v49   ;;  %4743 = vst.msk [vmem:[#allocation0 + $0x7a4] sm:$0x30] %vm4227_vm10, %v4736_v49   ;;  %v6165_v55 = vld [vmem:[#allocation0 + $0x758] sm:$0x3] }
 0x3f8   :  { %4745 = vst.msk [vmem:[#allocation0 + $0x7b2] sm:$0xc0] %vm4227_vm10, %v4736_v49   ;;  %7295 = vst [vmem:[%s11811_s1 + $0x1ae] sm:$0x3] %v6045_v51  ;;  %v6177_v56 = vld [vmem:[#allocation0 + $0x768] sm:$0x3] }
 0x3f9   :  { %7313 = vst [vmem:[%s11811_s1 + $0x1d2] sm:$0x3] %v6153_v53  ;;  %7315 = vst [vmem:[%s11811_s1 + $0x1d6] sm:$0x3] %v6165_v55  ;;  %v6189_v58 = vld [vmem:[#allocation0 + $0x778] sm:$0x3] }
 0x3fa   :  { %7317 = vst [vmem:[%s11811_s1 + $0x1da] sm:$0x3] %v6177_v56  ;;  %7319 = vst [vmem:[%s11811_s1 + $0x1de] sm:$0x3] %v6189_v58  ;;  %v6105_v59 = vld [vmem:[#allocation0 + $0x708] sm:$0x3] }
 0x3fb   :  { %v6117_v62 = vld [vmem:[#allocation0 + $0x718] sm:$0x3]  ;;  %v6129_v63 = vld [vmem:[#allocation0 + $0x728] sm:$0x3]  ;;  %7305 = vst [vmem:[%s11811_s1 + $0x1c2] sm:$0x3] %v6105_v59 }
 0x3fc   :  { %7307 = vst [vmem:[%s11811_s1 + $0x1c6] sm:$0x3] %v6117_v62  ;;  %7309 = vst [vmem:[%s11811_s1 + $0x1ca] sm:$0x3] %v6129_v63  ;;  %v6141_v4 = vld [vmem:[#allocation0 + $0x738] sm:$0x3] }
 0x3fd   :  { %7311 = vst [vmem:[%s11811_s1 + $0x1ce] sm:$0x3] %v6141_v4  ;;  %v6249_v5 = vld [vmem:[#allocation0 + $0x7c8] sm:$0x3]  ;;  %v6261_v8 = vld [vmem:[#allocation0 + $0x7d8] sm:$0x3] }
 0x3fe   :  { %7329 = vst [vmem:[%s11811_s1 + $0x1f2] sm:$0x3] %v6249_v5  ;;  %7331 = vst [vmem:[%s11811_s1 + $0x1f6] sm:$0x3] %v6261_v8  ;;  %v6201_v10 = vld [vmem:[#allocation0 + $0x788] sm:$0x3] }
 0x3ff   :  { %v6213_v11 = vld [vmem:[#allocation0 + $0x798] sm:$0x3]  ;;  %v6225_v13 = vld [vmem:[#allocation0 + $0x7a8] sm:$0x3]  ;;  %7321 = vst [vmem:[%s11811_s1 + $0x1e2] sm:$0x3] %v6201_v10 }
 0x400   :  { %7323 = vst [vmem:[%s11811_s1 + $0x1e6] sm:$0x3] %v6213_v11  ;;  %7325 = vst [vmem:[%s11811_s1 + $0x1ea] sm:$0x3] %v6225_v13  ;;  %v6237_v14 = vld [vmem:[#allocation0 + $0x7b8] sm:$0x3] }
 0x401   :  { %7327 = vst [vmem:[%s11811_s1 + $0x1ee] sm:$0x3] %v6237_v14 }

// kernel: modulation_ncc_loss.1
= control target key start
LH: loop header
LB: loop body
LE: loop exit
PB: predicated region body
PF: predicated region fallthrough
CT: control target
= control target key end

     0   :  { %7 = vsyncpa [#allocation3], 0  ;;  %v18_v0 = vlaneseq  ;;  %vm361_vm0 = vcmask 1045504   ;;  %vm370_vm1 = vcmask 785408   ;;  %vm372_vm2 = vcmask 783360   ;;  %s933_s0 = inlined_call_operand.vmem [shape: f32[9,1,224], index: 0, kind: input, shape index: {}]   ;;  %s934_s1 = inlined_call_operand.vmem [shape: f32[2,9,14,224], index: 1, kind: input, shape index: {}]   ;;  %s935_s2 = inlined_call_operand.hbm [shape: f32[1,1], index: 2, kind: output, shape index: {}]  }
   0x1   :  { %v12_v1 = vld [vmem:[%s933_s0] sm:$0x3]  ;;  %v15_v4 = vld [vmem:[%s934_s1 + $0x10] sm:$0x3f]  ;;  %v509_v5 = vld [vmem:[%s933_s0 + $0x2] sm:$0x3] }
   0x2   :  { %v19_v2 = vshrl.u32 %v18_v0, 7  ;;  %v13_v3 = vld [vmem:[%s934_s1] sm:$0xff]  ;;  %v14_v6 = vld [vmem:[%s934_s1 + $0x8] sm:$0xff]  ;;  %v16_v7 = vld [vmem:[%s934_s1 + $0x18] sm:$0x3f]  ;;  %vm489_vm3 = vcmask 0  }
   0x3   :  { %v505_v10 = vld [vmem:[%s934_s1 + $0x120] sm:$0xff]  ;;  %v506_v11 = vld [vmem:[%s934_s1 + $0x128] sm:$0xff]  ;;  %v507_v12 = vld [vmem:[%s934_s1 + $0x130] sm:$0x3f] }
   0x4   :  { %v646_v8 = vsub.s32 0, %v19_v2  ;;  %v648_v9 = vsub.s32 1, %v19_v2  ;;  %v508_v13 = vld [vmem:[%s934_s1 + $0x138] sm:$0x3f]  ;;  %v510_v16 = vld [vmem:[%s934_s1 + $0x20] sm:$0xff]  ;;  %v511_v17 = vld [vmem:[%s934_s1 + $0x28] sm:$0xff] }
   0x5   :  { %v518_v20 = vld [vmem:[%s933_s0 + $0x4] sm:$0x3]  ;;  %v512_v21 = vld [vmem:[%s934_s1 + $0x30] sm:$0x3f]  ;;  %v513_v22 = vld [vmem:[%s934_s1 + $0x38] sm:$0x3f] }
   0x6   :  { %v21_v14 = vrot.slane %v12_v1, %v646_v8  ;;  %v25_v15 = vrot.slane %v12_v1, %v648_v9  ;;  %v60_v18 = vrot.slane %v509_v5, %v646_v8  ;;  %v64_v19 = vrot.slane %v509_v5, %v648_v9  ;;  %v514_v23 = vld [vmem:[%s934_s1 + $0x140] sm:$0xff]  ;;  %v515_v30 = vld [vmem:[%s934_s1 + $0x148] sm:$0xff]  ;;  %v516_v31 = vld [vmem:[%s934_s1 + $0x150] sm:$0x3f] }
   0x7   :  { %v99_v24 = vrot.slane %v518_v20, %v646_v8  ;;  %v103_v25 = vrot.slane %v518_v20, %v648_v9  ;;  %v517_v32 = vld [vmem:[%s934_s1 + $0x158] sm:$0x3f]  ;;  %v519_v41 = vld [vmem:[%s934_s1 + $0x40] sm:$0xff]  ;;  %v520_v42 = vld [vmem:[%s934_s1 + $0x48] sm:$0xff] }
   0x8   :  { %v28_v26 = vmul.f32 %v21_v14, %v13_v3  ;;  %v29_v27 = vmul.f32 %v25_v15, %v14_v6  ;;  %v30_v28 = vmul.f32 %v21_v14, %v15_v4  ;;  %v31_v29 = vmul.f32 %v25_v15, %v16_v7  ;;  %v521_v47 = vld [vmem:[%s934_s1 + $0x50] sm:$0x3f]  ;;  %v522_v48 = vld [vmem:[%s934_s1 + $0x58] sm:$0x3f]  ;;  %v523_v49 = vld [vmem:[%s934_s1 + $0x160] sm:$0xff] }
   0x9   :  { %v41_v33 = vmul.f32 %v505_v10, %v21_v14  ;;  %v42_v34 = vmul.f32 %v506_v11, %v25_v15  ;;  %v43_v35 = vmul.f32 %v507_v12, %v21_v14  ;;  %v44_v36 = vmul.f32 %v508_v13, %v25_v15  ;;  %v524_v54 = vld [vmem:[%s934_s1 + $0x168] sm:$0xff]  ;;  %v525_v55 = vld [vmem:[%s934_s1 + $0x170] sm:$0x3f]  ;;  %v526_v56 = vld [vmem:[%s934_s1 + $0x178] sm:$0x3f] }
   0xa   :  { %v67_v37 = vmul.f32 %v510_v16, %v60_v18  ;;  %v68_v38 = vmul.f32 %v511_v17, %v64_v19  ;;  %v69_v39 = vmul.f32 %v512_v21, %v60_v18  ;;  %v70_v40 = vmul.f32 %v513_v22, %v64_v19  ;;  %v527_v5 = vld [vmem:[%s933_s0 + $0x6] sm:$0x3]  ;;  %v536_v7 = vld [vmem:[%s933_s0 + $0x8] sm:$0x3]  ;;  %v530_v15 = vld [vmem:[%s934_s1 + $0x70] sm:$0x3f] }
   0xb   :  { %v80_v43 = vmul.f32 %v514_v23, %v60_v18  ;;  %v81_v44 = vmul.f32 %v515_v30, %v64_v19  ;;  %v82_v45 = vmul.f32 %v516_v31, %v60_v18  ;;  %v83_v46 = vmul.f32 %v517_v32, %v64_v19  ;;  %v528_v6 = vld [vmem:[%s934_s1 + $0x60] sm:$0xff]  ;;  %v529_v14 = vld [vmem:[%s934_s1 + $0x68] sm:$0xff]  ;;  %v531_v21 = vld [vmem:[%s934_s1 + $0x78] sm:$0x3f] }
   0xc   :  { %v71_v50 = vadd.f32 %v67_v37, %v28_v26  ;;  %v72_v51 = vadd.f32 %v68_v38, %v29_v27  ;;  %v73_v52 = vadd.f32 %v69_v39, %v30_v28  ;;  %v74_v53 = vadd.f32 %v70_v40, %v31_v29  ;;  %v545_v16 = vld [vmem:[%s933_s0 + $0xa] sm:$0x3]  ;;  %v532_v22 = vld [vmem:[%s934_s1 + $0x180] sm:$0xff]  ;;  %v534_v26 = vld [vmem:[%s934_s1 + $0x190] sm:$0x3f] }
   0xd   :  { %v84_v57 = vadd.f32 %v80_v43, %v41_v33  ;;  %v85_v58 = vadd.f32 %v81_v44, %v42_v34  ;;  %v86_v59 = vadd.f32 %v82_v45, %v43_v35  ;;  %v87_v60 = vadd.f32 %v83_v46, %v44_v36  ;;  %v533_v23 = vld [vmem:[%s934_s1 + $0x188] sm:$0xff]  ;;  %v535_v27 = vld [vmem:[%s934_s1 + $0x198] sm:$0x3f]  ;;  %v537_v39 = vld [vmem:[%s934_s1 + $0x80] sm:$0xff] }
   0xe   :  { %v106_v61 = vmul.f32 %v519_v41, %v99_v24  ;;  %v107_v62 = vmul.f32 %v520_v42, %v103_v25  ;;  %v108_v63 = vmul.f32 %v521_v47, %v99_v24  ;;  %v109_v0 = vmul.f32 %v522_v48, %v103_v25  ;;  %v554_v30 = vld [vmem:[%s933_s0 + $0xc] sm:$0x3]  ;;  %v539_v45 = vld [vmem:[%s934_s1 + $0x90] sm:$0x3f]  ;;  %v540_v46 = vld [vmem:[%s934_s1 + $0x98] sm:$0x3f] }
   0xf   :  { %v119_v1 = vmul.f32 %v523_v49, %v99_v24  ;;  %v120_v2 = vmul.f32 %v524_v54, %v103_v25  ;;  %v121_v3 = vmul.f32 %v525_v55, %v99_v24  ;;  %v122_v4 = vmul.f32 %v526_v56, %v103_v25  ;;  %v538_v40 = vld [vmem:[%s934_s1 + $0x88] sm:$0xff]  ;;  %v541_v47 = vld [vmem:[%s934_s1 + $0x1a0] sm:$0xff]  ;;  %v544_v54 = vld [vmem:[%s934_s1 + $0x1b8] sm:$0x3f] }
  0x10   :  { %v110_v10 = vadd.f32 %v106_v61, %v71_v50  ;;  %v111_v11 = vadd.f32 %v107_v62, %v72_v51  ;;  %v112_v12 = vadd.f32 %v108_v63, %v73_v52  ;;  %v113_v13 = vadd.f32 %v109_v0, %v74_v53  ;;  %v542_v52 = vld [vmem:[%s934_s1 + $0x1a8] sm:$0xff]  ;;  %v543_v53 = vld [vmem:[%s934_s1 + $0x1b0] sm:$0x3f]  ;;  %v546_v63 = vld [vmem:[%s934_s1 + $0xa0] sm:$0xff] }
  0x11   :  { %v123_v17 = vadd.f32 %v119_v1, %v84_v57  ;;  %v124_v18 = vadd.f32 %v120_v2, %v85_v58  ;;  %v125_v19 = vadd.f32 %v121_v3, %v86_v59  ;;  %v126_v20 = vadd.f32 %v122_v4, %v87_v60  ;;  %v547_v0 = vld [vmem:[%s934_s1 + $0xa8] sm:$0xff] }
  0x12   :  { %v138_v24 = vrot.slane %v527_v5, %v646_v8  ;;  %v142_v25 = vrot.slane %v527_v5, %v648_v9  ;;  %v177_v28 = vrot.slane %v536_v7, %v646_v8  ;;  %v181_v29 = vrot.slane %v536_v7, %v648_v9  ;;  %v548_v5 = vld [vmem:[%s934_s1 + $0xb0] sm:$0x3f]  ;;  %v550_v7 = vld [vmem:[%s934_s1 + $0x1c0] sm:$0xff] }
  0x13   :  { %v216_v31 = vrot.slane %v545_v16, %v646_v8  ;;  %v220_v32 = vrot.slane %v545_v16, %v648_v9  ;;  %v762_v33 = vrot.slane %v554_v30, %v646_v8  ;;  %v765_v34 = vrot.slane %v554_v30, %v648_v9  ;;  %v553_v16 = vld [vmem:[%s934_s1 + $0x1d8] sm:$0x3f] }
  0x14   :  { %v145_v35 = vmul.f32 %v528_v6, %v138_v24  ;;  %v146_v36 = vmul.f32 %v529_v14, %v142_v25  ;;  %v147_v37 = vmul.f32 %v530_v15, %v138_v24  ;;  %v148_v38 = vmul.f32 %v531_v21, %v142_v25  ;;  %v549_v6 = vld [vmem:[%s934_s1 + $0xb8] sm:$0x3f]  ;;  %v551_v14 = vld [vmem:[%s934_s1 + $0x1c8] sm:$0xff]  ;;  %v552_v15 = vld [vmem:[%s934_s1 + $0x1d0] sm:$0x3f] }
  0x15   :  { %v158_v41 = vmul.f32 %v532_v22, %v138_v24  ;;  %v159_v42 = vmul.f32 %v533_v23, %v142_v25  ;;  %v160_v43 = vmul.f32 %v534_v26, %v138_v24  ;;  %v161_v44 = vmul.f32 %v535_v27, %v142_v25  ;;  %v555_v25 = vld [vmem:[%s934_s1 + $0xc0] sm:$0xff]  ;;  %v556_v26 = vld [vmem:[%s934_s1 + $0xc8] sm:$0xff] }
  0x16   :  { %v149_v48 = vadd.f32 %v145_v35, %v110_v10  ;;  %v150_v49 = vadd.f32 %v146_v36, %v111_v11  ;;  %v151_v50 = vadd.f32 %v147_v37, %v112_v12  ;;  %v152_v51 = vadd.f32 %v148_v38, %v113_v13  ;;  %v557_v35 = vld [vmem:[%s934_s1 + $0xd0] sm:$0x3f]  ;;  %v558_v36 = vld [vmem:[%s934_s1 + $0xd8] sm:$0x3f]  ;;  %v559_v37 = vld [vmem:[%s934_s1 + $0x1e0] sm:$0xff] }
  0x17   :  { %v162_v55 = vadd.f32 %v158_v41, %v123_v17  ;;  %v163_v56 = vadd.f32 %v159_v42, %v124_v18  ;;  %v164_v57 = vadd.f32 %v160_v43, %v125_v19  ;;  %v165_v58 = vadd.f32 %v161_v44, %v126_v20  ;;  %v562_v42 = vld [vmem:[%s934_s1 + $0x1f8] sm:$0x3f] }
  0x18   :  { %v184_v59 = vmul.f32 %v537_v39, %v177_v28  ;;  %v185_v60 = vmul.f32 %v538_v40, %v181_v29  ;;  %v186_v61 = vmul.f32 %v539_v45, %v177_v28  ;;  %v187_v62 = vmul.f32 %v540_v46, %v181_v29 }
  0x19   :  { %v197_v1 = vmul.f32 %v541_v47, %v177_v28  ;;  %v198_v2 = vmul.f32 %v542_v52, %v181_v29  ;;  %v199_v3 = vmul.f32 %v543_v53, %v177_v28  ;;  %v200_v4 = vmul.f32 %v544_v54, %v181_v29 }
  0x1a   :  { %v188_v10 = vadd.f32 %v184_v59, %v149_v48  ;;  %v189_v11 = vadd.f32 %v185_v60, %v150_v49  ;;  %v190_v12 = vadd.f32 %v186_v61, %v151_v50  ;;  %v191_v13 = vadd.f32 %v187_v62, %v152_v51  ;;  %v566_v61 = vld [vmem:[%s934_s1 + $0xf0] sm:$0x3f]  ;;  %v567_v62 = vld [vmem:[%s934_s1 + $0xf8] sm:$0x3f] }
  0x1b   :  { %v201_v17 = vadd.f32 %v197_v1, %v162_v55  ;;  %v202_v18 = vadd.f32 %v198_v2, %v163_v56  ;;  %v203_v19 = vadd.f32 %v199_v3, %v164_v57  ;;  %v204_v20 = vadd.f32 %v200_v4, %v165_v58  ;;  %v563_v55 = vld [vmem:[%s933_s0 + $0xe] sm:$0x3]  ;;  %v564_v56 = vld [vmem:[%s934_s1 + $0xe0] sm:$0xff]  ;;  %v572_v58 = vld [vmem:[%s933_s0 + $0x10] sm:$0x3] }
  0x1c   :  { %v223_v21 = vmul.f32 %v546_v63, %v216_v31  ;;  %v224_v22 = vmul.f32 %v547_v0, %v220_v32  ;;  %v225_v23 = vmul.f32 %v548_v5, %v216_v31  ;;  %v226_v24 = vmul.f32 %v549_v6, %v220_v32  ;;  %v565_v57 = vld [vmem:[%s934_s1 + $0xe8] sm:$0xff]  ;;  %v568_v63 = vld [vmem:[%s934_s1 + $0x200] sm:$0xff]  ;;  %v570_v5 = vld [vmem:[%s934_s1 + $0x210] sm:$0x3f] }
  0x1d   :  { %v236_v27 = vmul.f32 %v550_v7, %v216_v31  ;;  %v237_v28 = vmul.f32 %v551_v14, %v220_v32  ;;  %v238_v29 = vmul.f32 %v552_v15, %v216_v31  ;;  %v239_v30 = vmul.f32 %v553_v16, %v220_v32  ;;  %v560_v31 = vld [vmem:[%s934_s1 + $0x1e8] sm:$0xff]  ;;  %v561_v32 = vld [vmem:[%s934_s1 + $0x1f0] sm:$0x3f]  ;;  %v571_v6 = vld [vmem:[%s934_s1 + $0x218] sm:$0x3f] }
  0x1e   :  { %v227_v38 = vadd.f32 %v223_v21, %v188_v10  ;;  %v228_v39 = vadd.f32 %v224_v22, %v189_v11  ;;  %v229_v40 = vadd.f32 %v225_v23, %v190_v12  ;;  %v230_v41 = vadd.f32 %v226_v24, %v191_v13  ;;  %v569_v4 = vld [vmem:[%s934_s1 + $0x208] sm:$0xff]  ;;  %v577_v23 = vld [vmem:[%s934_s1 + $0x220] sm:$0xff] }
  0x1f   :  { %v240_v43 = vadd.f32 %v236_v27, %v201_v17  ;;  %v241_v44 = vadd.f32 %v237_v28, %v202_v18  ;;  %v242_v45 = vadd.f32 %v238_v29, %v203_v19  ;;  %v243_v46 = vadd.f32 %v239_v30, %v204_v20  ;;  %v573_v17 = vld [vmem:[%s934_s1 + $0x100] sm:$0xff]  ;;  %v574_v18 = vld [vmem:[%s934_s1 + $0x108] sm:$0xff]  ;;  %v579_v29 = vld [vmem:[%s934_s1 + $0x230] sm:$0x3f] }
  0x20   :  { %v262_v47 = vmul.f32 %v555_v25, %v762_v33  ;;  %v263_v48 = vmul.f32 %v556_v26, %v765_v34  ;;  %v264_v49 = vmul.f32 %v557_v35, %v762_v33  ;;  %v265_v50 = vmul.f32 %v558_v36, %v765_v34  ;;  %v578_v28 = vld [vmem:[%s934_s1 + $0x228] sm:$0xff]  ;;  %v580_v30 = vld [vmem:[%s934_s1 + $0x238] sm:$0x3f] }
  0x21   :  { %v275_v51 = vmul.f32 %v559_v37, %v762_v33  ;;  %v276_v52 = vmul.f32 %v560_v31, %v765_v34  ;;  %v277_v53 = vmul.f32 %v561_v32, %v762_v33  ;;  %v278_v54 = vmul.f32 %v562_v42, %v765_v34 }
  0x22   :  { %v266_v59 = vadd.f32 %v262_v47, %v227_v38  ;;  %v267_v33 = vadd.f32 %v263_v48, %v228_v39  ;;  %v268_v60 = vadd.f32 %v264_v49, %v229_v40  ;;  %v269_v34 = vadd.f32 %v265_v50, %v230_v41 }
  0x23   :  { %v279_v0 = vadd.f32 %v275_v51, %v240_v43  ;;  %v280_v1 = vadd.f32 %v276_v52, %v241_v44  ;;  %v294_v2 = vrot.slane %v563_v55, %v646_v8  ;;  %v298_v3 = vrot.slane %v563_v55, %v648_v9 }
  0x24   :  { %v281_v7 = vadd.f32 %v277_v53, %v242_v45  ;;  %v282_v10 = vadd.f32 %v278_v54, %v243_v46  ;;  %v333_v11 = vrot.slane %v572_v58, %v646_v8  ;;  %v337_v12 = vrot.slane %v572_v58, %v648_v9  ;;  %v575_v8 = vld [vmem:[%s934_s1 + $0x110] sm:$0x3f]  ;;  %v576_v9 = vld [vmem:[%s934_s1 + $0x118] sm:$0x3f]  ;;  %s612_s1 = smov [#allocation2]  }
  0x25   :  { %v301_v13 = vmul.f32 %v564_v56, %v294_v2  ;;  %v302_v14 = vmul.f32 %v565_v57, %v298_v3  ;;  %v303_v15 = vmul.f32 %v566_v61, %v294_v2  ;;  %v304_v16 = vmul.f32 %v567_v62, %v298_v3  ;;  %s497_s30 = sshll.u32 %s612_s1, 4  ;;  %s498_s30 = int_to_ptr.vmem [resolvable:$true] %s497_s30 }
  0x26   :  { %v314_v19 = vmul.f32 %v568_v63, %v294_v2  ;;  %v315_v20 = vmul.f32 %v569_v4, %v298_v3  ;;  %v316_v21 = vmul.f32 %v570_v5, %v294_v2  ;;  %v317_v22 = vmul.f32 %v571_v6, %v298_v3  ;;  %s588_s3 = scalar_lea.vmem %s498_s30, 16  ;;  %s592_s4 = scalar_lea.vmem %s498_s30, 32 }
  0x27   :  { %v305_v24 = vadd.f32 %v301_v13, %v266_v59  ;;  %v306_v25 = vadd.f32 %v302_v14, %v267_v33  ;;  %v307_v26 = vadd.f32 %v303_v15, %v268_v60  ;;  %v308_v27 = vadd.f32 %v304_v16, %v269_v34  ;;  %p589_p0 = scmp.ne.s32.totalorder %s498_s30, %s588_s3  ;;  %p593_p1 = scmp.lt.s32.totalorder %s498_s30, %s498_s30 }
  0x28   :  { %v318_v35 = vadd.f32 %v314_v19, %v279_v0  ;;  %v319_v36 = vadd.f32 %v315_v20, %v280_v1  ;;  %v320_v37 = vadd.f32 %v316_v21, %v281_v7  ;;  %v321_v38 = vadd.f32 %v317_v22, %v282_v10  ;;  %p594_p2 = scmp.lt.s32.totalorder %s592_s4, %s588_s3 }
  0x29   :  { %v340_v39 = vmul.f32 %v573_v17, %v333_v11  ;;  %v341_v40 = vmul.f32 %v574_v18, %v337_v12  ;;  %v342_v41 = vmul.f32 %v575_v8, %v333_v11  ;;  %v343_v31 = vmul.f32 %v576_v9, %v337_v12 }
  0x2a   :  { %v353_v32 = vmul.f32 %v577_v23, %v333_v11  ;;  %v354_v42 = vmul.f32 %v578_v28, %v337_v12  ;;  %v355_v43 = vmul.f32 %v579_v29, %v333_v11  ;;  %v356_v44 = vmul.f32 %v580_v30, %v337_v12  ;;  %p595_p3 = por %p594_p2, %p593_p1 }
  0x2b   :  { %v344_v45 = vadd.f32 %v340_v39, %v305_v24  ;;  %v345_v46 = vadd.f32 %v341_v40, %v306_v25  ;;  %v346_v47 = vadd.f32 %v342_v41, %v307_v26  ;;  %v347_v48 = vadd.f32 %v343_v31, %v308_v27 }
  0x2c   :  { %v357_v49 = vadd.f32 %v353_v32, %v318_v35  ;;  %v358_v50 = vadd.f32 %v354_v42, %v319_v36  ;;  %v359_v51 = vadd.f32 %v355_v43, %v320_v37  ;;  %v360_v52 = vadd.f32 %v356_v44, %v321_v38  ;;  %p596_p4 = pnand %p595_p3, %p589_p0 }
  0x2d   :  { %v362_v53 = vsel %vm361_vm0, %v346_v47, 0.0  ;;  %v371_v54 = vsel %vm370_vm1, %v345_v46, 0.0  ;;  %v373_v55 = vsel %vm372_vm2, %v347_v48, 0.0 }
  0x2e   :  { %v363_v56 = vadd.f32 %v362_v53, %v344_v45  ;;  %v374_v57 = vadd.f32 %v373_v55, %v371_v54  ;;  %v388_v58 = vsel %vm361_vm0, %v359_v51, 0.0  ;;  %v396_v59 = vsel %vm370_vm1, %v358_v50, 0.0 }
  0x2f   :  { %v389_v33 = vadd.f32 %v388_v58, %v357_v49  ;;  %v397_v60 = vsel %vm372_vm2, %v360_v52, 0.0 }
  0x30   :  { %v364_v34 = vrot.slane %v363_v56, 4  ;;  %v375_v61 = vrot.slane %v374_v57, 4  ;;  %v398_v62 = vadd.f32 %v397_v60, %v396_v59 }
  0x31   :  { %v390_v63 = vrot.slane %v389_v33, 4 }
  0x32   :  { %v365_v0 = vadd.f32 %v364_v34, %v363_v56  ;;  %v376_v1 = vadd.f32 %v375_v61, %v374_v57  ;;  %v399_v2 = vrot.slane %v398_v62, 4 }
  0x33   :  { %v391_v3 = vadd.f32 %v390_v63, %v389_v33 }
  0x34   :  { %v366_v4 = vrot.slane %v365_v0, 2  ;;  %v377_v5 = vrot.slane %v376_v1, 2  ;;  %v400_v6 = vadd.f32 %v399_v2, %v398_v62 }
  0x35   :  { %v392_v7 = vrot.slane %v391_v3, 2 }
  0x36   :  { %v367_v10 = vadd.f32 %v366_v4, %v365_v0  ;;  %v378_v11 = vadd.f32 %v377_v5, %v376_v1  ;;  %v401_v12 = vrot.slane %v400_v6, 2 }
  0x37   :  { %v393_v13 = vadd.f32 %v392_v7, %v391_v3 }
  0x38   :  { %v368_v14 = vrot.slane %v367_v10, 1  ;;  %v379_v15 = vrot.slane %v378_v11, 1  ;;  %v402_v16 = vadd.f32 %v401_v12, %v400_v6 }
  0x39   :  { %v394_v17 = vrot.slane %v393_v13, 1 }
  0x3a   :  { %v369_v18 = vadd.f32 %v368_v14, %v367_v10  ;;  %v380_v19 = vadd.f32 %v379_v15, %v378_v11  ;;  %v403_v20 = vrot.slane %v402_v16, 1 }
  0x3b   :  { %v395_v21 = vadd.f32 %v394_v17, %v393_v13 }
  0x3c   :  { %v382_v22 = vmul.f32 0.071428575, %v369_v18  ;;  %v383_v8 = vmul.f32 0.071428575, %v380_v19  ;;  %v404_v9 = vadd.f32 %v403_v20, %v402_v16 }
  0x3d   :  { %v405_v23 = vmul.f32 0.071428575, %v395_v21 }
  0x3e   :  { %v384_v24 = vsub.f32 %v344_v45, %v382_v22  ;;  %v385_v25 = vsub.f32 %v345_v46, %v383_v8  ;;  %v386_v26 = vsub.f32 %v346_v47, %v382_v22  ;;  %v387_v27 = vsub.f32 %v347_v48, %v383_v8 }
  0x3f   :  { %v406_v28 = vmul.f32 0.071428575, %v404_v9  ;;  %v407_v29 = vsub.f32 %v357_v49, %v405_v23  ;;  %v409_v30 = vsub.f32 %v359_v51, %v405_v23 }
  0x40   :  { %v432_v35 = vmul.f32 %v384_v24, %v384_v24  ;;  %v433_v36 = vmul.f32 %v385_v25, %v385_v25  ;;  %v434_v37 = vmul.f32 %v386_v26, %v386_v26  ;;  %v435_v38 = vmul.f32 %v387_v27, %v387_v27 }
  0x41   :  { %v408_v39 = vsub.f32 %v358_v50, %v406_v28  ;;  %v410_v40 = vsub.f32 %v360_v52, %v406_v28  ;;  %v411_v41 = vmul.f32 %v407_v29, %v384_v24  ;;  %v413_v31 = vmul.f32 %v409_v30, %v386_v26 }
  0x42   :  { %v436_v32 = vsel %vm361_vm0, %v434_v37, 0.0  ;;  %v444_v42 = vsel %vm370_vm1, %v433_v36, 0.0  ;;  %v445_v43 = vsel %vm372_vm2, %v435_v38, 0.0  ;;  %v453_v44 = vmul.f32 %v407_v29, %v407_v29 }
  0x43   :  { %v412_v45 = vmul.f32 %v408_v39, %v385_v25  ;;  %v414_v46 = vmul.f32 %v410_v40, %v387_v27  ;;  %v415_v47 = vsel %vm361_vm0, %v413_v31, 0.0  ;;  %v437_v48 = vadd.f32 %v436_v32, %v432_v35 }
  0x44   :  { %v446_v49 = vadd.f32 %v445_v43, %v444_v42  ;;  %v454_v51 = vmul.f32 %v408_v39, %v408_v39  ;;  %v455_v53 = vmul.f32 %v409_v30, %v409_v30  ;;  %v456_v55 = vmul.f32 %v410_v40, %v410_v40 }
  0x45   :  { %v423_v50 = vsel %vm370_vm1, %v412_v45, 0.0  ;;  %v424_v52 = vsel %vm372_vm2, %v414_v46, 0.0  ;;  %v438_v54 = vrot.slane %v437_v48, 4  ;;  %v416_v56 = vadd.f32 %v415_v47, %v411_v41 }
  0x46   :  { %v425_v57 = vadd.f32 %v424_v52, %v423_v50  ;;  %v447_v58 = vrot.slane %v446_v49, 4  ;;  %v457_v59 = vsel %vm361_vm0, %v455_v53, 0.0  ;;  %v465_v34 = vsel %vm370_vm1, %v454_v51, 0.0 }
  0x47   :  { %v439_v33 = vadd.f32 %v438_v54, %v437_v48  ;;  %v458_v60 = vadd.f32 %v457_v59, %v453_v44  ;;  %v466_v61 = vsel %vm372_vm2, %v456_v55, 0.0  ;;  %v417_v2 = vrot.slane %v416_v56, 4 }
  0x48   :  { %v448_v62 = vadd.f32 %v447_v58, %v446_v49  ;;  %v467_v63 = vadd.f32 %v466_v61, %v465_v34  ;;  %v426_v5 = vrot.slane %v425_v57, 4 }
  0x49   :  { %v440_v0 = vrot.slane %v439_v33, 2  ;;  %v459_v1 = vrot.slane %v458_v60, 4  ;;  %v418_v14 = vadd.f32 %v417_v2, %v416_v56 }
  0x4a   :  { %v449_v3 = vrot.slane %v448_v62, 2  ;;  %v468_v4 = vrot.slane %v467_v63, 4  ;;  %v427_v17 = vadd.f32 %v426_v5, %v425_v57 }
  0x4b   :  { %v441_v6 = vadd.f32 %v440_v0, %v439_v33  ;;  %v460_v7 = vadd.f32 %v459_v1, %v458_v60  ;;  %v419_v22 = vrot.slane %v418_v14, 2 }
  0x4c   :  { %v450_v10 = vadd.f32 %v449_v3, %v448_v62  ;;  %v469_v11 = vadd.f32 %v468_v4, %v467_v63  ;;  %v428_v23 = vrot.slane %v427_v17, 2 }
  0x4d   :  { %v442_v12 = vrot.slane %v441_v6, 1  ;;  %v461_v13 = vrot.slane %v460_v7, 2  ;;  %v420_v27 = vadd.f32 %v419_v22, %v418_v14 }
  0x4e   :  { %v451_v15 = vrot.slane %v450_v10, 1  ;;  %v470_v16 = vrot.slane %v469_v11, 2  ;;  %v429_v29 = vadd.f32 %v428_v23, %v427_v17 }
  0x4f   :  { %v462_v18 = vadd.f32 %v461_v13, %v460_v7  ;;  %v443_v20 = vadd.f32 %v442_v12, %v441_v6  ;;  %v421_v30 = vrot.slane %v420_v27, 1 }
  0x50   :  { %v471_v19 = vadd.f32 %v470_v16, %v469_v11  ;;  %v452_v8 = vadd.f32 %v451_v15, %v450_v10  ;;  %v430_v35 = vrot.slane %v429_v29, 1 }
  0x51   :  { %v463_v21 = vrot.slane %v462_v18, 1  ;;  %v422_v36 = vadd.f32 %v421_v30, %v420_v27 }
  0x52   :  { %v472_v9 = vrot.slane %v471_v19, 1  ;;  %v431_v37 = vadd.f32 %v430_v35, %v429_v29 }
  0x53   :  { %v464_v24 = vadd.f32 %v463_v21, %v462_v18 }
  0x54   :  { %v473_v25 = vadd.f32 %v472_v9, %v471_v19 }
  0x55   :  { %v474_v26 = vmul.f32 %v464_v24, %v443_v20 }
  0x56   :  { %v475_v28 = vmul.f32 %v473_v25, %v452_v8 }
  0x57   :  { %584 = vrsqrt.f32 %v474_v26 }
  0x58   :  { %586 = vrsqrt.f32 %v475_v28 }
  0x61   :  { %v585_v38 = vpop.eup %584 }
  0x62   :  { %v587_v39 = vpop.eup %586  ;;  %v478_v40 = vmul.f32 %v585_v38, %v422_v36 }
  0x63   :  { %v479_v41 = vmul.f32 %v587_v39, %v431_v37 }
  0x64   :  { %v581_v31 = vadd.f32 -1.0, %v478_v40 }
  0x65   :  { %v582_v32 = vadd.f32 -1.0, %v479_v41 }
  0x66   :  { %v482_v42 = vmul.f32 %v581_v31, %v581_v31 }
  0x67   :  { %v483_v43 = vmul.f32 %v582_v32, %v582_v32 }
  0x69   :  { %v484_v44 = vsel %vm370_vm1, %v483_v43, 0.0 }
  0x6a   :  { %v485_v45 = vadd.f32 %v484_v44, %v482_v42 }
  0x6c   :  { %486 = vadd.xlane.f32.xlu0 %v485_v45 }
  0xf9   :  { %v487_v46 = vpop.xlane.xlu0 %486 }
  0xfa   :  { %v488_v47 = vmul.f32 0.004464286, %v487_v46 }
  0xfc   :  { %490 = vst.msk [vmem:[#allocation2] sm:$0x1] %vm489_vm3, %v488_v47 }
  0xfd   :  { %599 = shalt.err (!%p596_p4)
}
  0xfe   :  { %s600_s7 = scalar_lea.hbm %s935_s2, 16 }
  0xff   :  { %p601_p5 = scmp.ne.s32.totalorder %s935_s2, %s600_s7  ;;  %p604_p6 = scmp.lt.u32.totalorder %s600_s7, %s935_s2 }
 0x101   :  { %p606_p7 = pnand %p604_p6, %p601_p5 }
 0x103   :  { %609 = shalt.err (!%p606_p7)
}
 0x104   :  { %500 = dma.vmem_to_hbm [thread:$0]  %s498_s30, 16, %s935_s2, [#allocation3]  }
 0x105   :  { %610 = dma.done.wait [#allocation3], 16  }
 0x106   :  { %611 = vsyncadd [#allocation3], 4294967280 }
 0x107   :  { %504 = vsyncpa [#allocation3], 1 }

</bundles_post_ra>
